<compile_context>
chip_gen: v6e
topology: v6e:2x2x1
jax: 0.10.0
libtpu: 0.0.40
codegen_flags: <defaults>
</compile_context>

<pallas_src>
import jax
import jax.numpy as jnp
from jax.experimental import pallas as pl
from jax.experimental.pallas import tpu as pltpu


# ---------------------------------------------------------------------------
# tiling helpers
# ---------------------------------------------------------------------------

def _round_up(x, m):
    return (x + m - 1) // m * m


def _pick_tile(dim, quantum, cap):
    """Return (tile, padded_dim): tile % quantum == 0, tile <= cap, tile | padded_dim."""
    padded = _round_up(dim, quantum)
    if padded <= cap:
        return padded, padded
    for t in range(cap, 0, -quantum):
        if padded % t == 0:
            return t, padded
    return quantum, padded


# ---------------------------------------------------------------------------
# Fused tiled matmul kernel:  out = relu((A @ B) * scale + shift + residual)
# ---------------------------------------------------------------------------

def _make_mm_kernel(has_scale, has_res, relu):
    def kernel(*refs):
        a_ref, b_ref = refs[0], refs[1]
        idx = 2
        s_ref = None
        if has_scale:
            s_ref = refs[idx]
            idx += 1
        t_ref = refs[idx]
        idx += 1
        r_ref = None
        if has_res:
            r_ref = refs[idx]
            idx += 1
        o_ref = refs[idx]
        acc_ref = refs[idx + 1]

        @pl.when(pl.program_id(2) == 0)
        def _():
            acc_ref[...] = jnp.zeros_like(acc_ref)

        acc_ref[...] += jnp.dot(a_ref[...], b_ref[...],
                                preferred_element_type=jnp.float32)

        @pl.when(pl.program_id(2) == pl.num_programs(2) - 1)
        def _():
            out = acc_ref[...]
            if has_scale:
                out = out * s_ref[...]
            out = out + t_ref[...]
            if has_res:
                out = out + r_ref[...].astype(jnp.float32)
            if relu:
                out = jnp.maximum(out, 0.0)
            o_ref[...] = out.astype(o_ref.dtype)

    return kernel


def matmul_fused(a, b, shift, scale=None, residual=None, relu=False,
                 out_dtype=jnp.bfloat16):
    """Tiled MXU matmul with fused per-column affine (+residual, +ReLU) epilogue."""
    M, K = a.shape
    K2, N = b.shape
    assert K2 == K
    # 16-row M quantum (bf16 packs 16 rows / sublane tile); tm capped at 128 so small
    # problems still produce >=2 parallel grid steps (v7x megacore).
    tm, Mp = _pick_tile(M, 16, 128)
    tn, Np = _pick_tile(N, 128, 256)
    tk, Kp = _pick_tile(K, 128, 512)

    a = a.astype(jnp.bfloat16)
    b = b.astype(jnp.bfloat16)
    if (Mp, Kp) != (M, K):
        a = jnp.pad(a, ((0, Mp - M), (0, Kp - K)))
    if (Kp, Np) != (K, N):
        b = jnp.pad(b, ((0, Kp - K), (0, Np - N)))

    args = [a, b]
    in_specs = [pl.BlockSpec((tm, tk), lambda i, j, k: (i, k)),
                pl.BlockSpec((tk, tn), lambda i, j, k: (k, j))]
    if scale is not None:
        s = jnp.pad(scale.astype(jnp.float32), (0, Np - N)).reshape(1, Np)
        args.append(s)
        in_specs.append(pl.BlockSpec((1, tn), lambda i, j, k: (0, j)))
    t = jnp.pad(shift.astype(jnp.float32), (0, Np - N)).reshape(1, Np)
    args.append(t)
    in_specs.append(pl.BlockSpec((1, tn), lambda i, j, k: (0, j)))
    if residual is not None:
        r = residual.astype(jnp.bfloat16)
        if (Mp, Np) != (M, N):
            r = jnp.pad(r, ((0, Mp - M), (0, Np - N)))
        args.append(r)
        in_specs.append(pl.BlockSpec((tm, tn), lambda i, j, k: (i, j)))

    out = pl.pallas_call(
        _make_mm_kernel(scale is not None, residual is not None, relu),
        out_shape=jax.ShapeDtypeStruct((Mp, Np), out_dtype),
        grid=(Mp // tm, Np // tn, Kp // tk),
        in_specs=in_specs,
        out_specs=pl.BlockSpec((tm, tn), lambda i, j, k: (i, j)),
        scratch_shapes=[pltpu.VMEM((tm, tn), jnp.float32)],
        compiler_params=pltpu.CompilerParams(
            dimension_semantics=("parallel", "parallel", "arbitrary"),
            vmem_limit_bytes=32 * 1024 * 1024),
    )(*args)

    if (Mp, Np) != (M, N):
        out = out[:M, :N]
    return out


# ---------------------------------------------------------------------------
# Fully fused stride-1 bottleneck: conv1(1x1) -> conv2(3x3) -> conv3(1x1)+res+ReLU
# One pallas_call per block; intermediates stay in VMEM.  grid = (batch,).
# ---------------------------------------------------------------------------

def _make_bottleneck_kernel(h, w, has_ds):
    hw = h * w

    def kernel(*refs):
        if has_ds:
            (x_ref, w1_ref, s1_ref, t1_ref, w2_ref, s2_ref, t2_ref,
             w3_ref, s3_ref, t3_ref, wd_ref, sd_ref, td_ref, o_ref) = refs
        else:
            (x_ref, w1_ref, s1_ref, t1_ref, w2_ref, s2_ref, t2_ref,
             w3_ref, s3_ref, t3_ref, o_ref) = refs

        x = x_ref[0]                                              # (hw, cin) bf16

        # ---- conv1 (1x1) + BN + ReLU, f32 accumulation ----
        h1 = jnp.dot(x, w1_ref[...], preferred_element_type=jnp.float32)
        h1 = jnp.maximum(h1 * s1_ref[...] + t1_ref[...], 0.0)    # (hw, P) f32
        p = h1.shape[1]

        # ---- conv2 (3x3 / stride 1 / pad 1): in-VMEM im2col + ONE deep MXU dot ----
        # Vertical (row) padding: prepend/append w+1 zero rows in flattened row-major
        # space; a tap with flat offset `off` is then a static slice of `ext`.
        # Horizontal edges: masked per output column (w is a power of two -> cheap &).
        zpad = jnp.zeros((w + 1, p), h1.dtype)
        ext = jnp.concatenate([zpad, h1, zpad], axis=0)           # (hw + 2w + 2, P)
        colidx = jnp.bitwise_and(
            jax.lax.broadcasted_iota(jnp.int32, (hw, p), 0), w - 1)
        left_ok = colidx >= 1                                     # taps with dx == 0
        right_ok = colidx < (w - 1)                               # taps with dx == 2
        zero = jnp.zeros((hw, p), h1.dtype)

        pieces = []
        for dy in range(3):
            for dx in range(3):
                off = (dy - 1) * w + (dx - 1)
                tap = ext[(w + 1) + off:(w + 1) + off + hw, :]    # static slice
                if dx == 0:
                    tap = jnp.where(left_ok, tap, zero)
                elif dx == 2:
                    tap = jnp.where(right_ok, tap, zero)
                pieces.append(tap)
        cols = jnp.concatenate(pieces, axis=1).astype(jnp.bfloat16)   # (hw, 9P)
        h2 = jnp.dot(cols, w2_ref[...], preferred_element_type=jnp.float32)
        h2 = jnp.maximum(h2 * s2_ref[...] + t2_ref[...], 0.0).astype(jnp.bfloat16)

        # ---- conv3 (1x1) + BN, residual add and final ReLU fused ----
        out = jnp.dot(h2, w3_ref[...], preferred_element_type=jnp.float32)
        out = out * s3_ref[...] + t3_ref[...]
        if has_ds:
            ident = jnp.dot(x, wd_ref[...], preferred_element_type=jnp.float32)
            ident = ident * sd_ref[...] + td_ref[...]
        else:
            ident = x.astype(jnp.float32)
        o_ref[0] = jnp.maximum(out + ident, 0.0).astype(o_ref.dtype)

    return kernel


def bottleneck_fused(x, p):
    n, h, w, cin = x.shape
    assert w > 0 and (w & (w - 1)) == 0, "fused path expects power-of-two width"
    hw = h * w
    P = p["w2"].shape[1]
    cout = p["w3"].shape[1]
    has_ds = "wd" in p
    assert p["w1"].shape[0] == cin

    xf = x.reshape(n, hw, cin)
    args = [xf, p["w1"], p["s1"], p["t1"], p["w2"], p["s2"], p["t2"],
            p["w3"], p["s3"], p["t3"]]
    in_specs = [
        pl.BlockSpec((1, hw, cin), lambda b: (b, 0, 0)),
        pl.BlockSpec((cin, P), lambda b: (0, 0)),
        pl.BlockSpec((1, P), lambda b: (0, 0)),
        pl.BlockSpec((1, P), lambda b: (0, 0)),
        pl.BlockSpec((9 * P, P), lambda b: (0, 0)),
        pl.BlockSpec((1, P), lambda b: (0, 0)),
        pl.BlockSpec((1, P), lambda b: (0, 0)),
        pl.BlockSpec((P, cout), lambda b: (0, 0)),
        pl.BlockSpec((1, cout), lambda b: (0, 0)),
        pl.BlockSpec((1, cout), lambda b: (0, 0)),
    ]
    if has_ds:
        args += [p["wd"], p["sd"], p["td"]]
        in_specs += [pl.BlockSpec((cin, cout), lambda b: (0, 0)),
                     pl.BlockSpec((1, cout), lambda b: (0, 0)),
                     pl.BlockSpec((1, cout), lambda b: (0, 0))]

    out = pl.pallas_call(
        _make_bottleneck_kernel(h, w, has_ds),
        out_shape=jax.ShapeDtypeStruct((n, hw, cout), jnp.bfloat16),
        grid=(n,),
        in_specs=in_specs,
        out_specs=pl.BlockSpec((1, hw, cout), lambda b: (b, 0, 0)),
        compiler_params=pltpu.CompilerParams(
            dimension_semantics=("parallel",),
            vmem_limit_bytes=32 * 1024 * 1024),
    )(*args)
    return out.reshape(n, h, w, cout)


# ---------------------------------------------------------------------------
# Maxpool 3x3 / stride 2 / pad 1 — whole-image parity slabs, grid=(batch,)
# ---------------------------------------------------------------------------

def _maxpool_kernel(ee_ref, eq_ref, qe_ref, qq_ref, o_ref):
    ho, wo = o_ref.shape[1], o_ref.shape[2]
    ee, eq, qe, qq = ee_ref[0], eq_ref[0], qe_ref[0], qq_ref[0]
    m = ee[0:ho, 0:wo]
    m = jnp.maximum(m, eq[0:ho, 0:wo])
    m = jnp.maximum(m, ee[0:ho, 1:wo + 1])
    m = jnp.maximum(m, qe[0:ho, 0:wo])
    m = jnp.maximum(m, qq[0:ho, 0:wo])
    m = jnp.maximum(m, qe[0:ho, 1:wo + 1])
    m = jnp.maximum(m, ee[1:ho + 1, 0:wo])
    m = jnp.maximum(m, eq[1:ho + 1, 0:wo])
    m = jnp.maximum(m, ee[1:ho + 1, 1:wo + 1])
    o_ref[0] = m


def maxpool_3x3_s2_p1(x):
    n, h, w, c = x.shape
    assert h % 2 == 0 and w % 2 == 0
    ho = (h + 2 - 3) // 2 + 1
    wo = (w + 2 - 3) // 2 + 1
    xp = jnp.pad(x, ((0, 0), (1, 1), (1, 1), (0, 0)), constant_values=-jnp.inf)
    ee = xp[:, 0::2, 0::2, :]       # even rows, even cols
    eq = xp[:, 0::2, 1::2, :]       # even rows, odd cols
    qe = xp[:, 1::2, 0::2, :]       # odd rows,  even cols
    qq = xp[:, 1::2, 1::2, :]       # odd rows,  odd cols

    def spec(a):
        return pl.BlockSpec((1,) + a.shape[1:], lambda b: (b, 0, 0, 0))

    return pl.pallas_call(
        _maxpool_kernel,
        out_shape=jax.ShapeDtypeStruct((n, ho, wo, c), x.dtype),
        grid=(n,),
        in_specs=[spec(ee), spec(eq), spec(qe), spec(qq)],
        out_specs=pl.BlockSpec((1, ho, wo, c), lambda b: (b, 0, 0, 0)),
        compiler_params=pltpu.CompilerParams(
            dimension_semantics=("parallel",)),
    )(ee, eq, qe, qq)


# ---------------------------------------------------------------------------
# Global average pool (spatial mean)
# ---------------------------------------------------------------------------

def _spatial_mean_kernel(x_ref, o_ref):
    o_ref[...] = jnp.mean(x_ref[...].astype(jnp.float32), axis=1)


def spatial_mean(x):
    n, h, w, c = x.shape
    x3 = x.reshape(n, h * w, c)
    return pl.pallas_call(
        _spatial_mean_kernel,
        out_shape=jax.ShapeDtypeStruct((n, c), jnp.float32),
        grid=(1,),
        in_specs=[pl.BlockSpec((n, h * w, c), lambda i: (0, 0, 0))],
        out_specs=pl.BlockSpec((n, c), lambda i: (0, 0)),
    )(x3)


# ---------------------------------------------------------------------------
# im2col conv wrappers (stem 7x7 and the single stride-2 3x3 only)
# ---------------------------------------------------------------------------

def _im2col(x, kh, kw, stride, pad):
    if pad:
        x = jnp.pad(x, ((0, 0), (pad, pad), (pad, pad), (0, 0)))
    n, h, w, c = x.shape
    ho = (h - kh) // stride + 1
    wo = (w - kw) // stride + 1
    cols = [x[:, dy:dy + stride * ho:stride, dx:dx + stride * wo:stride, :]
            for dy in range(kh) for dx in range(kw)]
    return jnp.concatenate(cols, axis=-1), ho, wo


def conv_im2col_bn(x, cp, kh, kw, stride, pad, relu):
    # TODO(synk): im2col retained only for the one-shot 7x7 stem conv and the single
    # stride-2 3x3 conv (layer2 block0); every other conv runs inside fused kernels.
    cols, ho, wo = _im2col(x, kh, kw, stride, pad)
    n = x.shape[0]
    a = cols.reshape(n * ho * wo, cols.shape[-1])
    out = matmul_fused(a, cp["w2d"], cp["shift"], scale=cp["scale"], relu=relu)
    return out.reshape(n, ho, wo, cp["w2d"].shape[1])


def conv1x1_bn(x, cp, relu, residual=None, stride=1):
    if stride != 1:
        x = x[:, ::stride, ::stride, :]
    n, h, w, cin = x.shape
    cout = cp["w2d"].shape[1]
    a = x.reshape(n * h * w, cin)
    r = residual.reshape(n * h * w, cout) if residual is not None else None
    out = matmul_fused(a, cp["w2d"], cp["shift"], scale=cp["scale"],
                       residual=r, relu=relu)
    return out.reshape(n, h, w, cout)


def bottleneck_strided(x, p):
    """layer2 block 0 (stride-2): unfused path with fused matmul epilogues."""
    out = conv1x1_bn(x, p["conv1"], relu=True)
    out = conv_im2col_bn(out, p["conv2"], 3, 3, stride=2, pad=1, relu=True)
    identity = conv1x1_bn(x, p["downsample"], relu=False, stride=2)
    return conv1x1_bn(out, p["conv3"], relu=True, residual=identity)


# ---------------------------------------------------------------------------
# Model forward
# ---------------------------------------------------------------------------

def resnet50_base_forward(prep, x_nchw):
    # layout: input follows the PyTorch NCHW convention (matches nn.Conv2d).
    x = jnp.transpose(x_nchw, (0, 2, 3, 1)).astype(jnp.bfloat16)
    features = {}

    # stem: conv1 -> bn1 -> relu -> maxpool  (stem cout lane-padded to 128, exact zeros)
    x = conv_im2col_bn(x, prep["conv1"], 7, 7, stride=2, pad=3, relu=True)
    x = maxpool_3x3_s2_p1(x)

    # layer1: 3 bottlenecks (stride 1) -> 256 channels, each a single fused kernel
    for bp in prep["layer1"]:
        x = bottleneck_fused(x, bp)
    features["layer1"] = jnp.transpose(x.astype(jnp.float32), (0, 3, 1, 2))

    # layer2: block0 has stride 2 (unfused), remaining 3 blocks fused -> 512 channels
    x = bottleneck_strided(x, prep["layer2_block0"])
    for bp in prep["layer2"]:
        x = bottleneck_fused(x, bp)
    features["layer2"] = jnp.transpose(x.astype(jnp.float32), (0, 3, 1, 2))

    # x_pool = mean over spatial dims, then classifier (bias-only epilogue)
    pooled = spatial_mean(x)
    logits = matmul_fused(pooled, prep["fc_w"], prep["fc_b"],
                          relu=False, out_dtype=jnp.float32)
    return logits, features


# ---------------------------------------------------------------------------
# Deterministic synthetic parameters (no pretrained checkpoint loading)
# ---------------------------------------------------------------------------

class _Rng:
    def __init__(self, seed):
        self._key = jax.random.PRNGKey(seed)

    def next(self):
        self._key, sub = jax.random.split(self._key)
        return sub


def make_conv_bn_params(rng, kh, kw, cin, cout):
    fan_in = kh * kw * cin
    w = jax.random.normal(rng.next(), (kh, kw, cin, cout), jnp.float32)
    w = w * (2.0 / fan_in) ** 0.5
    gamma = 1.0 + 0.1 * jax.random.normal(rng.next(), (cout,), jnp.float32)
    beta = 0.1 * jax.random.normal(rng.next(), (cout,), jnp.float32)
    mean = 0.1 * jax.random.normal(rng.next(), (cout,), jnp.float32)
    var = jax.random.uniform(rng.next(), (cout,), jnp.float32, minval=0.5, maxval=1.5)
    scale = gamma / jnp.sqrt(var + 1e-5)      # folded eval-mode BatchNorm
    shift = beta - mean * scale
    return {"w": w, "scale": scale, "shift": shift}


def make_bottleneck_params(rng, inplanes, planes, downsample):
    p = {
        "conv1": make_conv_bn_params(rng, 1, 1, inplanes, planes),
        "conv2": make_conv_bn_params(rng, 3, 3, planes, planes),
        "conv3": make_conv_bn_params(rng, 1, 1, planes, planes * 4),
    }
    if downsample:
        p["downsample"] = make_conv_bn_params(rng, 1, 1, inplanes, planes * 4)
    return p


def build_params(seed, num_classes):
    rng = _Rng(seed)
    return {
        "conv1": make_conv_bn_params(rng, 7, 7, 3, 64),
        "layer1": [make_bottleneck_params(rng, 64, 64, downsample=True)]
        + [make_bottleneck_params(rng, 256, 64, downsample=False) for _ in range(2)],
        "layer2": [make_bottleneck_params(rng, 256, 128, downsample=True)]
        + [make_bottleneck_params(rng, 512, 128, downsample=False) for _ in range(3)],
        "fc_w": jax.random.normal(rng.next(), (512, num_classes), jnp.float32) * (1.0 / 512) ** 0.5,
        "fc_b": jnp.zeros((num_classes,), jnp.float32),
    }


# ---------------------------------------------------------------------------
# One-time parameter preparation: bf16 cast, 2D reshape, lane-density zero padding.
# Padding uses zero weights / zero scale / zero shift => numerically identical.
# ---------------------------------------------------------------------------

def _prep_conv(p, cin_pad=None, cout_pad=None):
    w, scale, shift = p["w"], p["scale"], p["shift"]
    kh, kw, cin, cout = w.shape
    if cin_pad is not None and cin_pad > cin:
        w = jnp.pad(w, ((0, 0), (0, 0), (0, cin_pad - cin), (0, 0)))
    if cout_pad is not None and cout_pad > cout:
        w = jnp.pad(w, ((0, 0), (0, 0), (0, 0), (0, cout_pad - cout)))
        scale = jnp.pad(scale, (0, cout_pad - cout))
        shift = jnp.pad(shift, (0, cout_pad - cout))
    ci, co = w.shape[2], w.shape[3]
    return {"w2d": w.reshape(kh * kw * ci, co).astype(jnp.bfloat16),
            "scale": scale.astype(jnp.float32),
            "shift": shift.astype(jnp.float32)}


def _prep_bottleneck_fused(bp, cin_pad=None, plane_pad=None):
    c1 = _prep_conv(bp["conv1"], cin_pad=cin_pad, cout_pad=plane_pad)
    c2 = _prep_conv(bp["conv2"], cin_pad=plane_pad, cout_pad=plane_pad)
    c3 = _prep_conv(bp["conv3"], cin_pad=plane_pad)
    out = {"w1": c1["w2d"], "s1": c1["scale"].reshape(1, -1), "t1": c1["shift"].reshape(1, -1),
           "w2": c2["w2d"], "s2": c2["scale"].reshape(1, -1), "t2": c2["shift"].reshape(1, -1),
           "w3": c3["w2d"], "s3": c3["scale"].reshape(1, -1), "t3": c3["shift"].reshape(1, -1)}
    if "downsample" in bp:
        cd = _prep_conv(bp["downsample"], cin_pad=cin_pad)
        out["wd"] = cd["w2d"]
        out["sd"] = cd["scale"].reshape(1, -1)
        out["td"] = cd["shift"].reshape(1, -1)
    return out


def prepare_params(params):
    prep = {"conv1": _prep_conv(params["conv1"], cout_pad=128)}   # stem: 64 -> 128 lanes
    prep["layer1"] = [
        _prep_bottleneck_fused(bp, cin_pad=128 if i == 0 else None, plane_pad=128)
        for i, bp in enumerate(params["layer1"])]
    b0 = params["layer2"][0]
    prep["layer2_block0"] = {k: _prep_conv(b0[k])
                             for k in ("conv1", "conv2", "conv3", "downsample")}
    prep["layer2"] = [_prep_bottleneck_fused(bp) for bp in params["layer2"][1:]]
    prep["fc_w"] = params["fc_w"].astype(jnp.bfloat16)
    prep["fc_b"] = params["fc_b"].astype(jnp.float32)
    return prep


# ---------------------------------------------------------------------------

if __name__ == "__main__":
    num_classes = 10
    raw_params = build_params(seed=42, num_classes=num_classes)
    params = prepare_params(raw_params)   # one-time bf16 cast / reshape / lane padding

    # Small deterministic input consistent with ResNet50 conv1 (3 input channels).
    x = jax.random.normal(jax.random.PRNGKey(0), (2, 3, 32, 32), jnp.float32)

    fwd = jax.jit(resnet50_base_forward)
    logits, features = fwd(params, x)

    logits = jax.block_until_ready(logits)
    for v in features.values():
        jax.block_until_ready(v)

    assert logits.shape == (2, num_classes)
    assert features["layer1"].shape == (2, 256, 8, 8)
    assert features["layer2"].shape == (2, 512, 4, 4)
    assert bool(jnp.isfinite(logits).all())
    print("KERNEL_OK")
</pallas_src>

<mosaic_0001>
module attributes {stable_mosaic.version = 11 : i64} {
  func.func @kernel(%arg0: i32, %arg1: i32, %arg2: i32, %arg3: memref<128x256xbf16, #tpu.memory_space<vmem>>, %arg4: memref<256x128xbf16, #tpu.memory_space<vmem>>, %arg5: memref<1x128xf32, #tpu.memory_space<vmem>>, %arg6: memref<1x128xf32, #tpu.memory_space<vmem>>, %arg7: memref<128x128xbf16, #tpu.memory_space<vmem>>, %arg8: memref<128x128xf32, #tpu.memory_space<vmem>>) attributes {dimension_semantics = [#tpu.dimension_semantics<parallel>, #tpu.dimension_semantics<parallel>, #tpu.dimension_semantics<arbitrary>], iteration_bounds = array<i64: 4, 1, 1>, scalar_prefetch = 0 : i64, scratch_operands = 1 : i64, tpu.core_type = #tpu.core_type<tc>, window_params = [{transform_indices = @transform_0, window_bounds = array<i64: 128, 256>}, {transform_indices = @transform_1, window_bounds = array<i64: 256, 128>}, {transform_indices = @transform_2, window_bounds = array<i64: 1, 128>}, {transform_indices = @transform_3, window_bounds = array<i64: 1, 128>}, {transform_indices = @transform_4, window_bounds = array<i64: 128, 128>}]} {
    %c0_i32 = arith.constant 0 : i32
    %0 = arith.cmpi eq, %arg2, %c0_i32 : i32
    %1 = arith.extui %0 : i1 to i32
    %c0_i32_0 = arith.constant 0 : i32
    %2 = arith.cmpi ne, %1, %c0_i32_0 : i32
    scf.if %2 {
      %cst_10 = arith.constant 0.000000e+00 : f32
      %12 = vector.broadcast %cst_10 : f32 to vector<128x128xf32>
      %c0_11 = arith.constant 0 : index
      %c0_12 = arith.constant 0 : index
      %13 = vector.load %arg8[%c0_11, %c0_12] : memref<128x128xf32, #tpu.memory_space<vmem>>, vector<128x128xf32>
      tpu.vector_store %arg8[%c0_11, %c0_12], %12 {strides = array<i32>} : memref<128x128xf32, #tpu.memory_space<vmem>>, vector<128x128xf32>,
    } else {
    }
    %c0 = arith.constant 0 : index
    %c0_1 = arith.constant 0 : index
    %3 = vector.load %arg8[%c0, %c0_1] : memref<128x128xf32, #tpu.memory_space<vmem>>, vector<128x128xf32>
    %c0_2 = arith.constant 0 : index
    %c0_3 = arith.constant 0 : index
    %4 = vector.load %arg3[%c0_2, %c0_3] : memref<128x256xbf16, #tpu.memory_space<vmem>>, vector<128x256xbf16>
    %c0_4 = arith.constant 0 : index
    %c0_5 = arith.constant 0 : index
    %5 = vector.load %arg4[%c0_4, %c0_5] : memref<256x128xbf16, #tpu.memory_space<vmem>>, vector<256x128xbf16>
    %cst = arith.constant dense<0.000000e+00> : vector<128x128xf32>
    %6 = tpu.matmul %4, %5, %cst {dimension_numbers = #tpu.dot_dimension_numbers<[1], [0], [0], [1], [0, 0, 1, 1], [], []>} : vector<128x256xbf16>, vector<256x128xbf16>, vector<128x128xf32> -> vector<128x128xf32>
    %7 = arith.addf %3, %6 : vector<128x128xf32>
    %c0_6 = arith.constant 0 : index
    %c0_7 = arith.constant 0 : index
    %8 = vector.load %arg8[%c0_6, %c0_7] : memref<128x128xf32, #tpu.memory_space<vmem>>, vector<128x128xf32>
    tpu.vector_store %arg8[%c0_6, %c0_7], %7 {strides = array<i32>} : memref<128x128xf32, #tpu.memory_space<vmem>>, vector<128x128xf32>,
    %c0_i32_8 = arith.constant 0 : i32
    %9 = arith.cmpi eq, %arg2, %c0_i32_8 : i32
    %10 = arith.extui %9 : i1 to i32
    %c0_i32_9 = arith.constant 0 : i32
    %11 = arith.cmpi ne, %10, %c0_i32_9 : i32
    scf.if %11 {
      %c0_10 = arith.constant 0 : index
      %c0_11 = arith.constant 0 : index
      %12 = vector.load %arg8[%c0_10, %c0_11] : memref<128x128xf32, #tpu.memory_space<vmem>>, vector<128x128xf32>
      %c0_12 = arith.constant 0 : index
      %c0_13 = arith.constant 0 : index
      %13 = vector.load %arg5[%c0_12, %c0_13] : memref<1x128xf32, #tpu.memory_space<vmem>>, vector<1x128xf32>
      %14 = vector.broadcast %13 : vector<1x128xf32> to vector<128x128xf32>
      %15 = arith.mulf %12, %14 : vector<128x128xf32>
      %c0_14 = arith.constant 0 : index
      %c0_15 = arith.constant 0 : index
      %16 = vector.load %arg6[%c0_14, %c0_15] : memref<1x128xf32, #tpu.memory_space<vmem>>, vector<1x128xf32>
      %17 = vector.broadcast %16 : vector<1x128xf32> to vector<128x128xf32>
      %18 = arith.addf %15, %17 : vector<128x128xf32>
      %cst_16 = arith.constant 0.000000e+00 : f32
      %19 = vector.broadcast %cst_16 : f32 to vector<128x128xf32>
      %20 = arith.maximumf %18, %19 : vector<128x128xf32>
      %21 = arith.truncf %20 : vector<128x128xf32> to vector<128x128xbf16>
      %c0_17 = arith.constant 0 : index
      %c0_18 = arith.constant 0 : index
      %22 = vector.load %arg7[%c0_17, %c0_18] : memref<128x128xbf16, #tpu.memory_space<vmem>>, vector<128x128xbf16>
      tpu.vector_store %arg7[%c0_17, %c0_18], %21 {strides = array<i32>} : memref<128x128xbf16, #tpu.memory_space<vmem>>, vector<128x128xbf16>,
    } else {
    }
    return
  }
  func.func @transform_0(%arg0: i32, %arg1: i32, %arg2: i32) -> (i32, i32) {
    %c0_i32 = arith.constant 0 : i32
    return %arg0, %arg2 : i32, i32
  }
  func.func @transform_1(%arg0: i32, %arg1: i32, %arg2: i32) -> (i32, i32) {
    %c0_i32 = arith.constant 0 : i32
    return %arg2, %arg1 : i32, i32
  }
  func.func @transform_2(%arg0: i32, %arg1: i32, %arg2: i32) -> (i32, i32) {
    %c0_i32 = arith.constant 0 : i32
    %c0_i32_0 = arith.constant 0 : i32
    return %c0_i32, %arg1 : i32, i32
  }
  func.func @transform_3(%arg0: i32, %arg1: i32, %arg2: i32) -> (i32, i32) {
    %c0_i32 = arith.constant 0 : i32
    %c0_i32_0 = arith.constant 0 : i32
    return %c0_i32, %arg1 : i32, i32
  }
  func.func @transform_4(%arg0: i32, %arg1: i32, %arg2: i32) -> (i32, i32) {
    %c0_i32 = arith.constant 0 : i32
    return %arg0, %arg1 : i32, i32
  }
}

module attributes {stable_mosaic.version = 11 : i64} {
  func.func @_maxpool_kernel(%arg0: i32, %arg1: memref<1x9x9x128xbf16, #tpu.memory_space<vmem>>, %arg2: memref<1x9x9x128xbf16, #tpu.memory_space<vmem>>, %arg3: memref<1x9x9x128xbf16, #tpu.memory_space<vmem>>, %arg4: memref<1x9x9x128xbf16, #tpu.memory_space<vmem>>, %arg5: memref<1x8x8x128xbf16, #tpu.memory_space<vmem>>) attributes {dimension_semantics = [#tpu.dimension_semantics<parallel>], iteration_bounds = array<i64: 2>, scalar_prefetch = 0 : i64, scratch_operands = 0 : i64, tpu.core_type = #tpu.core_type<tc>, window_params = [{transform_indices = @transform_0, window_bounds = array<i64: 1, 9, 9, 128>}, {transform_indices = @transform_1, window_bounds = array<i64: 1, 9, 9, 128>}, {transform_indices = @transform_2, window_bounds = array<i64: 1, 9, 9, 128>}, {transform_indices = @transform_3, window_bounds = array<i64: 1, 9, 9, 128>}, {transform_indices = @transform_4, window_bounds = array<i64: 1, 8, 8, 128>}]} {
    %c0 = arith.constant 0 : index
    %c0_0 = arith.constant 0 : index
    %c0_1 = arith.constant 0 : index
    %c0_2 = arith.constant 0 : index
    %0 = vector.load %arg1[%c0, %c0_0, %c0_1, %c0_2] : memref<1x9x9x128xbf16, #tpu.memory_space<vmem>>, vector<1x9x9x128xbf16>
    %1 = vector.shape_cast %0 : vector<1x9x9x128xbf16> to vector<9x9x128xbf16>
    %c0_3 = arith.constant 0 : index
    %c0_4 = arith.constant 0 : index
    %c0_5 = arith.constant 0 : index
    %c0_6 = arith.constant 0 : index
    %2 = vector.load %arg2[%c0_3, %c0_4, %c0_5, %c0_6] : memref<1x9x9x128xbf16, #tpu.memory_space<vmem>>, vector<1x9x9x128xbf16>
    %3 = vector.shape_cast %2 : vector<1x9x9x128xbf16> to vector<9x9x128xbf16>
    %c0_7 = arith.constant 0 : index
    %c0_8 = arith.constant 0 : index
    %c0_9 = arith.constant 0 : index
    %c0_10 = arith.constant 0 : index
    %4 = vector.load %arg3[%c0_7, %c0_8, %c0_9, %c0_10] : memref<1x9x9x128xbf16, #tpu.memory_space<vmem>>, vector<1x9x9x128xbf16>
    %5 = vector.shape_cast %4 : vector<1x9x9x128xbf16> to vector<9x9x128xbf16>
    %c0_11 = arith.constant 0 : index
    %c0_12 = arith.constant 0 : index
    %c0_13 = arith.constant 0 : index
    %c0_14 = arith.constant 0 : index
    %6 = vector.load %arg4[%c0_11, %c0_12, %c0_13, %c0_14] : memref<1x9x9x128xbf16, #tpu.memory_space<vmem>>, vector<1x9x9x128xbf16>
    %7 = vector.shape_cast %6 : vector<1x9x9x128xbf16> to vector<9x9x128xbf16>
    %8 = vector.extract_strided_slice %1 {offsets = [0, 0, 0], sizes = [8, 8, 128], strides = [1, 1, 1]} : vector<9x9x128xbf16> to vector<8x8x128xbf16>
    %9 = vector.extract_strided_slice %3 {offsets = [0, 0, 0], sizes = [8, 8, 128], strides = [1, 1, 1]} : vector<9x9x128xbf16> to vector<8x8x128xbf16>
    %10 = arith.maximumf %8, %9 : vector<8x8x128xbf16>
    %11 = vector.extract_strided_slice %1 {offsets = [0, 1, 0], sizes = [8, 8, 128], strides = [1, 1, 1]} : vector<9x9x128xbf16> to vector<8x8x128xbf16>
    %12 = arith.maximumf %10, %11 : vector<8x8x128xbf16>
    %13 = vector.extract_strided_slice %5 {offsets = [0, 0, 0], sizes = [8, 8, 128], strides = [1, 1, 1]} : vector<9x9x128xbf16> to vector<8x8x128xbf16>
    %14 = arith.maximumf %12, %13 : vector<8x8x128xbf16>
    %15 = vector.extract_strided_slice %7 {offsets = [0, 0, 0], sizes = [8, 8, 128], strides = [1, 1, 1]} : vector<9x9x128xbf16> to vector<8x8x128xbf16>
    %16 = arith.maximumf %14, %15 : vector<8x8x128xbf16>
    %17 = vector.extract_strided_slice %5 {offsets = [0, 1, 0], sizes = [8, 8, 128], strides = [1, 1, 1]} : vector<9x9x128xbf16> to vector<8x8x128xbf16>
    %18 = arith.maximumf %16, %17 : vector<8x8x128xbf16>
    %19 = vector.extract_strided_slice %1 {offsets = [1, 0, 0], sizes = [8, 8, 128], strides = [1, 1, 1]} : vector<9x9x128xbf16> to vector<8x8x128xbf16>
    %20 = arith.maximumf %18, %19 : vector<8x8x128xbf16>
    %21 = vector.extract_strided_slice %3 {offsets = [1, 0, 0], sizes = [8, 8, 128], strides = [1, 1, 1]} : vector<9x9x128xbf16> to vector<8x8x128xbf16>
    %22 = arith.maximumf %20, %21 : vector<8x8x128xbf16>
    %23 = vector.extract_strided_slice %1 {offsets = [1, 1, 0], sizes = [8, 8, 128], strides = [1, 1, 1]} : vector<9x9x128xbf16> to vector<8x8x128xbf16>
    %24 = arith.maximumf %22, %23 : vector<8x8x128xbf16>
    %c0_15 = arith.constant 0 : index
    %c0_16 = arith.constant 0 : index
    %c0_17 = arith.constant 0 : index
    %c0_18 = arith.constant 0 : index
    %25 = vector.load %arg5[%c0_15, %c0_16, %c0_17, %c0_18] : memref<1x8x8x128xbf16, #tpu.memory_space<vmem>>, vector<1x8x8x128xbf16>
    %26 = vector.shape_cast %25 : vector<1x8x8x128xbf16> to vector<8x8x128xbf16>
    %27 = vector.shape_cast %24 : vector<8x8x128xbf16> to vector<1x8x8x128xbf16>
    tpu.vector_store %arg5[%c0_15, %c0_16, %c0_17, %c0_18], %27 {strides = array<i32>} : memref<1x8x8x128xbf16, #tpu.memory_space<vmem>>, vector<1x8x8x128xbf16>,
    return
  }
  func.func @transform_0(%arg0: i32) -> (i32, i32, i32, i32) {
    %c0_i32 = arith.constant 0 : i32
    %c0_i32_0 = arith.constant 0 : i32
    %c0_i32_1 = arith.constant 0 : i32
    %c0_i32_2 = arith.constant 0 : i32
    return %arg0, %c0_i32, %c0_i32_0, %c0_i32_1 : i32, i32, i32, i32
  }
  func.func @transform_1(%arg0: i32) -> (i32, i32, i32, i32) {
    %c0_i32 = arith.constant 0 : i32
    %c0_i32_0 = arith.constant 0 : i32
    %c0_i32_1 = arith.constant 0 : i32
    %c0_i32_2 = arith.constant 0 : i32
    return %arg0, %c0_i32, %c0_i32_0, %c0_i32_1 : i32, i32, i32, i32
  }
  func.func @transform_2(%arg0: i32) -> (i32, i32, i32, i32) {
    %c0_i32 = arith.constant 0 : i32
    %c0_i32_0 = arith.constant 0 : i32
    %c0_i32_1 = arith.constant 0 : i32
    %c0_i32_2 = arith.constant 0 : i32
    return %arg0, %c0_i32, %c0_i32_0, %c0_i32_1 : i32, i32, i32, i32
  }
  func.func @transform_3(%arg0: i32) -> (i32, i32, i32, i32) {
    %c0_i32 = arith.constant 0 : i32
    %c0_i32_0 = arith.constant 0 : i32
    %c0_i32_1 = arith.constant 0 : i32
    %c0_i32_2 = arith.constant 0 : i32
    return %arg0, %c0_i32, %c0_i32_0, %c0_i32_1 : i32, i32, i32, i32
  }
  func.func @transform_4(%arg0: i32) -> (i32, i32, i32, i32) {
    %c0_i32 = arith.constant 0 : i32
    %c0_i32_0 = arith.constant 0 : i32
    %c0_i32_1 = arith.constant 0 : i32
    %c0_i32_2 = arith.constant 0 : i32
    return %arg0, %c0_i32, %c0_i32_0, %c0_i32_1 : i32, i32, i32, i32
  }
}

module attributes {stable_mosaic.version = 11 : i64} {
  func.func @kernel(%arg0: i32, %arg1: memref<1x64x256xbf16, #tpu.memory_space<vmem>>, %arg2: memref<256x128xbf16, #tpu.memory_space<vmem>>, %arg3: memref<1x128xf32, #tpu.memory_space<vmem>>, %arg4: memref<1x128xf32, #tpu.memory_space<vmem>>, %arg5: memref<1152x128xbf16, #tpu.memory_space<vmem>>, %arg6: memref<1x128xf32, #tpu.memory_space<vmem>>, %arg7: memref<1x128xf32, #tpu.memory_space<vmem>>, %arg8: memref<128x256xbf16, #tpu.memory_space<vmem>>, %arg9: memref<1x256xf32, #tpu.memory_space<vmem>>, %arg10: memref<1x256xf32, #tpu.memory_space<vmem>>, %arg11: memref<1x64x256xbf16, #tpu.memory_space<vmem>>) attributes {dimension_semantics = [#tpu.dimension_semantics<parallel>], iteration_bounds = array<i64: 2>, scalar_prefetch = 0 : i64, scratch_operands = 0 : i64, tpu.core_type = #tpu.core_type<tc>, window_params = [{transform_indices = @transform_0, window_bounds = array<i64: 1, 64, 256>}, {pipeline_mode = #tpu.pipeline_mode<synchronous>, transform_indices = @transform_1, window_bounds = array<i64: 256, 128>}, {pipeline_mode = #tpu.pipeline_mode<synchronous>, transform_indices = @transform_2, window_bounds = array<i64: 1, 128>}, {pipeline_mode = #tpu.pipeline_mode<synchronous>, transform_indices = @transform_3, window_bounds = array<i64: 1, 128>}, {pipeline_mode = #tpu.pipeline_mode<synchronous>, transform_indices = @transform_4, window_bounds = array<i64: 1152, 128>}, {pipeline_mode = #tpu.pipeline_mode<synchronous>, transform_indices = @transform_5, window_bounds = array<i64: 1, 128>}, {pipeline_mode = #tpu.pipeline_mode<synchronous>, transform_indices = @transform_6, window_bounds = array<i64: 1, 128>}, {pipeline_mode = #tpu.pipeline_mode<synchronous>, transform_indices = @transform_7, window_bounds = array<i64: 128, 256>}, {pipeline_mode = #tpu.pipeline_mode<synchronous>, transform_indices = @transform_8, window_bounds = array<i64: 1, 256>}, {pipeline_mode = #tpu.pipeline_mode<synchronous>, transform_indices = @transform_9, window_bounds = array<i64: 1, 256>}, {transform_indices = @transform_10, window_bounds = array<i64: 1, 64, 256>}]} {
    %c0 = arith.constant 0 : index
    %c0_0 = arith.constant 0 : index
    %c0_1 = arith.constant 0 : index
    %0 = vector.load %arg1[%c0, %c0_0, %c0_1] : memref<1x64x256xbf16, #tpu.memory_space<vmem>>, vector<1x64x256xbf16>
    %1 = vector.shape_cast %0 : vector<1x64x256xbf16> to vector<64x256xbf16>
    %c0_2 = arith.constant 0 : index
    %c0_3 = arith.constant 0 : index
    %2 = vector.load %arg2[%c0_2, %c0_3] : memref<256x128xbf16, #tpu.memory_space<vmem>>, vector<256x128xbf16>
    %cst = arith.constant dense<0.000000e+00> : vector<64x128xf32>
    %3 = tpu.matmul %1, %2, %cst {dimension_numbers = #tpu.dot_dimension_numbers<[1], [0], [0], [1], [0, 0, 1, 1], [], []>} : vector<64x256xbf16>, vector<256x128xbf16>, vector<64x128xf32> -> vector<64x128xf32>
    %c0_4 = arith.constant 0 : index
    %c0_5 = arith.constant 0 : index
    %4 = vector.load %arg3[%c0_4, %c0_5] : memref<1x128xf32, #tpu.memory_space<vmem>>, vector<1x128xf32>
    %5 = vector.broadcast %4 : vector<1x128xf32> to vector<64x128xf32>
    %6 = arith.mulf %3, %5 : vector<64x128xf32>
    %c0_6 = arith.constant 0 : index
    %c0_7 = arith.constant 0 : index
    %7 = vector.load %arg4[%c0_6, %c0_7] : memref<1x128xf32, #tpu.memory_space<vmem>>, vector<1x128xf32>
    %8 = vector.broadcast %7 : vector<1x128xf32> to vector<64x128xf32>
    %9 = arith.addf %6, %8 : vector<64x128xf32>
    %cst_8 = arith.constant 0.000000e+00 : f32
    %10 = vector.broadcast %cst_8 : f32 to vector<64x128xf32>
    %11 = arith.maximumf %9, %10 : vector<64x128xf32>
    %cst_9 = arith.constant 0.000000e+00 : f32
    %12 = vector.broadcast %cst_9 : f32 to vector<9x128xf32>
    %13 = tpu.concatenate %12, %11, %12 in 0 : vector<9x128xf32>, vector<64x128xf32>, vector<9x128xf32> -> vector<82x128xf32>
    %14 = tpu.iota {dimensions = array<i32: 0>} : vector<64x128xi32>
    %c7_i32 = arith.constant 7 : i32
    %15 = vector.broadcast %c7_i32 : i32 to vector<64x128xi32>
    %16 = arith.andi %14, %15 : vector<64x128xi32>
    %c1_i32 = arith.constant 1 : i32
    %17 = vector.broadcast %c1_i32 : i32 to vector<64x128xi32>
    %18 = arith.cmpi sge, %16, %17 : vector<64x128xi32>
    %c7_i32_10 = arith.constant 7 : i32
    %19 = vector.broadcast %c7_i32_10 : i32 to vector<64x128xi32>
    %20 = arith.cmpi slt, %16, %19 : vector<64x128xi32>
    %cst_11 = arith.constant 0.000000e+00 : f32
    %21 = vector.broadcast %cst_11 : f32 to vector<64x128xf32>
    %22 = vector.extract_strided_slice %13 {offsets = [0, 0], sizes = [64, 128], strides = [1, 1]} : vector<82x128xf32> to vector<64x128xf32>
    %23 = arith.select %18, %22, %21 : vector<64x128xi1>, vector<64x128xf32>
    %24 = vector.extract_strided_slice %13 {offsets = [1, 0], sizes = [64, 128], strides = [1, 1]} : vector<82x128xf32> to vector<64x128xf32>
    %25 = vector.extract_strided_slice %13 {offsets = [2, 0], sizes = [64, 128], strides = [1, 1]} : vector<82x128xf32> to vector<64x128xf32>
    %26 = arith.select %20, %25, %21 : vector<64x128xi1>, vector<64x128xf32>
    %27 = vector.extract_strided_slice %13 {offsets = [8, 0], sizes = [64, 128], strides = [1, 1]} : vector<82x128xf32> to vector<64x128xf32>
    %28 = arith.select %18, %27, %21 : vector<64x128xi1>, vector<64x128xf32>
    %29 = vector.extract_strided_slice %13 {offsets = [9, 0], sizes = [64, 128], strides = [1, 1]} : vector<82x128xf32> to vector<64x128xf32>
    %30 = vector.extract_strided_slice %13 {offsets = [10, 0], sizes = [64, 128], strides = [1, 1]} : vector<82x128xf32> to vector<64x128xf32>
    %31 = arith.select %20, %30, %21 : vector<64x128xi1>, vector<64x128xf32>
    %32 = vector.extract_strided_slice %13 {offsets = [16, 0], sizes = [64, 128], strides = [1, 1]} : vector<82x128xf32> to vector<64x128xf32>
    %33 = arith.select %18, %32, %21 : vector<64x128xi1>, vector<64x128xf32>
    %34 = vector.extract_strided_slice %13 {offsets = [17, 0], sizes = [64, 128], strides = [1, 1]} : vector<82x128xf32> to vector<64x128xf32>
    %35 = vector.extract_strided_slice %13 {offsets = [18, 0], sizes = [64, 128], strides = [1, 1]} : vector<82x128xf32> to vector<64x128xf32>
    %36 = arith.select %20, %35, %21 : vector<64x128xi1>, vector<64x128xf32>
    %37 = tpu.concatenate %23, %24, %26, %28, %29, %31, %33, %34, %36 in 1 : vector<64x128xf32>, vector<64x128xf32>, vector<64x128xf32>, vector<64x128xf32>, vector<64x128xf32>, vector<64x128xf32>, vector<64x128xf32>, vector<64x128xf32>, vector<64x128xf32> -> vector<64x1152xf32>
    %38 = arith.truncf %37 : vector<64x1152xf32> to vector<64x1152xbf16>
    %c0_12 = arith.constant 0 : index
    %c0_13 = arith.constant 0 : index
    %39 = vector.load %arg5[%c0_12, %c0_13] : memref<1152x128xbf16, #tpu.memory_space<vmem>>, vector<1152x128xbf16>
    %cst_14 = arith.constant dense<0.000000e+00> : vector<64x128xf32>
    %40 = tpu.matmul %38, %39, %cst_14 {dimension_numbers = #tpu.dot_dimension_numbers<[1], [0], [0], [1], [0, 0, 1, 1], [], []>} : vector<64x1152xbf16>, vector<1152x128xbf16>, vector<64x128xf32> -> vector<64x128xf32>
    %c0_15 = arith.constant 0 : index
    %c0_16 = arith.constant 0 : index
    %41 = vector.load %arg6[%c0_15, %c0_16] : memref<1x128xf32, #tpu.memory_space<vmem>>, vector<1x128xf32>
    %42 = vector.broadcast %41 : vector<1x128xf32> to vector<64x128xf32>
    %43 = arith.mulf %40, %42 : vector<64x128xf32>
    %c0_17 = arith.constant 0 : index
    %c0_18 = arith.constant 0 : index
    %44 = vector.load %arg7[%c0_17, %c0_18] : memref<1x128xf32, #tpu.memory_space<vmem>>, vector<1x128xf32>
    %45 = vector.broadcast %44 : vector<1x128xf32> to vector<64x128xf32>
    %46 = arith.addf %43, %45 : vector<64x128xf32>
    %cst_19 = arith.constant 0.000000e+00 : f32
    %47 = vector.broadcast %cst_19 : f32 to vector<64x128xf32>
    %48 = arith.maximumf %46, %47 : vector<64x128xf32>
    %49 = arith.truncf %48 : vector<64x128xf32> to vector<64x128xbf16>
    %c0_20 = arith.constant 0 : index
    %c0_21 = arith.constant 0 : index
    %50 = vector.load %arg8[%c0_20, %c0_21] : memref<128x256xbf16, #tpu.memory_space<vmem>>, vector<128x256xbf16>
    %cst_22 = arith.constant dense<0.000000e+00> : vector<64x256xf32>
    %51 = tpu.matmul %49, %50, %cst_22 {dimension_numbers = #tpu.dot_dimension_numbers<[1], [0], [0], [1], [0, 0, 1, 1], [], []>} : vector<64x128xbf16>, vector<128x256xbf16>, vector<64x256xf32> -> vector<64x256xf32>
    %c0_23 = arith.constant 0 : index
    %c0_24 = arith.constant 0 : index
    %52 = vector.load %arg9[%c0_23, %c0_24] : memref<1x256xf32, #tpu.memory_space<vmem>>, vector<1x256xf32>
    %53 = vector.broadcast %52 : vector<1x256xf32> to vector<64x256xf32>
    %54 = arith.mulf %51, %53 : vector<64x256xf32>
    %c0_25 = arith.constant 0 : index
    %c0_26 = arith.constant 0 : index
    %55 = vector.load %arg10[%c0_25, %c0_26] : memref<1x256xf32, #tpu.memory_space<vmem>>, vector<1x256xf32>
    %56 = vector.broadcast %55 : vector<1x256xf32> to vector<64x256xf32>
    %57 = arith.addf %54, %56 : vector<64x256xf32>
    %58 = arith.extf %1 : vector<64x256xbf16> to vector<64x256xf32>
    %59 = arith.addf %57, %58 : vector<64x256xf32>
    %cst_27 = arith.constant 0.000000e+00 : f32
    %60 = vector.broadcast %cst_27 : f32 to vector<64x256xf32>
    %61 = arith.maximumf %59, %60 : vector<64x256xf32>
    %62 = arith.truncf %61 : vector<64x256xf32> to vector<64x256xbf16>
    %c0_28 = arith.constant 0 : index
    %c0_29 = arith.constant 0 : index
    %c0_30 = arith.constant 0 : index
    %63 = vector.load %arg11[%c0_28, %c0_29, %c0_30] : memref<1x64x256xbf16, #tpu.memory_space<vmem>>, vector<1x64x256xbf16>
    %64 = vector.shape_cast %63 : vector<1x64x256xbf16> to vector<64x256xbf16>
    %65 = vector.shape_cast %62 : vector<64x256xbf16> to vector<1x64x256xbf16>
    tpu.vector_store %arg11[%c0_28, %c0_29, %c0_30], %65 {strides = array<i32>} : memref<1x64x256xbf16, #tpu.memory_space<vmem>>, vector<1x64x256xbf16>,
    return
  }
  func.func @transform_0(%arg0: i32) -> (i32, i32, i32) {
    %c0_i32 = arith.constant 0 : i32
    %c0_i32_0 = arith.constant 0 : i32
    %c0_i32_1 = arith.constant 0 : i32
    return %arg0, %c0_i32, %c0_i32_0 : i32, i32, i32
  }
  func.func @transform_1(%arg0: i32) -> (i32, i32) {
    %c0_i32 = arith.constant 0 : i32
    %c0_i32_0 = arith.constant 0 : i32
    %c0_i32_1 = arith.constant 0 : i32
    return %c0_i32, %c0_i32_0 : i32, i32
  }
  func.func @transform_2(%arg0: i32) -> (i32, i32) {
    %c0_i32 = arith.constant 0 : i32
    %c0_i32_0 = arith.constant 0 : i32
    %c0_i32_1 = arith.constant 0 : i32
    return %c0_i32, %c0_i32_0 : i32, i32
  }
  func.func @transform_3(%arg0: i32) -> (i32, i32) {
    %c0_i32 = arith.constant 0 : i32
    %c0_i32_0 = arith.constant 0 : i32
    %c0_i32_1 = arith.constant 0 : i32
    return %c0_i32, %c0_i32_0 : i32, i32
  }
  func.func @transform_4(%arg0: i32) -> (i32, i32) {
    %c0_i32 = arith.constant 0 : i32
    %c0_i32_0 = arith.constant 0 : i32
    %c0_i32_1 = arith.constant 0 : i32
    return %c0_i32, %c0_i32_0 : i32, i32
  }
  func.func @transform_5(%arg0: i32) -> (i32, i32) {
    %c0_i32 = arith.constant 0 : i32
    %c0_i32_0 = arith.constant 0 : i32
    %c0_i32_1 = arith.constant 0 : i32
    return %c0_i32, %c0_i32_0 : i32, i32
  }
  func.func @transform_6(%arg0: i32) -> (i32, i32) {
    %c0_i32 = arith.constant 0 : i32
    %c0_i32_0 = arith.constant 0 : i32
    %c0_i32_1 = arith.constant 0 : i32
    return %c0_i32, %c0_i32_0 : i32, i32
  }
  func.func @transform_7(%arg0: i32) -> (i32, i32) {
    %c0_i32 = arith.constant 0 : i32
    %c0_i32_0 = arith.constant 0 : i32
    %c0_i32_1 = arith.constant 0 : i32
    return %c0_i32, %c0_i32_0 : i32, i32
  }
  func.func @transform_8(%arg0: i32) -> (i32, i32) {
    %c0_i32 = arith.constant 0 : i32
    %c0_i32_0 = arith.constant 0 : i32
    %c0_i32_1 = arith.constant 0 : i32
    return %c0_i32, %c0_i32_0 : i32, i32
  }
  func.func @transform_9(%arg0: i32) -> (i32, i32) {
    %c0_i32 = arith.constant 0 : i32
    %c0_i32_0 = arith.constant 0 : i32
    %c0_i32_1 = arith.constant 0 : i32
    return %c0_i32, %c0_i32_0 : i32, i32
  }
  func.func @transform_10(%arg0: i32) -> (i32, i32, i32) {
    %c0_i32 = arith.constant 0 : i32
    %c0_i32_0 = arith.constant 0 : i32
    %c0_i32_1 = arith.constant 0 : i32
    return %arg0, %c0_i32, %c0_i32_0 : i32, i32, i32
  }
}

module attributes {stable_mosaic.version = 11 : i64} {
  func.func @kernel(%arg0: i32, %arg1: memref<1x64x128xbf16, #tpu.memory_space<vmem>>, %arg2: memref<128x128xbf16, #tpu.memory_space<vmem>>, %arg3: memref<1x128xf32, #tpu.memory_space<vmem>>, %arg4: memref<1x128xf32, #tpu.memory_space<vmem>>, %arg5: memref<1152x128xbf16, #tpu.memory_space<vmem>>, %arg6: memref<1x128xf32, #tpu.memory_space<vmem>>, %arg7: memref<1x128xf32, #tpu.memory_space<vmem>>, %arg8: memref<128x256xbf16, #tpu.memory_space<vmem>>, %arg9: memref<1x256xf32, #tpu.memory_space<vmem>>, %arg10: memref<1x256xf32, #tpu.memory_space<vmem>>, %arg11: memref<128x256xbf16, #tpu.memory_space<vmem>>, %arg12: memref<1x256xf32, #tpu.memory_space<vmem>>, %arg13: memref<1x256xf32, #tpu.memory_space<vmem>>, %arg14: memref<1x64x256xbf16, #tpu.memory_space<vmem>>) attributes {dimension_semantics = [#tpu.dimension_semantics<parallel>], iteration_bounds = array<i64: 2>, scalar_prefetch = 0 : i64, scratch_operands = 0 : i64, tpu.core_type = #tpu.core_type<tc>, window_params = [{transform_indices = @transform_0, window_bounds = array<i64: 1, 64, 128>}, {pipeline_mode = #tpu.pipeline_mode<synchronous>, transform_indices = @transform_1, window_bounds = array<i64: 128, 128>}, {pipeline_mode = #tpu.pipeline_mode<synchronous>, transform_indices = @transform_2, window_bounds = array<i64: 1, 128>}, {pipeline_mode = #tpu.pipeline_mode<synchronous>, transform_indices = @transform_3, window_bounds = array<i64: 1, 128>}, {pipeline_mode = #tpu.pipeline_mode<synchronous>, transform_indices = @transform_4, window_bounds = array<i64: 1152, 128>}, {pipeline_mode = #tpu.pipeline_mode<synchronous>, transform_indices = @transform_5, window_bounds = array<i64: 1, 128>}, {pipeline_mode = #tpu.pipeline_mode<synchronous>, transform_indices = @transform_6, window_bounds = array<i64: 1, 128>}, {pipeline_mode = #tpu.pipeline_mode<synchronous>, transform_indices = @transform_7, window_bounds = array<i64: 128, 256>}, {pipeline_mode = #tpu.pipeline_mode<synchronous>, transform_indices = @transform_8, window_bounds = array<i64: 1, 256>}, {pipeline_mode = #tpu.pipeline_mode<synchronous>, transform_indices = @transform_9, window_bounds = array<i64: 1, 256>}, {pipeline_mode = #tpu.pipeline_mode<synchronous>, transform_indices = @transform_10, window_bounds = array<i64: 128, 256>}, {pipeline_mode = #tpu.pipeline_mode<synchronous>, transform_indices = @transform_11, window_bounds = array<i64: 1, 256>}, {pipeline_mode = #tpu.pipeline_mode<synchronous>, transform_indices = @transform_12, window_bounds = array<i64: 1, 256>}, {transform_indices = @transform_13, window_bounds = array<i64: 1, 64, 256>}]} {
    %c0 = arith.constant 0 : index
    %c0_0 = arith.constant 0 : index
    %c0_1 = arith.constant 0 : index
    %0 = vector.load %arg1[%c0, %c0_0, %c0_1] : memref<1x64x128xbf16, #tpu.memory_space<vmem>>, vector<1x64x128xbf16>
    %1 = vector.shape_cast %0 : vector<1x64x128xbf16> to vector<64x128xbf16>
    %c0_2 = arith.constant 0 : index
    %c0_3 = arith.constant 0 : index
    %2 = vector.load %arg2[%c0_2, %c0_3] : memref<128x128xbf16, #tpu.memory_space<vmem>>, vector<128x128xbf16>
    %cst = arith.constant dense<0.000000e+00> : vector<64x128xf32>
    %3 = tpu.matmul %1, %2, %cst {dimension_numbers = #tpu.dot_dimension_numbers<[1], [0], [0], [1], [0, 0, 1, 1], [], []>} : vector<64x128xbf16>, vector<128x128xbf16>, vector<64x128xf32> -> vector<64x128xf32>
    %c0_4 = arith.constant 0 : index
    %c0_5 = arith.constant 0 : index
    %4 = vector.load %arg3[%c0_4, %c0_5] : memref<1x128xf32, #tpu.memory_space<vmem>>, vector<1x128xf32>
    %5 = vector.broadcast %4 : vector<1x128xf32> to vector<64x128xf32>
    %6 = arith.mulf %3, %5 : vector<64x128xf32>
    %c0_6 = arith.constant 0 : index
    %c0_7 = arith.constant 0 : index
    %7 = vector.load %arg4[%c0_6, %c0_7] : memref<1x128xf32, #tpu.memory_space<vmem>>, vector<1x128xf32>
    %8 = vector.broadcast %7 : vector<1x128xf32> to vector<64x128xf32>
    %9 = arith.addf %6, %8 : vector<64x128xf32>
    %cst_8 = arith.constant 0.000000e+00 : f32
    %10 = vector.broadcast %cst_8 : f32 to vector<64x128xf32>
    %11 = arith.maximumf %9, %10 : vector<64x128xf32>
    %cst_9 = arith.constant 0.000000e+00 : f32
    %12 = vector.broadcast %cst_9 : f32 to vector<9x128xf32>
    %13 = tpu.concatenate %12, %11, %12 in 0 : vector<9x128xf32>, vector<64x128xf32>, vector<9x128xf32> -> vector<82x128xf32>
    %14 = tpu.iota {dimensions = array<i32: 0>} : vector<64x128xi32>
    %c7_i32 = arith.constant 7 : i32
    %15 = vector.broadcast %c7_i32 : i32 to vector<64x128xi32>
    %16 = arith.andi %14, %15 : vector<64x128xi32>
    %c1_i32 = arith.constant 1 : i32
    %17 = vector.broadcast %c1_i32 : i32 to vector<64x128xi32>
    %18 = arith.cmpi sge, %16, %17 : vector<64x128xi32>
    %c7_i32_10 = arith.constant 7 : i32
    %19 = vector.broadcast %c7_i32_10 : i32 to vector<64x128xi32>
    %20 = arith.cmpi slt, %16, %19 : vector<64x128xi32>
    %cst_11 = arith.constant 0.000000e+00 : f32
    %21 = vector.broadcast %cst_11 : f32 to vector<64x128xf32>
    %22 = vector.extract_strided_slice %13 {offsets = [0, 0], sizes = [64, 128], strides = [1, 1]} : vector<82x128xf32> to vector<64x128xf32>
    %23 = arith.select %18, %22, %21 : vector<64x128xi1>, vector<64x128xf32>
    %24 = vector.extract_strided_slice %13 {offsets = [1, 0], sizes = [64, 128], strides = [1, 1]} : vector<82x128xf32> to vector<64x128xf32>
    %25 = vector.extract_strided_slice %13 {offsets = [2, 0], sizes = [64, 128], strides = [1, 1]} : vector<82x128xf32> to vector<64x128xf32>
    %26 = arith.select %20, %25, %21 : vector<64x128xi1>, vector<64x128xf32>
    %27 = vector.extract_strided_slice %13 {offsets = [8, 0], sizes = [64, 128], strides = [1, 1]} : vector<82x128xf32> to vector<64x128xf32>
    %28 = arith.select %18, %27, %21 : vector<64x128xi1>, vector<64x128xf32>
    %29 = vector.extract_strided_slice %13 {offsets = [9, 0], sizes = [64, 128], strides = [1, 1]} : vector<82x128xf32> to vector<64x128xf32>
    %30 = vector.extract_strided_slice %13 {offsets = [10, 0], sizes = [64, 128], strides = [1, 1]} : vector<82x128xf32> to vector<64x128xf32>
    %31 = arith.select %20, %30, %21 : vector<64x128xi1>, vector<64x128xf32>
    %32 = vector.extract_strided_slice %13 {offsets = [16, 0], sizes = [64, 128], strides = [1, 1]} : vector<82x128xf32> to vector<64x128xf32>
    %33 = arith.select %18, %32, %21 : vector<64x128xi1>, vector<64x128xf32>
    %34 = vector.extract_strided_slice %13 {offsets = [17, 0], sizes = [64, 128], strides = [1, 1]} : vector<82x128xf32> to vector<64x128xf32>
    %35 = vector.extract_strided_slice %13 {offsets = [18, 0], sizes = [64, 128], strides = [1, 1]} : vector<82x128xf32> to vector<64x128xf32>
    %36 = arith.select %20, %35, %21 : vector<64x128xi1>, vector<64x128xf32>
    %37 = tpu.concatenate %23, %24, %26, %28, %29, %31, %33, %34, %36 in 1 : vector<64x128xf32>, vector<64x128xf32>, vector<64x128xf32>, vector<64x128xf32>, vector<64x128xf32>, vector<64x128xf32>, vector<64x128xf32>, vector<64x128xf32>, vector<64x128xf32> -> vector<64x1152xf32>
    %38 = arith.truncf %37 : vector<64x1152xf32> to vector<64x1152xbf16>
    %c0_12 = arith.constant 0 : index
    %c0_13 = arith.constant 0 : index
    %39 = vector.load %arg5[%c0_12, %c0_13] : memref<1152x128xbf16, #tpu.memory_space<vmem>>, vector<1152x128xbf16>
    %cst_14 = arith.constant dense<0.000000e+00> : vector<64x128xf32>
    %40 = tpu.matmul %38, %39, %cst_14 {dimension_numbers = #tpu.dot_dimension_numbers<[1], [0], [0], [1], [0, 0, 1, 1], [], []>} : vector<64x1152xbf16>, vector<1152x128xbf16>, vector<64x128xf32> -> vector<64x128xf32>
    %c0_15 = arith.constant 0 : index
    %c0_16 = arith.constant 0 : index
    %41 = vector.load %arg6[%c0_15, %c0_16] : memref<1x128xf32, #tpu.memory_space<vmem>>, vector<1x128xf32>
    %42 = vector.broadcast %41 : vector<1x128xf32> to vector<64x128xf32>
    %43 = arith.mulf %40, %42 : vector<64x128xf32>
    %c0_17 = arith.constant 0 : index
    %c0_18 = arith.constant 0 : index
    %44 = vector.load %arg7[%c0_17, %c0_18] : memref<1x128xf32, #tpu.memory_space<vmem>>, vector<1x128xf32>
    %45 = vector.broadcast %44 : vector<1x128xf32> to vector<64x128xf32>
    %46 = arith.addf %43, %45 : vector<64x128xf32>
    %cst_19 = arith.constant 0.000000e+00 : f32
    %47 = vector.broadcast %cst_19 : f32 to vector<64x128xf32>
    %48 = arith.maximumf %46, %47 : vector<64x128xf32>
    %49 = arith.truncf %48 : vector<64x128xf32> to vector<64x128xbf16>
    %c0_20 = arith.constant 0 : index
    %c0_21 = arith.constant 0 : index
    %50 = vector.load %arg8[%c0_20, %c0_21] : memref<128x256xbf16, #tpu.memory_space<vmem>>, vector<128x256xbf16>
    %cst_22 = arith.constant dense<0.000000e+00> : vector<64x256xf32>
    %51 = tpu.matmul %49, %50, %cst_22 {dimension_numbers = #tpu.dot_dimension_numbers<[1], [0], [0], [1], [0, 0, 1, 1], [], []>} : vector<64x128xbf16>, vector<128x256xbf16>, vector<64x256xf32> -> vector<64x256xf32>
    %c0_23 = arith.constant 0 : index
    %c0_24 = arith.constant 0 : index
    %52 = vector.load %arg9[%c0_23, %c0_24] : memref<1x256xf32, #tpu.memory_space<vmem>>, vector<1x256xf32>
    %53 = vector.broadcast %52 : vector<1x256xf32> to vector<64x256xf32>
    %54 = arith.mulf %51, %53 : vector<64x256xf32>
    %c0_25 = arith.constant 0 : index
    %c0_26 = arith.constant 0 : index
    %55 = vector.load %arg10[%c0_25, %c0_26] : memref<1x256xf32, #tpu.memory_space<vmem>>, vector<1x256xf32>
    %56 = vector.broadcast %55 : vector<1x256xf32> to vector<64x256xf32>
    %57 = arith.addf %54, %56 : vector<64x256xf32>
    %c0_27 = arith.constant 0 : index
    %c0_28 = arith.constant 0 : index
    %58 = vector.load %arg11[%c0_27, %c0_28] : memref<128x256xbf16, #tpu.memory_space<vmem>>, vector<128x256xbf16>
    %cst_29 = arith.constant dense<0.000000e+00> : vector<64x256xf32>
    %59 = tpu.matmul %1, %58, %cst_29 {dimension_numbers = #tpu.dot_dimension_numbers<[1], [0], [0], [1], [0, 0, 1, 1], [], []>} : vector<64x128xbf16>, vector<128x256xbf16>, vector<64x256xf32> -> vector<64x256xf32>
    %c0_30 = arith.constant 0 : index
    %c0_31 = arith.constant 0 : index
    %60 = vector.load %arg12[%c0_30, %c0_31] : memref<1x256xf32, #tpu.memory_space<vmem>>, vector<1x256xf32>
    %61 = vector.broadcast %60 : vector<1x256xf32> to vector<64x256xf32>
    %62 = arith.mulf %59, %61 : vector<64x256xf32>
    %c0_32 = arith.constant 0 : index
    %c0_33 = arith.constant 0 : index
    %63 = vector.load %arg13[%c0_32, %c0_33] : memref<1x256xf32, #tpu.memory_space<vmem>>, vector<1x256xf32>
    %64 = vector.broadcast %63 : vector<1x256xf32> to vector<64x256xf32>
    %65 = arith.addf %62, %64 : vector<64x256xf32>
    %66 = arith.addf %57, %65 : vector<64x256xf32>
    %cst_34 = arith.constant 0.000000e+00 : f32
    %67 = vector.broadcast %cst_34 : f32 to vector<64x256xf32>
    %68 = arith.maximumf %66, %67 : vector<64x256xf32>
    %69 = arith.truncf %68 : vector<64x256xf32> to vector<64x256xbf16>
    %c0_35 = arith.constant 0 : index
    %c0_36 = arith.constant 0 : index
    %c0_37 = arith.constant 0 : index
    %70 = vector.load %arg14[%c0_35, %c0_36, %c0_37] : memref<1x64x256xbf16, #tpu.memory_space<vmem>>, vector<1x64x256xbf16>
    %71 = vector.shape_cast %70 : vector<1x64x256xbf16> to vector<64x256xbf16>
    %72 = vector.shape_cast %69 : vector<64x256xbf16> to vector<1x64x256xbf16>
    tpu.vector_store %arg14[%c0_35, %c0_36, %c0_37], %72 {strides = array<i32>} : memref<1x64x256xbf16, #tpu.memory_space<vmem>>, vector<1x64x256xbf16>,
    return
  }
  func.func @transform_0(%arg0: i32) -> (i32, i32, i32) {
    %c0_i32 = arith.constant 0 : i32
    %c0_i32_0 = arith.constant 0 : i32
    %c0_i32_1 = arith.constant 0 : i32
    return %arg0, %c0_i32, %c0_i32_0 : i32, i32, i32
  }
  func.func @transform_1(%arg0: i32) -> (i32, i32) {
    %c0_i32 = arith.constant 0 : i32
    %c0_i32_0 = arith.constant 0 : i32
    %c0_i32_1 = arith.constant 0 : i32
    return %c0_i32, %c0_i32_0 : i32, i32
  }
  func.func @transform_2(%arg0: i32) -> (i32, i32) {
    %c0_i32 = arith.constant 0 : i32
    %c0_i32_0 = arith.constant 0 : i32
    %c0_i32_1 = arith.constant 0 : i32
    return %c0_i32, %c0_i32_0 : i32, i32
  }
  func.func @transform_3(%arg0: i32) -> (i32, i32) {
    %c0_i32 = arith.constant 0 : i32
    %c0_i32_0 = arith.constant 0 : i32
    %c0_i32_1 = arith.constant 0 : i32
    return %c0_i32, %c0_i32_0 : i32, i32
  }
  func.func @transform_4(%arg0: i32) -> (i32, i32) {
    %c0_i32 = arith.constant 0 : i32
    %c0_i32_0 = arith.constant 0 : i32
    %c0_i32_1 = arith.constant 0 : i32
    return %c0_i32, %c0_i32_0 : i32, i32
  }
  func.func @transform_5(%arg0: i32) -> (i32, i32) {
    %c0_i32 = arith.constant 0 : i32
    %c0_i32_0 = arith.constant 0 : i32
    %c0_i32_1 = arith.constant 0 : i32
    return %c0_i32, %c0_i32_0 : i32, i32
  }
  func.func @transform_6(%arg0: i32) -> (i32, i32) {
    %c0_i32 = arith.constant 0 : i32
    %c0_i32_0 = arith.constant 0 : i32
    %c0_i32_1 = arith.constant 0 : i32
    return %c0_i32, %c0_i32_0 : i32, i32
  }
  func.func @transform_7(%arg0: i32) -> (i32, i32) {
    %c0_i32 = arith.constant 0 : i32
    %c0_i32_0 = arith.constant 0 : i32
    %c0_i32_1 = arith.constant 0 : i32
    return %c0_i32, %c0_i32_0 : i32, i32
  }
  func.func @transform_8(%arg0: i32) -> (i32, i32) {
    %c0_i32 = arith.constant 0 : i32
    %c0_i32_0 = arith.constant 0 : i32
    %c0_i32_1 = arith.constant 0 : i32
    return %c0_i32, %c0_i32_0 : i32, i32
  }
  func.func @transform_9(%arg0: i32) -> (i32, i32) {
    %c0_i32 = arith.constant 0 : i32
    %c0_i32_0 = arith.constant 0 : i32
    %c0_i32_1 = arith.constant 0 : i32
    return %c0_i32, %c0_i32_0 : i32, i32
  }
  func.func @transform_10(%arg0: i32) -> (i32, i32) {
    %c0_i32 = arith.constant 0 : i32
    %c0_i32_0 = arith.constant 0 : i32
    %c0_i32_1 = arith.constant 0 : i32
    return %c0_i32, %c0_i32_0 : i32, i32
  }
  func.func @transform_11(%arg0: i32) -> (i32, i32) {
    %c0_i32 = arith.constant 0 : i32
    %c0_i32_0 = arith.constant 0 : i32
    %c0_i32_1 = arith.constant 0 : i32
    return %c0_i32, %c0_i32_0 : i32, i32
  }
  func.func @transform_12(%arg0: i32) -> (i32, i32) {
    %c0_i32 = arith.constant 0 : i32
    %c0_i32_0 = arith.constant 0 : i32
    %c0_i32_1 = arith.constant 0 : i32
    return %c0_i32, %c0_i32_0 : i32, i32
  }
  func.func @transform_13(%arg0: i32) -> (i32, i32, i32) {
    %c0_i32 = arith.constant 0 : i32
    %c0_i32_0 = arith.constant 0 : i32
    %c0_i32_1 = arith.constant 0 : i32
    return %arg0, %c0_i32, %c0_i32_0 : i32, i32, i32
  }
}

module attributes {stable_mosaic.version = 11 : i64} {
  func.func @kernel(%arg0: i32, %arg1: i32, %arg2: i32, %arg3: memref<128x256xbf16, #tpu.memory_space<vmem>>, %arg4: memref<256x128xbf16, #tpu.memory_space<vmem>>, %arg5: memref<1x128xf32, #tpu.memory_space<vmem>>, %arg6: memref<1x128xf32, #tpu.memory_space<vmem>>, %arg7: memref<128x128xbf16, #tpu.memory_space<vmem>>, %arg8: memref<128x128xf32, #tpu.memory_space<vmem>>) attributes {dimension_semantics = [#tpu.dimension_semantics<parallel>, #tpu.dimension_semantics<parallel>, #tpu.dimension_semantics<arbitrary>], iteration_bounds = array<i64: 1, 1, 1>, scalar_prefetch = 0 : i64, scratch_operands = 1 : i64, tpu.core_type = #tpu.core_type<tc>, window_params = [{transform_indices = @transform_0, window_bounds = array<i64: 128, 256>}, {transform_indices = @transform_1, window_bounds = array<i64: 256, 128>}, {transform_indices = @transform_2, window_bounds = array<i64: 1, 128>}, {transform_indices = @transform_3, window_bounds = array<i64: 1, 128>}, {transform_indices = @transform_4, window_bounds = array<i64: 128, 128>}]} {
    %c0_i32 = arith.constant 0 : i32
    %0 = arith.cmpi eq, %arg2, %c0_i32 : i32
    %1 = arith.extui %0 : i1 to i32
    %c0_i32_0 = arith.constant 0 : i32
    %2 = arith.cmpi ne, %1, %c0_i32_0 : i32
    scf.if %2 {
      %cst_10 = arith.constant 0.000000e+00 : f32
      %12 = vector.broadcast %cst_10 : f32 to vector<128x128xf32>
      %c0_11 = arith.constant 0 : index
      %c0_12 = arith.constant 0 : index
      %13 = vector.load %arg8[%c0_11, %c0_12] : memref<128x128xf32, #tpu.memory_space<vmem>>, vector<128x128xf32>
      tpu.vector_store %arg8[%c0_11, %c0_12], %12 {strides = array<i32>} : memref<128x128xf32, #tpu.memory_space<vmem>>, vector<128x128xf32>,
    } else {
    }
    %c0 = arith.constant 0 : index
    %c0_1 = arith.constant 0 : index
    %3 = vector.load %arg8[%c0, %c0_1] : memref<128x128xf32, #tpu.memory_space<vmem>>, vector<128x128xf32>
    %c0_2 = arith.constant 0 : index
    %c0_3 = arith.constant 0 : index
    %4 = vector.load %arg3[%c0_2, %c0_3] : memref<128x256xbf16, #tpu.memory_space<vmem>>, vector<128x256xbf16>
    %c0_4 = arith.constant 0 : index
    %c0_5 = arith.constant 0 : index
    %5 = vector.load %arg4[%c0_4, %c0_5] : memref<256x128xbf16, #tpu.memory_space<vmem>>, vector<256x128xbf16>
    %cst = arith.constant dense<0.000000e+00> : vector<128x128xf32>
    %6 = tpu.matmul %4, %5, %cst {dimension_numbers = #tpu.dot_dimension_numbers<[1], [0], [0], [1], [0, 0, 1, 1], [], []>} : vector<128x256xbf16>, vector<256x128xbf16>, vector<128x128xf32> -> vector<128x128xf32>
    %7 = arith.addf %3, %6 : vector<128x128xf32>
    %c0_6 = arith.constant 0 : index
    %c0_7 = arith.constant 0 : index
    %8 = vector.load %arg8[%c0_6, %c0_7] : memref<128x128xf32, #tpu.memory_space<vmem>>, vector<128x128xf32>
    tpu.vector_store %arg8[%c0_6, %c0_7], %7 {strides = array<i32>} : memref<128x128xf32, #tpu.memory_space<vmem>>, vector<128x128xf32>,
    %c0_i32_8 = arith.constant 0 : i32
    %9 = arith.cmpi eq, %arg2, %c0_i32_8 : i32
    %10 = arith.extui %9 : i1 to i32
    %c0_i32_9 = arith.constant 0 : i32
    %11 = arith.cmpi ne, %10, %c0_i32_9 : i32
    scf.if %11 {
      %c0_10 = arith.constant 0 : index
      %c0_11 = arith.constant 0 : index
      %12 = vector.load %arg8[%c0_10, %c0_11] : memref<128x128xf32, #tpu.memory_space<vmem>>, vector<128x128xf32>
      %c0_12 = arith.constant 0 : index
      %c0_13 = arith.constant 0 : index
      %13 = vector.load %arg5[%c0_12, %c0_13] : memref<1x128xf32, #tpu.memory_space<vmem>>, vector<1x128xf32>
      %14 = vector.broadcast %13 : vector<1x128xf32> to vector<128x128xf32>
      %15 = arith.mulf %12, %14 : vector<128x128xf32>
      %c0_14 = arith.constant 0 : index
      %c0_15 = arith.constant 0 : index
      %16 = vector.load %arg6[%c0_14, %c0_15] : memref<1x128xf32, #tpu.memory_space<vmem>>, vector<1x128xf32>
      %17 = vector.broadcast %16 : vector<1x128xf32> to vector<128x128xf32>
      %18 = arith.addf %15, %17 : vector<128x128xf32>
      %cst_16 = arith.constant 0.000000e+00 : f32
      %19 = vector.broadcast %cst_16 : f32 to vector<128x128xf32>
      %20 = arith.maximumf %18, %19 : vector<128x128xf32>
      %21 = arith.truncf %20 : vector<128x128xf32> to vector<128x128xbf16>
      %c0_17 = arith.constant 0 : index
      %c0_18 = arith.constant 0 : index
      %22 = vector.load %arg7[%c0_17, %c0_18] : memref<128x128xbf16, #tpu.memory_space<vmem>>, vector<128x128xbf16>
      tpu.vector_store %arg7[%c0_17, %c0_18], %21 {strides = array<i32>} : memref<128x128xbf16, #tpu.memory_space<vmem>>, vector<128x128xbf16>,
    } else {
    }
    return
  }
  func.func @transform_0(%arg0: i32, %arg1: i32, %arg2: i32) -> (i32, i32) {
    %c0_i32 = arith.constant 0 : i32
    return %arg0, %arg2 : i32, i32
  }
  func.func @transform_1(%arg0: i32, %arg1: i32, %arg2: i32) -> (i32, i32) {
    %c0_i32 = arith.constant 0 : i32
    return %arg2, %arg1 : i32, i32
  }
  func.func @transform_2(%arg0: i32, %arg1: i32, %arg2: i32) -> (i32, i32) {
    %c0_i32 = arith.constant 0 : i32
    %c0_i32_0 = arith.constant 0 : i32
    return %c0_i32, %arg1 : i32, i32
  }
  func.func @transform_3(%arg0: i32, %arg1: i32, %arg2: i32) -> (i32, i32) {
    %c0_i32 = arith.constant 0 : i32
    %c0_i32_0 = arith.constant 0 : i32
    return %c0_i32, %arg1 : i32, i32
  }
  func.func @transform_4(%arg0: i32, %arg1: i32, %arg2: i32) -> (i32, i32) {
    %c0_i32 = arith.constant 0 : i32
    return %arg0, %arg1 : i32, i32
  }
}

module attributes {stable_mosaic.version = 11 : i64} {
  func.func @kernel(%arg0: i32, %arg1: i32, %arg2: i32, %arg3: memref<32x128xbf16, #tpu.memory_space<vmem>>, %arg4: memref<128x256xbf16, #tpu.memory_space<vmem>>, %arg5: memref<1x256xf32, #tpu.memory_space<vmem>>, %arg6: memref<1x256xf32, #tpu.memory_space<vmem>>, %arg7: memref<32x256xbf16, #tpu.memory_space<vmem>>, %arg8: memref<32x256xbf16, #tpu.memory_space<vmem>>, %arg9: memref<32x256xf32, #tpu.memory_space<vmem>>) attributes {dimension_semantics = [#tpu.dimension_semantics<parallel>, #tpu.dimension_semantics<parallel>, #tpu.dimension_semantics<arbitrary>], iteration_bounds = array<i64: 1, 2, 1>, scalar_prefetch = 0 : i64, scratch_operands = 1 : i64, tpu.core_type = #tpu.core_type<tc>, window_params = [{transform_indices = @transform_0, window_bounds = array<i64: 32, 128>}, {transform_indices = @transform_1, window_bounds = array<i64: 128, 256>}, {transform_indices = @transform_2, window_bounds = array<i64: 1, 256>}, {transform_indices = @transform_3, window_bounds = array<i64: 1, 256>}, {transform_indices = @transform_4, window_bounds = array<i64: 32, 256>}, {transform_indices = @transform_5, window_bounds = array<i64: 32, 256>}]} {
    %c0_i32 = arith.constant 0 : i32
    %0 = arith.cmpi eq, %arg2, %c0_i32 : i32
    %1 = arith.extui %0 : i1 to i32
    %c0_i32_0 = arith.constant 0 : i32
    %2 = arith.cmpi ne, %1, %c0_i32_0 : i32
    scf.if %2 {
      %cst_10 = arith.constant 0.000000e+00 : f32
      %12 = vector.broadcast %cst_10 : f32 to vector<32x256xf32>
      %c0_11 = arith.constant 0 : index
      %c0_12 = arith.constant 0 : index
      %13 = vector.load %arg9[%c0_11, %c0_12] : memref<32x256xf32, #tpu.memory_space<vmem>>, vector<32x256xf32>
      tpu.vector_store %arg9[%c0_11, %c0_12], %12 {strides = array<i32>} : memref<32x256xf32, #tpu.memory_space<vmem>>, vector<32x256xf32>,
    } else {
    }
    %c0 = arith.constant 0 : index
    %c0_1 = arith.constant 0 : index
    %3 = vector.load %arg9[%c0, %c0_1] : memref<32x256xf32, #tpu.memory_space<vmem>>, vector<32x256xf32>
    %c0_2 = arith.constant 0 : index
    %c0_3 = arith.constant 0 : index
    %4 = vector.load %arg3[%c0_2, %c0_3] : memref<32x128xbf16, #tpu.memory_space<vmem>>, vector<32x128xbf16>
    %c0_4 = arith.constant 0 : index
    %c0_5 = arith.constant 0 : index
    %5 = vector.load %arg4[%c0_4, %c0_5] : memref<128x256xbf16, #tpu.memory_space<vmem>>, vector<128x256xbf16>
    %cst = arith.constant dense<0.000000e+00> : vector<32x256xf32>
    %6 = tpu.matmul %4, %5, %cst {dimension_numbers = #tpu.dot_dimension_numbers<[1], [0], [0], [1], [0, 0, 1, 1], [], []>} : vector<32x128xbf16>, vector<128x256xbf16>, vector<32x256xf32> -> vector<32x256xf32>
    %7 = arith.addf %3, %6 : vector<32x256xf32>
    %c0_6 = arith.constant 0 : index
    %c0_7 = arith.constant 0 : index
    %8 = vector.load %arg9[%c0_6, %c0_7] : memref<32x256xf32, #tpu.memory_space<vmem>>, vector<32x256xf32>
    tpu.vector_store %arg9[%c0_6, %c0_7], %7 {strides = array<i32>} : memref<32x256xf32, #tpu.memory_space<vmem>>, vector<32x256xf32>,
    %c0_i32_8 = arith.constant 0 : i32
    %9 = arith.cmpi eq, %arg2, %c0_i32_8 : i32
    %10 = arith.extui %9 : i1 to i32
    %c0_i32_9 = arith.constant 0 : i32
    %11 = arith.cmpi ne, %10, %c0_i32_9 : i32
    scf.if %11 {
      %c0_10 = arith.constant 0 : index
      %c0_11 = arith.constant 0 : index
      %12 = vector.load %arg9[%c0_10, %c0_11] : memref<32x256xf32, #tpu.memory_space<vmem>>, vector<32x256xf32>
      %c0_12 = arith.constant 0 : index
      %c0_13 = arith.constant 0 : index
      %13 = vector.load %arg5[%c0_12, %c0_13] : memref<1x256xf32, #tpu.memory_space<vmem>>, vector<1x256xf32>
      %14 = vector.broadcast %13 : vector<1x256xf32> to vector<32x256xf32>
      %15 = arith.mulf %12, %14 : vector<32x256xf32>
      %c0_14 = arith.constant 0 : index
      %c0_15 = arith.constant 0 : index
      %16 = vector.load %arg6[%c0_14, %c0_15] : memref<1x256xf32, #tpu.memory_space<vmem>>, vector<1x256xf32>
      %17 = vector.broadcast %16 : vector<1x256xf32> to vector<32x256xf32>
      %18 = arith.addf %15, %17 : vector<32x256xf32>
      %c0_16 = arith.constant 0 : index
      %c0_17 = arith.constant 0 : index
      %19 = vector.load %arg7[%c0_16, %c0_17] : memref<32x256xbf16, #tpu.memory_space<vmem>>, vector<32x256xbf16>
      %20 = arith.extf %19 : vector<32x256xbf16> to vector<32x256xf32>
      %21 = arith.addf %18, %20 : vector<32x256xf32>
      %cst_18 = arith.constant 0.000000e+00 : f32
      %22 = vector.broadcast %cst_18 : f32 to vector<32x256xf32>
      %23 = arith.maximumf %21, %22 : vector<32x256xf32>
      %24 = arith.truncf %23 : vector<32x256xf32> to vector<32x256xbf16>
      %c0_19 = arith.constant 0 : index
      %c0_20 = arith.constant 0 : index
      %25 = vector.load %arg8[%c0_19, %c0_20] : memref<32x256xbf16, #tpu.memory_space<vmem>>, vector<32x256xbf16>
      tpu.vector_store %arg8[%c0_19, %c0_20], %24 {strides = array<i32>} : memref<32x256xbf16, #tpu.memory_space<vmem>>, vector<32x256xbf16>,
    } else {
    }
    return
  }
  func.func @transform_0(%arg0: i32, %arg1: i32, %arg2: i32) -> (i32, i32) {
    %c0_i32 = arith.constant 0 : i32
    return %arg0, %arg2 : i32, i32
  }
  func.func @transform_1(%arg0: i32, %arg1: i32, %arg2: i32) -> (i32, i32) {
    %c0_i32 = arith.constant 0 : i32
    return %arg2, %arg1 : i32, i32
  }
  func.func @transform_2(%arg0: i32, %arg1: i32, %arg2: i32) -> (i32, i32) {
    %c0_i32 = arith.constant 0 : i32
    %c0_i32_0 = arith.constant 0 : i32
    return %c0_i32, %arg1 : i32, i32
  }
  func.func @transform_3(%arg0: i32, %arg1: i32, %arg2: i32) -> (i32, i32) {
    %c0_i32 = arith.constant 0 : i32
    %c0_i32_0 = arith.constant 0 : i32
    return %c0_i32, %arg1 : i32, i32
  }
  func.func @transform_4(%arg0: i32, %arg1: i32, %arg2: i32) -> (i32, i32) {
    %c0_i32 = arith.constant 0 : i32
    return %arg0, %arg1 : i32, i32
  }
  func.func @transform_5(%arg0: i32, %arg1: i32, %arg2: i32) -> (i32, i32) {
    %c0_i32 = arith.constant 0 : i32
    return %arg0, %arg1 : i32, i32
  }
}

module attributes {stable_mosaic.version = 11 : i64} {
  func.func @kernel(%arg0: i32, %arg1: i32, %arg2: i32, %arg3: memref<32x384xbf16, #tpu.memory_space<vmem>>, %arg4: memref<384x128xbf16, #tpu.memory_space<vmem>>, %arg5: memref<1x128xf32, #tpu.memory_space<vmem>>, %arg6: memref<1x128xf32, #tpu.memory_space<vmem>>, %arg7: memref<32x128xbf16, #tpu.memory_space<vmem>>, %arg8: memref<32x128xf32, #tpu.memory_space<vmem>>) attributes {dimension_semantics = [#tpu.dimension_semantics<parallel>, #tpu.dimension_semantics<parallel>, #tpu.dimension_semantics<arbitrary>], iteration_bounds = array<i64: 1, 1, 3>, scalar_prefetch = 0 : i64, scratch_operands = 1 : i64, tpu.core_type = #tpu.core_type<tc>, window_params = [{transform_indices = @transform_0, window_bounds = array<i64: 32, 384>}, {transform_indices = @transform_1, window_bounds = array<i64: 384, 128>}, {transform_indices = @transform_2, window_bounds = array<i64: 1, 128>}, {transform_indices = @transform_3, window_bounds = array<i64: 1, 128>}, {transform_indices = @transform_4, window_bounds = array<i64: 32, 128>}]} {
    %c0_i32 = arith.constant 0 : i32
    %0 = arith.cmpi eq, %arg2, %c0_i32 : i32
    %1 = arith.extui %0 : i1 to i32
    %c0_i32_0 = arith.constant 0 : i32
    %2 = arith.cmpi ne, %1, %c0_i32_0 : i32
    scf.if %2 {
      %cst_9 = arith.constant 0.000000e+00 : f32
      %12 = vector.broadcast %cst_9 : f32 to vector<32x128xf32>
      %c0_10 = arith.constant 0 : index
      %c0_11 = arith.constant 0 : index
      %13 = vector.load %arg8[%c0_10, %c0_11] : memref<32x128xf32, #tpu.memory_space<vmem>>, vector<32x128xf32>
      tpu.vector_store %arg8[%c0_10, %c0_11], %12 {strides = array<i32>} : memref<32x128xf32, #tpu.memory_space<vmem>>, vector<32x128xf32>,
    } else {
    }
    %c0 = arith.constant 0 : index
    %c0_1 = arith.constant 0 : index
    %3 = vector.load %arg8[%c0, %c0_1] : memref<32x128xf32, #tpu.memory_space<vmem>>, vector<32x128xf32>
    %c0_2 = arith.constant 0 : index
    %c0_3 = arith.constant 0 : index
    %4 = vector.load %arg3[%c0_2, %c0_3] : memref<32x384xbf16, #tpu.memory_space<vmem>>, vector<32x384xbf16>
    %c0_4 = arith.constant 0 : index
    %c0_5 = arith.constant 0 : index
    %5 = vector.load %arg4[%c0_4, %c0_5] : memref<384x128xbf16, #tpu.memory_space<vmem>>, vector<384x128xbf16>
    %cst = arith.constant dense<0.000000e+00> : vector<32x128xf32>
    %6 = tpu.matmul %4, %5, %cst {dimension_numbers = #tpu.dot_dimension_numbers<[1], [0], [0], [1], [0, 0, 1, 1], [], []>} : vector<32x384xbf16>, vector<384x128xbf16>, vector<32x128xf32> -> vector<32x128xf32>
    %7 = arith.addf %3, %6 : vector<32x128xf32>
    %c0_6 = arith.constant 0 : index
    %c0_7 = arith.constant 0 : index
    %8 = vector.load %arg8[%c0_6, %c0_7] : memref<32x128xf32, #tpu.memory_space<vmem>>, vector<32x128xf32>
    tpu.vector_store %arg8[%c0_6, %c0_7], %7 {strides = array<i32>} : memref<32x128xf32, #tpu.memory_space<vmem>>, vector<32x128xf32>,
    %c2_i32 = arith.constant 2 : i32
    %9 = arith.cmpi eq, %arg2, %c2_i32 : i32
    %10 = arith.extui %9 : i1 to i32
    %c0_i32_8 = arith.constant 0 : i32
    %11 = arith.cmpi ne, %10, %c0_i32_8 : i32
    scf.if %11 {
      %c0_9 = arith.constant 0 : index
      %c0_10 = arith.constant 0 : index
      %12 = vector.load %arg8[%c0_9, %c0_10] : memref<32x128xf32, #tpu.memory_space<vmem>>, vector<32x128xf32>
      %c0_11 = arith.constant 0 : index
      %c0_12 = arith.constant 0 : index
      %13 = vector.load %arg5[%c0_11, %c0_12] : memref<1x128xf32, #tpu.memory_space<vmem>>, vector<1x128xf32>
      %14 = vector.broadcast %13 : vector<1x128xf32> to vector<32x128xf32>
      %15 = arith.mulf %12, %14 : vector<32x128xf32>
      %c0_13 = arith.constant 0 : index
      %c0_14 = arith.constant 0 : index
      %16 = vector.load %arg6[%c0_13, %c0_14] : memref<1x128xf32, #tpu.memory_space<vmem>>, vector<1x128xf32>
      %17 = vector.broadcast %16 : vector<1x128xf32> to vector<32x128xf32>
      %18 = arith.addf %15, %17 : vector<32x128xf32>
      %cst_15 = arith.constant 0.000000e+00 : f32
      %19 = vector.broadcast %cst_15 : f32 to vector<32x128xf32>
      %20 = arith.maximumf %18, %19 : vector<32x128xf32>
      %21 = arith.truncf %20 : vector<32x128xf32> to vector<32x128xbf16>
      %c0_16 = arith.constant 0 : index
      %c0_17 = arith.constant 0 : index
      %22 = vector.load %arg7[%c0_16, %c0_17] : memref<32x128xbf16, #tpu.memory_space<vmem>>, vector<32x128xbf16>
      tpu.vector_store %arg7[%c0_16, %c0_17], %21 {strides = array<i32>} : memref<32x128xbf16, #tpu.memory_space<vmem>>, vector<32x128xbf16>,
    } else {
    }
    return
  }
  func.func @transform_0(%arg0: i32, %arg1: i32, %arg2: i32) -> (i32, i32) {
    %c0_i32 = arith.constant 0 : i32
    return %arg0, %arg2 : i32, i32
  }
  func.func @transform_1(%arg0: i32, %arg1: i32, %arg2: i32) -> (i32, i32) {
    %c0_i32 = arith.constant 0 : i32
    return %arg2, %arg1 : i32, i32
  }
  func.func @transform_2(%arg0: i32, %arg1: i32, %arg2: i32) -> (i32, i32) {
    %c0_i32 = arith.constant 0 : i32
    %c0_i32_0 = arith.constant 0 : i32
    return %c0_i32, %arg1 : i32, i32
  }
  func.func @transform_3(%arg0: i32, %arg1: i32, %arg2: i32) -> (i32, i32) {
    %c0_i32 = arith.constant 0 : i32
    %c0_i32_0 = arith.constant 0 : i32
    return %c0_i32, %arg1 : i32, i32
  }
  func.func @transform_4(%arg0: i32, %arg1: i32, %arg2: i32) -> (i32, i32) {
    %c0_i32 = arith.constant 0 : i32
    return %arg0, %arg1 : i32, i32
  }
}

module attributes {stable_mosaic.version = 11 : i64} {
  func.func @kernel(%arg0: i32, %arg1: i32, %arg2: i32, %arg3: memref<32x256xbf16, #tpu.memory_space<vmem>>, %arg4: memref<256x256xbf16, #tpu.memory_space<vmem>>, %arg5: memref<1x256xf32, #tpu.memory_space<vmem>>, %arg6: memref<1x256xf32, #tpu.memory_space<vmem>>, %arg7: memref<32x256xbf16, #tpu.memory_space<vmem>>, %arg8: memref<32x256xf32, #tpu.memory_space<vmem>>) attributes {dimension_semantics = [#tpu.dimension_semantics<parallel>, #tpu.dimension_semantics<parallel>, #tpu.dimension_semantics<arbitrary>], iteration_bounds = array<i64: 1, 2, 1>, scalar_prefetch = 0 : i64, scratch_operands = 1 : i64, tpu.core_type = #tpu.core_type<tc>, window_params = [{transform_indices = @transform_0, window_bounds = array<i64: 32, 256>}, {transform_indices = @transform_1, window_bounds = array<i64: 256, 256>}, {transform_indices = @transform_2, window_bounds = array<i64: 1, 256>}, {transform_indices = @transform_3, window_bounds = array<i64: 1, 256>}, {transform_indices = @transform_4, window_bounds = array<i64: 32, 256>}]} {
    %c0_i32 = arith.constant 0 : i32
    %0 = arith.cmpi eq, %arg2, %c0_i32 : i32
    %1 = arith.extui %0 : i1 to i32
    %c0_i32_0 = arith.constant 0 : i32
    %2 = arith.cmpi ne, %1, %c0_i32_0 : i32
    scf.if %2 {
      %cst_10 = arith.constant 0.000000e+00 : f32
      %12 = vector.broadcast %cst_10 : f32 to vector<32x256xf32>
      %c0_11 = arith.constant 0 : index
      %c0_12 = arith.constant 0 : index
      %13 = vector.load %arg8[%c0_11, %c0_12] : memref<32x256xf32, #tpu.memory_space<vmem>>, vector<32x256xf32>
      tpu.vector_store %arg8[%c0_11, %c0_12], %12 {strides = array<i32>} : memref<32x256xf32, #tpu.memory_space<vmem>>, vector<32x256xf32>,
    } else {
    }
    %c0 = arith.constant 0 : index
    %c0_1 = arith.constant 0 : index
    %3 = vector.load %arg8[%c0, %c0_1] : memref<32x256xf32, #tpu.memory_space<vmem>>, vector<32x256xf32>
    %c0_2 = arith.constant 0 : index
    %c0_3 = arith.constant 0 : index
    %4 = vector.load %arg3[%c0_2, %c0_3] : memref<32x256xbf16, #tpu.memory_space<vmem>>, vector<32x256xbf16>
    %c0_4 = arith.constant 0 : index
    %c0_5 = arith.constant 0 : index
    %5 = vector.load %arg4[%c0_4, %c0_5] : memref<256x256xbf16, #tpu.memory_space<vmem>>, vector<256x256xbf16>
    %cst = arith.constant dense<0.000000e+00> : vector<32x256xf32>
    %6 = tpu.matmul %4, %5, %cst {dimension_numbers = #tpu.dot_dimension_numbers<[1], [0], [0], [1], [0, 0, 1, 1], [], []>} : vector<32x256xbf16>, vector<256x256xbf16>, vector<32x256xf32> -> vector<32x256xf32>
    %7 = arith.addf %3, %6 : vector<32x256xf32>
    %c0_6 = arith.constant 0 : index
    %c0_7 = arith.constant 0 : index
    %8 = vector.load %arg8[%c0_6, %c0_7] : memref<32x256xf32, #tpu.memory_space<vmem>>, vector<32x256xf32>
    tpu.vector_store %arg8[%c0_6, %c0_7], %7 {strides = array<i32>} : memref<32x256xf32, #tpu.memory_space<vmem>>, vector<32x256xf32>,
    %c0_i32_8 = arith.constant 0 : i32
    %9 = arith.cmpi eq, %arg2, %c0_i32_8 : i32
    %10 = arith.extui %9 : i1 to i32
    %c0_i32_9 = arith.constant 0 : i32
    %11 = arith.cmpi ne, %10, %c0_i32_9 : i32
    scf.if %11 {
      %c0_10 = arith.constant 0 : index
      %c0_11 = arith.constant 0 : index
      %12 = vector.load %arg8[%c0_10, %c0_11] : memref<32x256xf32, #tpu.memory_space<vmem>>, vector<32x256xf32>
      %c0_12 = arith.constant 0 : index
      %c0_13 = arith.constant 0 : index
      %13 = vector.load %arg5[%c0_12, %c0_13] : memref<1x256xf32, #tpu.memory_space<vmem>>, vector<1x256xf32>
      %14 = vector.broadcast %13 : vector<1x256xf32> to vector<32x256xf32>
      %15 = arith.mulf %12, %14 : vector<32x256xf32>
      %c0_14 = arith.constant 0 : index
      %c0_15 = arith.constant 0 : index
      %16 = vector.load %arg6[%c0_14, %c0_15] : memref<1x256xf32, #tpu.memory_space<vmem>>, vector<1x256xf32>
      %17 = vector.broadcast %16 : vector<1x256xf32> to vector<32x256xf32>
      %18 = arith.addf %15, %17 : vector<32x256xf32>
      %19 = arith.truncf %18 : vector<32x256xf32> to vector<32x256xbf16>
      %c0_16 = arith.constant 0 : index
      %c0_17 = arith.constant 0 : index
      %20 = vector.load %arg7[%c0_16, %c0_17] : memref<32x256xbf16, #tpu.memory_space<vmem>>, vector<32x256xbf16>
      tpu.vector_store %arg7[%c0_16, %c0_17], %19 {strides = array<i32>} : memref<32x256xbf16, #tpu.memory_space<vmem>>, vector<32x256xbf16>,
    } else {
    }
    return
  }
  func.func @transform_0(%arg0: i32, %arg1: i32, %arg2: i32) -> (i32, i32) {
    %c0_i32 = arith.constant 0 : i32
    return %arg0, %arg2 : i32, i32
  }
  func.func @transform_1(%arg0: i32, %arg1: i32, %arg2: i32) -> (i32, i32) {
    %c0_i32 = arith.constant 0 : i32
    return %arg2, %arg1 : i32, i32
  }
  func.func @transform_2(%arg0: i32, %arg1: i32, %arg2: i32) -> (i32, i32) {
    %c0_i32 = arith.constant 0 : i32
    %c0_i32_0 = arith.constant 0 : i32
    return %c0_i32, %arg1 : i32, i32
  }
  func.func @transform_3(%arg0: i32, %arg1: i32, %arg2: i32) -> (i32, i32) {
    %c0_i32 = arith.constant 0 : i32
    %c0_i32_0 = arith.constant 0 : i32
    return %c0_i32, %arg1 : i32, i32
  }
  func.func @transform_4(%arg0: i32, %arg1: i32, %arg2: i32) -> (i32, i32) {
    %c0_i32 = arith.constant 0 : i32
    return %arg0, %arg1 : i32, i32
  }
}

module attributes {stable_mosaic.version = 11 : i64} {
  func.func @kernel(%arg0: i32, %arg1: memref<1x16x512xbf16, #tpu.memory_space<vmem>>, %arg2: memref<512x128xbf16, #tpu.memory_space<vmem>>, %arg3: memref<1x128xf32, #tpu.memory_space<vmem>>, %arg4: memref<1x128xf32, #tpu.memory_space<vmem>>, %arg5: memref<1152x128xbf16, #tpu.memory_space<vmem>>, %arg6: memref<1x128xf32, #tpu.memory_space<vmem>>, %arg7: memref<1x128xf32, #tpu.memory_space<vmem>>, %arg8: memref<128x512xbf16, #tpu.memory_space<vmem>>, %arg9: memref<1x512xf32, #tpu.memory_space<vmem>>, %arg10: memref<1x512xf32, #tpu.memory_space<vmem>>, %arg11: memref<1x16x512xbf16, #tpu.memory_space<vmem>>) attributes {dimension_semantics = [#tpu.dimension_semantics<parallel>], iteration_bounds = array<i64: 2>, scalar_prefetch = 0 : i64, scratch_operands = 0 : i64, tpu.core_type = #tpu.core_type<tc>, window_params = [{transform_indices = @transform_0, window_bounds = array<i64: 1, 16, 512>}, {pipeline_mode = #tpu.pipeline_mode<synchronous>, transform_indices = @transform_1, window_bounds = array<i64: 512, 128>}, {pipeline_mode = #tpu.pipeline_mode<synchronous>, transform_indices = @transform_2, window_bounds = array<i64: 1, 128>}, {pipeline_mode = #tpu.pipeline_mode<synchronous>, transform_indices = @transform_3, window_bounds = array<i64: 1, 128>}, {pipeline_mode = #tpu.pipeline_mode<synchronous>, transform_indices = @transform_4, window_bounds = array<i64: 1152, 128>}, {pipeline_mode = #tpu.pipeline_mode<synchronous>, transform_indices = @transform_5, window_bounds = array<i64: 1, 128>}, {pipeline_mode = #tpu.pipeline_mode<synchronous>, transform_indices = @transform_6, window_bounds = array<i64: 1, 128>}, {pipeline_mode = #tpu.pipeline_mode<synchronous>, transform_indices = @transform_7, window_bounds = array<i64: 128, 512>}, {pipeline_mode = #tpu.pipeline_mode<synchronous>, transform_indices = @transform_8, window_bounds = array<i64: 1, 512>}, {pipeline_mode = #tpu.pipeline_mode<synchronous>, transform_indices = @transform_9, window_bounds = array<i64: 1, 512>}, {transform_indices = @transform_10, window_bounds = array<i64: 1, 16, 512>}]} {
    %c0 = arith.constant 0 : index
    %c0_0 = arith.constant 0 : index
    %c0_1 = arith.constant 0 : index
    %0 = vector.load %arg1[%c0, %c0_0, %c0_1] : memref<1x16x512xbf16, #tpu.memory_space<vmem>>, vector<1x16x512xbf16>
    %1 = vector.shape_cast %0 : vector<1x16x512xbf16> to vector<16x512xbf16>
    %c0_2 = arith.constant 0 : index
    %c0_3 = arith.constant 0 : index
    %2 = vector.load %arg2[%c0_2, %c0_3] : memref<512x128xbf16, #tpu.memory_space<vmem>>, vector<512x128xbf16>
    %cst = arith.constant dense<0.000000e+00> : vector<16x128xf32>
    %3 = tpu.matmul %1, %2, %cst {dimension_numbers = #tpu.dot_dimension_numbers<[1], [0], [0], [1], [0, 0, 1, 1], [], []>} : vector<16x512xbf16>, vector<512x128xbf16>, vector<16x128xf32> -> vector<16x128xf32>
    %c0_4 = arith.constant 0 : index
    %c0_5 = arith.constant 0 : index
    %4 = vector.load %arg3[%c0_4, %c0_5] : memref<1x128xf32, #tpu.memory_space<vmem>>, vector<1x128xf32>
    %5 = vector.broadcast %4 : vector<1x128xf32> to vector<16x128xf32>
    %6 = arith.mulf %3, %5 : vector<16x128xf32>
    %c0_6 = arith.constant 0 : index
    %c0_7 = arith.constant 0 : index
    %7 = vector.load %arg4[%c0_6, %c0_7] : memref<1x128xf32, #tpu.memory_space<vmem>>, vector<1x128xf32>
    %8 = vector.broadcast %7 : vector<1x128xf32> to vector<16x128xf32>
    %9 = arith.addf %6, %8 : vector<16x128xf32>
    %cst_8 = arith.constant 0.000000e+00 : f32
    %10 = vector.broadcast %cst_8 : f32 to vector<16x128xf32>
    %11 = arith.maximumf %9, %10 : vector<16x128xf32>
    %cst_9 = arith.constant 0.000000e+00 : f32
    %12 = vector.broadcast %cst_9 : f32 to vector<5x128xf32>
    %13 = tpu.concatenate %12, %11, %12 in 0 : vector<5x128xf32>, vector<16x128xf32>, vector<5x128xf32> -> vector<26x128xf32>
    %14 = tpu.iota {dimensions = array<i32: 0>} : vector<16x128xi32>
    %c3_i32 = arith.constant 3 : i32
    %15 = vector.broadcast %c3_i32 : i32 to vector<16x128xi32>
    %16 = arith.andi %14, %15 : vector<16x128xi32>
    %c1_i32 = arith.constant 1 : i32
    %17 = vector.broadcast %c1_i32 : i32 to vector<16x128xi32>
    %18 = arith.cmpi sge, %16, %17 : vector<16x128xi32>
    %c3_i32_10 = arith.constant 3 : i32
    %19 = vector.broadcast %c3_i32_10 : i32 to vector<16x128xi32>
    %20 = arith.cmpi slt, %16, %19 : vector<16x128xi32>
    %cst_11 = arith.constant 0.000000e+00 : f32
    %21 = vector.broadcast %cst_11 : f32 to vector<16x128xf32>
    %22 = vector.extract_strided_slice %13 {offsets = [0, 0], sizes = [16, 128], strides = [1, 1]} : vector<26x128xf32> to vector<16x128xf32>
    %23 = arith.select %18, %22, %21 : vector<16x128xi1>, vector<16x128xf32>
    %24 = vector.extract_strided_slice %13 {offsets = [1, 0], sizes = [16, 128], strides = [1, 1]} : vector<26x128xf32> to vector<16x128xf32>
    %25 = vector.extract_strided_slice %13 {offsets = [2, 0], sizes = [16, 128], strides = [1, 1]} : vector<26x128xf32> to vector<16x128xf32>
    %26 = arith.select %20, %25, %21 : vector<16x128xi1>, vector<16x128xf32>
    %27 = vector.extract_strided_slice %13 {offsets = [4, 0], sizes = [16, 128], strides = [1, 1]} : vector<26x128xf32> to vector<16x128xf32>
    %28 = arith.select %18, %27, %21 : vector<16x128xi1>, vector<16x128xf32>
    %29 = vector.extract_strided_slice %13 {offsets = [5, 0], sizes = [16, 128], strides = [1, 1]} : vector<26x128xf32> to vector<16x128xf32>
    %30 = vector.extract_strided_slice %13 {offsets = [6, 0], sizes = [16, 128], strides = [1, 1]} : vector<26x128xf32> to vector<16x128xf32>
    %31 = arith.select %20, %30, %21 : vector<16x128xi1>, vector<16x128xf32>
    %32 = vector.extract_strided_slice %13 {offsets = [8, 0], sizes = [16, 128], strides = [1, 1]} : vector<26x128xf32> to vector<16x128xf32>
    %33 = arith.select %18, %32, %21 : vector<16x128xi1>, vector<16x128xf32>
    %34 = vector.extract_strided_slice %13 {offsets = [9, 0], sizes = [16, 128], strides = [1, 1]} : vector<26x128xf32> to vector<16x128xf32>
    %35 = vector.extract_strided_slice %13 {offsets = [10, 0], sizes = [16, 128], strides = [1, 1]} : vector<26x128xf32> to vector<16x128xf32>
    %36 = arith.select %20, %35, %21 : vector<16x128xi1>, vector<16x128xf32>
    %37 = tpu.concatenate %23, %24, %26, %28, %29, %31, %33, %34, %36 in 1 : vector<16x128xf32>, vector<16x128xf32>, vector<16x128xf32>, vector<16x128xf32>, vector<16x128xf32>, vector<16x128xf32>, vector<16x128xf32>, vector<16x128xf32>, vector<16x128xf32> -> vector<16x1152xf32>
    %38 = arith.truncf %37 : vector<16x1152xf32> to vector<16x1152xbf16>
    %c0_12 = arith.constant 0 : index
    %c0_13 = arith.constant 0 : index
    %39 = vector.load %arg5[%c0_12, %c0_13] : memref<1152x128xbf16, #tpu.memory_space<vmem>>, vector<1152x128xbf16>
    %cst_14 = arith.constant dense<0.000000e+00> : vector<16x128xf32>
    %40 = tpu.matmul %38, %39, %cst_14 {dimension_numbers = #tpu.dot_dimension_numbers<[1], [0], [0], [1], [0, 0, 1, 1], [], []>} : vector<16x1152xbf16>, vector<1152x128xbf16>, vector<16x128xf32> -> vector<16x128xf32>
    %c0_15 = arith.constant 0 : index
    %c0_16 = arith.constant 0 : index
    %41 = vector.load %arg6[%c0_15, %c0_16] : memref<1x128xf32, #tpu.memory_space<vmem>>, vector<1x128xf32>
    %42 = vector.broadcast %41 : vector<1x128xf32> to vector<16x128xf32>
    %43 = arith.mulf %40, %42 : vector<16x128xf32>
    %c0_17 = arith.constant 0 : index
    %c0_18 = arith.constant 0 : index
    %44 = vector.load %arg7[%c0_17, %c0_18] : memref<1x128xf32, #tpu.memory_space<vmem>>, vector<1x128xf32>
    %45 = vector.broadcast %44 : vector<1x128xf32> to vector<16x128xf32>
    %46 = arith.addf %43, %45 : vector<16x128xf32>
    %cst_19 = arith.constant 0.000000e+00 : f32
    %47 = vector.broadcast %cst_19 : f32 to vector<16x128xf32>
    %48 = arith.maximumf %46, %47 : vector<16x128xf32>
    %49 = arith.truncf %48 : vector<16x128xf32> to vector<16x128xbf16>
    %c0_20 = arith.constant 0 : index
    %c0_21 = arith.constant 0 : index
    %50 = vector.load %arg8[%c0_20, %c0_21] : memref<128x512xbf16, #tpu.memory_space<vmem>>, vector<128x512xbf16>
    %cst_22 = arith.constant dense<0.000000e+00> : vector<16x512xf32>
    %51 = tpu.matmul %49, %50, %cst_22 {dimension_numbers = #tpu.dot_dimension_numbers<[1], [0], [0], [1], [0, 0, 1, 1], [], []>} : vector<16x128xbf16>, vector<128x512xbf16>, vector<16x512xf32> -> vector<16x512xf32>
    %c0_23 = arith.constant 0 : index
    %c0_24 = arith.constant 0 : index
    %52 = vector.load %arg9[%c0_23, %c0_24] : memref<1x512xf32, #tpu.memory_space<vmem>>, vector<1x512xf32>
    %53 = vector.broadcast %52 : vector<1x512xf32> to vector<16x512xf32>
    %54 = arith.mulf %51, %53 : vector<16x512xf32>
    %c0_25 = arith.constant 0 : index
    %c0_26 = arith.constant 0 : index
    %55 = vector.load %arg10[%c0_25, %c0_26] : memref<1x512xf32, #tpu.memory_space<vmem>>, vector<1x512xf32>
    %56 = vector.broadcast %55 : vector<1x512xf32> to vector<16x512xf32>
    %57 = arith.addf %54, %56 : vector<16x512xf32>
    %58 = arith.extf %1 : vector<16x512xbf16> to vector<16x512xf32>
    %59 = arith.addf %57, %58 : vector<16x512xf32>
    %cst_27 = arith.constant 0.000000e+00 : f32
    %60 = vector.broadcast %cst_27 : f32 to vector<16x512xf32>
    %61 = arith.maximumf %59, %60 : vector<16x512xf32>
    %62 = arith.truncf %61 : vector<16x512xf32> to vector<16x512xbf16>
    %c0_28 = arith.constant 0 : index
    %c0_29 = arith.constant 0 : index
    %c0_30 = arith.constant 0 : index
    %63 = vector.load %arg11[%c0_28, %c0_29, %c0_30] : memref<1x16x512xbf16, #tpu.memory_space<vmem>>, vector<1x16x512xbf16>
    %64 = vector.shape_cast %63 : vector<1x16x512xbf16> to vector<16x512xbf16>
    %65 = vector.shape_cast %62 : vector<16x512xbf16> to vector<1x16x512xbf16>
    tpu.vector_store %arg11[%c0_28, %c0_29, %c0_30], %65 {strides = array<i32>} : memref<1x16x512xbf16, #tpu.memory_space<vmem>>, vector<1x16x512xbf16>,
    return
  }
  func.func @transform_0(%arg0: i32) -> (i32, i32, i32) {
    %c0_i32 = arith.constant 0 : i32
    %c0_i32_0 = arith.constant 0 : i32
    %c0_i32_1 = arith.constant 0 : i32
    return %arg0, %c0_i32, %c0_i32_0 : i32, i32, i32
  }
  func.func @transform_1(%arg0: i32) -> (i32, i32) {
    %c0_i32 = arith.constant 0 : i32
    %c0_i32_0 = arith.constant 0 : i32
    %c0_i32_1 = arith.constant 0 : i32
    return %c0_i32, %c0_i32_0 : i32, i32
  }
  func.func @transform_2(%arg0: i32) -> (i32, i32) {
    %c0_i32 = arith.constant 0 : i32
    %c0_i32_0 = arith.constant 0 : i32
    %c0_i32_1 = arith.constant 0 : i32
    return %c0_i32, %c0_i32_0 : i32, i32
  }
  func.func @transform_3(%arg0: i32) -> (i32, i32) {
    %c0_i32 = arith.constant 0 : i32
    %c0_i32_0 = arith.constant 0 : i32
    %c0_i32_1 = arith.constant 0 : i32
    return %c0_i32, %c0_i32_0 : i32, i32
  }
  func.func @transform_4(%arg0: i32) -> (i32, i32) {
    %c0_i32 = arith.constant 0 : i32
    %c0_i32_0 = arith.constant 0 : i32
    %c0_i32_1 = arith.constant 0 : i32
    return %c0_i32, %c0_i32_0 : i32, i32
  }
  func.func @transform_5(%arg0: i32) -> (i32, i32) {
    %c0_i32 = arith.constant 0 : i32
    %c0_i32_0 = arith.constant 0 : i32
    %c0_i32_1 = arith.constant 0 : i32
    return %c0_i32, %c0_i32_0 : i32, i32
  }
  func.func @transform_6(%arg0: i32) -> (i32, i32) {
    %c0_i32 = arith.constant 0 : i32
    %c0_i32_0 = arith.constant 0 : i32
    %c0_i32_1 = arith.constant 0 : i32
    return %c0_i32, %c0_i32_0 : i32, i32
  }
  func.func @transform_7(%arg0: i32) -> (i32, i32) {
    %c0_i32 = arith.constant 0 : i32
    %c0_i32_0 = arith.constant 0 : i32
    %c0_i32_1 = arith.constant 0 : i32
    return %c0_i32, %c0_i32_0 : i32, i32
  }
  func.func @transform_8(%arg0: i32) -> (i32, i32) {
    %c0_i32 = arith.constant 0 : i32
    %c0_i32_0 = arith.constant 0 : i32
    %c0_i32_1 = arith.constant 0 : i32
    return %c0_i32, %c0_i32_0 : i32, i32
  }
  func.func @transform_9(%arg0: i32) -> (i32, i32) {
    %c0_i32 = arith.constant 0 : i32
    %c0_i32_0 = arith.constant 0 : i32
    %c0_i32_1 = arith.constant 0 : i32
    return %c0_i32, %c0_i32_0 : i32, i32
  }
  func.func @transform_10(%arg0: i32) -> (i32, i32, i32) {
    %c0_i32 = arith.constant 0 : i32
    %c0_i32_0 = arith.constant 0 : i32
    %c0_i32_1 = arith.constant 0 : i32
    return %arg0, %c0_i32, %c0_i32_0 : i32, i32, i32
  }
}

module attributes {stable_mosaic.version = 11 : i64} {
  func.func @_spatial_mean_kernel(%arg0: i32, %arg1: memref<2x16x512xbf16, #tpu.memory_space<vmem>>, %arg2: memref<2x512xf32, #tpu.memory_space<vmem>>) attributes {dimension_semantics = [#tpu.dimension_semantics<arbitrary>], iteration_bounds = array<i64: 1>, scalar_prefetch = 0 : i64, scratch_operands = 0 : i64, tpu.core_type = #tpu.core_type<tc>, window_params = [{pipeline_mode = #tpu.pipeline_mode<synchronous>, transform_indices = @transform_0, window_bounds = array<i64: 2, 16, 512>}, {pipeline_mode = #tpu.pipeline_mode<synchronous>, transform_indices = @transform_1, window_bounds = array<i64: 2, 512>}]} {
    %c0 = arith.constant 0 : index
    %c0_0 = arith.constant 0 : index
    %c0_1 = arith.constant 0 : index
    %0 = vector.load %arg1[%c0, %c0_0, %c0_1] : memref<2x16x512xbf16, #tpu.memory_space<vmem>>, vector<2x16x512xbf16>
    %1 = arith.extf %0 : vector<2x16x512xbf16> to vector<2x16x512xf32>
    %cst = arith.constant dense<0.000000e+00> : vector<2x512xf32>
    %2 = vector.multi_reduction <add>, %1, %cst [1] : vector<2x16x512xf32> to vector<2x512xf32>
    %cst_2 = arith.constant 1.600000e+01 : f32
    %3 = vector.broadcast %cst_2 : f32 to vector<2x512xf32>
    %4 = arith.divf %2, %3 : vector<2x512xf32>
    %c0_3 = arith.constant 0 : index
    %c0_4 = arith.constant 0 : index
    %5 = vector.load %arg2[%c0_3, %c0_4] : memref<2x512xf32, #tpu.memory_space<vmem>>, vector<2x512xf32>
    tpu.vector_store %arg2[%c0_3, %c0_4], %4 {strides = array<i32>} : memref<2x512xf32, #tpu.memory_space<vmem>>, vector<2x512xf32>,
    return
  }
  func.func @transform_0(%arg0: i32) -> (i32, i32, i32) {
    %c0_i32 = arith.constant 0 : i32
    %c0_i32_0 = arith.constant 0 : i32
    %c0_i32_1 = arith.constant 0 : i32
    %c0_i32_2 = arith.constant 0 : i32
    return %c0_i32, %c0_i32_0, %c0_i32_1 : i32, i32, i32
  }
  func.func @transform_1(%arg0: i32) -> (i32, i32) {
    %c0_i32 = arith.constant 0 : i32
    %c0_i32_0 = arith.constant 0 : i32
    %c0_i32_1 = arith.constant 0 : i32
    return %c0_i32, %c0_i32_0 : i32, i32
  }
}

module attributes {stable_mosaic.version = 11 : i64} {
  func.func @kernel(%arg0: i32, %arg1: i32, %arg2: i32, %arg3: memref<16x512xbf16, #tpu.memory_space<vmem>>, %arg4: memref<512x128xbf16, #tpu.memory_space<vmem>>, %arg5: memref<1x128xf32, #tpu.memory_space<vmem>>, %arg6: memref<16x128xf32, #tpu.memory_space<vmem>>, %arg7: memref<16x128xf32, #tpu.memory_space<vmem>>) attributes {dimension_semantics = [#tpu.dimension_semantics<parallel>, #tpu.dimension_semantics<parallel>, #tpu.dimension_semantics<arbitrary>], iteration_bounds = array<i64: 1, 1, 1>, scalar_prefetch = 0 : i64, scratch_operands = 1 : i64, tpu.core_type = #tpu.core_type<tc>, window_params = [{transform_indices = @transform_0, window_bounds = array<i64: 16, 512>}, {transform_indices = @transform_1, window_bounds = array<i64: 512, 128>}, {transform_indices = @transform_2, window_bounds = array<i64: 1, 128>}, {transform_indices = @transform_3, window_bounds = array<i64: 16, 128>}]} {
    %c0_i32 = arith.constant 0 : i32
    %0 = arith.cmpi eq, %arg2, %c0_i32 : i32
    %1 = arith.extui %0 : i1 to i32
    %c0_i32_0 = arith.constant 0 : i32
    %2 = arith.cmpi ne, %1, %c0_i32_0 : i32
    scf.if %2 {
      %cst_10 = arith.constant 0.000000e+00 : f32
      %12 = vector.broadcast %cst_10 : f32 to vector<16x128xf32>
      %c0_11 = arith.constant 0 : index
      %c0_12 = arith.constant 0 : index
      %13 = vector.load %arg7[%c0_11, %c0_12] : memref<16x128xf32, #tpu.memory_space<vmem>>, vector<16x128xf32>
      tpu.vector_store %arg7[%c0_11, %c0_12], %12 {strides = array<i32>} : memref<16x128xf32, #tpu.memory_space<vmem>>, vector<16x128xf32>,
    } else {
    }
    %c0 = arith.constant 0 : index
    %c0_1 = arith.constant 0 : index
    %3 = vector.load %arg7[%c0, %c0_1] : memref<16x128xf32, #tpu.memory_space<vmem>>, vector<16x128xf32>
    %c0_2 = arith.constant 0 : index
    %c0_3 = arith.constant 0 : index
    %4 = vector.load %arg3[%c0_2, %c0_3] : memref<16x512xbf16, #tpu.memory_space<vmem>>, vector<16x512xbf16>
    %c0_4 = arith.constant 0 : index
    %c0_5 = arith.constant 0 : index
    %5 = vector.load %arg4[%c0_4, %c0_5] : memref<512x128xbf16, #tpu.memory_space<vmem>>, vector<512x128xbf16>
    %cst = arith.constant dense<0.000000e+00> : vector<16x128xf32>
    %6 = tpu.matmul %4, %5, %cst {dimension_numbers = #tpu.dot_dimension_numbers<[1], [0], [0], [1], [0, 0, 1, 1], [], []>} : vector<16x512xbf16>, vector<512x128xbf16>, vector<16x128xf32> -> vector<16x128xf32>
    %7 = arith.addf %3, %6 : vector<16x128xf32>
    %c0_6 = arith.constant 0 : index
    %c0_7 = arith.constant 0 : index
    %8 = vector.load %arg7[%c0_6, %c0_7] : memref<16x128xf32, #tpu.memory_space<vmem>>, vector<16x128xf32>
    tpu.vector_store %arg7[%c0_6, %c0_7], %7 {strides = array<i32>} : memref<16x128xf32, #tpu.memory_space<vmem>>, vector<16x128xf32>,
    %c0_i32_8 = arith.constant 0 : i32
    %9 = arith.cmpi eq, %arg2, %c0_i32_8 : i32
    %10 = arith.extui %9 : i1 to i32
    %c0_i32_9 = arith.constant 0 : i32
    %11 = arith.cmpi ne, %10, %c0_i32_9 : i32
    scf.if %11 {
      %c0_10 = arith.constant 0 : index
      %c0_11 = arith.constant 0 : index
      %12 = vector.load %arg7[%c0_10, %c0_11] : memref<16x128xf32, #tpu.memory_space<vmem>>, vector<16x128xf32>
      %c0_12 = arith.constant 0 : index
      %c0_13 = arith.constant 0 : index
      %13 = vector.load %arg5[%c0_12, %c0_13] : memref<1x128xf32, #tpu.memory_space<vmem>>, vector<1x128xf32>
      %14 = vector.broadcast %13 : vector<1x128xf32> to vector<16x128xf32>
      %15 = arith.addf %12, %14 : vector<16x128xf32>
      %c0_14 = arith.constant 0 : index
      %c0_15 = arith.constant 0 : index
      %16 = vector.load %arg6[%c0_14, %c0_15] : memref<16x128xf32, #tpu.memory_space<vmem>>, vector<16x128xf32>
      tpu.vector_store %arg6[%c0_14, %c0_15], %15 {strides = array<i32>} : memref<16x128xf32, #tpu.memory_space<vmem>>, vector<16x128xf32>,
    } else {
    }
    return
  }
  func.func @transform_0(%arg0: i32, %arg1: i32, %arg2: i32) -> (i32, i32) {
    %c0_i32 = arith.constant 0 : i32
    return %arg0, %arg2 : i32, i32
  }
  func.func @transform_1(%arg0: i32, %arg1: i32, %arg2: i32) -> (i32, i32) {
    %c0_i32 = arith.constant 0 : i32
    return %arg2, %arg1 : i32, i32
  }
  func.func @transform_2(%arg0: i32, %arg1: i32, %arg2: i32) -> (i32, i32) {
    %c0_i32 = arith.constant 0 : i32
    %c0_i32_0 = arith.constant 0 : i32
    return %c0_i32, %arg1 : i32, i32
  }
  func.func @transform_3(%arg0: i32, %arg1: i32, %arg2: i32) -> (i32, i32) {
    %c0_i32 = arith.constant 0 : i32
    return %arg0, %arg1 : i32, i32
  }
}

</mosaic_0001>

<bundles_post_ra>
// kernel: resnet50_base_forward.14
= control target key start
LH: loop header
LB: loop body
LE: loop exit
PB: predicated region body
PF: predicated region fallthrough
CT: control target
= control target key end

     0   :  { %s1307_s15 = smov 0   ;;  %s1309_s16 = smov 0   ;;  %s1462_s0 = inlined_call_operand.vmem [shape: bf16[512,256], index: 0, kind: input, shape index: {}]   ;;  %s1463_s1 = inlined_call_operand.vmem [shape: bf16[256,128], index: 1, kind: input, shape index: {}]   ;;  %s1464_s2 = inlined_call_operand.vmem [shape: f32[1,128], index: 2, kind: input, shape index: {}]   ;;  %s1465_s3 = inlined_call_operand.vmem [shape: f32[1,128], index: 3, kind: input, shape index: {}]   ;;  %s1466_s4 = inlined_call_operand.vmem [shape: bf16[512,128], index: 4, kind: output, shape index: {}]  }
   0x1   :  { %s1311_s17 = smov 0  }
   0x2 LB: > { %s33_s18 = sadd.s32 1, %s1276_s16  ;;  %p992_p0 = scmp.ge.s32.totalorder %s1280_s17, 1  ;;  %s1280_s17 = sphi %s1311_s17, %s14_s17   ;;  %s1276_s16 = sphi %s1309_s16, %s1468_s16   ;;  %s1272_s15 = sphi %s1307_s15, %s1467_s15  }
   0x3   : > { %p35_p1 = scmp.ge.s32.totalorder %s33_s18, 4  ;;  %p224_p2 = scmp.lt.s32.totalorder %s1280_s17, 5 }
   0x5   : > { %s1470_s18 = smov (%p35_p1, %s33_s18), 0  ;;  %p225_p3 = pnand %p992_p0, %p224_p2 }
   0x6   : > { %s993_s21 = sshll.u32 (!%p225_p3), %s1272_s15, 4 }
   0x7   : > { %228 = sbr.rel (%p225_p3) target bundleno = 279 (0x117), region = 36  ;;  %p274_p4 = scmp.lt.s32.totalorder (!%p225_p3), %s993_s21, 63 }
   0xc   : > { %v1218_v0 = vld [vmem:[%s1463_s1 + $0x78] sm:$0xff]   ;;  %v1220_v2 = vld [vmem:[%s1463_s1 + $0x70] sm:$0xff]   ;;  %v1222_v4 = vld [vmem:[%s1463_s1 + $0x68] sm:$0xff]   ;;  %s1472_s21 = smov (!%p274_p4, %s993_s21), 63 }
   0xd   : > { %v1219_v1 = vld [vmem:[%s1463_s1 + $0x38] sm:$0xff]   ;;  %1114 = vmatprep.subr.bf16.mxu0 %v1218_v0  ;;  %1178 = vmatprep.subr.bf16.mxu1 %v1218_v0  ;;  %v1221_v3 = vld [vmem:[%s1463_s1 + $0x30] sm:$0xff]   ;;  %v1223_v5 = vld [vmem:[%s1463_s1 + $0x28] sm:$0xff]   ;;  %s1050_s10 = sshll.u32 %s1472_s21, 3  ;;  %s997_s12 = sshll.u32 %s1472_s21, 2 }
   0xe   : > { %1115 = vmatpush3.bf16.msra.mxu0 %v1219_v1  ;;  %1186 = vmatpush3.bf16.msra.mxu1 %v1219_v1  ;;  %v1224_v6 = vld [vmem:[%s1463_s1 + $0x60] sm:$0xff]   ;;  %v1226_v8 = vld [vmem:[%s1463_s1 + $0x58] sm:$0xff]   ;;  %s1358_s15 = scalar_lea.vmem %s1462_s0, %s1050_s10  ;;  %v1228_v10 = vld [vmem:[%s1463_s1 + $0x50] sm:$0xff]  }
   0xf   : > { %1116 = vmatprep.subr.bf16.mxu0 %v1220_v2  ;;  %1179 = vmatprep.subr.bf16.mxu1 %v1220_v2  ;;  %v1225_v7 = vld [vmem:[%s1463_s1 + $0x20] sm:$0xff]   ;;  %v1227_v9 = vld [vmem:[%s1463_s1 + $0x18] sm:$0xff]   ;;  %v1229_v13 = vld [vmem:[%s1463_s1 + $0x10] sm:$0xff]  }
  0x10   : > { %v1236_v11 = vld [vmem:[%s1358_s15 + $0x4] ss:$8 sps:$4 sm:$0xff]   ;;  %v1234_v18 = vld [vmem:[%s1358_s15] ss:$8 sps:$4 sm:$0xff]   ;;  %v1240_v20 = vld [vmem:[%s1358_s15 + $0x14] ss:$8 sps:$4 sm:$0xff]  }
  0x11   : > { %v1239_v12 = vld [vmem:[%s1358_s15 + $0x44] ss:$8 sps:$4 sm:$0xff]   ;;  %601 = vmatprep.mubr.bf16.mxu0 %v1236_v11  ;;  %v1237_v19 = vld [vmem:[%s1358_s15 + $0x40] ss:$8 sps:$4 sm:$0xff]   ;;  %v1242_v21 = vld [vmem:[%s1358_s15 + $0x54] ss:$8 sps:$4 sm:$0xff]  }
  0x12   : > { %1117 = vmatpush3.bf16.msra.mxu0 %v1221_v3  ;;  %1187 = vmatpush3.bf16.msra.mxu1 %v1221_v3  ;;  %v1230_v14 = vld [vmem:[%s1463_s1 + $0x48] sm:$0xff]   ;;  %v1232_v16 = vld [vmem:[%s1463_s1 + $0x40] sm:$0xff]   ;;  %v1244_v22 = vld [vmem:[%s1358_s15 + $0x10] ss:$8 sps:$4 sm:$0xff]  }
  0x13   : > { %1118 = vmatprep.subr.bf16.mxu0 %v1222_v4  ;;  %1180 = vmatprep.subr.bf16.mxu1 %v1222_v4  ;;  %v1231_v15 = vld [vmem:[%s1463_s1 + $0x8] sm:$0xff]   ;;  %v1233_v17 = vld [vmem:[%s1463_s1] sm:$0xff]   ;;  %v1245_v23 = vld [vmem:[%s1358_s15 + $0x50] ss:$8 sps:$4 sm:$0xff]  }
  0x14   : > { %633 = vmatprep.mubr.bf16.mxu1 %v1239_v12  ;;  %v1246_v24 = vld [vmem:[%s1358_s15 + $0x24] ss:$8 sps:$4 sm:$0xff]   ;;  %v1250_v26 = vld [vmem:[%s1358_s15 + $0x20] ss:$8 sps:$4 sm:$0xff]   ;;  %v1252_v28 = vld [vmem:[%s1358_s15 + $0x34] ss:$8 sps:$4 sm:$0xff]  }
  0x15   : > { %v1248_v25 = vld [vmem:[%s1358_s15 + $0x64] ss:$8 sps:$4 sm:$0xff]   ;;  %v1251_v27 = vld [vmem:[%s1358_s15 + $0x60] ss:$8 sps:$4 sm:$0xff]   ;;  %v1254_v29 = vld [vmem:[%s1358_s15 + $0x74] ss:$8 sps:$4 sm:$0xff]  }
  0x16   : > { %1119 = vmatpush3.bf16.msra.mxu0 %v1223_v5  ;;  %1188 = vmatpush3.bf16.msra.mxu1 %v1223_v5  ;;  %v1256_v30 = vld [vmem:[%s1358_s15 + $0x30] ss:$8 sps:$4 sm:$0xff]   ;;  %v1400_v35 = vld [vmem:[%s1464_s2] ss:$0 sm:$0xff] }
  0x17   : > { %1120 = vmatprep.subr.bf16.mxu0 %v1224_v6  ;;  %1181 = vmatprep.subr.bf16.mxu1 %v1224_v6  ;;  %v1257_v31 = vld [vmem:[%s1358_s15 + $0x70] ss:$8 sps:$4 sm:$0xff]   ;;  %v1407_v43 = vld [vmem:[%s1465_s3] ss:$0 sm:$0xff]  ;;  %s1419_s15 = scalar_lea.vmem %s1466_s4, %s997_s12 }
  0x1a   : > { %1121 = vmatpush3.bf16.msra.mxu0 %v1225_v7  ;;  %1189 = vmatpush3.bf16.msra.mxu1 %v1225_v7 }
  0x1b   : > { %1122 = vmatprep.subr.bf16.mxu0 %v1226_v8  ;;  %1182 = vmatprep.subr.bf16.mxu1 %v1226_v8 }
  0x1e   : > { %1123 = vmatpush3.bf16.msra.mxu0 %v1227_v9  ;;  %1190 = vmatpush3.bf16.msra.mxu1 %v1227_v9 }
  0x1f   : > { %1124 = vmatprep.subr.bf16.mxu0 %v1228_v10  ;;  %1183 = vmatprep.subr.bf16.mxu1 %v1228_v10 }
  0x22   : > { %1125 = vmatpush3.bf16.msra.mxu0 %v1229_v13  ;;  %1191 = vmatpush3.bf16.msra.mxu1 %v1229_v13 }
  0x23   : > { %1126 = vmatprep.subr.bf16.mxu0 %v1230_v14  ;;  %1184 = vmatprep.subr.bf16.mxu1 %v1230_v14 }
  0x26   : > { %1127 = vmatpush3.bf16.msra.mxu0 %v1231_v15  ;;  %1192 = vmatpush3.bf16.msra.mxu1 %v1231_v15 }
  0x27   : > { %1128 = vmatprep.subr.bf16.mxu0 %v1232_v16  ;;  %1185 = vmatprep.subr.bf16.mxu1 %v1232_v16 }
  0x2a   : > { %1129 = vmatpush3.bf16.msra.mxu0 %v1233_v17  ;;  %1193 = vmatpush3.bf16.msra.mxu1 %v1233_v17 }
  0x2d   : > { %602 = vmatmul.mubr.bf16.vlgmr.msra.gmra.mxu0 %v1234_v18  ;;  %634 = vmatmul.mubr.bf16.vlgmr.msra.gmra.mxu1 %v1237_v19 }
  0x2e   : > { %609 = vmatprep.mubr.bf16.mxu0 %v1240_v20  ;;  %641 = vmatprep.mubr.bf16.mxu1 %v1242_v21 }
  0x35   : > { %610 = vmatmul.mubr.bf16.gmra.mxu0 %v1244_v22  ;;  %642 = vmatmul.mubr.bf16.gmra.mxu1 %v1245_v23 }
  0x36   : > { %617 = vmatprep.mubr.bf16.mxu0 %v1246_v24  ;;  %649 = vmatprep.mubr.bf16.mxu1 %v1248_v25 }
  0x3d   : > { %618 = vmatmul.mubr.bf16.gmra.mxu0 %v1250_v26  ;;  %650 = vmatmul.mubr.bf16.gmra.mxu1 %v1251_v27 }
  0x3e   : > { %625 = vmatprep.mubr.bf16.mxu0 %v1252_v28  ;;  %657 = vmatprep.mubr.bf16.mxu1 %v1254_v29 }
  0x45   : > { %626 = vmatmul.mubr.bf16.gmra.mxu0 %v1256_v30  ;;  %658 = vmatmul.mubr.bf16.gmra.mxu1 %v1257_v31 }
  0xed   : > { %v1130_v32 = vpop.f32.mrf.mxu0  ;;  %v1154_v33 = vpop.f32.mrf.mxu1 }
  0xef   : > { %v1131_v34 = vpop.f32.mrf.mxu0  ;;  %v1155_v36 = vpop.f32.mrf.mxu1 }
  0xf0   : > { %v1132_v37 = vadd.f32 %v1131_v34, %v1130_v32  ;;  %v1156_v38 = vadd.f32 %v1155_v36, %v1154_v33 }
  0xf1   : > { %v1133_v39 = vpop.f32.mrf.mxu0  ;;  %v1157_v40 = vpop.f32.mrf.mxu1 }
  0xf2   : > { %v724_v41 = vmul.f32 %v1132_v37, %v1400_v35  ;;  %v732_v42 = vmul.f32 %v1156_v38, %v1400_v35 }
  0xf3   : > { %v1134_v44 = vpop.f32.mrf.mxu0  ;;  %v1158_v45 = vpop.f32.mrf.mxu1 }
  0xf4   : > { %v1135_v46 = vadd.f32 %v1134_v44, %v1133_v39  ;;  %v1159_v47 = vadd.f32 %v1158_v45, %v1157_v40  ;;  %v747_v50 = vadd.f32 %v1407_v43, %v724_v41  ;;  %v755_v51 = vadd.f32 %v1407_v43, %v732_v42 }
  0xf5   : > { %v1136_v48 = vpop.f32.mrf.mxu0  ;;  %v1160_v49 = vpop.f32.mrf.mxu1 }
  0xf6   : > { %v725_v52 = vmul.f32 %v1135_v46, %v1400_v35  ;;  %v733_v53 = vmul.f32 %v1159_v47, %v1400_v35  ;;  %v763_v62 = vmax.f32 %v747_v50, 0.0  ;;  %v771_v63 = vmax.f32 %v755_v51, 0.0 }
  0xf7   : > { %v1137_v54 = vpop.f32.mrf.mxu0  ;;  %v1161_v55 = vpop.f32.mrf.mxu1 }
  0xf8   : > { %v748_v56 = vadd.f32 %v1407_v43, %v725_v52  ;;  %v756_v57 = vadd.f32 %v1407_v43, %v733_v53  ;;  %v1138_v58 = vadd.f32 %v1137_v54, %v1136_v48  ;;  %v1162_v59 = vadd.f32 %v1161_v55, %v1160_v49 }
  0xf9   : > { %v1139_v60 = vpop.f32.mrf.mxu0  ;;  %v1163_v61 = vpop.f32.mrf.mxu1 }
  0xfa   : > { %v764_v0 = vmax.f32 %v748_v56, 0.0  ;;  %v772_v1 = vmax.f32 %v756_v57, 0.0  ;;  %v726_v2 = vmul.f32 %v1138_v58, %v1400_v35  ;;  %v734_v3 = vmul.f32 %v1162_v59, %v1400_v35 }
  0xfb   : > { %v1140_v4 = vpop.f32.mrf.mxu0  ;;  %v1164_v5 = vpop.f32.mrf.mxu1 }
  0xfc   : > { %v1070_v6 = vpack.c.bf16 %v764_v0, %v763_v62  ;;  %v1090_v7 = vpack.c.bf16 %v772_v1, %v771_v63  ;;  %v1141_v8 = vadd.f32 %v1140_v4, %v1139_v60  ;;  %v1165_v9 = vadd.f32 %v1164_v5, %v1163_v61 }
  0xfd   : > { %v1142_v10 = vpop.f32.mrf.mxu0  ;;  %v1166_v11 = vpop.f32.mrf.mxu1  ;;  %v749_v12 = vadd.f32 %v1407_v43, %v726_v2  ;;  %v757_v13 = vadd.f32 %v1407_v43, %v734_v3 }
  0xfe   : > { %1071 = vst [vmem:[%s1419_s15] sm:$0xff] %v1070_v6   ;;  %1110 = vst [vmem:[%s1419_s15 + $0x20] sm:$0xff] %v1090_v7   ;;  %v727_v14 = vmul.f32 %v1141_v8, %v1400_v35  ;;  %v735_v15 = vmul.f32 %v1165_v9, %v1400_v35 }
  0xff   : > { %v1143_v16 = vpop.f32.mrf.mxu0  ;;  %v1167_v17 = vpop.f32.mrf.mxu1  ;;  %v765_v26 = vmax.f32 %v749_v12, 0.0  ;;  %v773_v27 = vmax.f32 %v757_v13, 0.0 }
 0x100   : > { %v1144_v18 = vadd.f32 %v1143_v16, %v1142_v10  ;;  %v1168_v19 = vadd.f32 %v1167_v17, %v1166_v11  ;;  %v750_v20 = vadd.f32 %v1407_v43, %v727_v14  ;;  %v758_v21 = vadd.f32 %v1407_v43, %v735_v15 }
 0x101   : > { %v1145_v22 = vpop.f32.mrf.mxu0  ;;  %v1169_v23 = vpop.f32.mrf.mxu1 }
 0x102   : > { %v728_v24 = vmul.f32 %v1144_v18, %v1400_v35  ;;  %v736_v25 = vmul.f32 %v1168_v19, %v1400_v35  ;;  %v766_v28 = vmax.f32 %v750_v20, 0.0  ;;  %v774_v29 = vmax.f32 %v758_v21, 0.0 }
 0x103   : > { %v1146_v30 = vpop.f32.mrf.mxu0  ;;  %v1170_v31 = vpop.f32.mrf.mxu1 }
 0x104   : > { %v1147_v32 = vadd.f32 %v1146_v30, %v1145_v22  ;;  %v1171_v33 = vadd.f32 %v1170_v31, %v1169_v23  ;;  %v1075_v34 = vpack.c.bf16 %v766_v28, %v765_v26  ;;  %v1095_v36 = vpack.c.bf16 %v774_v29, %v773_v27 }
 0x105   : > { %v1148_v37 = vpop.f32.mrf.mxu0  ;;  %v1172_v38 = vpop.f32.mrf.mxu1  ;;  %v751_v39 = vadd.f32 %v1407_v43, %v728_v24  ;;  %v759_v40 = vadd.f32 %v1407_v43, %v736_v25 }
 0x106   : > { %v729_v41 = vmul.f32 %v1147_v32, %v1400_v35  ;;  %v737_v42 = vmul.f32 %v1171_v33, %v1400_v35  ;;  %1107 = vst [vmem:[%s1419_s15 + $0x8] sm:$0xff] %v1075_v34   ;;  %1111 = vst [vmem:[%s1419_s15 + $0x28] sm:$0xff] %v1095_v36  }
 0x107   : > { %v1149_v44 = vpop.f32.mrf.mxu0  ;;  %v1173_v45 = vpop.f32.mrf.mxu1  ;;  %v767_v52 = vmax.f32 %v751_v39, 0.0  ;;  %v775_v53 = vmax.f32 %v759_v40, 0.0 }
 0x108   : > { %v752_v46 = vadd.f32 %v1407_v43, %v729_v41  ;;  %v760_v47 = vadd.f32 %v1407_v43, %v737_v42  ;;  %v1150_v48 = vadd.f32 %v1149_v44, %v1148_v37  ;;  %v1174_v49 = vadd.f32 %v1173_v45, %v1172_v38 }
 0x109   : > { %v1151_v50 = vpop.f32.mrf.mxu0  ;;  %v1175_v51 = vpop.f32.mrf.mxu1 }
 0x10a   : > { %v768_v54 = vmax.f32 %v752_v46, 0.0  ;;  %v776_v55 = vmax.f32 %v760_v47, 0.0  ;;  %v730_v56 = vmul.f32 %v1150_v48, %v1400_v35  ;;  %v738_v57 = vmul.f32 %v1174_v49, %v1400_v35 }
 0x10b   : > { %v1152_v58 = vpop.f32.mrf.mxu0  ;;  %v1176_v59 = vpop.f32.mrf.mxu1 }
 0x10c   : > { %v1080_v60 = vpack.c.bf16 %v768_v54, %v767_v52  ;;  %v1100_v61 = vpack.c.bf16 %v776_v55, %v775_v53  ;;  %v1153_v62 = vadd.f32 %v1152_v58, %v1151_v50  ;;  %v1177_v63 = vadd.f32 %v1176_v59, %v1175_v51 }
 0x10d   : > { %v753_v0 = vadd.f32 %v1407_v43, %v730_v56  ;;  %v761_v1 = vadd.f32 %v1407_v43, %v738_v57 }
 0x10e   : > { %1108 = vst [vmem:[%s1419_s15 + $0x10] sm:$0xff] %v1080_v60   ;;  %1112 = vst [vmem:[%s1419_s15 + $0x30] sm:$0xff] %v1100_v61   ;;  %v731_v2 = vmul.f32 %v1153_v62, %v1400_v35  ;;  %v739_v3 = vmul.f32 %v1177_v63, %v1400_v35 }
 0x10f   : > { %v769_v6 = vmax.f32 %v753_v0, 0.0  ;;  %v777_v7 = vmax.f32 %v761_v1, 0.0 }
 0x110   : > { %v754_v4 = vadd.f32 %v1407_v43, %v731_v2  ;;  %v762_v5 = vadd.f32 %v1407_v43, %v739_v3 }
 0x112   : > { %v770_v8 = vmax.f32 %v754_v4, 0.0  ;;  %v778_v9 = vmax.f32 %v762_v5, 0.0 }
 0x114   : > { %v1085_v10 = vpack.c.bf16 %v770_v8, %v769_v6  ;;  %v1105_v11 = vpack.c.bf16 %v778_v9, %v777_v7 }
 0x116   : > { %1109 = vst [vmem:[%s1419_s15 + $0x18] sm:$0xff] %v1085_v10   ;;  %1113 = vst [vmem:[%s1419_s15 + $0x38] sm:$0xff] %v1105_v11  }
 0x117 PF: > { %s14_s17 = sadd.s32 1, %s1280_s17   ;;  %s1467_s15 = smov %s1276_s16 }
 0x118   : > { %p11_p5 = scmp.ge.s32.totalorder %s14_s17, 6   ;;  %s1468_s16 = smov %s1470_s18 }
 0x11a   :  { %13 = sbr.rel (!%p11_p5) target bundleno = 2 (0x2), region = 83 }

// kernel: resnet50_base_forward.15
= control target key start
LH: loop header
LB: loop body
LE: loop exit
PB: predicated region body
PF: predicated region fallthrough
CT: control target
= control target key end

     0   :  { %s813_s15 = smov 0   ;;  %s1132_s0 = inlined_call_operand.vmem [shape: bf16[2,9,9,128], index: 0, kind: input, shape index: {}]   ;;  %s1133_s1 = inlined_call_operand.vmem [shape: bf16[2,9,9,128], index: 1, kind: input, shape index: {}]   ;;  %s1134_s2 = inlined_call_operand.vmem [shape: bf16[2,9,9,128], index: 2, kind: input, shape index: {}]   ;;  %s1135_s3 = inlined_call_operand.vmem [shape: bf16[2,9,9,128], index: 3, kind: input, shape index: {}]   ;;  %s1136_s4 = inlined_call_operand.vmem [shape: bf16[2,8,8,128], index: 4, kind: output, shape index: {}]  }
   0x1 LB: > { %s730_s16 = sadd.s32 4294967295, %s786_s15   ;;  %p734_p0 = scmp.ge.s32.totalorder %s786_s15, 1  ;;  %s786_s15 = sphi %s813_s15, %s14_s15  }
   0x2   : > { %p192_p1 = scmp.lt.s32.totalorder %s786_s15, 3 }
   0x4   : > { %p193_p2 = pnand %p734_p0, %p192_p1 }
   0x5   : > { %p233_p3 = scmp.lt.s32.totalorder (!%p193_p2), %s730_s16, 1 }
   0x6   : > { %196 = sbr.rel (%p193_p2) target bundleno = 83 (0x53), region = 36 }
   0xb   : > { %s1140_s16 = smov (!%p233_p3, %s730_s16), 1  ;;  %vm317_vm0 = vsmask.f32 3328  ;;  %vm318_vm1 = vsmask.f32 7440 }
   0xc   : > { %s824_s17 = smul.u32 72, %s1140_s16  ;;  %vm917_vm2 = vmor %vm317_vm0, %vm318_vm1  ;;  %s743_s30 = sshll.u32 %s1140_s16, 5 }
   0xd   : > { %s257_s7 = scalar_lea.vmem %s1136_s4, %s743_s30 }
   0xe   : > { %s830_s20 = scalar_lea.vmem %s1133_s1, %s824_s17  ;;  %s836_s23 = scalar_lea.vmem %s1132_s0, %s824_s17 }
   0xf   : > { %v839_v0 = vld [vmem:[%s830_s20] sm:$0xf]  ;;  %v842_v1 = vld [vmem:[%s830_s20 + $0x8] sm:$0xf]  ;;  %v259_v3 = vld [vmem:[%s836_s23 + $0x4] sm:$0x1]  ;;  %s944_s26 = scalar_lea.vmem %s1134_s2, %s824_s17  ;;  %s955_s29 = scalar_lea.vmem %s1135_s3, %s824_s17 }
  0x10   : > { %v845_v2 = vld [vmem:[%s836_s23] sm:$0xf]  ;;  %v849_v4 = vld [vmem:[%s836_s23 + $0x8] sm:$0xf]  ;;  %v852_v5 = vld [vmem:[%s830_s20 + $0x10] sm:$0xf] }
  0x11   : > { %v855_v6 = vld [vmem:[%s830_s20 + $0x18] sm:$0xf]  ;;  %v858_v7 = vld [vmem:[%s830_s20 + $0x20] sm:$0xf]  ;;  %v261_v8 = vld [vmem:[%s836_s23 + $0xc] sm:$0x1]  ;;  %v309_v18 = vmax.bf16 %v839_v0, %v845_v2  ;;  %v310_v19 = vmax.bf16 %v842_v1, %v849_v4 }
  0x12   : > { %v862_v9 = vld [vmem:[%s830_s20 + $0x28] sm:$0xf]  ;;  %v865_v10 = vld [vmem:[%s830_s20 + $0x30] sm:$0xf]  ;;  %v868_v11 = vld [vmem:[%s830_s20 + $0x38] sm:$0xf] }
  0x13   : > { %v871_v12 = vld [vmem:[%s836_s23 + $0x10] sm:$0xf]  ;;  %v874_v13 = vld [vmem:[%s836_s23 + $0x18] sm:$0xf]  ;;  %v877_v14 = vld [vmem:[%s836_s23 + $0x20] sm:$0xf] }
  0x14   : > { %v880_v15 = vld [vmem:[%s836_s23 + $0x28] sm:$0xf]  ;;  %v883_v16 = vld [vmem:[%s836_s23 + $0x30] sm:$0xf]  ;;  %v886_v17 = vld [vmem:[%s836_s23 + $0x38] sm:$0xf]  ;;  %v311_v20 = vmax.bf16 %v852_v5, %v871_v12  ;;  %v312_v21 = vmax.bf16 %v855_v6, %v874_v13  ;;  %v313_v22 = vmax.bf16 %v858_v7, %v877_v14 }
  0x15   : > { %v314_v23 = vmax.bf16 %v862_v9, %v880_v15  ;;  %v315_v24 = vmax.bf16 %v865_v10, %v883_v16  ;;  %v316_v25 = vmax.bf16 %v868_v11, %v886_v17  ;;  %v321_v26 = vshrl.u32 %v845_v2, 16  ;;  %v263_v30 = vld [vmem:[%s836_s23 + $0x14] sm:$0x1]  ;;  %v265_v35 = vld [vmem:[%s836_s23 + $0x1c] sm:$0x1] }
  0x16   : > { %v324_v27 = vshll.u32 %v845_v2, 16  ;;  %v330_v28 = vshll.u32 %v259_v3, 16  ;;  %v335_v29 = vshrl.u32 %v849_v4, 16  ;;  %v338_v31 = vshll.u32 %v849_v4, 16  ;;  %v267_v48 = vld [vmem:[%s836_s23 + $0x24] sm:$0x1] }
  0x17   : > { %v344_v32 = vshll.u32 %v261_v8, 16  ;;  %v349_v33 = vshrl.u32 %v871_v12, 16  ;;  %v352_v34 = vshll.u32 %v871_v12, 16  ;;  %v323_v36 = vrot.slane %v321_v26, 4  ;;  %v269_v58 = vld [vmem:[%s836_s23 + $0x2c] sm:$0x1] }
  0x18   : > { %v326_v37 = vrot.slane %v324_v27, 5  ;;  %v332_v38 = vrot.slane %v330_v28, 5  ;;  %v337_v39 = vrot.slane %v335_v29, 4  ;;  %v340_v40 = vrot.slane %v338_v31, 5  ;;  %v271_v27 = vld [vmem:[%s836_s23 + $0x34] sm:$0x1] }
  0x19   : > { %v346_v41 = vrot.slane %v344_v32, 5  ;;  %v351_v42 = vrot.slane %v349_v33, 4  ;;  %v354_v43 = vrot.slane %v352_v34, 5  ;;  %v358_v45 = vshll.u32 %v263_v30, 16  ;;  %v978_v2 = vld [vmem:[%s944_s26 + $0x20] sm:$0xf] }
  0x1a   : > { %v327_v44 = vor.u32 %v326_v37, %v323_v36  ;;  %v363_v46 = vshrl.u32 %v874_v13, 16  ;;  %v366_v47 = vshll.u32 %v874_v13, 16  ;;  %v341_v50 = vor.u32 %v340_v40, %v337_v39  ;;  %v273_v36 = vld [vmem:[%s836_s23 + $0x3c] sm:$0x1] }
  0x1b   : > { %v355_v51 = vor.u32 %v354_v43, %v351_v42  ;;  %v372_v52 = vshll.u32 %v265_v35, 16  ;;  %v377_v53 = vshrl.u32 %v877_v14, 16  ;;  %v360_v55 = vrot.slane %v358_v45, 5 }
  0x1c   : > { %v328_v54 = vrot.slane %v327_v44, 4  ;;  %v365_v56 = vrot.slane %v363_v46, 4  ;;  %v368_v57 = vrot.slane %v366_v47, 5  ;;  %v342_v59 = vrot.slane %v341_v50, 4 }
  0x1d   : > { %v356_v60 = vrot.slane %v355_v51, 4  ;;  %v374_v61 = vrot.slane %v372_v52, 5  ;;  %v379_v62 = vrot.slane %v377_v53, 4  ;;  %v380_v8 = vshll.u32 %v877_v14, 16 }
  0x1e   : > { %v333_v63 = vsel %vm917_vm2, %v328_v54, %v332_v38  ;;  %v369_v3 = vor.u32 %v368_v57, %v365_v56  ;;  %v386_v26 = vshll.u32 %v267_v48, 16  ;;  %v929_v28 = vsel %vm917_vm2, %v342_v59, %v346_v41  ;;  %v285_v54 = vld [vmem:[%s944_s26] sm:$0xf]  ;;  %v287_v59 = vld [vmem:[%s944_s26 + $0x8] sm:$0xf] }
  0x1f   : > { %v933_v29 = vsel %vm917_vm2, %v356_v60, %v360_v55  ;;  %v391_v30 = vshrl.u32 %v880_v15, 16  ;;  %v394_v31 = vshll.u32 %v880_v15, 16  ;;  %v382_v33 = vrot.slane %v380_v8, 5  ;;  %v964_v60 = vld [vmem:[%s944_s26 + $0x10] sm:$0xf] }
  0x20   : > { %v370_v32 = vrot.slane %v369_v3, 4  ;;  %v388_v34 = vrot.slane %v386_v26, 5  ;;  %v400_v35 = vshll.u32 %v269_v58, 16  ;;  %v405_v39 = vshrl.u32 %v883_v16, 16 }
  0x21   : > { %v393_v37 = vrot.slane %v391_v30, 4  ;;  %v396_v38 = vrot.slane %v394_v31, 5  ;;  %v408_v40 = vshll.u32 %v883_v16, 16  ;;  %v383_v42 = vor.u32 %v382_v33, %v379_v62  ;;  %v302_v30 = vld [vmem:[%s955_s29 + $0x8] sm:$0xf] }
  0x22   : > { %v948_v41 = vsel %vm917_vm2, %v370_v32, %v374_v61  ;;  %v402_v43 = vrot.slane %v400_v35, 5  ;;  %v414_v44 = vshll.u32 %v271_v27, 16  ;;  %v407_v46 = vrot.slane %v405_v39, 4  ;;  %v967_v61 = vld [vmem:[%s944_s26 + $0x18] sm:$0xf] }
  0x23   : > { %v397_v45 = vor.u32 %v396_v38, %v393_v37  ;;  %v410_v47 = vrot.slane %v408_v40, 5  ;;  %v419_v48 = vshrl.u32 %v886_v17, 16  ;;  %v384_v50 = vrot.slane %v383_v42, 4  ;;  %v303_v31 = vld [vmem:[%s955_s29 + $0x10] sm:$0xf] }
  0x24   : > { %v416_v51 = vrot.slane %v414_v44, 5  ;;  %v422_v52 = vshll.u32 %v886_v17, 16  ;;  %v428_v53 = vshll.u32 %v273_v36, 16  ;;  %v440_v58 = vmax.bf16 %v333_v63, %v309_v18  ;;  %v301_v18 = vld [vmem:[%s955_s29] sm:$0xf] }
  0x25   : > { %v398_v55 = vrot.slane %v397_v45, 4  ;;  %v411_v56 = vor.u32 %v410_v47, %v407_v46  ;;  %v421_v57 = vrot.slane %v419_v48, 4  ;;  %v971_v62 = vsel %vm917_vm2, %v384_v50, %v388_v34  ;;  %v304_v32 = vld [vmem:[%s955_s29 + $0x18] sm:$0xf]  ;;  %v1005_v36 = vld [vmem:[%s944_s26 + $0x28] sm:$0xf] }
  0x26   : > { %v424_v3 = vrot.slane %v422_v52, 5  ;;  %v430_v8 = vrot.slane %v428_v53, 5  ;;  %v441_v0 = vmax.bf16 %v929_v28, %v310_v19  ;;  %v442_v27 = vmax.bf16 %v933_v29, %v311_v20  ;;  %v306_v37 = vld [vmem:[%s955_s29 + $0x28] sm:$0xf]  ;;  %v286_v42 = vld [vmem:[%s944_s26 + $0x4] sm:$0x1] }
  0x27   : > { %v983_v63 = vsel %vm917_vm2, %v398_v55, %v402_v43  ;;  %v412_v26 = vrot.slane %v411_v56, 4  ;;  %v443_v19 = vmax.bf16 %v948_v41, %v312_v21  ;;  %v444_v34 = vmax.bf16 %v971_v62, %v313_v22  ;;  %v305_v21 = vld [vmem:[%s955_s29 + $0x20] sm:$0xf]  ;;  %v288_v46 = vld [vmem:[%s944_s26 + $0xc] sm:$0x1] }
  0x28   : > { %v425_v33 = vor.u32 %v424_v3, %v421_v57  ;;  %v445_v20 = vmax.bf16 %v983_v63, %v314_v23  ;;  %v448_v35 = vmax.bf16 %v440_v58, %v285_v54  ;;  %v449_v39 = vmax.bf16 %v441_v0, %v287_v59  ;;  %v1024_v47 = vld [vmem:[%s944_s26 + $0x30] sm:$0xf]  ;;  %v290_v55 = vld [vmem:[%s944_s26 + $0x14] sm:$0x1]  ;;  %v1046_v3 = vld [vmem:[%s944_s26 + $0x38] sm:$0xf] }
  0x29   : > { %v1011_v38 = vsel %vm917_vm2, %v412_v26, %v416_v51  ;;  %v450_v22 = vmax.bf16 %v442_v27, %v964_v60  ;;  %v451_v40 = vmax.bf16 %v443_v19, %v967_v61  ;;  %v452_v44 = vmax.bf16 %v444_v34, %v978_v2  ;;  %v307_v48 = vld [vmem:[%s955_s29 + $0x30] sm:$0xf]  ;;  %v308_v19 = vld [vmem:[%s955_s29 + $0x38] sm:$0xf] }
  0x2a   : > { %v426_v43 = vrot.slane %v425_v33, 4  ;;  %v446_v23 = vmax.bf16 %v1011_v38, %v315_v24  ;;  %v453_v45 = vmax.bf16 %v445_v20, %v1005_v36  ;;  %v1027_v50 = vmax.bf16 %v448_v35, %v301_v18 }
  0x2b   : > { %v1029_v51 = vmax.bf16 %v449_v39, %v302_v30  ;;  %v1031_v52 = vmax.bf16 %v450_v22, %v303_v31  ;;  %v1033_v53 = vmax.bf16 %v451_v40, %v304_v32  ;;  %v1041_v57 = vmax.bf16 %v452_v44, %v305_v21  ;;  %v292_v21 = vld [vmem:[%s944_s26 + $0x1c] sm:$0x1] }
  0x2c   : > { %v1038_v24 = vsel %vm917_vm2, %v426_v43, %v430_v8  ;;  %v454_v56 = vmax.bf16 %v446_v23, %v1024_v47  ;;  %v1043_v58 = vmax.bf16 %v453_v45, %v306_v37  ;;  %v465_v18 = vshrl.u32 %v285_v54, 16 }
  0x2d   : > { %v447_v0 = vmax.bf16 %v1038_v24, %v316_v25  ;;  %v468_v26 = vshll.u32 %v285_v54, 16  ;;  %v474_v27 = vshll.u32 %v286_v42, 16  ;;  %v479_v30 = vshrl.u32 %v287_v59, 16 }
  0x2e   : > { %v1053_v8 = vmax.bf16 %v454_v56, %v307_v48  ;;  %v482_v31 = vshll.u32 %v287_v59, 16  ;;  %v488_v32 = vshll.u32 %v288_v46, 16  ;;  %v467_v34 = vrot.slane %v465_v18, 4  ;;  %v294_v46 = vld [vmem:[%s944_s26 + $0x24] sm:$0x1] }
  0x2f   : > { %v455_v33 = vmax.bf16 %v447_v0, %v1046_v3  ;;  %v470_v20 = vrot.slane %v468_v26, 5  ;;  %v476_v35 = vrot.slane %v474_v27, 5  ;;  %v481_v37 = vrot.slane %v479_v30, 4 }
  0x30   : > { %v484_v39 = vrot.slane %v482_v31, 5  ;;  %v490_v22 = vrot.slane %v488_v32, 5  ;;  %v493_v25 = vshrl.u32 %v964_v60, 16  ;;  %v496_v42 = vshll.u32 %v964_v60, 16  ;;  %v296_v31 = vld [vmem:[%s944_s26 + $0x2c] sm:$0x1] }
  0x31   : > { %v1058_v54 = vmax.bf16 %v455_v33, %v308_v19  ;;  %v471_v40 = vor.u32 %v470_v20, %v467_v34  ;;  %v502_v59 = vshll.u32 %v290_v55, 16  ;;  %v507_v44 = vshrl.u32 %v967_v61, 16 }
  0x32   : > { %v485_v43 = vor.u32 %v484_v39, %v481_v37  ;;  %v495_v23 = vrot.slane %v493_v25, 4  ;;  %v510_v45 = vshll.u32 %v967_v61, 16  ;;  %v498_v56 = vrot.slane %v496_v42, 5  ;;  %v298_v42 = vld [vmem:[%s944_s26 + $0x34] sm:$0x1] }
  0x33   : > { %v472_v48 = vrot.slane %v471_v40, 4  ;;  %v504_v0 = vrot.slane %v502_v59, 5  ;;  %v516_v18 = vshll.u32 %v292_v21, 16  ;;  %v509_v27 = vrot.slane %v507_v44, 4  ;;  %v300_v44 = vld [vmem:[%s944_s26 + $0x3c] sm:$0x1] }
  0x34   : > { %v486_v26 = vrot.slane %v485_v43, 4  ;;  %v512_v19 = vrot.slane %v510_v45, 5  ;;  %v521_v30 = vshrl.u32 %v978_v2, 16  ;;  %v499_v55 = vor.u32 %v498_v56, %v495_v23 }
  0x35   : > { %v477_v60 = vsel %vm917_vm2, %v472_v48, %v476_v35  ;;  %v518_v32 = vrot.slane %v516_v18, 5  ;;  %v524_v61 = vshll.u32 %v978_v2, 16  ;;  %v530_v21 = vshll.u32 %v294_v46, 16 }
  0x36   : > { %v491_v33 = vsel %vm917_vm2, %v486_v26, %v490_v22  ;;  %v513_v34 = vor.u32 %v512_v19, %v509_v27  ;;  %v523_v20 = vrot.slane %v521_v30, 4  ;;  %v500_v37 = vrot.slane %v499_v55, 4 }
  0x37   : > { %v526_v39 = vrot.slane %v524_v61, 5  ;;  %v535_v25 = vshrl.u32 %v1005_v36, 16  ;;  %v538_v40 = vshll.u32 %v1005_v36, 16  ;;  %v532_v35 = vrot.slane %v530_v21, 5 }
  0x38   : > { %v514_v59 = vrot.slane %v513_v34, 4  ;;  %v544_v43 = vshll.u32 %v296_v31, 16  ;;  %v549_v23 = vshrl.u32 %v1024_v47, 16  ;;  %v505_v2 = vsel %vm917_vm2, %v500_v37, %v504_v0 }
  0x39   : > { %v527_v22 = vor.u32 %v526_v39, %v523_v20  ;;  %v537_v45 = vrot.slane %v535_v25, 4  ;;  %v540_v48 = vrot.slane %v538_v40, 5  ;;  %v552_v36 = vshll.u32 %v1024_v47, 16 }
  0x3a   : > { %v519_v46 = vsel %vm917_vm2, %v514_v59, %v518_v32  ;;  %v546_v56 = vrot.slane %v544_v43, 5  ;;  %v551_v18 = vrot.slane %v549_v23, 4  ;;  %v558_v19 = vshll.u32 %v298_v42, 16  ;;  %v274_v23 = vld [vmem:[%s836_s23 + $0x40] sm:$0xf] }
  0x3b   : > { %v528_v26 = vrot.slane %v527_v22, 4  ;;  %v541_v27 = vor.u32 %v540_v48, %v537_v45  ;;  %v563_v30 = vshrl.u32 %v1046_v3, 16  ;;  %v554_v31 = vrot.slane %v552_v36, 5 }
  0x3c   : > { %v566_v55 = vshll.u32 %v1046_v3, 16  ;;  %v572_v61 = vshll.u32 %v300_v44, 16  ;;  %v584_v0 = vmax.bf16 %v477_v60, %v1027_v50  ;;  %v560_v20 = vrot.slane %v558_v19, 5 }
  0x3d   : > { %v533_v34 = vsel %vm917_vm2, %v528_v26, %v532_v35  ;;  %v542_v32 = vrot.slane %v541_v27, 4  ;;  %v565_v21 = vrot.slane %v563_v30, 4  ;;  %v555_v37 = vor.u32 %v554_v31, %v551_v18 }
  0x3e   : > { %v568_v47 = vrot.slane %v566_v55, 5  ;;  %v574_v39 = vrot.slane %v572_v61, 5  ;;  %v585_v25 = vmax.bf16 %v491_v33, %v1029_v51  ;;  %v586_v3 = vmax.bf16 %v505_v2, %v1031_v52  ;;  %v275_v2 = vld [vmem:[%s836_s23 + $0x44] sm:$0x1] }
  0x3f   : > { %v547_v40 = vsel %vm917_vm2, %v542_v32, %v546_v56  ;;  %v587_v50 = vmax.bf16 %v519_v46, %v1033_v53  ;;  %v588_v60 = vmax.bf16 %v533_v34, %v1041_v57  ;;  %v556_v42 = vrot.slane %v555_v37, 4 }
  0x40   : > { %v569_v59 = vor.u32 %v568_v47, %v565_v21  ;;  %v589_v35 = vmax.bf16 %v547_v40, %v1043_v58  ;;  %v592_v43 = vmax.bf16 %v584_v0, %v849_v4  ;;  %v593_v44 = vmax.bf16 %v585_v25, %v871_v12 }
  0x41   : > { %v594_v51 = vmax.bf16 %v586_v3, %v874_v13  ;;  %v595_v33 = vmax.bf16 %v587_v50, %v877_v14  ;;  %v596_v52 = vmax.bf16 %v588_v60, %v880_v15  ;;  %v561_v53 = vsel %vm917_vm2, %v556_v42, %v560_v20 }
  0x42   : > { %v570_v57 = vrot.slane %v569_v59, 4  ;;  %v597_v22 = vmax.bf16 %v589_v35, %v883_v16  ;;  %v600_v58 = vmax.bf16 %v592_v43, %v842_v1  ;;  %v590_v4 = vmax.bf16 %v561_v53, %v1053_v8 }
  0x43   : > { %v601_v45 = vmax.bf16 %v593_v44, %v852_v5  ;;  %v602_v12 = vmax.bf16 %v594_v51, %v855_v6  ;;  %v603_v13 = vmax.bf16 %v595_v33, %v858_v7  ;;  %v604_v15 = vmax.bf16 %v596_v52, %v862_v9  ;;  %v284_v9 = vld [vmem:[%s830_s20 + $0x40] sm:$0xf] }
  0x44   : > { %v575_v14 = vsel %vm917_vm2, %v570_v57, %v574_v39  ;;  %v605_v48 = vmax.bf16 %v597_v22, %v865_v10  ;;  %v609_v16 = vshrl.u32 %v274_v23, 16  ;;  %v598_v8 = vmax.bf16 %v590_v4, %v886_v17 }
  0x45   : > { %v591_v1 = vmax.bf16 %v575_v14, %v1058_v54  ;;  %v612_v46 = vshll.u32 %v274_v23, 16  ;;  %v618_v5 = vshll.u32 %v275_v2, 16  ;;  %v623_v6 = vmax.bf16 %v600_v58, %v929_v28 }
  0x46   : > { %v611_v56 = vrot.slane %v609_v16, 4  ;;  %v624_v7 = vmax.bf16 %v601_v45, %v933_v29  ;;  %v625_v18 = vmax.bf16 %v602_v12, %v948_v41  ;;  %v606_v36 = vmax.bf16 %v598_v8, %v868_v11 }
  0x47   : > { %v599_v10 = vmax.bf16 %v591_v1, %v274_v23  ;;  %v614_v54 = vrot.slane %v612_v46, 5  ;;  %v626_v17 = vmax.bf16 %v603_v13, %v971_v62  ;;  %v627_v26 = vmax.bf16 %v604_v15, %v983_v63 }
  0x48   : > { %v628_v27 = vmax.bf16 %v605_v48, %v1011_v38  ;;  %v764_v28 = vcombine.low %v623_v6, %v624_v7  ;;  %v620_v29 = vrot.slane %v618_v5, 5  ;;  %v629_v61 = vmax.bf16 %v606_v36, %v1038_v24 }
  0x49   : > { %v615_v19 = vor.u32 %v614_v54, %v611_v56  ;;  %v607_v30 = vmax.bf16 %v599_v10, %v284_v9  ;;  %v765_v41 = vcombine.low %v625_v18, %v626_v17 }
  0x4a   : > { %748 = vst [vmem:[%s257_s7] sm:$0xff] %v764_v28   ;;  %v767_v31 = vcombine.low %v627_v26, %v628_v27 }
  0x4b   : > { %v616_v55 = vrot.slane %v615_v19, 4  ;;  %766 = vst [vmem:[%s257_s7 + $0x8] sm:$0xff] %v765_v41  }
  0x4c   : > { %768 = vst [vmem:[%s257_s7 + $0x10] sm:$0xff] %v767_v31  }
  0x4d   : > { %v621_v11 = vsel %vm917_vm2, %v616_v55, %v620_v29 }
  0x4e   : > { %v630_v62 = vmax.bf16 %v621_v11, %v607_v30 }
  0x50   : > { %v769_v0 = vcombine.low %v629_v61, %v630_v62 }
  0x52   : > { %770 = vst [vmem:[%s257_s7 + $0x18] sm:$0xff] %v769_v0  }
  0x53 PF: > { %s14_s15 = sadd.s32 1, %s786_s15  }
  0x54   : > { %p11_p4 = scmp.ge.s32.totalorder %s14_s15, 4  }
  0x56   :  { %13 = sbr.rel (!%p11_p4) target bundleno = 1 (0x1), region = 75 }

// kernel: resnet50_base_forward.17
= control target key start
LH: loop header
LB: loop body
LE: loop exit
PB: predicated region body
PF: predicated region fallthrough
CT: control target
= control target key end

     0   :  { %s2838_s13 = smov 0   ;;  %s3745_s0 = inlined_call_operand.vmem [shape: bf16[2,64,256], index: 0, kind: input, shape index: {}]   ;;  %s3746_s1 = inlined_call_operand.vmem [shape: bf16[256,128], index: 1, kind: input, shape index: {}]   ;;  %s3747_s2 = inlined_call_operand.vmem [shape: f32[1,128], index: 2, kind: input, shape index: {}]   ;;  %s3748_s3 = inlined_call_operand.vmem [shape: f32[1,128], index: 3, kind: input, shape index: {}]   ;;  %s3749_s4 = inlined_call_operand.vmem [shape: bf16[1152,128], index: 4, kind: input, shape index: {}]   ;;  %s3750_s5 = inlined_call_operand.vmem [shape: f32[1,128], index: 5, kind: input, shape index: {}]   ;;  %s3751_s6 = inlined_call_operand.vmem [shape: f32[1,128], index: 6, kind: input, shape index: {}]   ;;  %s3752_s7 = inlined_call_operand.vmem [shape: bf16[128,256], index: 7, kind: input, shape index: {}]   ;;  %s3753_s8 = inlined_call_operand.vmem [shape: f32[1,256], index: 8, kind: input, shape index: {}]   ;;  %s3754_s9 = inlined_call_operand.vmem [shape: f32[1,256], index: 9, kind: input, shape index: {}]   ;;  %s3755_s10 = inlined_call_operand.vmem [shape: bf16[2,64,256], index: 10, kind: output, shape index: {}]  }
   0x1 LB: > { %s2180_s14 = sadd.s32 4294967295, %s2778_s13   ;;  %p2184_p0 = scmp.ge.s32.totalorder %s2778_s13, 1  ;;  %s2778_s13 = sphi %s2838_s13, %s20_s13  }
   0x2   : > { %p312_p1 = scmp.lt.s32.totalorder %s2778_s13, 3 }
   0x4   : > { %p313_p2 = pnand %p2184_p0, %p312_p1 }
   0x6   : > { %316 = sbr.rel (%p313_p2) target bundleno = 767 (0x2ff), region = 60 }
   0xb   : > { %v2644_v0 = vld [vmem:[%s3746_s1 + $0x78] sm:$0xff]   ;;  %v2646_v2 = vld [vmem:[%s3746_s1 + $0x70] sm:$0xff]   ;;  %p350_p3 = scmp.lt.s32.totalorder %s2180_s14, 1  ;;  %v2648_v4 = vld [vmem:[%s3746_s1 + $0x68] sm:$0xff]   ;;  %vm648_vm0 = vcmask 1040384   ;;  %vm789_vm1 = vcmask 1046528  }
   0xc   : > { %v2645_v1 = vld [vmem:[%s3746_s1 + $0x38] sm:$0xff]   ;;  %2397 = vmatprep.subr.bf16.mxu1 %v2644_v0  ;;  %v2647_v3 = vld [vmem:[%s3746_s1 + $0x30] sm:$0xff]   ;;  %v2649_v5 = vld [vmem:[%s3746_s1 + $0x28] sm:$0xff]   ;;  %vm717_vm5 = vcmask 1045504   ;;  %vm2781_vm10 = vmmov 1  }
   0xd   : > { %2398 = vmatpush3.bf16.msra.mxu1 %v2645_v1  ;;  %s3824_s14 = smov (!%p350_p3, %s2180_s14), 1  ;;  %v2650_v6 = vld [vmem:[%s3746_s1 + $0x60] sm:$0xff]   ;;  %v2652_v8 = vld [vmem:[%s3746_s1 + $0x58] sm:$0xff]   ;;  %v2654_v10 = vld [vmem:[%s3746_s1 + $0x50] sm:$0xff]  }
   0xe   : > { %2399 = vmatprep.subr.bf16.mxu1 %v2646_v2  ;;  %s2387_s29 = sshll.u32 %s3824_s14, 6  ;;  %v2651_v7 = vld [vmem:[%s3746_s1 + $0x20] sm:$0xff]   ;;  %v2653_v9 = vld [vmem:[%s3746_s1 + $0x18] sm:$0xff]   ;;  %v2655_v14 = vld [vmem:[%s3746_s1 + $0x10] sm:$0xff]   ;;  %v675_v2 = vlaneseq }
   0xf   : > { %s2881_s18 = scalar_lea.vmem %s3745_s0, %s2387_s29  ;;  %v2656_v15 = vld [vmem:[%s3746_s1 + $0x48] sm:$0xff]   ;;  %v2669_v16 = vld [vmem:[%s3749_s4 + $0xf8] sm:$0xff]   ;;  %v2658_v19 = vld [vmem:[%s3746_s1 + $0x40] sm:$0xff]   ;;  %s3703_s12 = scalar_lea.vmem %s3755_s10, %s2387_s29 }
  0x10   : > { %v361_v11 = vld [vmem:[%s2881_s18] sm:$0xff]  ;;  %v362_v12 = vld [vmem:[%s2881_s18 + $0x8] sm:$0xff]  ;;  %2477 = vmatprep.subr.bf16.mxu0 %v2669_v16  ;;  %v2671_v18 = vld [vmem:[%s3749_s4 + $0xb8] sm:$0xff]  }
  0x11   : > { %2400 = vmatpush3.bf16.msra.mxu1 %v2647_v3  ;;  %v2190_v13 = vcombine.high %v361_v11, %v362_v12  ;;  %v2657_v17 = vld [vmem:[%s3746_s1 + $0x8] sm:$0xff]   ;;  %2478 = vmatpush3.bf16.msra.mxu0 %v2671_v18  ;;  %v2673_v20 = vld [vmem:[%s3749_s4 + $0xf0] sm:$0xff]   ;;  %v2659_v21 = vld [vmem:[%s3746_s1] sm:$0xff]   ;;  %v2189_v28 = vcombine.low %v361_v11, %v362_v12 }
  0x12   : > { %2401 = vmatprep.subr.bf16.mxu1 %v2648_v4  ;;  %v363_v22 = vld [vmem:[%s2881_s18 + $0x10] sm:$0xff]  ;;  %v364_v23 = vld [vmem:[%s2881_s18 + $0x18] sm:$0xff]  ;;  %2479 = vmatprep.subr.bf16.mxu0 %v2673_v20  ;;  %v2677_v26 = vld [vmem:[%s3749_s4 + $0xe8] sm:$0xff]  }
  0x13   : > { %569 = vmatprep.mubr.bf16.mxu1 %v2190_v13  ;;  %v2675_v24 = vld [vmem:[%s3749_s4 + $0xb0] sm:$0xff]   ;;  %v2668_v25 = vld [vmem:[%s3749_s4 + $0x78] sm:$0xff]   ;;  %v2192_v30 = vcombine.high %v363_v22, %v364_v23  ;;  %v365_v32 = vld [vmem:[%s2881_s18 + $0x20] sm:$0xff]  ;;  %v2191_v35 = vcombine.low %v363_v22, %v364_v23 }
  0x14   : > { %v2670_v27 = vld [vmem:[%s3749_s4 + $0x38] sm:$0xff]   ;;  %v2672_v29 = vld [vmem:[%s3749_s4 + $0x70] sm:$0xff]   ;;  %v366_v33 = vld [vmem:[%s2881_s18 + $0x28] sm:$0xff] }
  0x15   : > { %2402 = vmatpush3.bf16.msra.mxu1 %v2649_v5  ;;  %2480 = vmatpush3.bf16.msra.mxu0 %v2675_v24  ;;  %v2674_v31 = vld [vmem:[%s3749_s4 + $0x30] sm:$0xff]   ;;  %v2676_v34 = vld [vmem:[%s3749_s4 + $0x68] sm:$0xff]   ;;  %v2194_v36 = vcombine.high %v365_v32, %v366_v33  ;;  %v368_v38 = vld [vmem:[%s2881_s18 + $0x38] sm:$0xff]  ;;  %v2193_v39 = vcombine.low %v365_v32, %v366_v33 }
  0x16   : > { %2403 = vmatprep.subr.bf16.mxu1 %v2650_v6  ;;  %2481 = vmatprep.subr.bf16.mxu0 %v2677_v26  ;;  %v367_v37 = vld [vmem:[%s2881_s18 + $0x30] sm:$0xff]  ;;  %v2679_v42 = vld [vmem:[%s3749_s4 + $0xa8] sm:$0xff]   ;;  %v2681_v44 = vld [vmem:[%s3749_s4 + $0xe0] sm:$0xff]   ;;  %v3019_v6 = vshrl.u32 %v675_v2, 7  ;;  %v2780_v26 = vmov 0.0  }
  0x17   : > { %v2196_v40 = vcombine.high %v367_v37, %v368_v38  ;;  %v2195_v41 = vcombine.low %v367_v37, %v368_v38  ;;  %v2678_v43 = vld [vmem:[%s3749_s4 + $0x28] sm:$0xff]   ;;  %v2680_v45 = vld [vmem:[%s3749_s4 + $0x60] sm:$0xff]   ;;  %v2685_v48 = vld [vmem:[%s3749_s4 + $0xd8] sm:$0xff]  }
  0x18   : > { %v2683_v46 = vld [vmem:[%s3749_s4 + $0xa0] sm:$0xff]   ;;  %v2684_v49 = vld [vmem:[%s3749_s4 + $0x58] sm:$0xff]   ;;  %v2689_v52 = vld [vmem:[%s3749_s4 + $0xd0] sm:$0xff]   ;;  %3760 = vst [vmem:[#allocation2_spill] sm:$0xff] %v3019_v6  ;;  %v677_v12 = vadd.s32 8, %v3019_v6  ;;  %v3031_v18 = vadd.s32 16, %v3019_v6 }
  0x19   : > { %2404 = vmatpush3.bf16.msra.mxu1 %v2651_v7  ;;  %2482 = vmatpush3.bf16.msra.mxu0 %v2679_v42  ;;  %v2682_v47 = vld [vmem:[%s3749_s4 + $0x20] sm:$0xff]   ;;  %v2687_v50 = vld [vmem:[%s3749_s4 + $0x98] sm:$0xff]   ;;  %v2688_v53 = vld [vmem:[%s3749_s4 + $0x50] sm:$0xff]   ;;  %v684_v20 = vand.u32 7, %v3019_v6 }
  0x1a   : > { %2405 = vmatprep.subr.bf16.mxu1 %v2652_v8  ;;  %2483 = vmatprep.subr.bf16.mxu0 %v2681_v44  ;;  %v2686_v51 = vld [vmem:[%s3749_s4 + $0x18] sm:$0xff]   ;;  %v2691_v54 = vld [vmem:[%s3749_s4 + $0x90] sm:$0xff]   ;;  %v2693_v56 = vld [vmem:[%s3749_s4 + $0xc8] sm:$0xff]   ;;  %v686_v33 = vand.u32 7, %v3031_v18 }
  0x1b   : > { %v2690_v55 = vld [vmem:[%s3749_s4 + $0x10] sm:$0xff]   ;;  %v2692_v57 = vld [vmem:[%s3749_s4 + $0x48] sm:$0xff]   ;;  %v2697_v60 = vld [vmem:[%s3749_s4 + $0xc0] sm:$0xff]   ;;  %vm3045_vm2 = vcmp.ge.s32.totalorder %v684_v20, 1  ;;  %vm3053_vm4 = vcmp.lt.s32.totalorder %v684_v20, 7 }
  0x1c   : > { %v2695_v58 = vld [vmem:[%s3749_s4 + $0x88] sm:$0xff]   ;;  %v2696_v61 = vld [vmem:[%s3749_s4 + $0x40] sm:$0xff]   ;;  %v2701_v0 = vld [vmem:[%s3749_s4 + $0x1f8] sm:$0xff]   ;;  %vm3071_vm8 = vcmp.ge.s32.totalorder %v686_v33, 1  ;;  %vm3147_vm13 = vcmp.lt.s32.totalorder %v686_v33, 7 }
  0x1d   : > { %2406 = vmatpush3.bf16.msra.mxu1 %v2653_v9  ;;  %2484 = vmatpush3.bf16.msra.mxu0 %v2683_v46  ;;  %v2694_v59 = vld [vmem:[%s3749_s4 + $0x8] sm:$0xff]   ;;  %v2699_v62 = vld [vmem:[%s3749_s4 + $0x80] sm:$0xff]   ;;  %v2700_v1 = vld [vmem:[%s3749_s4 + $0x178] sm:$0xff]  }
  0x1e   : > { %2407 = vmatprep.subr.bf16.mxu1 %v2654_v10  ;;  %2485 = vmatprep.subr.bf16.mxu0 %v2685_v48  ;;  %v2698_v63 = vld [vmem:[%s3749_s4] sm:$0xff]   ;;  %v2707_v33 = vld [vmem:[%s3749_s4 + $0x1b0] sm:$0xff]  }
  0x1f   : > { %v3017_v5 = vld [vmem:[%s3747_s2] ss:$0 sm:$0xff] }
  0x20   : > { %v3024_v8 = vld [vmem:[%s3748_s3] ss:$0 sm:$0xff] }
  0x21   : > { %2408 = vmatpush3.bf16.msra.mxu1 %v2655_v14  ;;  %2486 = vmatpush3.bf16.msra.mxu0 %v2687_v50 }
  0x22   : > { %2409 = vmatprep.subr.bf16.mxu1 %v2656_v15  ;;  %2487 = vmatprep.subr.bf16.mxu0 %v2689_v52 }
  0x25   : > { %2410 = vmatpush3.bf16.msra.mxu1 %v2657_v17  ;;  %2488 = vmatpush3.bf16.msra.mxu0 %v2691_v54  ;;  %v3079_v54 = vadd.s32 32, %v3019_v6 }
  0x26   : > { %2411 = vmatprep.subr.bf16.mxu1 %v2658_v19  ;;  %2489 = vmatprep.subr.bf16.mxu0 %v2693_v56 }
  0x29   : > { %2412 = vmatpush3.bf16.msra.mxu1 %v2659_v21  ;;  %2490 = vmatpush3.bf16.msra.mxu0 %v2695_v58  ;;  %v685_v21 = vand.u32 7, %v677_v12  ;;  %v3083_v58 = vadd.s32 40, %v3019_v6 }
  0x2a   : > { %2437 = vmatprep.subr.bf16.mxu1 %v2668_v25  ;;  %2491 = vmatprep.subr.bf16.mxu0 %v2697_v60 }
  0x2b   : > { %vm3049_vm3 = vcmp.ge.s32.totalorder %v685_v21, 1  ;;  %vm3058_vm6 = vcmp.lt.s32.totalorder %v685_v21, 7 }
  0x2c   : > { %570 = vmatmul.mubr.bf16.vlgmr.msra.gmra.mxu1 %v2189_v28  ;;  %v3037_v28 = vrot.slane %v2780_v26, 2  ;;  %vm2299_vm7 = vmpackc.low %vm3049_vm3, %vm3045_vm2 }
  0x2d   : > { %577 = vmatprep.mubr.bf16.mxu1 %v2192_v30  ;;  %2438 = vmatpush3.bf16.msra.mxu1 %v2670_v27  ;;  %v3035_v27 = vrot.slane %v2780_v26, 1  ;;  %vm3108_vm9 = vmpackc.low %vm3058_vm6, %vm3053_vm4 }
  0x2e   : > { %2439 = vmatprep.subr.bf16.mxu1 %v2672_v29  ;;  %2492 = vmatpush3.bf16.msra.mxu0 %v2699_v62  ;;  %v3040_v29 = vadd.s32 24, %v3019_v6  ;;  %vm3118_vm11 = vmpackc.low %vm3049_vm3, %vm2781_vm10 }
  0x2f   : > { %2557 = vmatprep.subr.bf16.mxu0 %v2701_v0  ;;  %v2740_v0 = vld [vmem:[%s3752_s7 + $0x70] ss:$8 sps:$4 sm:$0xff]  }
  0x31   : > { %2440 = vmatpush3.bf16.msra.mxu1 %v2674_v31 }
  0x32   : > { %2441 = vmatprep.subr.bf16.mxu1 %v2676_v34 }
  0x34   : > { %578 = vmatmul.mubr.bf16.gmra.mxu1 %v2191_v35 }
  0x35   : > { %585 = vmatprep.mubr.bf16.mxu1 %v2194_v36  ;;  %2442 = vmatpush3.bf16.msra.mxu1 %v2678_v43  ;;  %v2735_v36 = vld [vmem:[%s3749_s4 + $0x220] sm:$0xff]  }
  0x36   : > { %2443 = vmatprep.subr.bf16.mxu1 %v2680_v45  ;;  %v687_v45 = vand.u32 7, %v3040_v29 }
  0x38   : > { %vm3136_vm12 = vcmp.ge.s32.totalorder %v687_v45, 1  ;;  %vm3151_vm14 = vcmp.lt.s32.totalorder %v687_v45, 7 }
  0x39   : > { %2444 = vmatpush3.bf16.msra.mxu1 %v2682_v47  ;;  %vm3164_vm15 = vmpackc.low %vm3136_vm12, %vm3071_vm8 }
  0x3a   : > { %2445 = vmatprep.subr.bf16.mxu1 %v2684_v49  ;;  %vm3229_vm6 = vmpackc.low %vm3151_vm14, %vm3147_vm13 }
  0x3c   : > { %586 = vmatmul.mubr.bf16.gmra.mxu1 %v2193_v39 }
  0x3d   : > { %593 = vmatprep.mubr.bf16.mxu1 %v2196_v40  ;;  %2446 = vmatpush3.bf16.msra.mxu1 %v2686_v51 }
  0x3e   : > { %2447 = vmatprep.subr.bf16.mxu1 %v2688_v53 }
  0x41   : > { %2448 = vmatpush3.bf16.msra.mxu1 %v2690_v55 }
  0x42   : > { %2449 = vmatprep.subr.bf16.mxu1 %v2692_v57 }
  0x44   : > { %594 = vmatmul.mubr.bf16.gmra.mxu1 %v2195_v41  ;;  %v2708_v41 = vld [vmem:[%s3749_s4 + $0x168] sm:$0xff]  }
  0x45   : > { %2450 = vmatpush3.bf16.msra.mxu1 %v2694_v59 }
  0x46   : > { %2451 = vmatprep.subr.bf16.mxu1 %v2696_v61 }
  0x49   : > { %2452 = vmatpush3.bf16.msra.mxu1 %v2698_v63 }
  0x4a   : > { %2517 = vmatprep.subr.bf16.mxu1 %v2700_v1 }
  0xec   : > { %v2413_v3 = vpop.f32.mrf.mxu1 }
  0xee   : > { %v2414_v4 = vpop.f32.mrf.mxu1 }
  0xef   : > { %v2415_v7 = vadd.f32 %v2414_v4, %v2413_v3 }
  0xf0   : > { %v2416_v9 = vpop.f32.mrf.mxu1 }
  0xf1   : > { %v609_v10 = vmul.f32 %v2415_v7, %v3017_v5 }
  0xf2   : > { %v2417_v11 = vpop.f32.mrf.mxu1 }
  0xf3   : > { %v624_v13 = vadd.f32 %v3024_v8, %v609_v10  ;;  %v2418_v14 = vadd.f32 %v2417_v11, %v2416_v9  ;;  %v2702_v9 = vld [vmem:[%s3749_s4 + $0x138] sm:$0xff]  }
  0xf4   : > { %v2419_v15 = vpop.f32.mrf.mxu1  ;;  %v2703_v10 = vld [vmem:[%s3749_s4 + $0x1b8] sm:$0xff]  }
  0xf5   : > { %v632_v16 = vmax.f32 %v624_v13, 0.0  ;;  %v610_v17 = vmul.f32 %v2418_v14, %v3017_v5  ;;  %v2704_v14 = vld [vmem:[%s3749_s4 + $0x170] sm:$0xff]  }
  0xf6   : > { %v2420_v19 = vpop.f32.mrf.mxu1 }
  0xf7   : > { %v649_v22 = vrot.slane %v632_v16, 7  ;;  %v625_v23 = vadd.f32 %v3024_v8, %v610_v17  ;;  %v2421_v24 = vadd.f32 %v2420_v19, %v2419_v15  ;;  %v2705_v15 = vld [vmem:[%s3749_s4 + $0x1f0] sm:$0xff]   ;;  %v688_v17 = vand.u32 7, %v3079_v54 }
  0xf8   : > { %v2422_v25 = vpop.f32.mrf.mxu1 }
  0xf9   : > { %v633_v30 = vmax.f32 %v625_v23, 0.0  ;;  %v611_v31 = vmul.f32 %v2421_v24, %v3017_v5  ;;  %v673_v32 = vsel %vm648_vm0, 0.0, %v649_v22  ;;  %vm3187_vm4 = vcmp.ge.s32.totalorder %v688_v17, 1 }
  0xfa   : > { %v2423_v34 = vpop.f32.mrf.mxu1  ;;  %v719_v43 = vrot.slane %v673_v32, 2  ;;  %v791_v44 = vrot.slane %v673_v32, 1  ;;  %v2288_v11 = vpack.c.bf16 %v673_v32, %v2780_v26  ;;  %vm3271_vm10 = vcmp.lt.s32.totalorder %v688_v17, 7  ;;  %v2714_v17 = vld [vmem:[%s3749_s4 + $0x120] sm:$0xff]  }
  0xfb   : > { %v650_v38 = vrot.slane %v633_v30, 7  ;;  %v626_v39 = vadd.f32 %v3024_v8, %v611_v31  ;;  %v2424_v40 = vadd.f32 %v2423_v34, %v2422_v25  ;;  %v689_v34 = vand.u32 7, %v3083_v58 }
  0xfc   : > { %v2425_v42 = vpop.f32.mrf.mxu1  ;;  %v792_v60 = vsel %vm789_vm1, %v3035_v27, %v791_v44  ;;  %v720_v62 = vsel %vm717_vm5, %v3037_v28, %v719_v43 }
  0xfd   : > { %v634_v46 = vmax.f32 %v626_v39, 0.0  ;;  %v612_v47 = vmul.f32 %v2424_v40, %v3017_v5  ;;  %v3065_v48 = vsel %vm648_vm0, %v649_v22, %v650_v38  ;;  %vm3253_vm8 = vcmp.ge.s32.totalorder %v689_v34, 1 }
  0xfe   : > { %v2426_v50 = vpop.f32.mrf.mxu1  ;;  %v721_v51 = vrot.slane %v3065_v48, 2  ;;  %v2300_v52 = vpack.c.bf16 %v3065_v48, %v673_v32  ;;  %v793_v53 = vrot.slane %v3065_v48, 1  ;;  %v2706_v32 = vld [vmem:[%s3749_s4 + $0x130] sm:$0xff]   ;;  %vm3288_vm12 = vmpackc.low %vm3253_vm8, %vm3187_vm4 }
  0xff   : > { %v652_v55 = vrot.slane %v634_v46, 7  ;;  %v627_v56 = vadd.f32 %v3024_v8, %v612_v47  ;;  %v2427_v57 = vadd.f32 %v2426_v50, %v2425_v42  ;;  %v2709_v42 = vld [vmem:[%s3749_s4 + $0x1e8] sm:$0xff]   ;;  %v3193_v47 = vadd.s32 48, %v3019_v6 }
 0x100   : > { %v2428_v59 = vpop.f32.mrf.mxu1  ;;  %2301 = vmatprep.mubr.msk.bf16.mxu0 %vm2299_vm7, %v2300_v52  ;;  %v3095_v61 = vsel %vm789_vm1, %v791_v44, %v793_v53  ;;  %v3102_v63 = vsel %vm717_vm5, %v719_v43, %v721_v51  ;;  %v2745_v43 = vld [vmem:[%s3752_s7 + $0x64] ss:$8 sps:$4 sm:$0xff]  }
 0x101   : > { %v3113_v1 = vsel %vm648_vm0, %v650_v38, %v652_v55  ;;  %v635_v2 = vmax.f32 %v627_v56, 0.0  ;;  %v613_v3 = vmul.f32 %v2427_v57, %v3017_v5  ;;  %v821_v7 = vpack.c.bf16 %v3095_v61, %v792_v60  ;;  %v2710_v60 = vld [vmem:[%s3749_s4 + $0x128] sm:$0xff]  }
 0x102   : > { %v2429_v12 = vpop.f32.mrf.mxu1  ;;  %v2303_v13 = vpack.c.bf16 %v3102_v63, %v720_v62  ;;  %v795_v22 = vrot.slane %v3113_v1, 1  ;;  %v723_v25 = vrot.slane %v3113_v1, 2  ;;  %v2711_v62 = vld [vmem:[%s3749_s4 + $0x1a8] sm:$0xff]   ;;  %v3245_v4 = vpack.c.bf16 %v3113_v1, %v3065_v48 }
 0x103   : > { %v654_v18 = vrot.slane %v635_v2, 7  ;;  %v628_v19 = vadd.f32 %v3024_v8, %v613_v3  ;;  %v2430_v20 = vadd.f32 %v2429_v12, %v2428_v59  ;;  %1461 = vmatprep.mubr.bf16.mxu1 %v821_v7  ;;  %v2712_v7 = vld [vmem:[%s3749_s4 + $0x160] sm:$0xff]  }
 0x104   : > { %2304 = vmatmul.mubr.msk.bf16.vlgmr.msra.gmra.mxu0 %vm3108_vm9, %v2303_v13  ;;  %v2431_v21 = vpop.f32.mrf.mxu1  ;;  %2289 = vmatmul.mubr.msk.bf16.vlgmr.msra.gmra.mxu1 %vm3118_vm11, %v2288_v11  ;;  %v3200_v50 = vsel %vm789_vm1, %v793_v53, %v795_v22  ;;  %v3258_v11 = vadd.s32 56, %v3019_v6  ;;  %vm3275_vm11 = vcmp.lt.s32.totalorder %v689_v34, 7 }
 0x105   : > { %v3157_v26 = vsel %vm648_vm0, %v652_v55, %v654_v18  ;;  %v636_v29 = vmax.f32 %v628_v19, 0.0  ;;  %v614_v30 = vmul.f32 %v2430_v20, %v3017_v5  ;;  %2518 = vmatpush3.bf16.msra.mxu1 %v2702_v9  ;;  %2558 = vmatpush3.bf16.msra.mxu0 %v2703_v10  ;;  %v3210_v55 = vsel %vm717_vm5, %v721_v51, %v723_v25  ;;  %v2713_v9 = vld [vmem:[%s3749_s4 + $0x1e0] sm:$0xff]   ;;  %vm3338_vm13 = vmpackc.low %vm3275_vm11, %vm3271_vm10 }
 0x106   : > { %v2432_v37 = vpop.f32.mrf.mxu1  ;;  %2519 = vmatprep.subr.bf16.mxu1 %v2704_v14  ;;  %2559 = vmatprep.subr.bf16.mxu0 %v2705_v15  ;;  %v2306_v38 = vpack.c.bf16 %v3157_v26, %v3113_v1  ;;  %v797_v39 = vrot.slane %v3157_v26, 1  ;;  %v725_v40 = vrot.slane %v3157_v26, 2  ;;  %v2725_v14 = vld [vmem:[%s3749_s4 + $0x1c8] sm:$0xff]  }
 0x107   : > { %v656_v44 = vrot.slane %v636_v29, 7  ;;  %v629_v45 = vadd.f32 %v3024_v8, %v614_v30  ;;  %v2433_v46 = vadd.f32 %v2432_v37, %v2431_v21  ;;  %v2715_v21 = vld [vmem:[%s3749_s4 + $0x1a0] sm:$0xff]   ;;  %v2717_v29 = vld [vmem:[%s3749_s4 + $0x1d8] sm:$0xff]   ;;  %v691_v30 = vand.u32 7, %v3258_v11 }
 0x108   : > { %v2434_v49 = vpop.f32.mrf.mxu1  ;;  %2307 = vmatprep.mubr.msk.bf16.mxu0 %vm3164_vm15, %v2306_v38  ;;  %v3205_v52 = vsel %vm789_vm1, %v795_v22, %v797_v39  ;;  %v3215_v56 = vsel %vm717_vm5, %v723_v25, %v725_v40  ;;  %v2716_v25 = vld [vmem:[%s3749_s4 + $0x158] sm:$0xff]   ;;  %v2743_v51 = vld [vmem:[%s3752_s7 + $0x60] ss:$8 sps:$4 sm:$0xff]  }
 0x109   : > { %v3218_v57 = vsel %vm648_vm0, %v654_v18, %v656_v44  ;;  %v637_v53 = vmax.f32 %v629_v45, 0.0  ;;  %v615_v58 = vmul.f32 %v2433_v46, %v3017_v5  ;;  %2520 = vmatpush3.bf16.msra.mxu1 %v2706_v32  ;;  %2560 = vmatpush3.bf16.msra.mxu0 %v2707_v33  ;;  %v3223_v59 = vpack.c.bf16 %v3205_v52, %v3200_v50  ;;  %v2719_v45 = vld [vmem:[%s3749_s4 + $0x198] sm:$0xff]  }
 0x10a   : > { %v2435_v2 = vpop.f32.mrf.mxu1  ;;  %v3241_v3 = vpack.c.bf16 %v3215_v56, %v3210_v55  ;;  %2521 = vmatprep.subr.bf16.mxu1 %v2708_v41  ;;  %2561 = vmatprep.subr.bf16.mxu0 %v2709_v42  ;;  %v799_v1 = vrot.slane %v3218_v57, 1  ;;  %v727_v16 = vrot.slane %v3218_v57, 2  ;;  %v3354_v46 = vpack.c.bf16 %v3218_v57, %v3157_v26 }
 0x10b   : > { %v658_v12 = vrot.slane %v637_v53, 7  ;;  %v630_v13 = vadd.f32 %v3024_v8, %v615_v58  ;;  %v2436_v48 = vadd.f32 %v2435_v2, %v2434_v49  ;;  %1469 = vmatprep.mubr.bf16.mxu1 %v3223_v59  ;;  %v2721_v49 = vld [vmem:[%s3749_s4 + $0x1d0] sm:$0xff]   ;;  %vm699_vm4 = vcmp.ge.s32.totalorder %v691_v30, 1 }
 0x10c   : > { %2310 = vmatmul.mubr.msk.bf16.gmra.mxu0 %vm3229_vm6, %v3241_v3  ;;  %2292 = vmatmul.mubr.msk.bf16.gmra.mxu1 %vm3164_vm15, %v3245_v4  ;;  %v3316_v34 = vsel %vm789_vm1, %v797_v39, %v799_v1  ;;  %v3324_v38 = vsel %vm717_vm5, %v725_v40, %v727_v16  ;;  %v2722_v2 = vld [vmem:[%s3749_s4 + $0x110] sm:$0xff]  }
 0x10d   : > { %v3281_v18 = vsel %vm648_vm0, %v656_v44, %v658_v12  ;;  %v638_v19 = vmax.f32 %v630_v13, 0.0  ;;  %v616_v20 = vmul.f32 %v2436_v48, %v3017_v5  ;;  %2522 = vmatpush3.bf16.msra.mxu1 %v2710_v60  ;;  %2562 = vmatpush3.bf16.msra.mxu0 %v2711_v62  ;;  %v690_v5 = vand.u32 7, %v3193_v47  ;;  %v2718_v44 = vld [vmem:[%s3749_s4 + $0x118] sm:$0xff]   ;;  %v2720_v47 = vld [vmem:[%s3749_s4 + $0x150] sm:$0xff]   ;;  %v2763_v62 = vld [vmem:[%s3752_s7 + $0x4] ss:$8 sps:$4 sm:$0xff]  }
 0x10e   : > { %2523 = vmatprep.subr.bf16.mxu1 %v2712_v7  ;;  %2563 = vmatprep.subr.bf16.mxu0 %v2713_v9  ;;  %v2312_v22 = vpack.c.bf16 %v3281_v18, %v3218_v57  ;;  %v801_v23 = vrot.slane %v3281_v18, 1  ;;  %v729_v24 = vrot.slane %v3281_v18, 2  ;;  %v2723_v7 = vld [vmem:[%s3749_s4 + $0x190] sm:$0xff]   ;;  %v832_v35 = vpack.c.bf16 %v3316_v34, %v3205_v52  ;;  %v2736_v52 = vld [vmem:[%s3749_s4 + $0x218] sm:$0xff]  }
 0x10f   : > { %v660_v32 = vrot.slane %v638_v19, 7  ;;  %v631_v33 = vadd.f32 %v3024_v8, %v616_v20  ;;  %vm698_vm14 = vcmp.ge.s32.totalorder %v690_v5, 1  ;;  %vm3385_vm10 = vcmp.lt.s32.totalorder %v690_v5, 7 }
 0x110   : > { %2313 = vmatprep.mubr.msk.bf16.mxu0 %vm3288_vm12, %v2312_v22  ;;  %v3319_v37 = vsel %vm789_vm1, %v799_v1, %v801_v23  ;;  %v3327_v41 = vsel %vm717_vm5, %v727_v16, %v729_v24  ;;  %vm3375_vm8 = vmpackc.low %vm699_vm4, %vm698_vm14  ;;  %v2724_v1 = vld [vmem:[%s3749_s4 + $0x148] sm:$0xff]  }
 0x111   : > { %v661_v8 = vsel %vm648_vm0, %v658_v12, %v660_v32  ;;  %v639_v42 = vmax.f32 %v631_v33, 0.0  ;;  %2524 = vmatpush3.bf16.msra.mxu1 %v2714_v17  ;;  %2564 = vmatpush3.bf16.msra.mxu0 %v2715_v21  ;;  %v3332_v39 = vpack.c.bf16 %v3319_v37, %v3316_v34  ;;  %v3344_v40 = vpack.c.bf16 %v3327_v41, %v3324_v38  ;;  %v2732_v33 = vld [vmem:[%s3749_s4 + $0x238] sm:$0xff]  }
 0x112   : > { %2525 = vmatprep.subr.bf16.mxu1 %v2716_v25  ;;  %2565 = vmatprep.subr.bf16.mxu0 %v2717_v29  ;;  %v803_v58 = vrot.slane %v661_v8, 1  ;;  %v731_v26 = vrot.slane %v661_v8, 2  ;;  %v2728_v25 = vld [vmem:[%s3749_s4 + $0x140] sm:$0xff]  }
 0x113   : > { %v662_v53 = vrot.slane %v639_v42, 7  ;;  %1477 = vmatprep.mubr.bf16.mxu1 %v3332_v39  ;;  %v2729_v29 = vld [vmem:[%s3749_s4 + $0x1c0] sm:$0xff]  }
 0x114   : > { %2316 = vmatmul.mubr.msk.bf16.gmra.mxu0 %vm3338_vm13, %v3344_v40  ;;  %2295 = vmatmul.mubr.msk.bf16.gmra.mxu1 %vm3288_vm12, %v3354_v46  ;;  %v3404_v15 = vsel %vm789_vm1, %v801_v23, %v803_v58  ;;  %v732_v19 = vsel %vm717_vm5, %v729_v24, %v731_v26  ;;  %v2727_v23 = vld [vmem:[%s3749_s4 + $0x188] sm:$0xff]   ;;  %v2297_v24 = vpack.c.bf16 %v661_v8, %v3281_v18  ;;  %v2730_v18 = vld [vmem:[%s3749_s4 + $0x100] sm:$0xff]  }
 0x115   : > { %v3370_v57 = vsel %vm648_vm0, %v660_v32, %v662_v53  ;;  %v3373_v60 = vsel %vm648_vm0, %v662_v53, 0.0  ;;  %2526 = vmatpush3.bf16.msra.mxu1 %v2718_v44  ;;  %2566 = vmatpush3.bf16.msra.mxu0 %v2719_v45  ;;  %vm3389_vm0 = vcmp.lt.s32.totalorder %v691_v30, 7  ;;  %v2324_v30 = vpack.c.bf16 %v3210_v55, %v3102_v63  ;;  %v2731_v32 = vld [vmem:[%s3749_s4 + $0x180] sm:$0xff]   ;;  %v2733_v55 = vld [vmem:[%s3749_s4 + $0x230] sm:$0xff]  }
 0x116   : > { %v760_v11 = vrot.slane %v3373_v60, 2  ;;  %2527 = vmatprep.subr.bf16.mxu1 %v2720_v47  ;;  %2567 = vmatprep.subr.bf16.mxu0 %v2721_v49  ;;  %v2318_v12 = vpack.c.bf16 %v3370_v57, %v661_v8  ;;  %v805_v13 = vrot.slane %v3370_v57, 1  ;;  %v733_v48 = vrot.slane %v3370_v57, 2  ;;  %vm3429_vm11 = vmpackc.low %vm3389_vm0, %vm3385_vm10  ;;  %v2748_v45 = vld [vmem:[%s3752_s7 + $0x54] ss:$8 sps:$4 sm:$0xff]  }
 0x117   : > { %v824_v63 = vpack.c.bf16 %v3200_v50, %v3095_v61  ;;  %v2734_v61 = vld [vmem:[%s3749_s4 + $0x228] sm:$0xff]   ;;  %v2330_v50 = vpack.c.bf16 %v732_v19, %v3327_v41  ;;  %v2737_v41 = vld [vmem:[%s3749_s4 + $0x210] sm:$0xff]   ;;  %v2345_v42 = vpack.c.bf16 %v3373_v60, %v3370_v57 }
 0x118   : > { %2319 = vmatprep.mubr.msk.bf16.mxu0 %vm3375_vm8, %v2318_v12  ;;  %v3409_v16 = vsel %vm789_vm1, %v803_v58, %v805_v13  ;;  %v3415_v20 = vsel %vm717_vm5, %v731_v26, %v733_v48  ;;  %v3421_v17 = vsel %vm717_vm5, %v760_v11, %v3037_v28  ;;  %v2726_v28 = vld [vmem:[%s3749_s4 + $0x108] sm:$0xff]   ;;  %v761_v34 = vsel %vm717_vm5, %v733_v48, %v760_v11  ;;  %v2754_v49 = vld [vmem:[%s3752_s7 + $0x34] ss:$8 sps:$4 sm:$0xff]   ;;  %v2752_v53 = vld [vmem:[%s3752_s7 + $0x30] ss:$8 sps:$4 sm:$0xff]  }
 0x119   : > { %2528 = vmatpush3.bf16.msra.mxu1 %v2722_v2  ;;  %2568 = vmatpush3.bf16.msra.mxu0 %v2723_v7  ;;  %v843_v21 = vpack.c.bf16 %v3409_v16, %v3404_v15  ;;  %v3434_v22 = vpack.c.bf16 %v3415_v20, %v732_v19  ;;  %v2357_v44 = vpack.c.bf16 %v3421_v17, %v761_v34  ;;  %v2751_v47 = vld [vmem:[%s3752_s7 + $0x44] ss:$8 sps:$4 sm:$0xff]   ;;  %v2755_v26 = vld [vmem:[%s3752_s7 + $0x20] ss:$8 sps:$4 sm:$0xff]   ;;  %v2760_v57 = vld [vmem:[%s3752_s7 + $0x14] ss:$8 sps:$4 sm:$0xff]  }
 0x11a   : > { %2529 = vmatprep.subr.bf16.mxu1 %v2724_v1  ;;  %2569 = vmatprep.subr.bf16.mxu0 %v2725_v14  ;;  %v2757_v58 = vld [vmem:[%s3752_s7 + $0x24] ss:$8 sps:$4 sm:$0xff]   ;;  %v2761_v2 = vld [vmem:[%s3752_s7] ss:$8 sps:$4 sm:$0xff]   ;;  %v3756_v7 = vmov 0  }
 0x11b   : > { %1485 = vmatprep.mubr.bf16.mxu1 %v843_v21 }
 0x11c   : > { %2322 = vmatmul.mubr.msk.bf16.gmra.mxu0 %vm3429_vm11, %v3434_v22  ;;  %2298 = vmatmul.mubr.msk.bf16.gmra.mxu1 %vm3375_vm8, %v2297_v24 }
 0x11d   : > { %2530 = vmatpush3.bf16.msra.mxu1 %v2726_v28  ;;  %2570 = vmatpush3.bf16.msra.mxu0 %v2727_v23 }
 0x11e   : > { %1656 = vmatprep.mubr.bf16.mxu0 %v3223_v59  ;;  %2325 = vmatprep.mubr.msk.bf16.mxu1 %vm3108_vm9, %v2324_v30  ;;  %v2327_v59 = vpack.c.bf16 %v3324_v38, %v3215_v56  ;;  %v815_v56 = vrot.slane %v3373_v60, 1  ;;  %v840_v38 = vpack.c.bf16 %v3404_v15, %v3319_v37  ;;  %v2738_v37 = vld [vmem:[%s3749_s4 + $0x208] sm:$0xff]   ;;  %v2758_v60 = vld [vmem:[%s3752_s7 + $0x10] ss:$8 sps:$4 sm:$0xff]  }
 0x11f   : > { %2531 = vmatprep.subr.bf16.mxu1 %v2728_v25  ;;  %2571 = vmatprep.subr.bf16.mxu0 %v2729_v29 }
 0x120   : > { %v818_v31 = vsel %vm789_vm1, %v815_v56, %v3035_v27  ;;  %v2333_v27 = vpack.c.bf16 %v761_v34, %v3415_v20 }
 0x121   : > { %2532 = vmatpush3.bf16.msra.mxu1 %v2730_v18  ;;  %2572 = vmatpush3.bf16.msra.mxu0 %v2731_v32 }
 0x122   : > { %2609 = vmatprep.subr.bf16.mxu1 %v2732_v33 }
 0x124   : > { %2337 = vmatmul.mubr.msk.bf16.vlgmr.msra.gmra.mxu0 %vm2299_vm7, %v3245_v4  ;;  %1592 = vmatmul.mubr.bf16.vlgmr.msra.gmra.mxu1 %v824_v63  ;;  %v816_v4 = vsel %vm789_vm1, %v805_v13, %v815_v56 }
 0x125   : > { %1664 = vmatprep.mubr.bf16.mxu0 %v3332_v39  ;;  %2610 = vmatpush3.bf16.msra.mxu1 %v2732_v33  ;;  %v851_v8 = vpack.c.bf16 %v818_v31, %v816_v4  ;;  %v848_v54 = vpack.c.bf16 %v816_v4, %v3409_v16  ;;  %v2739_v39 = vld [vmem:[%s3749_s4 + $0x200] sm:$0xff]  }
 0x126   : > { %2328 = vmatprep.mubr.msk.bf16.mxu1 %vm3229_vm6, %v2327_v59  ;;  %2611 = vmatprep.subr.bf16.mxu1 %v2733_v55 }
 0x129   : > { %2612 = vmatpush3.bf16.msra.mxu1 %v2733_v55 }
 0x12a   : > { %2613 = vmatprep.subr.bf16.mxu1 %v2734_v61 }
 0x12c   : > { %2340 = vmatmul.mubr.msk.bf16.gmra.mxu0 %vm3164_vm15, %v3354_v46  ;;  %1600 = vmatmul.mubr.bf16.gmra.mxu1 %v832_v35  ;;  %v2749_v46 = vld [vmem:[%s3752_s7 + $0x40] ss:$8 sps:$4 sm:$0xff]  }
 0x12d   : > { %1672 = vmatprep.mubr.bf16.mxu0 %v843_v21  ;;  %2614 = vmatpush3.bf16.msra.mxu1 %v2734_v61 }
 0x12e   : > { %2331 = vmatprep.mubr.msk.bf16.mxu1 %vm3338_vm13, %v2330_v50  ;;  %2615 = vmatprep.subr.bf16.mxu1 %v2735_v36 }
 0x131   : > { %2616 = vmatpush3.bf16.msra.mxu1 %v2735_v36 }
 0x132   : > { %2617 = vmatprep.subr.bf16.mxu1 %v2736_v52 }
 0x134   : > { %2343 = vmatmul.mubr.msk.bf16.gmra.mxu0 %vm3288_vm12, %v2297_v24  ;;  %1608 = vmatmul.mubr.bf16.gmra.mxu1 %v840_v38 }
 0x135   : > { %1680 = vmatprep.mubr.bf16.mxu0 %v851_v8  ;;  %2618 = vmatpush3.bf16.msra.mxu1 %v2736_v52 }
 0x136   : > { %2334 = vmatprep.mubr.msk.bf16.mxu1 %vm3429_vm11, %v2333_v27  ;;  %2619 = vmatprep.subr.bf16.mxu1 %v2737_v41 }
 0x139   : > { %2620 = vmatpush3.bf16.msra.mxu1 %v2737_v41 }
 0x13a   : > { %2621 = vmatprep.subr.bf16.mxu1 %v2738_v37 }
 0x13c   : > { %2346 = vmatmul.mubr.msk.bf16.gmra.mxu0 %vm3375_vm8, %v2345_v42  ;;  %1616 = vmatmul.mubr.bf16.gmra.mxu1 %v848_v54 }
 0x13d   : > { %2622 = vmatpush3.bf16.msra.mxu1 %v2738_v37  ;;  %2625 = vmatprep.mubr.msk.bf16.mxu1 %vm3108_vm9, %v3241_v3  ;;  %v2742_v3 = vld [vmem:[%s3752_s7 + $0x74] ss:$8 sps:$4 sm:$0xff]  }
 0x13e   : > { %2623 = vmatprep.subr.bf16.mxu1 %v2739_v39  ;;  %1892 = vmatprep.subr.bf16.mxu0 %v2742_v3 }
 0x13f   : > { %1893 = vmatpush1.bf16.msra.mxu0 %v2740_v0  ;;  %1924 = vmatprep.mubr.bf16.mxu0 %v3756_v7 }
 0x140   : > { %1894 = vmatprep.subr.bf16.mxu0 %v2745_v43 }
 0x141   : > { %2624 = vmatpush3.bf16.msra.mxu1 %v2739_v39 }
 0x143   : > { %1895 = vmatpush1.bf16.msra.mxu0 %v2743_v51 }
 0x144   : > { %2626 = vmatmul.mubr.msk.bf16.vlgmr.msra.gmra.mxu1 %vm3229_vm6, %v3344_v40  ;;  %v2746_v40 = vld [vmem:[%s3752_s7 + $0x50] ss:$8 sps:$4 sm:$0xff]   ;;  %1896 = vmatprep.subr.bf16.mxu0 %v2748_v45 }
 0x145   : > { %2629 = vmatprep.mubr.msk.bf16.mxu1 %vm3338_vm13, %v3434_v22 }
 0x147   : > { %1897 = vmatpush1.bf16.msra.mxu0 %v2746_v40 }
 0x148   : > { %1898 = vmatprep.subr.bf16.mxu0 %v2751_v47 }
 0x14b   : > { %1899 = vmatpush1.bf16.msra.mxu0 %v2749_v46 }
 0x14c   : > { %2630 = vmatmul.mubr.msk.bf16.gmra.mxu1 %vm3429_vm11, %v2357_v44  ;;  %1900 = vmatprep.subr.bf16.mxu0 %v2754_v49 }
 0x14f   : > { %1901 = vmatpush1.bf16.msra.mxu0 %v2752_v53 }
 0x150   : > { %1902 = vmatprep.subr.bf16.mxu0 %v2757_v58 }
 0x153   : > { %1903 = vmatpush1.bf16.msra.mxu0 %v2755_v26 }
 0x154   : > { %1904 = vmatprep.subr.bf16.mxu0 %v2760_v57 }
 0x157   : > { %1905 = vmatpush1.bf16.msra.mxu0 %v2758_v60 }
 0x158   : > { %1906 = vmatprep.subr.bf16.mxu0 %v2763_v62 }
 0x15b   : > { %1907 = vmatpush1.bf16.msra.mxu0 %v2761_v2 }
 0x1c4   : > { %v2493_v9 = vpop.f32.mrf.mxu0  ;;  %v2453_v10 = vpop.f32.mrf.mxu1 }
 0x1c6   : > { %v2494_v11 = vpop.f32.mrf.mxu0  ;;  %v2454_v12 = vpop.f32.mrf.mxu1 }
 0x1c7   : > { %v2495_v46 = vadd.f32 %v2494_v11, %v2493_v9  ;;  %v2455_v47 = vadd.f32 %v2454_v12, %v2453_v10 }
 0x1c8   : > { %v2496_v13 = vpop.f32.mrf.mxu0  ;;  %v2456_v48 = vpop.f32.mrf.mxu1 }
 0x1c9   : > { %v1529_v57 = vadd.f32 %v2495_v46, %v2455_v47 }
 0x1ca   : > { %v2497_v1 = vpop.f32.mrf.mxu0  ;;  %v2457_v14 = vpop.f32.mrf.mxu1 }
 0x1cb   : > { %v2498_v62 = vadd.f32 %v2497_v1, %v2496_v13  ;;  %v2458_v2 = vadd.f32 %v2457_v14, %v2456_v48 }
 0x1cc   : > { %v2499_v15 = vpop.f32.mrf.mxu0  ;;  %v2459_v16 = vpop.f32.mrf.mxu1 }
 0x1cd   : > { %v1532_v12 = vadd.f32 %v2498_v62, %v2458_v2 }
 0x1ce   : > { %v2500_v19 = vpop.f32.mrf.mxu0  ;;  %v2460_v20 = vpop.f32.mrf.mxu1 }
 0x1d0   : > { %v2502_v17 = vpop.f32.mrf.mxu0  ;;  %v2462_v21 = vpop.f32.mrf.mxu1 }
 0x1d2   : > { %v2503_v5 = vpop.f32.mrf.mxu0  ;;  %v2463_v22 = vpop.f32.mrf.mxu1 }
 0x1d3   : > { %v2504_v7 = vadd.f32 %v2503_v5, %v2502_v17  ;;  %v2464_v6 = vadd.f32 %v2463_v22, %v2462_v21  ;;  %v3643_v5 = vld [vmem:[%s3750_s5] ss:$0 sm:$0xff] }
 0x1d4   : > { %v3592_v28 = vpop.f32.mrf.mxu0  ;;  %v3594_v23 = vpop.f32.mrf.mxu1 }
 0x1d6   : > { %v3596_v24 = vpop.f32.mrf.mxu0  ;;  %v3598_v25 = vpop.f32.mrf.mxu1 }
 0x1d8   : > { %v3600_v29 = vpop.f32.mrf.mxu0  ;;  %v3602_v30 = vpop.f32.mrf.mxu1 }
 0x1da   : > { %v3604_v18 = vpop.f32.mrf.mxu0  ;;  %v3606_v32 = vpop.f32.mrf.mxu1 }
 0x1dc   : > { %v3608_v33 = vpop.f32.mrf.mxu0  ;;  %v3610_v63 = vpop.f32.mrf.mxu1 }
 0x1dd   : > { %3805 = vst [vmem:[#allocation3_spill] sm:$0xff] %v3608_v33  ;;  %3806 = vst [vmem:[#allocation4_spill] sm:$0xff] %v3610_v63 }
 0x1de   : > { %v3612_v55 = vpop.f32.mrf.mxu0  ;;  %v3614_v59 = vpop.f32.mrf.mxu1 }
 0x1df   : > { %3807 = vst [vmem:[#allocation5_spill] sm:$0xff] %v3612_v55  ;;  %3808 = vst [vmem:[#allocation6_spill] sm:$0xff] %v3614_v59  ;;  %v2501_v59 = vadd.f32 %v2500_v19, %v2499_v15 }
 0x1e0   : > { %v3616_v61 = vpop.f32.mrf.mxu0  ;;  %v3618_v35 = vpop.f32.mrf.mxu1 }
 0x1e2   : > { %v3620_v36 = vpop.f32.mrf.mxu0  ;;  %v3622_v50 = vpop.f32.mrf.mxu1 }
 0x1e3   : > { %3809 = vst [vmem:[#allocation7_spill] sm:$0xff] %v3622_v50 }
 0x1e4   : > { %v2573_v56 = vpop.f32.mrf.mxu0  ;;  %v2533_v52 = vpop.f32.mrf.mxu1 }
 0x1e6   : > { %v2574_v4 = vpop.f32.mrf.mxu0  ;;  %v2534_v31 = vpop.f32.mrf.mxu1 }
 0x1e7   : > { %v2535_v26 = vadd.f32 %v2534_v31, %v2533_v52  ;;  %v2575_v50 = vadd.f32 %v2574_v4, %v2573_v56 }
 0x1e8   : > { %v2576_v34 = vpop.f32.mrf.mxu0  ;;  %v2536_v38 = vpop.f32.mrf.mxu1 }
 0x1e9   : > { %v1594_v33 = vadd.f32 %v2535_v26, %v1529_v57 }
 0x1ea   : > { %v2577_v41 = vpop.f32.mrf.mxu0  ;;  %v2537_v8 = vpop.f32.mrf.mxu1 }
 0x1eb   : > { %v2538_v9 = vadd.f32 %v2537_v8, %v2536_v38  ;;  %v1659_v48 = vadd.f32 %v2575_v50, %v1594_v33  ;;  %v2578_v14 = vadd.f32 %v2577_v41, %v2576_v34 }
 0x1ec   : > { %v2579_v27 = vpop.f32.mrf.mxu0  ;;  %v2539_v37 = vpop.f32.mrf.mxu1 }
 0x1ed   : > { %v1597_v47 = vadd.f32 %v2538_v9, %v1532_v12 }
 0x1ee   : > { %v2580_v42 = vpop.f32.mrf.mxu0  ;;  %v2540_v54 = vpop.f32.mrf.mxu1 }
 0x1ef   : > { %v2581_v33 = vadd.f32 %v2580_v42, %v2579_v27  ;;  %v3813_v42 = vld [vmem:[#allocation7_spill] sm:$0xff] }
 0x1f0   : > { %v2582_v39 = vpop.f32.mrf.mxu0  ;;  %v2542_v44 = vpop.f32.mrf.mxu1 }
 0x1f2   : > { %v2543_v0 = vpop.f32.mrf.mxu1  ;;  %v2583_v3 = vpop.f32.mrf.mxu0 }
 0x1f3   : > { %v2544_v10 = vadd.f32 %v2543_v0, %v2542_v44  ;;  %v2584_v19 = vadd.f32 %v2583_v3, %v2582_v39 }
 0x1f4   : > { %v2545_v51 = vpop.f32.mrf.mxu1  ;;  %v3624_v40 = vpop.f32.mrf.mxu0 }
 0x1f5   : > { %3810 = vst [vmem:[#allocation8_spill] sm:$0xff] %v3624_v40  ;;  %v2461_v40 = vadd.f32 %v2460_v20, %v2459_v16  ;;  %v2507_v16 = vadd.f32 %v3596_v24, %v3592_v28  ;;  %v2467_v20 = vadd.f32 %v3598_v25, %v3594_v23  ;;  %v1662_v24 = vadd.f32 %v2578_v14, %v1597_v47 }
 0x1f6   : > { %v2546_v43 = vpop.f32.mrf.mxu1  ;;  %v3626_v53 = vpop.f32.mrf.mxu0 }
 0x1f7   : > { %3811 = vst [vmem:[#allocation9_spill] sm:$0xff] %v3626_v53  ;;  %v1540_v53 = vadd.f32 %v2504_v7, %v2464_v6  ;;  %v1537_v46 = vadd.f32 %v2501_v59, %v2461_v40  ;;  %v2510_v6 = vadd.f32 %v3604_v18, %v3600_v29  ;;  %v2470_v7 = vadd.f32 %v3606_v32, %v3602_v30  ;;  %v2360_v32 = vld [vmem:[%s3751_s6] ss:$0 sm:$0xff]  ;;  %v3815_v40 = vld [vmem:[#allocation5_spill] sm:$0xff] }
 0x1f8   : > { %v2548_v45 = vpop.f32.mrf.mxu1  ;;  %v2588_v63 = vpop.f32.mrf.mxu0  ;;  %v2547_v25 = vadd.f32 %v2546_v43, %v2545_v51  ;;  %v1545_v38 = vadd.f32 %v2507_v16, %v2467_v20  ;;  %v3814_v43 = vld [vmem:[#allocation3_spill] sm:$0xff] }
 0x1f9   : > { %v1605_v13 = vadd.f32 %v2544_v10, %v1540_v53  ;;  %v1548_v4 = vadd.f32 %v2510_v6, %v2470_v7  ;;  %v3817_v53 = vld [vmem:[#allocation6_spill] sm:$0xff] }
 0x1fa   : > { %v2549_v49 = vpop.f32.mrf.mxu1  ;;  %v2589_v52 = vpop.f32.mrf.mxu0  ;;  %v1610_v0 = vadd.f32 %v2547_v25, %v1545_v38 }
 0x1fb   : > { %v1670_v28 = vadd.f32 %v2584_v19, %v1605_v13  ;;  %v2550_v50 = vadd.f32 %v2549_v49, %v2548_v45  ;;  %v2513_v45 = vadd.f32 %v3815_v40, %v3814_v43  ;;  %v3816_v49 = vld [vmem:[#allocation4_spill] sm:$0xff]  ;;  %v2590_v2 = vadd.f32 %v2589_v52, %v2588_v63  ;;  %v2764_v40 = vld [vmem:[%s2881_s18] sm:$0xff] }
 0x1fc   : > { %v3628_v58 = vpop.f32.mrf.mxu1  ;;  %v2591_v21 = vpop.f32.mrf.mxu0  ;;  %v3818_v26 = vld [vmem:[#allocation8_spill] sm:$0xff] }
 0x1fd   : > { %3812 = vst [vmem:[#allocation10_spill] sm:$0xff] %v3628_v58  ;;  %v2541_v58 = vadd.f32 %v2540_v54, %v2539_v37  ;;  %v2516_v37 = vadd.f32 %v3620_v36, %v3616_v61  ;;  %v2476_v54 = vadd.f32 %v3813_v42, %v3618_v35  ;;  %v1613_v39 = vadd.f32 %v2550_v50, %v1548_v4  ;;  %v3822_v42 = vld [vmem:[#allocation2_spill] sm:$0xff] }
 0x1fe   : > { %v3630_v60 = vpop.f32.mrf.mxu1  ;;  %v2592_v30 = vpop.f32.mrf.mxu0  ;;  %v3819_v57 = vld [vmem:[#allocation9_spill] sm:$0xff] }
 0x1ff   : > { %v1602_v15 = vadd.f32 %v2541_v58, %v1537_v46  ;;  %v2473_v58 = vadd.f32 %v3817_v53, %v3816_v49  ;;  %v2587_v62 = vadd.f32 %v3819_v57, %v3818_v26  ;;  %v1678_v46 = vadd.f32 %v2590_v2, %v1613_v39  ;;  %v1965_v39 = vld [vmem:[%s3753_s8] sm:$0x3] }
 0x200   : > { %v2554_v55 = vpop.f32.mrf.mxu1  ;;  %v2594_v61 = vpop.f32.mrf.mxu0  ;;  %v2022_v57 = vunpack.c.h.bf16 %v2764_v40 }
 0x201   : > { %v1667_v56 = vadd.f32 %v2581_v33, %v1602_v15  ;;  %v1675_v15 = vadd.f32 %v2587_v62, %v1610_v0  ;;  %v1553_v16 = vadd.f32 %v2513_v45, %v2473_v58  ;;  %v2593_v33 = vadd.f32 %v2592_v30, %v2591_v21 }
 0x202   : > { %v2555_v11 = vpop.f32.mrf.mxu1  ;;  %v2595_v19 = vpop.f32.mrf.mxu0  ;;  %v2021_v45 = vunpack.c.l.bf16 %v2764_v40 }
 0x203   : > { %v2556_v9 = vadd.f32 %v2555_v11, %v2554_v55  ;;  %v3821_v55 = vmov 0   ;;  %v2596_v6 = vadd.f32 %v2595_v19, %v2594_v61 }
 0x204   : > { %v2627_v31 = vpop.f32.mrf.mxu1  ;;  %v3820_v13 = vld [vmem:[#allocation10_spill] sm:$0xff] }
 0x205   : > { %v1732_v41 = vadd.f32 %v2627_v31, %v1667_v56  ;;  %v1556_v31 = vadd.f32 %v2516_v37, %v2476_v54  ;;  %v1969_v54 = vsub.s32 0, %v3822_v42 }
 0x206   : > { %v1723_v1 = vpop.f32.mrf.mxu1 }
 0x207   : > { %v1724_v17 = vadd.f32 %v1723_v1, %v1659_v48  ;;  %v1763_v35 = vmul.f32 %v3643_v5, %v1732_v41  ;;  %v2553_v48 = vadd.f32 %v3630_v60, %v3820_v13  ;;  %v1621_v63 = vadd.f32 %v2556_v9, %v1556_v31  ;;  %v2765_v9 = vld [vmem:[%s2881_s18 + $0x8] sm:$0xff] }
 0x208   : > { %v2628_v22 = vpop.f32.mrf.mxu1 }
 0x209   : > { %v1761_v59 = vmul.f32 %v3643_v5, %v1724_v17  ;;  %v1735_v29 = vadd.f32 %v2628_v22, %v1670_v28  ;;  %v1778_v52 = vadd.f32 %v2360_v32, %v1763_v35  ;;  %v1618_v11 = vadd.f32 %v2553_v48, %v1553_v16 }
 0x20a   : > { %v1726_v23 = vpop.f32.mrf.mxu1  ;;  %v1686_v28 = vadd.f32 %v2596_v6, %v1621_v63  ;;  %v2023_v35 = vunpack.c.l.bf16 %v2765_v9 }
 0x20b   : > { %v1727_v18 = vadd.f32 %v1726_v23, %v1662_v24  ;;  %v1776_v8 = vadd.f32 %v2360_v32, %v1761_v59  ;;  %v1764_v3 = vmul.f32 %v3643_v5, %v1735_v29  ;;  %v1786_v59 = vmax.f32 %v1778_v52, 0.0 }
 0x20c   : > { %v2631_v34 = vpop.f32.mrf.mxu1  ;;  %v1683_v24 = vadd.f32 %v2593_v33, %v1618_v11 }
 0x20d   : > { %v1762_v27 = vmul.f32 %v3643_v5, %v1727_v18  ;;  %v1784_v10 = vmax.f32 %v1776_v8, 0.0  ;;  %v1779_v1 = vadd.f32 %v2360_v32, %v1764_v3 }
 0x20e   : > { %v1739_v44 = vpop.f32.mrf.mxu1  ;;  %v1748_v56 = vadd.f32 %v2631_v34, %v1683_v24 }
 0x20f   : > { %v1777_v51 = vadd.f32 %v2360_v32, %v1762_v27  ;;  %v1740_v20 = vadd.f32 %v1739_v44, %v1675_v15  ;;  %v1787_v7 = vmax.f32 %v1779_v1, 0.0  ;;  %v3679_v44 = vrot.slane %v1965_v39, %v1969_v54 }
 0x210   : > { %v2632_v36 = vpop.f32.mrf.mxu1  ;;  %v1767_v38 = vmul.f32 %v3643_v5, %v1748_v56 }
 0x211   : > { %v1785_v12 = vmax.f32 %v1777_v51, 0.0  ;;  %v1765_v60 = vmul.f32 %v3643_v5, %v1740_v20  ;;  %v1751_v50 = vadd.f32 %v2632_v36, %v1686_v28  ;;  %v1793_v25 = vpack.c.bf16 %v1787_v7, %v1786_v59 }
 0x212   : > { %v1742_v47 = vpop.f32.mrf.mxu1  ;;  %v1782_v8 = vadd.f32 %v2360_v32, %v1767_v38 }
 0x213   : > { %v1792_v14 = vpack.c.bf16 %v1785_v12, %v1784_v10  ;;  %v1743_v17 = vadd.f32 %v1742_v47, %v1678_v46  ;;  %v1780_v29 = vadd.f32 %v2360_v32, %v1765_v60  ;;  %v1768_v18 = vmul.f32 %v3643_v5, %v1751_v50  ;;  %v2767_v60 = vld [vmem:[%s2881_s18 + $0x18] sm:$0xff] }
 0x214   : > { %v1790_v37 = vmax.f32 %v1782_v8, 0.0  ;;  %v2024_v47 = vunpack.c.h.bf16 %v2765_v9  ;;  %v2027_v28 = vunpack.c.l.bf16 %v2767_v60  ;;  %v2768_v8 = vld [vmem:[%s2881_s18 + $0x20] sm:$0xff] }
 0x215   : > { %1925 = vmatmul.mubr.bf16.vlgmr.msra.gmra.mxu0 %v1792_v14  ;;  %v1766_v22 = vmul.f32 %v3643_v5, %v1743_v17  ;;  %v1788_v41 = vmax.f32 %v1780_v29, 0.0  ;;  %v1783_v21 = vadd.f32 %v2360_v32, %v1768_v18  ;;  %v1973_v5 = vsub.s32 1, %v3822_v42  ;;  %v2766_v17 = vld [vmem:[%s2881_s18 + $0x10] sm:$0xff] }
 0x216   : > { %1934 = vmatprep.mubr.bf16.mxu0 %v3821_v55  ;;  %v2025_v16 = vunpack.c.l.bf16 %v2766_v17  ;;  %v2026_v6 = vunpack.c.h.bf16 %v2766_v17  ;;  %v2028_v18 = vunpack.c.h.bf16 %v2767_v60 }
 0x217   : > { %v1781_v23 = vadd.f32 %v2360_v32, %v1766_v22  ;;  %v1791_v27 = vmax.f32 %v1783_v21, 0.0  ;;  %v1993_v32 = vld [vmem:[%s3754_s9] sm:$0x3]  ;;  %v3683_v3 = vrot.slane %v1965_v39, %v1973_v5 }
 0x218   : > { %v3681_v0 = vrot.slane %v1993_v32, %v1969_v54  ;;  %v3687_v49 = vrot.slane %v1993_v32, %v1973_v5  ;;  %v2030_v32 = vunpack.c.h.bf16 %v2768_v8 }
 0x219   : > { %v1789_v4 = vmax.f32 %v1781_v23, 0.0  ;;  %v1795_v34 = vpack.c.bf16 %v1791_v27, %v1790_v37  ;;  %v2029_v27 = vunpack.c.l.bf16 %v2768_v8 }
 0x21b   : > { %v1794_v30 = vpack.c.bf16 %v1789_v4, %v1788_v41 }
 0x21d   : > { %1935 = vmatmul.mubr.bf16.gmra.mxu0 %v1793_v25 }
 0x21e   : > { %1944 = vmatprep.mubr.bf16.mxu0 %v3821_v55 }
 0x225   : > { %1945 = vmatmul.mubr.bf16.gmra.mxu0 %v1794_v30 }
 0x226   : > { %1954 = vmatprep.mubr.bf16.mxu0 %v3821_v55 }
 0x22d   : > { %1955 = vmatmul.mubr.bf16.gmra.mxu0 %v1795_v34 }
 0x2d5   : > { %v1926_v51 = vpop.f32.mrf.mxu0 }
 0x2d6   : > { %v1977_v43 = vmul.f32 %v3679_v44, %v1926_v51 }
 0x2d7   : > { %v1928_v53 = vpop.f32.mrf.mxu0 }
 0x2d8   : > { %v2005_v58 = vadd.f32 %v3681_v0, %v1977_v43  ;;  %v1978_v26 = vmul.f32 %v3683_v3, %v1928_v53 }
 0x2d9   : > { %v1930_v62 = vpop.f32.mrf.mxu0 }
 0x2da   : > { %v2037_v2 = vadd.f32 %v2021_v45, %v2005_v58  ;;  %v2006_v61 = vadd.f32 %v3687_v49, %v1978_v26  ;;  %v1979_v36 = vmul.f32 %v3679_v44, %v1930_v62 }
 0x2db   : > { %v1932_v10 = vpop.f32.mrf.mxu0 }
 0x2dc   : > { %v2038_v12 = vadd.f32 %v2022_v57, %v2006_v61  ;;  %v2007_v31 = vadd.f32 %v3681_v0, %v1979_v36  ;;  %v1980_v46 = vmul.f32 %v3683_v3, %v1932_v10  ;;  %v2053_v13 = vmax.f32 %v2037_v2, 0.0  ;;  %v2769_v57 = vld [vmem:[%s2881_s18 + $0x28] sm:$0xff] }
 0x2dd   : > { %v1936_v48 = vpop.f32.mrf.mxu0  ;;  %v2031_v62 = vunpack.c.l.bf16 %v2769_v57  ;;  %v2032_v10 = vunpack.c.h.bf16 %v2769_v57 }
 0x2de   : > { %v2054_v1 = vmax.f32 %v2038_v12, 0.0  ;;  %v2039_v14 = vadd.f32 %v2023_v35, %v2007_v31  ;;  %v2008_v15 = vadd.f32 %v3687_v49, %v1980_v46  ;;  %v1981_v19 = vmul.f32 %v3679_v44, %v1936_v48 }
 0x2df   : > { %v1938_v63 = vpop.f32.mrf.mxu0 }
 0x2e0   : > { %v2389_v52 = vpack.c.bf16 %v2054_v1, %v2053_v13  ;;  %v2040_v20 = vadd.f32 %v2024_v47, %v2008_v15  ;;  %v2009_v55 = vadd.f32 %v3681_v0, %v1981_v19  ;;  %v1982_v11 = vmul.f32 %v3683_v3, %v1938_v63  ;;  %v2770_v13 = vld [vmem:[%s2881_s18 + $0x30] sm:$0xff] }
 0x2e1   : > { %v1940_v7 = vpop.f32.mrf.mxu0  ;;  %v2055_v22 = vmax.f32 %v2039_v14, 0.0  ;;  %v2033_v48 = vunpack.c.l.bf16 %v2770_v13  ;;  %v2034_v63 = vunpack.c.h.bf16 %v2770_v13 }
 0x2e2   : > { %2117 = vst [vmem:[%s3703_s12] sm:$0xff] %v2389_v52  ;;  %v2056_v33 = vmax.f32 %v2040_v20, 0.0  ;;  %v1983_v59 = vmul.f32 %v3679_v44, %v1940_v7  ;;  %v2041_v24 = vadd.f32 %v2025_v16, %v2009_v55  ;;  %v2010_v50 = vadd.f32 %v3687_v49, %v1982_v11  ;;  %v2771_v7 = vld [vmem:[%s2881_s18 + $0x38] sm:$0xff] }
 0x2e3   : > { %v1942_v23 = vpop.f32.mrf.mxu0 }
 0x2e4   : > { %v2390_v25 = vpack.c.bf16 %v2056_v33, %v2055_v22  ;;  %v2011_v56 = vadd.f32 %v3681_v0, %v1983_v59  ;;  %v1984_v29 = vmul.f32 %v3683_v3, %v1942_v23  ;;  %v2042_v4 = vadd.f32 %v2026_v6, %v2010_v50 }
 0x2e5   : > { %v1946_v38 = vpop.f32.mrf.mxu0  ;;  %v2057_v37 = vmax.f32 %v2041_v24, 0.0  ;;  %v2035_v22 = vunpack.c.l.bf16 %v2771_v7  ;;  %v2036_v23 = vunpack.c.h.bf16 %v2771_v7 }
 0x2e6   : > { %2118 = vst [vmem:[%s3703_s12 + $0x8] sm:$0xff] %v2390_v25  ;;  %v2043_v41 = vadd.f32 %v2027_v28, %v2011_v56  ;;  %v2012_v21 = vadd.f32 %v3687_v49, %v1984_v29  ;;  %v1985_v30 = vmul.f32 %v3679_v44, %v1946_v38  ;;  %v2058_v34 = vmax.f32 %v2042_v4, 0.0 }
 0x2e7   : > { %v1948_v42 = vpop.f32.mrf.mxu0 }
 0x2e8   : > { %v2044_v54 = vadd.f32 %v2028_v18, %v2012_v21  ;;  %v2013_v39 = vadd.f32 %v3681_v0, %v1985_v30  ;;  %v1986_v5 = vmul.f32 %v3683_v3, %v1948_v42  ;;  %v2391_v51 = vpack.c.bf16 %v2058_v34, %v2057_v37 }
 0x2e9   : > { %v2059_v43 = vmax.f32 %v2043_v41, 0.0  ;;  %v1950_v40 = vpop.f32.mrf.mxu0 }
 0x2ea   : > { %v2060_v45 = vmax.f32 %v2044_v54, 0.0  ;;  %v2045_v53 = vadd.f32 %v2029_v27, %v2013_v39  ;;  %v2014_v58 = vadd.f32 %v3687_v49, %v1986_v5  ;;  %v1987_v26 = vmul.f32 %v3679_v44, %v1950_v40  ;;  %2119 = vst [vmem:[%s3703_s12 + $0x10] sm:$0xff] %v2391_v51 }
 0x2eb   : > { %v1952_v2 = vpop.f32.mrf.mxu0 }
 0x2ec   : > { %v2392_v61 = vpack.c.bf16 %v2060_v45, %v2059_v43  ;;  %v2046_v36 = vadd.f32 %v2030_v32, %v2014_v58  ;;  %v2015_v9 = vadd.f32 %v3681_v0, %v1987_v26  ;;  %v1988_v35 = vmul.f32 %v3683_v3, %v1952_v2 }
 0x2ed   : > { %v1956_v12 = vpop.f32.mrf.mxu0  ;;  %v2061_v31 = vmax.f32 %v2045_v53, 0.0 }
 0x2ee   : > { %2120 = vst [vmem:[%s3703_s12 + $0x18] sm:$0xff] %v2392_v61  ;;  %v2062_v46 = vmax.f32 %v2046_v36, 0.0  ;;  %v1989_v47 = vmul.f32 %v3679_v44, %v1956_v12  ;;  %v2047_v1 = vadd.f32 %v2031_v62, %v2015_v9  ;;  %v2016_v14 = vadd.f32 %v3687_v49, %v1988_v35 }
 0x2ef   : > { %v1958_v15 = vpop.f32.mrf.mxu0 }
 0x2f0   : > { %v2393_v19 = vpack.c.bf16 %v2062_v46, %v2061_v31  ;;  %v2017_v17 = vadd.f32 %v3681_v0, %v1989_v47  ;;  %v1990_v16 = vmul.f32 %v3683_v3, %v1958_v15  ;;  %v2048_v52 = vadd.f32 %v2032_v10, %v2016_v14 }
 0x2f1   : > { %v1960_v20 = vpop.f32.mrf.mxu0  ;;  %v2063_v33 = vmax.f32 %v2047_v1, 0.0 }
 0x2f2   : > { %2121 = vst [vmem:[%s3703_s12 + $0x20] sm:$0xff] %v2393_v19  ;;  %v2049_v55 = vadd.f32 %v2033_v48, %v2017_v17  ;;  %v2018_v11 = vadd.f32 %v3687_v49, %v1990_v16  ;;  %v1991_v6 = vmul.f32 %v3679_v44, %v1960_v20  ;;  %v2064_v59 = vmax.f32 %v2048_v52, 0.0 }
 0x2f3   : > { %v1962_v60 = vpop.f32.mrf.mxu0 }
 0x2f4   : > { %v2050_v28 = vadd.f32 %v2034_v63, %v2018_v11  ;;  %v2019_v24 = vadd.f32 %v3681_v0, %v1991_v6  ;;  %v1992_v50 = vmul.f32 %v3683_v3, %v1962_v60  ;;  %v2394_v25 = vpack.c.bf16 %v2064_v59, %v2063_v33 }
 0x2f5   : > { %v2065_v56 = vmax.f32 %v2049_v55, 0.0 }
 0x2f6   : > { %v2066_v29 = vmax.f32 %v2050_v28, 0.0  ;;  %v2051_v18 = vadd.f32 %v2035_v22, %v2019_v24  ;;  %v2020_v4 = vadd.f32 %v3687_v49, %v1992_v50  ;;  %2122 = vst [vmem:[%s3703_s12 + $0x28] sm:$0xff] %v2394_v25 }
 0x2f8   : > { %v2395_v44 = vpack.c.bf16 %v2066_v29, %v2065_v56  ;;  %v2052_v38 = vadd.f32 %v2036_v23, %v2020_v4  ;;  %v2067_v41 = vmax.f32 %v2051_v18, 0.0 }
 0x2fa   : > { %2123 = vst [vmem:[%s3703_s12 + $0x30] sm:$0xff] %v2395_v44  ;;  %v2068_v21 = vmax.f32 %v2052_v38, 0.0 }
 0x2fc   : > { %v2396_v30 = vpack.c.bf16 %v2068_v21, %v2067_v41 }
 0x2fe   : > { %2124 = vst [vmem:[%s3703_s12 + $0x38] sm:$0xff] %v2396_v30 }
 0x2ff PF: > { %s20_s13 = sadd.s32 1, %s2778_s13  }
 0x300   : > { %p17_p4 = scmp.ge.s32.totalorder %s20_s13, 4  }
 0x302   :  { %19 = sbr.rel (!%p17_p4) target bundleno = 1 (0x1), region = 90 }

// kernel: resnet50_base_forward.19
= control target key start
LH: loop header
LB: loop body
LE: loop exit
PB: predicated region body
PF: predicated region fallthrough
CT: control target
= control target key end

     0   :  { %s992_s1 = inlined_call_operand.vmem [shape: bf16[256,128], index: 1, kind: input, shape index: {}]   ;;  %s993_s0 = inlined_call_operand.vmem [shape: bf16[128,256], index: 0, kind: input, shape index: {}]   ;;  %s994_s2 = inlined_call_operand.vmem [shape: f32[1,128], index: 2, kind: input, shape index: {}]   ;;  %s995_s3 = inlined_call_operand.vmem [shape: f32[1,128], index: 3, kind: input, shape index: {}]   ;;  %s996_s4 = inlined_call_operand.vmem [shape: bf16[128,128], index: 4, kind: output, shape index: {}]  }
   0x1   :  { %v765_v0 = vld [vmem:[%s992_s1 + $0x78] sm:$0xff]   ;;  %v767_v2 = vld [vmem:[%s992_s1 + $0x70] sm:$0xff]   ;;  %v769_v4 = vld [vmem:[%s992_s1 + $0x68] sm:$0xff]  }
   0x2   :  { %v766_v1 = vld [vmem:[%s992_s1 + $0x38] sm:$0xff]   ;;  %685 = vmatprep.subr.bf16.mxu0 %v765_v0  ;;  %749 = vmatprep.subr.bf16.mxu1 %v765_v0  ;;  %v768_v3 = vld [vmem:[%s992_s1 + $0x30] sm:$0xff]   ;;  %v770_v5 = vld [vmem:[%s992_s1 + $0x28] sm:$0xff]  }
   0x3   :  { %686 = vmatpush3.bf16.msra.mxu0 %v766_v1  ;;  %757 = vmatpush3.bf16.msra.mxu1 %v766_v1  ;;  %v771_v6 = vld [vmem:[%s992_s1 + $0x60] sm:$0xff]   ;;  %v773_v8 = vld [vmem:[%s992_s1 + $0x58] sm:$0xff]   ;;  %v775_v10 = vld [vmem:[%s992_s1 + $0x50] sm:$0xff]  }
   0x4   :  { %687 = vmatprep.subr.bf16.mxu0 %v767_v2  ;;  %750 = vmatprep.subr.bf16.mxu1 %v767_v2  ;;  %v772_v7 = vld [vmem:[%s992_s1 + $0x20] sm:$0xff]   ;;  %v774_v9 = vld [vmem:[%s992_s1 + $0x18] sm:$0xff]   ;;  %v776_v13 = vld [vmem:[%s992_s1 + $0x10] sm:$0xff]  }
   0x5   :  { %v783_v11 = vld [vmem:[%s993_s0 + $0x4] ss:$8 sps:$4 sm:$0xff]   ;;  %v781_v18 = vld [vmem:[%s993_s0] ss:$8 sps:$4 sm:$0xff]   ;;  %v787_v20 = vld [vmem:[%s993_s0 + $0x14] ss:$8 sps:$4 sm:$0xff]  }
   0x6   :  { %v786_v12 = vld [vmem:[%s993_s0 + $0x44] ss:$8 sps:$4 sm:$0xff]   ;;  %310 = vmatprep.mubr.bf16.mxu0 %v783_v11  ;;  %v784_v19 = vld [vmem:[%s993_s0 + $0x40] ss:$8 sps:$4 sm:$0xff]   ;;  %v789_v21 = vld [vmem:[%s993_s0 + $0x54] ss:$8 sps:$4 sm:$0xff]  }
   0x7   :  { %688 = vmatpush3.bf16.msra.mxu0 %v768_v3  ;;  %758 = vmatpush3.bf16.msra.mxu1 %v768_v3  ;;  %v777_v14 = vld [vmem:[%s992_s1 + $0x48] sm:$0xff]   ;;  %v779_v16 = vld [vmem:[%s992_s1 + $0x40] sm:$0xff]   ;;  %v791_v22 = vld [vmem:[%s993_s0 + $0x10] ss:$8 sps:$4 sm:$0xff]  }
   0x8   :  { %689 = vmatprep.subr.bf16.mxu0 %v769_v4  ;;  %751 = vmatprep.subr.bf16.mxu1 %v769_v4  ;;  %v778_v15 = vld [vmem:[%s992_s1 + $0x8] sm:$0xff]   ;;  %v780_v17 = vld [vmem:[%s992_s1] sm:$0xff]   ;;  %v792_v23 = vld [vmem:[%s993_s0 + $0x50] ss:$8 sps:$4 sm:$0xff]  }
   0x9   :  { %342 = vmatprep.mubr.bf16.mxu1 %v786_v12  ;;  %v793_v24 = vld [vmem:[%s993_s0 + $0x24] ss:$8 sps:$4 sm:$0xff]   ;;  %v797_v26 = vld [vmem:[%s993_s0 + $0x20] ss:$8 sps:$4 sm:$0xff]   ;;  %v799_v28 = vld [vmem:[%s993_s0 + $0x34] ss:$8 sps:$4 sm:$0xff]  }
   0xa   :  { %v795_v25 = vld [vmem:[%s993_s0 + $0x64] ss:$8 sps:$4 sm:$0xff]   ;;  %v798_v27 = vld [vmem:[%s993_s0 + $0x60] ss:$8 sps:$4 sm:$0xff]   ;;  %v801_v29 = vld [vmem:[%s993_s0 + $0x74] ss:$8 sps:$4 sm:$0xff]  }
   0xb   :  { %690 = vmatpush3.bf16.msra.mxu0 %v770_v5  ;;  %759 = vmatpush3.bf16.msra.mxu1 %v770_v5  ;;  %v803_v30 = vld [vmem:[%s993_s0 + $0x30] ss:$8 sps:$4 sm:$0xff]   ;;  %v929_v35 = vld [vmem:[%s994_s2] ss:$0 sm:$0xff] }
   0xc   :  { %691 = vmatprep.subr.bf16.mxu0 %v771_v6  ;;  %752 = vmatprep.subr.bf16.mxu1 %v771_v6  ;;  %v804_v31 = vld [vmem:[%s993_s0 + $0x70] ss:$8 sps:$4 sm:$0xff]   ;;  %v936_v43 = vld [vmem:[%s995_s3] ss:$0 sm:$0xff] }
   0xf   :  { %692 = vmatpush3.bf16.msra.mxu0 %v772_v7  ;;  %760 = vmatpush3.bf16.msra.mxu1 %v772_v7 }
  0x10   :  { %693 = vmatprep.subr.bf16.mxu0 %v773_v8  ;;  %753 = vmatprep.subr.bf16.mxu1 %v773_v8 }
  0x13   :  { %694 = vmatpush3.bf16.msra.mxu0 %v774_v9  ;;  %761 = vmatpush3.bf16.msra.mxu1 %v774_v9 }
  0x14   :  { %695 = vmatprep.subr.bf16.mxu0 %v775_v10  ;;  %754 = vmatprep.subr.bf16.mxu1 %v775_v10 }
  0x17   :  { %696 = vmatpush3.bf16.msra.mxu0 %v776_v13  ;;  %762 = vmatpush3.bf16.msra.mxu1 %v776_v13 }
  0x18   :  { %697 = vmatprep.subr.bf16.mxu0 %v777_v14  ;;  %755 = vmatprep.subr.bf16.mxu1 %v777_v14 }
  0x1b   :  { %698 = vmatpush3.bf16.msra.mxu0 %v778_v15  ;;  %763 = vmatpush3.bf16.msra.mxu1 %v778_v15 }
  0x1c   :  { %699 = vmatprep.subr.bf16.mxu0 %v779_v16  ;;  %756 = vmatprep.subr.bf16.mxu1 %v779_v16 }
  0x1f   :  { %700 = vmatpush3.bf16.msra.mxu0 %v780_v17  ;;  %764 = vmatpush3.bf16.msra.mxu1 %v780_v17 }
  0x22   :  { %311 = vmatmul.mubr.bf16.vlgmr.msra.gmra.mxu0 %v781_v18  ;;  %343 = vmatmul.mubr.bf16.vlgmr.msra.gmra.mxu1 %v784_v19 }
  0x23   :  { %318 = vmatprep.mubr.bf16.mxu0 %v787_v20  ;;  %350 = vmatprep.mubr.bf16.mxu1 %v789_v21 }
  0x2a   :  { %319 = vmatmul.mubr.bf16.gmra.mxu0 %v791_v22  ;;  %351 = vmatmul.mubr.bf16.gmra.mxu1 %v792_v23 }
  0x2b   :  { %326 = vmatprep.mubr.bf16.mxu0 %v793_v24  ;;  %358 = vmatprep.mubr.bf16.mxu1 %v795_v25 }
  0x32   :  { %327 = vmatmul.mubr.bf16.gmra.mxu0 %v797_v26  ;;  %359 = vmatmul.mubr.bf16.gmra.mxu1 %v798_v27 }
  0x33   :  { %334 = vmatprep.mubr.bf16.mxu0 %v799_v28  ;;  %366 = vmatprep.mubr.bf16.mxu1 %v801_v29 }
  0x3a   :  { %335 = vmatmul.mubr.bf16.gmra.mxu0 %v803_v30  ;;  %367 = vmatmul.mubr.bf16.gmra.mxu1 %v804_v31 }
  0xe2   :  { %v701_v32 = vpop.f32.mrf.mxu0  ;;  %v725_v33 = vpop.f32.mrf.mxu1 }
  0xe4   :  { %v702_v34 = vpop.f32.mrf.mxu0  ;;  %v726_v36 = vpop.f32.mrf.mxu1 }
  0xe5   :  { %v703_v37 = vadd.f32 %v702_v34, %v701_v32  ;;  %v727_v38 = vadd.f32 %v726_v36, %v725_v33 }
  0xe6   :  { %v704_v39 = vpop.f32.mrf.mxu0  ;;  %v728_v40 = vpop.f32.mrf.mxu1 }
  0xe7   :  { %v433_v41 = vmul.f32 %v703_v37, %v929_v35  ;;  %v441_v42 = vmul.f32 %v727_v38, %v929_v35 }
  0xe8   :  { %v705_v44 = vpop.f32.mrf.mxu0  ;;  %v729_v45 = vpop.f32.mrf.mxu1 }
  0xe9   :  { %v706_v46 = vadd.f32 %v705_v44, %v704_v39  ;;  %v730_v47 = vadd.f32 %v729_v45, %v728_v40  ;;  %v456_v50 = vadd.f32 %v936_v43, %v433_v41  ;;  %v464_v51 = vadd.f32 %v936_v43, %v441_v42 }
  0xea   :  { %v707_v48 = vpop.f32.mrf.mxu0  ;;  %v731_v49 = vpop.f32.mrf.mxu1 }
  0xeb   :  { %v434_v52 = vmul.f32 %v706_v46, %v929_v35  ;;  %v442_v53 = vmul.f32 %v730_v47, %v929_v35  ;;  %v472_v62 = vmax.f32 %v456_v50, 0.0  ;;  %v480_v63 = vmax.f32 %v464_v51, 0.0 }
  0xec   :  { %v708_v54 = vpop.f32.mrf.mxu0  ;;  %v732_v55 = vpop.f32.mrf.mxu1 }
  0xed   :  { %v457_v56 = vadd.f32 %v936_v43, %v434_v52  ;;  %v465_v57 = vadd.f32 %v936_v43, %v442_v53  ;;  %v709_v58 = vadd.f32 %v708_v54, %v707_v48  ;;  %v733_v59 = vadd.f32 %v732_v55, %v731_v49 }
  0xee   :  { %v710_v60 = vpop.f32.mrf.mxu0  ;;  %v734_v61 = vpop.f32.mrf.mxu1 }
  0xef   :  { %v473_v0 = vmax.f32 %v457_v56, 0.0  ;;  %v481_v1 = vmax.f32 %v465_v57, 0.0  ;;  %v435_v2 = vmul.f32 %v709_v58, %v929_v35  ;;  %v443_v3 = vmul.f32 %v733_v59, %v929_v35 }
  0xf0   :  { %v711_v4 = vpop.f32.mrf.mxu0  ;;  %v735_v5 = vpop.f32.mrf.mxu1 }
  0xf1   :  { %v641_v6 = vpack.c.bf16 %v473_v0, %v472_v62  ;;  %v661_v7 = vpack.c.bf16 %v481_v1, %v480_v63  ;;  %v712_v8 = vadd.f32 %v711_v4, %v710_v60  ;;  %v736_v9 = vadd.f32 %v735_v5, %v734_v61 }
  0xf2   :  { %v713_v10 = vpop.f32.mrf.mxu0  ;;  %v737_v11 = vpop.f32.mrf.mxu1  ;;  %v458_v12 = vadd.f32 %v936_v43, %v435_v2  ;;  %v466_v13 = vadd.f32 %v936_v43, %v443_v3 }
  0xf3   :  { %642 = vst [vmem:[%s996_s4] sm:$0xff] %v641_v6   ;;  %681 = vst [vmem:[%s996_s4 + $0x20] sm:$0xff] %v661_v7   ;;  %v436_v14 = vmul.f32 %v712_v8, %v929_v35  ;;  %v444_v15 = vmul.f32 %v736_v9, %v929_v35 }
  0xf4   :  { %v714_v16 = vpop.f32.mrf.mxu0  ;;  %v738_v17 = vpop.f32.mrf.mxu1  ;;  %v474_v26 = vmax.f32 %v458_v12, 0.0  ;;  %v482_v27 = vmax.f32 %v466_v13, 0.0 }
  0xf5   :  { %v715_v18 = vadd.f32 %v714_v16, %v713_v10  ;;  %v739_v19 = vadd.f32 %v738_v17, %v737_v11  ;;  %v459_v20 = vadd.f32 %v936_v43, %v436_v14  ;;  %v467_v21 = vadd.f32 %v936_v43, %v444_v15 }
  0xf6   :  { %v716_v22 = vpop.f32.mrf.mxu0  ;;  %v740_v23 = vpop.f32.mrf.mxu1 }
  0xf7   :  { %v437_v24 = vmul.f32 %v715_v18, %v929_v35  ;;  %v445_v25 = vmul.f32 %v739_v19, %v929_v35  ;;  %v475_v28 = vmax.f32 %v459_v20, 0.0  ;;  %v483_v29 = vmax.f32 %v467_v21, 0.0 }
  0xf8   :  { %v717_v30 = vpop.f32.mrf.mxu0  ;;  %v741_v31 = vpop.f32.mrf.mxu1 }
  0xf9   :  { %v718_v32 = vadd.f32 %v717_v30, %v716_v22  ;;  %v742_v33 = vadd.f32 %v741_v31, %v740_v23  ;;  %v646_v34 = vpack.c.bf16 %v475_v28, %v474_v26  ;;  %v666_v36 = vpack.c.bf16 %v483_v29, %v482_v27 }
  0xfa   :  { %v719_v37 = vpop.f32.mrf.mxu0  ;;  %v743_v38 = vpop.f32.mrf.mxu1  ;;  %v460_v39 = vadd.f32 %v936_v43, %v437_v24  ;;  %v468_v40 = vadd.f32 %v936_v43, %v445_v25 }
  0xfb   :  { %v438_v41 = vmul.f32 %v718_v32, %v929_v35  ;;  %v446_v42 = vmul.f32 %v742_v33, %v929_v35  ;;  %678 = vst [vmem:[%s996_s4 + $0x8] sm:$0xff] %v646_v34   ;;  %682 = vst [vmem:[%s996_s4 + $0x28] sm:$0xff] %v666_v36  }
  0xfc   :  { %v720_v44 = vpop.f32.mrf.mxu0  ;;  %v744_v45 = vpop.f32.mrf.mxu1  ;;  %v476_v52 = vmax.f32 %v460_v39, 0.0  ;;  %v484_v53 = vmax.f32 %v468_v40, 0.0 }
  0xfd   :  { %v461_v46 = vadd.f32 %v936_v43, %v438_v41  ;;  %v469_v47 = vadd.f32 %v936_v43, %v446_v42  ;;  %v721_v48 = vadd.f32 %v720_v44, %v719_v37  ;;  %v745_v49 = vadd.f32 %v744_v45, %v743_v38 }
  0xfe   :  { %v722_v50 = vpop.f32.mrf.mxu0  ;;  %v746_v51 = vpop.f32.mrf.mxu1 }
  0xff   :  { %v477_v54 = vmax.f32 %v461_v46, 0.0  ;;  %v485_v55 = vmax.f32 %v469_v47, 0.0  ;;  %v439_v56 = vmul.f32 %v721_v48, %v929_v35  ;;  %v447_v57 = vmul.f32 %v745_v49, %v929_v35 }
 0x100   :  { %v723_v58 = vpop.f32.mrf.mxu0  ;;  %v747_v59 = vpop.f32.mrf.mxu1 }
 0x101   :  { %v651_v60 = vpack.c.bf16 %v477_v54, %v476_v52  ;;  %v671_v61 = vpack.c.bf16 %v485_v55, %v484_v53  ;;  %v724_v62 = vadd.f32 %v723_v58, %v722_v50  ;;  %v748_v63 = vadd.f32 %v747_v59, %v746_v51 }
 0x102   :  { %v462_v0 = vadd.f32 %v936_v43, %v439_v56  ;;  %v470_v1 = vadd.f32 %v936_v43, %v447_v57 }
 0x103   :  { %679 = vst [vmem:[%s996_s4 + $0x10] sm:$0xff] %v651_v60   ;;  %683 = vst [vmem:[%s996_s4 + $0x30] sm:$0xff] %v671_v61   ;;  %v440_v2 = vmul.f32 %v724_v62, %v929_v35  ;;  %v448_v3 = vmul.f32 %v748_v63, %v929_v35 }
 0x104   :  { %v478_v6 = vmax.f32 %v462_v0, 0.0  ;;  %v486_v7 = vmax.f32 %v470_v1, 0.0 }
 0x105   :  { %v463_v4 = vadd.f32 %v936_v43, %v440_v2  ;;  %v471_v5 = vadd.f32 %v936_v43, %v448_v3 }
 0x107   :  { %v479_v8 = vmax.f32 %v463_v4, 0.0  ;;  %v487_v9 = vmax.f32 %v471_v5, 0.0 }
 0x109   :  { %v656_v10 = vpack.c.bf16 %v479_v8, %v478_v6  ;;  %v676_v11 = vpack.c.bf16 %v487_v9, %v486_v7 }
 0x10b   :  { %680 = vst [vmem:[%s996_s4 + $0x18] sm:$0xff] %v656_v10   ;;  %684 = vst [vmem:[%s996_s4 + $0x38] sm:$0xff] %v676_v11  }

// kernel: resnet50_base_forward.16
= control target key start
LH: loop header
LB: loop body
LE: loop exit
PB: predicated region body
PF: predicated region fallthrough
CT: control target
= control target key end

     0   :  { %s3071_s25 = smov 0   ;;  %s4019_s0 = inlined_call_operand.vmem [shape: bf16[2,64,128], index: 0, kind: input, shape index: {}]   ;;  %s4020_s1 = inlined_call_operand.vmem [shape: bf16[128,128], index: 1, kind: input, shape index: {}]   ;;  %s4021_s2 = inlined_call_operand.vmem [shape: f32[1,128], index: 2, kind: input, shape index: {}]   ;;  %s4022_s3 = inlined_call_operand.vmem [shape: f32[1,128], index: 3, kind: input, shape index: {}]   ;;  %s4023_s4 = inlined_call_operand.vmem [shape: bf16[1152,128], index: 4, kind: input, shape index: {}]   ;;  %s4024_s5 = inlined_call_operand.vmem [shape: f32[1,128], index: 5, kind: input, shape index: {}]   ;;  %s4025_s6 = inlined_call_operand.vmem [shape: f32[1,128], index: 6, kind: input, shape index: {}]   ;;  %s4026_s7 = inlined_call_operand.vmem [shape: bf16[128,256], index: 7, kind: input, shape index: {}]   ;;  %s4027_s8 = inlined_call_operand.vmem [shape: f32[1,256], index: 8, kind: input, shape index: {}]   ;;  %s4028_s9 = inlined_call_operand.vmem [shape: f32[1,256], index: 9, kind: input, shape index: {}]   ;;  %s4029_s10 = inlined_call_operand.vmem [shape: bf16[128,256], index: 10, kind: input, shape index: {}]   ;;  %s4030_s11 = inlined_call_operand.vmem [shape: f32[1,256], index: 11, kind: input, shape index: {}]   ;;  %s4031_s12 = inlined_call_operand.vmem [shape: f32[1,256], index: 12, kind: input, shape index: {}]   ;;  %s4032_s13 = inlined_call_operand.vmem [shape: bf16[2,64,256], index: 13, kind: output, shape index: {}]  }
   0x1 LB: > { %s2390_s26 = sadd.s32 4294967295, %s2996_s25   ;;  %p2394_p0 = scmp.ge.s32.totalorder %s2996_s25, 1  ;;  %s2996_s25 = sphi %s3071_s25, %s23_s25  }
   0x2   : > { %p387_p1 = scmp.lt.s32.totalorder %s2996_s25, 3 }
   0x4   : > { %p388_p2 = pnand %p2394_p0, %p387_p1 }
   0x6   : > { %391 = sbr.rel (%p388_p2) target bundleno = 765 (0x2fd), region = 72 }
   0xb   : > { %v2854_v0 = vld [vmem:[%s4020_s1 + $0x38] sm:$0xff]   ;;  %p431_p3 = scmp.lt.s32.totalorder %s2390_s26, 1  ;;  %v2855_v1 = vld [vmem:[%s4020_s1 + $0x30] sm:$0xff]   ;;  %v2856_v2 = vld [vmem:[%s4020_s1 + $0x28] sm:$0xff]   ;;  %v676_v46 = vlaneseq  ;;  %vm649_vm0 = vcmask 1040384   ;;  %vm718_vm1 = vcmask 1045504  }
   0xc   : > { %2795 = vmatprep.subr.bf16.mxu0 %v2854_v0  ;;  %v2857_v3 = vld [vmem:[%s4020_s1 + $0x20] sm:$0xff]   ;;  %v2858_v5 = vld [vmem:[%s4020_s1 + $0x18] sm:$0xff]   ;;  %v2859_v8 = vld [vmem:[%s4020_s1 + $0x10] sm:$0xff]   ;;  %vm790_vm2 = vcmask 1046528   ;;  %vm2999_vm14 = vmmov 1  }
   0xd   : > { %s4093_s26 = smov (!%p431_p3, %s2390_s26), 1  ;;  %2796 = vmatpush3.bf16.msra.mxu0 %v2854_v0  ;;  %v2866_v6 = vld [vmem:[%s4023_s4 + $0x78] sm:$0xff]   ;;  %v2870_v9 = vld [vmem:[%s4023_s4 + $0x70] sm:$0xff]   ;;  %v2860_v11 = vld [vmem:[%s4020_s1 + $0x8] sm:$0xff]   ;;  %v3217_v47 = vshrl.u32 %v676_v46, 7  ;;  %v2998_v0 = vmov 0.0  }
   0xe   : > { %2797 = vmatprep.subr.bf16.mxu0 %v2855_v1  ;;  %s2601_s16 = sshll.u32 %s4093_s26, 5  ;;  %2623 = vmatprep.subr.bf16.mxu1 %v2866_v6  ;;  %v2868_v7 = vld [vmem:[%s4023_s4 + $0x38] sm:$0xff]   ;;  %v2872_v10 = vld [vmem:[%s4023_s4 + $0x30] sm:$0xff]   ;;  %v2874_v12 = vld [vmem:[%s4023_s4 + $0x68] sm:$0xff]   ;;  %s2602_s14 = sshll.u32 %s4093_s26, 6 }
   0xf   : > { %s3094_s19 = scalar_lea.vmem %s4019_s0, %s2601_s16  ;;  %2624 = vmatpush3.bf16.msra.mxu1 %v2868_v7  ;;  %v2876_v13 = vld [vmem:[%s4023_s4 + $0x28] sm:$0xff]   ;;  %v2861_v14 = vld [vmem:[%s4020_s1] sm:$0xff]   ;;  %v2867_v15 = vld [vmem:[%s4023_s4 + $0xf8] sm:$0xff]   ;;  %4037 = vst [vmem:[#allocation2_spill] sm:$0xff] %v3217_v47  ;;  %v678_v50 = vadd.s32 8, %v3217_v47  ;;  %v685_v56 = vand.u32 7, %v3217_v47  ;;  %s3960_s16 = scalar_lea.vmem %s4032_s13, %s2602_s14 }
  0x10   : > { %v2862_v4 = vld [vmem:[%s3094_s19] sm:$0xff]   ;;  %2625 = vmatprep.subr.bf16.mxu1 %v2870_v9  ;;  %v2863_v16 = vld [vmem:[%s3094_s19 + $0x8] sm:$0xff]   ;;  %v2864_v17 = vld [vmem:[%s3094_s19 + $0x10] sm:$0xff]   ;;  %v679_v58 = vadd.s32 16, %v3217_v47  ;;  %v680_v59 = vadd.s32 24, %v3217_v47 }
  0x11   : > { %2798 = vmatpush3.bf16.msra.mxu0 %v2855_v1  ;;  %2811 = vmatprep.mubr.bf16.mxu0 %v2862_v4  ;;  %v2869_v18 = vld [vmem:[%s4023_s4 + $0xb8] sm:$0xff]   ;;  %v2871_v19 = vld [vmem:[%s4023_s4 + $0xf0] sm:$0xff]   ;;  %v2875_v21 = vld [vmem:[%s4023_s4 + $0xe8] sm:$0xff]   ;;  %v686_v57 = vand.u32 7, %v678_v50  ;;  %v3239_v1 = vrot.slane %v2998_v0, 2  ;;  %vm3246_vm3 = vcmp.ge.s32.totalorder %v685_v56, 1 }
  0x12   : > { %2799 = vmatprep.subr.bf16.mxu0 %v2856_v2  ;;  %v2873_v20 = vld [vmem:[%s4023_s4 + $0xb0] sm:$0xff]   ;;  %v2865_v22 = vld [vmem:[%s3094_s19 + $0x18] sm:$0xff]   ;;  %v2877_v23 = vld [vmem:[%s4023_s4 + $0xa8] sm:$0xff]   ;;  %v687_v9 = vand.u32 7, %v679_v58  ;;  %vm3255_vm5 = vcmp.lt.s32.totalorder %v685_v56, 7 }
  0x13   : > { %2626 = vmatpush3.bf16.msra.mxu1 %v2872_v10  ;;  %v2879_v24 = vld [vmem:[%s4023_s4 + $0xe0] sm:$0xff]   ;;  %v2883_v28 = vld [vmem:[%s4023_s4 + $0xd8] sm:$0xff]   ;;  %v2887_v32 = vld [vmem:[%s4023_s4 + $0xd0] sm:$0xff]   ;;  %vm3250_vm4 = vcmp.ge.s32.totalorder %v686_v57, 1  ;;  %v688_v10 = vand.u32 7, %v680_v59  ;;  %vm3259_vm6 = vcmp.lt.s32.totalorder %v686_v57, 7 }
  0x14   : > { %2627 = vmatprep.subr.bf16.mxu1 %v2874_v12  ;;  %v2878_v25 = vld [vmem:[%s4023_s4 + $0x60] sm:$0xff]   ;;  %v2882_v29 = vld [vmem:[%s4023_s4 + $0x58] sm:$0xff]   ;;  %v2886_v33 = vld [vmem:[%s4023_s4 + $0x50] sm:$0xff]   ;;  %vm3272_vm7 = vcmp.ge.s32.totalorder %v687_v9, 1  ;;  %vm3294_vm9 = vcmp.lt.s32.totalorder %v687_v9, 7 }
  0x15   : > { %2800 = vmatpush3.bf16.msra.mxu0 %v2856_v2  ;;  %v2881_v26 = vld [vmem:[%s4023_s4 + $0xa0] sm:$0xff]   ;;  %v2885_v30 = vld [vmem:[%s4023_s4 + $0x98] sm:$0xff]   ;;  %v2889_v34 = vld [vmem:[%s4023_s4 + $0x90] sm:$0xff]   ;;  %v3242_v2 = vrot.slane %v2998_v0, 1  ;;  %vm3276_vm8 = vcmp.ge.s32.totalorder %v688_v10, 1  ;;  %vm3298_vm10 = vcmp.lt.s32.totalorder %v688_v10, 7 }
  0x16   : > { %2801 = vmatprep.subr.bf16.mxu0 %v2857_v3  ;;  %v2880_v27 = vld [vmem:[%s4023_s4 + $0x20] sm:$0xff]   ;;  %v2884_v31 = vld [vmem:[%s4023_s4 + $0x18] sm:$0xff]   ;;  %v2888_v35 = vld [vmem:[%s4023_s4 + $0x10] sm:$0xff]  }
  0x17   : > { %2628 = vmatpush3.bf16.msra.mxu1 %v2876_v13  ;;  %v2891_v36 = vld [vmem:[%s4023_s4 + $0xc8] sm:$0xff]   ;;  %v2895_v40 = vld [vmem:[%s4023_s4 + $0xc0] sm:$0xff]   ;;  %v2899_v44 = vld [vmem:[%s4023_s4 + $0x1f8] sm:$0xff]  }
  0x18   : > { %2629 = vmatprep.subr.bf16.mxu1 %v2878_v25  ;;  %v2890_v37 = vld [vmem:[%s4023_s4 + $0x48] sm:$0xff]   ;;  %v2894_v41 = vld [vmem:[%s4023_s4 + $0x40] sm:$0xff]   ;;  %v2898_v45 = vld [vmem:[%s4023_s4 + $0x178] sm:$0xff]  }
  0x19   : > { %2802 = vmatpush3.bf16.msra.mxu0 %v2857_v3  ;;  %v2893_v38 = vld [vmem:[%s4023_s4 + $0x88] sm:$0xff]   ;;  %v2897_v42 = vld [vmem:[%s4023_s4 + $0x80] sm:$0xff]   ;;  %vm2497_vm11 = vmpackc.low %vm3250_vm4, %vm3246_vm3 }
  0x1a   : > { %2803 = vmatprep.subr.bf16.mxu0 %v2858_v5  ;;  %v2892_v39 = vld [vmem:[%s4023_s4 + $0x8] sm:$0xff]   ;;  %v2896_v43 = vld [vmem:[%s4023_s4] sm:$0xff]   ;;  %vm3326_vm12 = vmpackc.low %vm3259_vm6, %vm3255_vm5 }
  0x1b   : > { %2630 = vmatpush3.bf16.msra.mxu1 %v2880_v27  ;;  %v3222_v48 = vld [vmem:[%s4021_s2] ss:$0 sm:$0xff]  ;;  %vm3344_vm13 = vmpackc.low %vm3276_vm8, %vm3272_vm7  ;;  %v2903_v9 = vld [vmem:[%s4023_s4 + $0x1f0] sm:$0xff]  }
  0x1c   : > { %2631 = vmatprep.subr.bf16.mxu1 %v2882_v29  ;;  %v3229_v52 = vld [vmem:[%s4022_s3] ss:$0 sm:$0xff]  ;;  %vm3354_vm15 = vmpackc.low %vm3250_vm4, %vm2999_vm14  ;;  %v2938_v57 = vld [vmem:[%s4029_s10 + $0x70] ss:$8 sps:$4 sm:$0xff]  }
  0x1d   : > { %2804 = vmatpush3.bf16.msra.mxu0 %v2858_v5  ;;  %vm3435_vm7 = vmpackc.low %vm3298_vm10, %vm3294_vm9 }
  0x1e   : > { %2805 = vmatprep.subr.bf16.mxu0 %v2859_v8 }
  0x1f   : > { %2632 = vmatpush3.bf16.msra.mxu1 %v2884_v31 }
  0x20   : > { %2633 = vmatprep.subr.bf16.mxu1 %v2886_v33 }
  0x21   : > { %2806 = vmatpush3.bf16.msra.mxu0 %v2859_v8  ;;  %v2933_v8 = vld [vmem:[%s4023_s4 + $0x220] sm:$0xff]  }
  0x22   : > { %2807 = vmatprep.subr.bf16.mxu0 %v2860_v11 }
  0x23   : > { %2634 = vmatpush3.bf16.msra.mxu1 %v2888_v35 }
  0x24   : > { %2635 = vmatprep.subr.bf16.mxu1 %v2890_v37 }
  0x25   : > { %2808 = vmatpush3.bf16.msra.mxu0 %v2860_v11 }
  0x26   : > { %2809 = vmatprep.subr.bf16.mxu0 %v2861_v14 }
  0x27   : > { %2636 = vmatpush3.bf16.msra.mxu1 %v2892_v39 }
  0x28   : > { %2637 = vmatprep.subr.bf16.mxu1 %v2894_v41 }
  0x29   : > { %2810 = vmatpush3.bf16.msra.mxu0 %v2861_v14 }
  0x2a   : > { %2663 = vmatprep.subr.bf16.mxu0 %v2867_v15 }
  0x2b   : > { %2638 = vmatpush3.bf16.msra.mxu1 %v2896_v43 }
  0x2c   : > { %2812 = vmatmul.mubr.bf16.vlgmr.msra.gmra.mxu0 %v2863_v16  ;;  %2703 = vmatprep.subr.bf16.mxu1 %v2898_v45 }
  0x2d   : > { %2815 = vmatprep.mubr.bf16.mxu0 %v2864_v17  ;;  %2664 = vmatpush3.bf16.msra.mxu0 %v2869_v18  ;;  %v3264_v18 = vadd.s32 32, %v3217_v47 }
  0x2e   : > { %2665 = vmatprep.subr.bf16.mxu0 %v2871_v19  ;;  %v3267_v19 = vadd.s32 40, %v3217_v47 }
  0x2f   : > { %v689_v35 = vand.u32 7, %v3264_v18 }
  0x31   : > { %2666 = vmatpush3.bf16.msra.mxu0 %v2873_v20  ;;  %vm3368_vm5 = vcmp.ge.s32.totalorder %v689_v35, 1 }
  0x32   : > { %2667 = vmatprep.subr.bf16.mxu0 %v2875_v21 }
  0x34   : > { %2816 = vmatmul.mubr.bf16.gmra.mxu0 %v2865_v22 }
  0x35   : > { %2668 = vmatpush3.bf16.msra.mxu0 %v2877_v23 }
  0x36   : > { %2669 = vmatprep.subr.bf16.mxu0 %v2879_v24 }
  0x39   : > { %2670 = vmatpush3.bf16.msra.mxu0 %v2881_v26 }
  0x3a   : > { %2671 = vmatprep.subr.bf16.mxu0 %v2883_v28 }
  0x3d   : > { %2672 = vmatpush3.bf16.msra.mxu0 %v2885_v30 }
  0x3e   : > { %2673 = vmatprep.subr.bf16.mxu0 %v2887_v32 }
  0x41   : > { %2674 = vmatpush3.bf16.msra.mxu0 %v2889_v34 }
  0x42   : > { %2675 = vmatprep.subr.bf16.mxu0 %v2891_v36  ;;  %v690_v36 = vand.u32 7, %v3267_v19  ;;  %v2914_v19 = vld [vmem:[%s4023_s4 + $0x158] sm:$0xff]  }
  0x44   : > { %vm698_vm6 = vcmp.ge.s32.totalorder %v690_v36, 1  ;;  %vm706_vm9 = vcmp.lt.s32.totalorder %v690_v36, 7 }
  0x45   : > { %2676 = vmatpush3.bf16.msra.mxu0 %v2893_v38  ;;  %vm3449_vm8 = vmpackc.low %vm698_vm6, %vm3368_vm5 }
  0x46   : > { %2677 = vmatprep.subr.bf16.mxu0 %v2895_v40 }
  0x49   : > { %2678 = vmatpush3.bf16.msra.mxu0 %v2897_v42  ;;  %v2909_v42 = vld [vmem:[%s4023_s4 + $0x1a8] sm:$0xff]  }
  0x4a   : > { %2743 = vmatprep.subr.bf16.mxu0 %v2899_v44 }
  0xec   : > { %v2813_v49 = vpop.f32.mrf.mxu0 }
  0xed   : > { %v612_v51 = vmul.f32 %v2813_v49, %v3222_v48 }
  0xee   : > { %v572_v53 = vpop.f32.mrf.mxu0 }
  0xef   : > { %v610_v54 = vmul.f32 %v3222_v48, %v572_v53  ;;  %v627_v60 = vadd.f32 %v3229_v52, %v612_v51 }
  0xf0   : > { %v2814_v55 = vpop.f32.mrf.mxu0 }
  0xf1   : > { %v625_v61 = vadd.f32 %v3229_v52, %v610_v54  ;;  %v613_v62 = vmul.f32 %v2814_v55, %v3222_v48  ;;  %v635_v11 = vmax.f32 %v627_v60, 0.0 }
  0xf2   : > { %v575_v63 = vpop.f32.mrf.mxu0 }
  0xf3   : > { %v633_v3 = vmax.f32 %v625_v61, 0.0  ;;  %v628_v4 = vadd.f32 %v3229_v52, %v613_v62  ;;  %v611_v5 = vmul.f32 %v3222_v48, %v575_v63  ;;  %v653_v28 = vrot.slane %v635_v11, 7  ;;  %v2901_v62 = vld [vmem:[%s4023_s4 + $0x1b8] sm:$0xff]  }
  0xf4   : > { %v2817_v6 = vpop.f32.mrf.mxu0 }
  0xf5   : > { %v650_v12 = vrot.slane %v633_v3, 7  ;;  %v636_v13 = vmax.f32 %v628_v4, 0.0  ;;  %v626_v14 = vadd.f32 %v3229_v52, %v611_v5  ;;  %v616_v22 = vmul.f32 %v2817_v6, %v3222_v48  ;;  %v2900_v6 = vld [vmem:[%s4023_s4 + $0x138] sm:$0xff]  }
  0xf6   : > { %v588_v15 = vpop.f32.mrf.mxu0 }
  0xf7   : > { %v674_v20 = vsel %vm649_vm0, 0.0, %v650_v12  ;;  %v634_v21 = vmax.f32 %v626_v14, 0.0  ;;  %v655_v23 = vrot.slane %v636_v13, 7  ;;  %v614_v24 = vmul.f32 %v3222_v48, %v588_v15  ;;  %v2902_v14 = vld [vmem:[%s4023_s4 + $0x170] sm:$0xff]  }
  0xf8   : > { %v2818_v25 = vpop.f32.mrf.mxu0  ;;  %v720_v29 = vrot.slane %v674_v20, 2  ;;  %v792_v34 = vrot.slane %v674_v20, 1  ;;  %v3291_v39 = vadd.f32 %v3229_v52, %v616_v22  ;;  %v3383_v15 = vadd.s32 48, %v3217_v47 }
  0xf9   : > { %v651_v30 = vrot.slane %v634_v21, 7  ;;  %v617_v31 = vmul.f32 %v2818_v25, %v3222_v48  ;;  %v629_v32 = vadd.f32 %v3229_v52, %v614_v24  ;;  %v3303_v43 = vsel %vm649_vm0, %v653_v28, %v655_v23  ;;  %v2905_v24 = vld [vmem:[%s4023_s4 + $0x1b0] sm:$0xff]  }
  0xfa   : > { %v591_v33 = vpop.f32.mrf.mxu0  ;;  %v721_v50 = vsel %vm718_vm1, %v3239_v1, %v720_v29  ;;  %v798_v13 = vrot.slane %v3303_v43, 1  ;;  %v726_v16 = vrot.slane %v3303_v43, 2  ;;  %v639_v17 = vmax.f32 %v3291_v39, 0.0 }
  0xfb   : > { %v3285_v37 = vsel %vm649_vm0, %v650_v12, %v651_v30  ;;  %v3288_v38 = vsel %vm649_vm0, %v651_v30, %v653_v28  ;;  %v632_v40 = vadd.f32 %v3229_v52, %v617_v31  ;;  %v637_v45 = vmax.f32 %v629_v32, 0.0  ;;  %v2904_v28 = vld [vmem:[%s4023_s4 + $0x130] sm:$0xff]   ;;  %v2907_v30 = vld [vmem:[%s4023_s4 + $0x1e8] sm:$0xff]  }
  0xfc   : > { %v722_v44 = vrot.slane %v3285_v37, 2  ;;  %v615_v46 = vmul.f32 %v3222_v48, %v591_v33  ;;  %v2498_v49 = vpack.c.bf16 %v3285_v37, %v674_v20  ;;  %v794_v51 = vrot.slane %v3285_v37, 1  ;;  %v2906_v31 = vld [vmem:[%s4023_s4 + $0x168] sm:$0xff]  }
  0xfd   : > { %v796_v53 = vrot.slane %v3288_v38, 1  ;;  %v657_v54 = vrot.slane %v637_v45, 7  ;;  %v793_v48 = vsel %vm790_vm2, %v3242_v2, %v792_v34  ;;  %v724_v58 = vrot.slane %v3288_v38, 2 }
  0xfe   : > { %v630_v55 = vadd.f32 %v3229_v52, %v615_v46  ;;  %v3318_v56 = vsel %vm718_vm1, %v720_v29, %v722_v44  ;;  %v640_v59 = vmax.f32 %v632_v40, 0.0  ;;  %2499 = vmatprep.mubr.msk.bf16.mxu0 %vm2497_vm11, %v2498_v49  ;;  %v3337_v52 = vsel %vm790_vm2, %v792_v34, %v794_v51  ;;  %v2941_v34 = vld [vmem:[%s4029_s10 + $0x60] ss:$8 sps:$4 sm:$0xff]  }
  0xff   : > { %v2501_v60 = vpack.c.bf16 %v3318_v56, %v721_v50  ;;  %v822_v3 = vpack.c.bf16 %v3337_v52, %v793_v48  ;;  %v2504_v5 = vpack.c.bf16 %v3303_v43, %v3288_v38  ;;  %v3373_v11 = vsel %vm790_vm2, %v794_v51, %v796_v53 }
 0x100   : > { %v638_v63 = vmax.f32 %v630_v55, 0.0  ;;  %v2486_v12 = vpack.c.bf16 %v674_v20, %v2998_v0  ;;  %v3388_v21 = vsel %vm649_vm0, %v655_v23, %v657_v54  ;;  %v663_v0 = vrot.slane %v640_v59, 7  ;;  %v2911_v59 = vld [vmem:[%s4023_s4 + $0x1e0] sm:$0xff]  }
 0x101   : > { %2502 = vmatmul.mubr.msk.bf16.vlgmr.msra.gmra.mxu0 %vm3326_vm12, %v2501_v60  ;;  %1462 = vmatprep.mubr.bf16.mxu1 %v822_v3  ;;  %v3395_v20 = vsel %vm790_vm2, %v796_v53, %v798_v13  ;;  %v3401_v23 = vsel %vm718_vm1, %v722_v44, %v724_v58  ;;  %v3404_v25 = vadd.s32 56, %v3217_v47  ;;  %v3419_v29 = vsel %vm718_vm1, %v724_v58, %v726_v16  ;;  %v2908_v53 = vld [vmem:[%s4023_s4 + $0x128] sm:$0xff]   ;;  %v2910_v58 = vld [vmem:[%s4023_s4 + $0x160] sm:$0xff]   ;;  %v2935_v3 = vld [vmem:[%s4023_s4 + $0x210] sm:$0xff]  }
 0x102   : > { %v659_v22 = vrot.slane %v638_v63, 7  ;;  %2505 = vmatprep.mubr.msk.bf16.mxu0 %vm3344_vm13, %v2504_v5  ;;  %2487 = vmatmul.mubr.msk.bf16.vlgmr.msra.gmra.mxu1 %vm3354_vm15, %v2486_v12  ;;  %v3411_v27 = vpack.c.bf16 %v3395_v20, %v3373_v11  ;;  %v800_v32 = vrot.slane %v3388_v21, 1  ;;  %v661_v33 = vrot.slane %v639_v17, 7  ;;  %v2912_v5 = vld [vmem:[%s4023_s4 + $0x120] sm:$0xff]   ;;  %v2916_v17 = vld [vmem:[%s4023_s4 + $0x118] sm:$0xff]  }
 0x103   : > { %2744 = vmatpush3.bf16.msra.mxu0 %v2901_v62  ;;  %2704 = vmatpush3.bf16.msra.mxu1 %v2900_v6  ;;  %v3441_v40 = vsel %vm649_vm0, %v663_v0, 0.0  ;;  %v3445_v44 = vpack.c.bf16 %v3419_v29, %v3401_v23  ;;  %v691_v45 = vand.u32 7, %v3383_v15  ;;  %v692_v46 = vand.u32 7, %v3404_v25  ;;  %v2919_v25 = vld [vmem:[%s4023_s4 + $0x1d0] sm:$0xff]  }
 0x104   : > { %v3407_v26 = vsel %vm649_vm0, %v657_v54, %v659_v22  ;;  %2745 = vmatprep.subr.bf16.mxu0 %v2903_v9  ;;  %2705 = vmatprep.subr.bf16.mxu1 %v2902_v14  ;;  %v3459_v49 = vsel %vm649_vm0, %v661_v33, %v663_v0  ;;  %v3475_v55 = vpack.c.bf16 %v3288_v38, %v3285_v37  ;;  %v728_v60 = vrot.slane %v3388_v21, 2  ;;  %v2913_v38 = vld [vmem:[%s4023_s4 + $0x1a0] sm:$0xff]   ;;  %v2917_v14 = vld [vmem:[%s4023_s4 + $0x198] sm:$0xff]  }
 0x105   : > { %1470 = vmatprep.mubr.bf16.mxu1 %v3411_v27  ;;  %v802_v39 = vrot.slane %v3407_v26, 1  ;;  %v730_v50 = vrot.slane %v3407_v26, 2  ;;  %v2510_v51 = vpack.c.bf16 %v3407_v26, %v3388_v21  ;;  %v3478_v48 = vsel %vm790_vm2, %v798_v13, %v800_v32  ;;  %v2953_v9 = vld [vmem:[%s4029_s10 + $0x40] ss:$8 sps:$4 sm:$0xff]   ;;  %v2958_v13 = vld [vmem:[%s4026_s7 + $0x54] ss:$8 sps:$4 sm:$0xff]  }
 0x106   : > { %v761_v62 = vrot.slane %v3441_v40, 2  ;;  %v3489_v63 = vsel %vm649_vm0, %v659_v22, %v661_v33  ;;  %vm3505_vm0 = vcmp.lt.s32.totalorder %v689_v35, 7  ;;  %v806_v4 = vrot.slane %v3459_v49, 1  ;;  %v2915_v35 = vld [vmem:[%s4023_s4 + $0x1d8] sm:$0xff]   ;;  %v2922_v33 = vld [vmem:[%s4023_s4 + $0x148] sm:$0xff]  }
 0x107   : > { %2746 = vmatpush3.bf16.msra.mxu0 %v2905_v24  ;;  %2706 = vmatpush3.bf16.msra.mxu1 %v2904_v28  ;;  %v3468_v54 = vsel %vm790_vm2, %v800_v32, %v802_v39  ;;  %v3519_v18 = vsel %vm718_vm1, %v728_v60, %v730_v50  ;;  %vm699_vm10 = vcmp.ge.s32.totalorder %v691_v45, 1  ;;  %vm700_vm14 = vcmp.ge.s32.totalorder %v692_v46, 1  ;;  %vm3535_vm15 = vmpackc.low %vm706_vm9, %vm3505_vm0  ;;  %v2918_v24 = vld [vmem:[%s4023_s4 + $0x150] sm:$0xff]   ;;  %v2923_v32 = vld [vmem:[%s4023_s4 + $0x1c8] sm:$0xff]  }
 0x108   : > { %2747 = vmatprep.subr.bf16.mxu0 %v2907_v30  ;;  %2707 = vmatprep.subr.bf16.mxu1 %v2906_v31  ;;  %v3495_v37 = vpack.c.bf16 %v3468_v54, %v3478_v48  ;;  %v804_v36 = vrot.slane %v3489_v63, 1  ;;  %v3531_v6 = vsel %vm718_vm1, %v726_v16, %v728_v60  ;;  %v3543_v10 = vsel %vm718_vm1, %v761_v62, %v3239_v1  ;;  %vm3549_vm5 = vmpackc.low %vm700_vm14, %vm699_vm10  ;;  %v2928_v60 = vld [vmem:[%s4023_s4 + $0x100] sm:$0xff]  }
 0x109   : > { %2508 = vmatmul.mubr.msk.bf16.gmra.mxu0 %vm3435_vm7, %v3445_v44  ;;  %v3547_v12 = vpack.c.bf16 %v3519_v18, %v3531_v6  ;;  %v734_v1 = vrot.slane %v3459_v49, 2  ;;  %v2516_v16 = vpack.c.bf16 %v3459_v49, %v3489_v63  ;;  %v2492_v22 = vpack.c.bf16 %v3388_v21, %v3303_v43  ;;  %v2921_v43 = vld [vmem:[%s4023_s4 + $0x190] sm:$0xff]  }
 0x10a   : > { %2511 = vmatprep.mubr.msk.bf16.mxu0 %vm3449_vm8, %v2510_v51  ;;  %2490 = vmatmul.mubr.msk.bf16.gmra.mxu1 %vm3344_vm13, %v3475_v55  ;;  %v3559_v15 = vsel %vm790_vm2, %v804_v36, %v806_v4  ;;  %v3573_v0 = vsel %vm790_vm2, %v802_v39, %v804_v36  ;;  %v732_v28 = vrot.slane %v3489_v63, 2  ;;  %vm707_vm6 = vcmp.lt.s32.totalorder %v691_v45, 7  ;;  %v2920_v21 = vld [vmem:[%s4023_s4 + $0x110] sm:$0xff]   ;;  %v2924_v51 = vld [vmem:[%s4023_s4 + $0x108] sm:$0xff]  }
 0x10b   : > { %2748 = vmatpush3.bf16.msra.mxu0 %v2909_v42  ;;  %2708 = vmatpush3.bf16.msra.mxu1 %v2908_v53  ;;  %v844_v30 = vpack.c.bf16 %v3559_v15, %v3573_v0  ;;  %vm708_vm0 = vcmp.lt.s32.totalorder %v692_v46, 7  ;;  %v2925_v46 = vld [vmem:[%s4023_s4 + $0x188] sm:$0xff]   ;;  %v2926_v53 = vld [vmem:[%s4023_s4 + $0x140] sm:$0xff]   ;;  %v833_v7 = vpack.c.bf16 %v3478_v48, %v3395_v20  ;;  %v2934_v20 = vld [vmem:[%s4023_s4 + $0x218] sm:$0xff]   ;;  %v762_v48 = vsel %vm718_vm1, %v734_v1, %v761_v62 }
 0x10c   : > { %1478 = vmatprep.mubr.bf16.mxu1 %v3495_v37  ;;  %2709 = vmatprep.subr.bf16.mxu1 %v2910_v58  ;;  %v3597_v31 = vsel %vm718_vm1, %v732_v28, %v734_v1  ;;  %v733_v39 = vsel %vm718_vm1, %v730_v50, %v732_v28  ;;  %vm3608_vm9 = vmpackc.low %vm708_vm0, %vm707_vm6  ;;  %v2495_v50 = vpack.c.bf16 %v3489_v63, %v3407_v26  ;;  %v2927_v58 = vld [vmem:[%s4023_s4 + $0x1c0] sm:$0xff]   ;;  %v2973_v28 = vld [vmem:[%s4029_s10 + $0x14] ss:$8 sps:$4 sm:$0xff]  }
 0x10d   : > { %2749 = vmatprep.subr.bf16.mxu0 %v2911_v59  ;;  %v3613_v45 = vpack.c.bf16 %v3597_v31, %v733_v39  ;;  %v2522_v59 = vpack.c.bf16 %v3401_v23, %v3318_v56  ;;  %v2929_v26 = vld [vmem:[%s4023_s4 + $0x180] sm:$0xff]   ;;  %v2930_v56 = vld [vmem:[%s4023_s4 + $0x238] sm:$0xff]   ;;  %v825_v23 = vpack.c.bf16 %v3373_v11, %v3337_v52  ;;  %v2525_v63 = vpack.c.bf16 %v3531_v6, %v3419_v29  ;;  %v2932_v52 = vld [vmem:[%s4023_s4 + $0x228] sm:$0xff]  }
 0x10e   : > { %v816_v11 = vrot.slane %v3441_v40, 1  ;;  %v2528_v29 = vpack.c.bf16 %v733_v39, %v3519_v18  ;;  %v2543_v62 = vpack.c.bf16 %v3441_v40, %v3459_v49  ;;  %v2555_v40 = vpack.c.bf16 %v3543_v10, %v762_v48  ;;  %v2943_v49 = vld [vmem:[%s4029_s10 + $0x64] ss:$8 sps:$4 sm:$0xff]   ;;  %v2946_v18 = vld [vmem:[%s4026_s7 + $0x74] ss:$8 sps:$4 sm:$0xff]  }
 0x10f   : > { %2750 = vmatpush3.bf16.msra.mxu0 %v2913_v38  ;;  %2710 = vmatpush3.bf16.msra.mxu1 %v2912_v5  ;;  %v2944_v5 = vld [vmem:[%s4026_s7 + $0x70] ss:$8 sps:$4 sm:$0xff]   ;;  %v2950_v36 = vld [vmem:[%s4026_s7 + $0x60] ss:$8 sps:$4 sm:$0xff]   ;;  %v2952_v6 = vld [vmem:[%s4026_s7 + $0x64] ss:$8 sps:$4 sm:$0xff]  }
 0x110   : > { %2751 = vmatprep.subr.bf16.mxu0 %v2915_v35  ;;  %2711 = vmatprep.subr.bf16.mxu1 %v2914_v19  ;;  %v819_v61 = vsel %vm790_vm2, %v816_v11, %v3242_v2  ;;  %v2531_v2 = vpack.c.bf16 %v762_v48, %v3597_v31  ;;  %v2947_v35 = vld [vmem:[%s4029_s10 + $0x50] ss:$8 sps:$4 sm:$0xff]   ;;  %v2949_v19 = vld [vmem:[%s4029_s10 + $0x54] ss:$8 sps:$4 sm:$0xff]   ;;  %v2955_v10 = vld [vmem:[%s4029_s10 + $0x44] ss:$8 sps:$4 sm:$0xff]  }
 0x111   : > { %2514 = vmatmul.mubr.msk.bf16.gmra.mxu0 %vm3535_vm15, %v3547_v12  ;;  %v2962_v1 = vld [vmem:[%s4026_s7 + $0x40] ss:$8 sps:$4 sm:$0xff]   ;;  %v2979_v31 = vld [vmem:[%s4029_s10 + $0x4] ss:$8 sps:$4 sm:$0xff]   ;;  %v4033_v39 = vmov 0  }
 0x112   : > { %2517 = vmatprep.mubr.msk.bf16.mxu0 %vm3549_vm5, %v2516_v16  ;;  %2493 = vmatmul.mubr.msk.bf16.gmra.mxu1 %vm3449_vm8, %v2492_v22  ;;  %v2964_v16 = vld [vmem:[%s4026_s7 + $0x44] ss:$8 sps:$4 sm:$0xff]   ;;  %v2983_v42 = vld [vmem:[%s4026_s7] ss:$8 sps:$4 sm:$0xff]  }
 0x113   : > { %2752 = vmatpush3.bf16.msra.mxu0 %v2917_v14  ;;  %2712 = vmatpush3.bf16.msra.mxu1 %v2916_v17  ;;  %v2959_v14 = vld [vmem:[%s4029_s10 + $0x30] ss:$8 sps:$4 sm:$0xff]   ;;  %v2965_v17 = vld [vmem:[%s4029_s10 + $0x20] ss:$8 sps:$4 sm:$0xff]  }
 0x114   : > { %1486 = vmatprep.mubr.bf16.mxu1 %v844_v30  ;;  %2713 = vmatprep.subr.bf16.mxu1 %v2918_v24  ;;  %v2970_v24 = vld [vmem:[%s4026_s7 + $0x34] ss:$8 sps:$4 sm:$0xff]  }
 0x115   : > { %2753 = vmatprep.subr.bf16.mxu0 %v2919_v25  ;;  %v2971_v25 = vld [vmem:[%s4029_s10 + $0x10] ss:$8 sps:$4 sm:$0xff]  }
 0x117   : > { %2754 = vmatpush3.bf16.msra.mxu0 %v2921_v43  ;;  %2714 = vmatpush3.bf16.msra.mxu1 %v2920_v21  ;;  %v2976_v43 = vld [vmem:[%s4026_s7 + $0x24] ss:$8 sps:$4 sm:$0xff]   ;;  %v2977_v21 = vld [vmem:[%s4029_s10] ss:$8 sps:$4 sm:$0xff]  }
 0x118   : > { %2755 = vmatprep.subr.bf16.mxu0 %v2923_v32  ;;  %2715 = vmatprep.subr.bf16.mxu1 %v2922_v33  ;;  %v2980_v32 = vld [vmem:[%s4026_s7 + $0x10] ss:$8 sps:$4 sm:$0xff]   ;;  %v2982_v33 = vld [vmem:[%s4026_s7 + $0x14] ss:$8 sps:$4 sm:$0xff]  }
 0x119   : > { %2520 = vmatmul.mubr.msk.bf16.gmra.mxu0 %vm3608_vm9, %v3613_v45 }
 0x11a   : > { %1657 = vmatprep.mubr.bf16.mxu0 %v3411_v27  ;;  %2496 = vmatmul.mubr.msk.bf16.gmra.mxu1 %vm3549_vm5, %v2495_v50  ;;  %v2931_v27 = vld [vmem:[%s4023_s4 + $0x230] sm:$0xff]  }
 0x11b   : > { %2756 = vmatpush3.bf16.msra.mxu0 %v2925_v46  ;;  %2716 = vmatpush3.bf16.msra.mxu1 %v2924_v51  ;;  %v2986_v46 = vld [vmem:[%s3094_s19] sm:$0xff]   ;;  %v2987_v51 = vld [vmem:[%s3094_s19 + $0x8] sm:$0xff]  }
 0x11c   : > { %2523 = vmatprep.mubr.msk.bf16.mxu1 %vm3326_vm12, %v2522_v59  ;;  %2717 = vmatprep.subr.bf16.mxu1 %v2926_v53  ;;  %v2989_v53 = vld [vmem:[%s3094_s19 + $0x18] sm:$0xff]  }
 0x11d   : > { %2757 = vmatprep.subr.bf16.mxu0 %v2927_v58 }
 0x11f   : > { %2758 = vmatpush3.bf16.msra.mxu0 %v2929_v26  ;;  %2718 = vmatpush3.bf16.msra.mxu1 %v2928_v60 }
 0x120   : > { %2819 = vmatprep.subr.bf16.mxu1 %v2930_v56  ;;  %1893 = vmatprep.subr.bf16.mxu0 %v2946_v18 }
 0x122   : > { %2535 = vmatmul.mubr.msk.bf16.vlgmr.msra.gmra.mxu0 %vm2497_vm11, %v3475_v55  ;;  %1593 = vmatmul.mubr.bf16.vlgmr.msra.gmra.mxu1 %v825_v23  ;;  %v817_v55 = vsel %vm790_vm2, %v806_v4, %v816_v11  ;;  %v2937_v4 = vld [vmem:[%s4023_s4 + $0x200] sm:$0xff]  }
 0x123   : > { %1665 = vmatprep.mubr.bf16.mxu0 %v3495_v37  ;;  %2820 = vmatpush3.bf16.msra.mxu1 %v2930_v56  ;;  %v841_v37 = vpack.c.bf16 %v3573_v0, %v3468_v54  ;;  %v852_v38 = vpack.c.bf16 %v819_v61, %v817_v55  ;;  %v2936_v54 = vld [vmem:[%s4023_s4 + $0x208] sm:$0xff]   ;;  %v849_v41 = vpack.c.bf16 %v817_v55, %v3559_v15  ;;  %v2961_v15 = vld [vmem:[%s4029_s10 + $0x34] ss:$8 sps:$4 sm:$0xff]   ;;  %v2968_v0 = vld [vmem:[%s4026_s7 + $0x30] ss:$8 sps:$4 sm:$0xff]  }
 0x124   : > { %2526 = vmatprep.mubr.msk.bf16.mxu1 %vm3435_vm7, %v2525_v63  ;;  %2821 = vmatprep.subr.bf16.mxu1 %v2931_v27 }
 0x125   : > { %1894 = vmatpush1.bf16.msra.mxu0 %v2944_v5 }
 0x126   : > { %1895 = vmatprep.subr.bf16.mxu0 %v2952_v6 }
 0x127   : > { %2822 = vmatpush3.bf16.msra.mxu1 %v2931_v27 }
 0x128   : > { %2823 = vmatprep.subr.bf16.mxu1 %v2932_v52 }
 0x129   : > { %1896 = vmatpush1.bf16.msra.mxu0 %v2950_v36 }
 0x12a   : > { %2538 = vmatmul.mubr.msk.bf16.gmra.mxu0 %vm3344_vm13, %v2492_v22  ;;  %1601 = vmatmul.mubr.bf16.gmra.mxu1 %v833_v7  ;;  %v2967_v22 = vld [vmem:[%s4029_s10 + $0x24] ss:$8 sps:$4 sm:$0xff]  }
 0x12b   : > { %1673 = vmatprep.mubr.bf16.mxu0 %v844_v30  ;;  %2824 = vmatpush3.bf16.msra.mxu1 %v2932_v52  ;;  %v2974_v30 = vld [vmem:[%s4026_s7 + $0x20] ss:$8 sps:$4 sm:$0xff]  }
 0x12c   : > { %2529 = vmatprep.mubr.msk.bf16.mxu1 %vm3535_vm15, %v2528_v29  ;;  %2825 = vmatprep.subr.bf16.mxu1 %v2933_v8 }
 0x12d   : > { %1897 = vmatprep.subr.bf16.mxu0 %v2958_v13 }
 0x12f   : > { %2826 = vmatpush3.bf16.msra.mxu1 %v2933_v8 }
 0x130   : > { %2827 = vmatprep.subr.bf16.mxu1 %v2934_v20 }
 0x132   : > { %2541 = vmatmul.mubr.msk.bf16.gmra.mxu0 %vm3449_vm8, %v2495_v50  ;;  %1609 = vmatmul.mubr.bf16.gmra.mxu1 %v841_v37  ;;  %v2988_v50 = vld [vmem:[%s3094_s19 + $0x10] sm:$0xff]  }
 0x133   : > { %1681 = vmatprep.mubr.bf16.mxu0 %v852_v38  ;;  %2828 = vmatpush3.bf16.msra.mxu1 %v2934_v20 }
 0x134   : > { %2532 = vmatprep.mubr.msk.bf16.mxu1 %vm3608_vm9, %v2531_v2  ;;  %2829 = vmatprep.subr.bf16.mxu1 %v2935_v3 }
 0x137   : > { %2830 = vmatpush3.bf16.msra.mxu1 %v2935_v3 }
 0x138   : > { %2831 = vmatprep.subr.bf16.mxu1 %v2936_v54 }
 0x13a   : > { %2544 = vmatmul.mubr.msk.bf16.gmra.mxu0 %vm3549_vm5, %v2543_v62  ;;  %1617 = vmatmul.mubr.bf16.gmra.mxu1 %v849_v41 }
 0x13b   : > { %2832 = vmatpush3.bf16.msra.mxu1 %v2936_v54  ;;  %2835 = vmatprep.mubr.msk.bf16.mxu1 %vm3326_vm12, %v3445_v44  ;;  %v2940_v44 = vld [vmem:[%s4029_s10 + $0x74] ss:$8 sps:$4 sm:$0xff]  }
 0x13c   : > { %2833 = vmatprep.subr.bf16.mxu1 %v2937_v4  ;;  %1925 = vmatprep.mubr.bf16.mxu0 %v4033_v39 }
 0x13f   : > { %2834 = vmatpush3.bf16.msra.mxu1 %v2937_v4 }
 0x140   : > { %2118 = vmatprep.subr.bf16.mxu1 %v2940_v44 }
 0x142   : > { %2836 = vmatmul.mubr.msk.bf16.vlgmr.msra.gmra.mxu1 %vm3435_vm7, %v3547_v12  ;;  %v2956_v12 = vld [vmem:[%s4026_s7 + $0x50] ss:$8 sps:$4 sm:$0xff]  }
 0x143   : > { %2839 = vmatprep.mubr.msk.bf16.mxu1 %vm3535_vm15, %v3613_v45  ;;  %2119 = vmatpush1.bf16.msra.mxu1 %v2938_v57  ;;  %v2985_v45 = vld [vmem:[%s4026_s7 + $0x4] ss:$8 sps:$4 sm:$0xff]  }
 0x144   : > { %2120 = vmatprep.subr.bf16.mxu1 %v2943_v49  ;;  %1898 = vmatpush1.bf16.msra.mxu0 %v2956_v12 }
 0x145   : > { %1899 = vmatprep.subr.bf16.mxu0 %v2964_v16 }
 0x147   : > { %2121 = vmatpush1.bf16.msra.mxu1 %v2941_v34 }
 0x148   : > { %2122 = vmatprep.subr.bf16.mxu1 %v2949_v19  ;;  %1900 = vmatpush1.bf16.msra.mxu0 %v2962_v1 }
 0x149   : > { %1901 = vmatprep.subr.bf16.mxu0 %v2970_v24 }
 0x14a   : > { %2840 = vmatmul.mubr.msk.bf16.gmra.mxu1 %vm3608_vm9, %v2555_v40 }
 0x14b   : > { %2123 = vmatpush1.bf16.msra.mxu1 %v2947_v35  ;;  %2150 = vmatprep.mubr.bf16.mxu1 %v4033_v39 }
 0x14c   : > { %2124 = vmatprep.subr.bf16.mxu1 %v2955_v10  ;;  %1902 = vmatpush1.bf16.msra.mxu0 %v2968_v0 }
 0x14d   : > { %1903 = vmatprep.subr.bf16.mxu0 %v2976_v43 }
 0x14f   : > { %2125 = vmatpush1.bf16.msra.mxu1 %v2953_v9 }
 0x150   : > { %2126 = vmatprep.subr.bf16.mxu1 %v2961_v15  ;;  %1904 = vmatpush1.bf16.msra.mxu0 %v2974_v30 }
 0x151   : > { %1905 = vmatprep.subr.bf16.mxu0 %v2982_v33 }
 0x153   : > { %2127 = vmatpush1.bf16.msra.mxu1 %v2959_v14 }
 0x154   : > { %2128 = vmatprep.subr.bf16.mxu1 %v2967_v22  ;;  %1906 = vmatpush1.bf16.msra.mxu0 %v2980_v32 }
 0x155   : > { %1907 = vmatprep.subr.bf16.mxu0 %v2985_v45 }
 0x157   : > { %2129 = vmatpush1.bf16.msra.mxu1 %v2965_v17 }
 0x158   : > { %2130 = vmatprep.subr.bf16.mxu1 %v2973_v28  ;;  %1908 = vmatpush1.bf16.msra.mxu0 %v2983_v42 }
 0x15b   : > { %2131 = vmatpush1.bf16.msra.mxu1 %v2971_v25 }
 0x15c   : > { %2132 = vmatprep.subr.bf16.mxu1 %v2979_v31 }
 0x15f   : > { %2133 = vmatpush1.bf16.msra.mxu1 %v2977_v21 }
 0x162   : > { %2151 = vmatmul.mubr.bf16.vlgmr.msra.gmra.mxu1 %v2986_v46 }
 0x163   : > { %2160 = vmatprep.mubr.bf16.mxu1 %v4033_v39 }
 0x16a   : > { %2161 = vmatmul.mubr.bf16.gmra.mxu1 %v2987_v51 }
 0x16b   : > { %2170 = vmatprep.mubr.bf16.mxu1 %v4033_v39 }
 0x172   : > { %2171 = vmatmul.mubr.bf16.gmra.mxu1 %v2988_v50 }
 0x173   : > { %2180 = vmatprep.mubr.bf16.mxu1 %v4033_v39 }
 0x17a   : > { %2181 = vmatmul.mubr.bf16.gmra.mxu1 %v2989_v53 }
 0x1c1   : > { %v2679_v58 = vpop.f32.mrf.mxu0 }
 0x1c2   : > { %v2639_v59 = vpop.f32.mrf.mxu1 }
 0x1c3   : > { %v2680_v26 = vpop.f32.mrf.mxu0 }
 0x1c4   : > { %v2640_v60 = vpop.f32.mrf.mxu1  ;;  %v2681_v21 = vadd.f32 %v2680_v26, %v2679_v58 }
 0x1c5   : > { %v2682_v56 = vpop.f32.mrf.mxu0  ;;  %v2641_v31 = vadd.f32 %v2640_v60, %v2639_v59 }
 0x1c6   : > { %v2642_v23 = vpop.f32.mrf.mxu1 }
 0x1c7   : > { %v2683_v27 = vpop.f32.mrf.mxu0  ;;  %v1530_v46 = vadd.f32 %v2681_v21, %v2641_v31 }
 0x1c8   : > { %v2643_v63 = vpop.f32.mrf.mxu1  ;;  %v2684_v50 = vadd.f32 %v2683_v27, %v2682_v56 }
 0x1c9   : > { %v2685_v52 = vpop.f32.mrf.mxu0  ;;  %v2644_v53 = vadd.f32 %v2643_v63, %v2642_v23 }
 0x1ca   : > { %v2645_v7 = vpop.f32.mrf.mxu1 }
 0x1cb   : > { %v2686_v8 = vpop.f32.mrf.mxu0  ;;  %v1533_v60 = vadd.f32 %v2684_v50, %v2644_v53 }
 0x1cc   : > { %v2646_v11 = vpop.f32.mrf.mxu1 }
 0x1cd   : > { %v2688_v29 = vpop.f32.mrf.mxu0 }
 0x1ce   : > { %v2648_v20 = vpop.f32.mrf.mxu1 }
 0x1cf   : > { %v2689_v55 = vpop.f32.mrf.mxu0 }
 0x1d0   : > { %v2649_v61 = vpop.f32.mrf.mxu1  ;;  %v2690_v39 = vadd.f32 %v2689_v55, %v2688_v29  ;;  %v3880_v55 = vld [vmem:[%s4024_s5] ss:$0 sm:$0xff] }
 0x1d1   : > { %v3829_v48 = vpop.f32.mrf.mxu0  ;;  %v2650_v47 = vadd.f32 %v2649_v61, %v2648_v20 }
 0x1d2   : > { %v3831_v37 = vpop.f32.mrf.mxu1 }
 0x1d3   : > { %v3833_v38 = vpop.f32.mrf.mxu0 }
 0x1d4   : > { %v3835_v3 = vpop.f32.mrf.mxu1 }
 0x1d5   : > { %v3837_v2 = vpop.f32.mrf.mxu0 }
 0x1d6   : > { %v3839_v54 = vpop.f32.mrf.mxu1 }
 0x1d7   : > { %v3841_v62 = vpop.f32.mrf.mxu0 }
 0x1d8   : > { %v3843_v41 = vpop.f32.mrf.mxu1 }
 0x1d9   : > { %v3845_v4 = vpop.f32.mrf.mxu0 }
 0x1da   : > { %4074 = vst [vmem:[#allocation3_spill] sm:$0xff] %v3845_v4  ;;  %v3847_v40 = vpop.f32.mrf.mxu1 }
 0x1db   : > { %4075 = vst [vmem:[#allocation4_spill] sm:$0xff] %v3847_v40  ;;  %v3849_v57 = vpop.f32.mrf.mxu0 }
 0x1dc   : > { %4076 = vst [vmem:[#allocation5_spill] sm:$0xff] %v3849_v57  ;;  %v3851_v44 = vpop.f32.mrf.mxu1 }
 0x1dd   : > { %4077 = vst [vmem:[#allocation6_spill] sm:$0xff] %v3851_v44  ;;  %v3853_v34 = vpop.f32.mrf.mxu0  ;;  %v2687_v44 = vadd.f32 %v2686_v8, %v2685_v52 }
 0x1de   : > { %v3855_v49 = vpop.f32.mrf.mxu1 }
 0x1df   : > { %v3857_v5 = vpop.f32.mrf.mxu0 }
 0x1e0   : > { %v3859_v18 = vpop.f32.mrf.mxu1 }
 0x1e1   : > { %4078 = vst [vmem:[#allocation7_spill] sm:$0xff] %v3859_v18 }
 0x1e2   : > { %v2759_v35 = vpop.f32.mrf.mxu0  ;;  %v2719_v19 = vpop.f32.mrf.mxu1 }
 0x1e4   : > { %v2760_v36 = vpop.f32.mrf.mxu0  ;;  %v2720_v6 = vpop.f32.mrf.mxu1 }
 0x1e5   : > { %v2721_v45 = vadd.f32 %v2720_v6, %v2719_v19  ;;  %v2761_v18 = vadd.f32 %v2760_v36, %v2759_v35 }
 0x1e6   : > { %v2762_v9 = vpop.f32.mrf.mxu0  ;;  %v2722_v10 = vpop.f32.mrf.mxu1 }
 0x1e7   : > { %v1595_v4 = vadd.f32 %v2721_v45, %v1530_v46 }
 0x1e8   : > { %v2763_v12 = vpop.f32.mrf.mxu0  ;;  %v2723_v13 = vpop.f32.mrf.mxu1 }
 0x1e9   : > { %v2724_v58 = vadd.f32 %v2723_v13, %v2722_v10  ;;  %v1660_v23 = vadd.f32 %v2761_v18, %v1595_v4  ;;  %v2764_v63 = vadd.f32 %v2763_v12, %v2762_v9 }
 0x1ea   : > { %v2765_v14 = vpop.f32.mrf.mxu0  ;;  %v2725_v15 = vpop.f32.mrf.mxu1 }
 0x1eb   : > { %v1598_v31 = vadd.f32 %v2724_v58, %v1533_v60 }
 0x1ec   : > { %v2766_v1 = vpop.f32.mrf.mxu0  ;;  %v2726_v16 = vpop.f32.mrf.mxu1 }
 0x1ed   : > { %v2767_v4 = vadd.f32 %v2766_v1, %v2765_v14  ;;  %v4082_v1 = vld [vmem:[#allocation7_spill] sm:$0xff] }
 0x1ee   : > { %v2768_v17 = vpop.f32.mrf.mxu0  ;;  %v2728_v22 = vpop.f32.mrf.mxu1 }
 0x1f0   : > { %v2729_v0 = vpop.f32.mrf.mxu1  ;;  %v2769_v24 = vpop.f32.mrf.mxu0 }
 0x1f1   : > { %v2730_v59 = vadd.f32 %v2729_v0, %v2728_v22  ;;  %v2770_v8 = vadd.f32 %v2769_v24, %v2768_v17 }
 0x1f2   : > { %v2731_v25 = vpop.f32.mrf.mxu1  ;;  %v3861_v30 = vpop.f32.mrf.mxu0 }
 0x1f3   : > { %4079 = vst [vmem:[#allocation8_spill] sm:$0xff] %v3861_v30  ;;  %v2647_v30 = vadd.f32 %v2646_v11, %v2645_v7  ;;  %v2693_v7 = vadd.f32 %v3833_v38, %v3829_v48  ;;  %v2653_v11 = vadd.f32 %v3835_v3, %v3831_v37  ;;  %v1663_v38 = vadd.f32 %v2764_v63, %v1598_v31 }
 0x1f4   : > { %v2732_v28 = vpop.f32.mrf.mxu1  ;;  %v3863_v33 = vpop.f32.mrf.mxu0 }
 0x1f5   : > { %4080 = vst [vmem:[#allocation9_spill] sm:$0xff] %v3863_v33  ;;  %v1541_v33 = vadd.f32 %v2690_v39, %v2650_v47  ;;  %v1538_v21 = vadd.f32 %v2687_v44, %v2647_v30  ;;  %v2696_v47 = vadd.f32 %v3841_v62, %v3837_v2  ;;  %v2656_v39 = vadd.f32 %v3843_v41, %v3839_v54  ;;  %v2558_v41 = vld [vmem:[%s4025_s6] ss:$0 sm:$0xff]  ;;  %v4084_v30 = vld [vmem:[#allocation5_spill] sm:$0xff] }
 0x1f6   : > { %v2734_v43 = vpop.f32.mrf.mxu1  ;;  %v2774_v40 = vpop.f32.mrf.mxu0  ;;  %v2733_v3 = vadd.f32 %v2732_v28, %v2731_v25  ;;  %v1546_v10 = vadd.f32 %v2693_v7, %v2653_v11  ;;  %v4083_v28 = vld [vmem:[#allocation3_spill] sm:$0xff] }
 0x1f7   : > { %v1606_v56 = vadd.f32 %v2730_v59, %v1541_v33  ;;  %v1549_v36 = vadd.f32 %v2696_v47, %v2656_v39  ;;  %v4086_v33 = vld [vmem:[#allocation6_spill] sm:$0xff] }
 0x1f8   : > { %v2735_v32 = vpop.f32.mrf.mxu1  ;;  %v2775_v19 = vpop.f32.mrf.mxu0  ;;  %v1611_v0 = vadd.f32 %v2733_v3, %v1546_v10 }
 0x1f9   : > { %v1671_v48 = vadd.f32 %v2770_v8, %v1606_v56  ;;  %v2736_v18 = vadd.f32 %v2735_v32, %v2734_v43  ;;  %v2699_v43 = vadd.f32 %v4084_v30, %v4083_v28  ;;  %v4085_v32 = vld [vmem:[#allocation4_spill] sm:$0xff]  ;;  %v2776_v53 = vadd.f32 %v2775_v19, %v2774_v40 }
 0x1fa   : > { %v3865_v42 = vpop.f32.mrf.mxu1  ;;  %v2777_v20 = vpop.f32.mrf.mxu0  ;;  %v4087_v45 = vld [vmem:[#allocation8_spill] sm:$0xff] }
 0x1fb   : > { %4081 = vst [vmem:[#allocation10_spill] sm:$0xff] %v3865_v42  ;;  %v2727_v42 = vadd.f32 %v2726_v16, %v2725_v15  ;;  %v2702_v15 = vadd.f32 %v3857_v5, %v3853_v34  ;;  %v2662_v16 = vadd.f32 %v4082_v1, %v3855_v49  ;;  %v1614_v17 = vadd.f32 %v2736_v18, %v1549_v36 }
 0x1fc   : > { %v3867_v51 = vpop.f32.mrf.mxu1  ;;  %v2778_v54 = vpop.f32.mrf.mxu0  ;;  %v4088_v46 = vld [vmem:[#allocation9_spill] sm:$0xff] }
 0x1fd   : > { %v1603_v52 = vadd.f32 %v2727_v42, %v1538_v21  ;;  %v2659_v42 = vadd.f32 %v4086_v33, %v4085_v32  ;;  %v2773_v50 = vadd.f32 %v4088_v46, %v4087_v45  ;;  %v1679_v21 = vadd.f32 %v2776_v53, %v1614_v17  ;;  %v2219_v33 = vld [vmem:[%s4031_s12] sm:$0x3] }
 0x1fe   : > { %v2740_v57 = vpop.f32.mrf.mxu1  ;;  %v2780_v34 = vpop.f32.mrf.mxu0  ;;  %v1994_v45 = vld [vmem:[%s4028_s9] sm:$0x3] }
 0x1ff   : > { %v1668_v35 = vadd.f32 %v2767_v4, %v1603_v52  ;;  %v1676_v52 = vadd.f32 %v2773_v50, %v1611_v0  ;;  %v1554_v7 = vadd.f32 %v2699_v43, %v2659_v42  ;;  %v2779_v4 = vadd.f32 %v2778_v54, %v2777_v20  ;;  %v1966_v42 = vld [vmem:[%s4027_s8] sm:$0x3] }
 0x200   : > { %v2741_v26 = vpop.f32.mrf.mxu1  ;;  %v2781_v8 = vpop.f32.mrf.mxu0 }
 0x201   : > { %v2742_v58 = vadd.f32 %v2741_v26, %v2740_v57  ;;  %v4090_v57 = vmov 0   ;;  %v2782_v47 = vadd.f32 %v2781_v8, %v2780_v34 }
 0x202   : > { %v2837_v6 = vpop.f32.mrf.mxu1  ;;  %v4089_v56 = vld [vmem:[#allocation10_spill] sm:$0xff] }
 0x203   : > { %v1733_v12 = vadd.f32 %v2837_v6, %v1668_v35  ;;  %v1557_v6 = vadd.f32 %v2702_v15, %v2662_v16 }
 0x204   : > { %v1724_v27 = vpop.f32.mrf.mxu1 }
 0x205   : > { %v1725_v29 = vadd.f32 %v1724_v27, %v1660_v23  ;;  %v1764_v49 = vmul.f32 %v3880_v55, %v1733_v12  ;;  %v2739_v23 = vadd.f32 %v3867_v51, %v4089_v56  ;;  %v1622_v40 = vadd.f32 %v2742_v58, %v1557_v6 }
 0x206   : > { %v2838_v61 = vpop.f32.mrf.mxu1 }
 0x207   : > { %v1762_v44 = vmul.f32 %v3880_v55, %v1725_v29  ;;  %v1736_v2 = vadd.f32 %v2838_v61, %v1671_v48  ;;  %v1779_v19 = vadd.f32 %v2558_v41, %v1764_v49  ;;  %v1619_v26 = vadd.f32 %v2739_v23, %v1554_v7 }
 0x208   : > { %v1727_v37 = vpop.f32.mrf.mxu1  ;;  %v1687_v48 = vadd.f32 %v2782_v47, %v1622_v40 }
 0x209   : > { %v1728_v62 = vadd.f32 %v1727_v37, %v1663_v38  ;;  %v1777_v13 = vadd.f32 %v2558_v41, %v1762_v44  ;;  %v1765_v24 = vmul.f32 %v3880_v55, %v1736_v2  ;;  %v1787_v44 = vmax.f32 %v1779_v19, 0.0 }
 0x20a   : > { %v2841_v9 = vpop.f32.mrf.mxu1  ;;  %v1684_v38 = vadd.f32 %v2779_v4, %v1619_v26 }
 0x20b   : > { %v1763_v14 = vmul.f32 %v3880_v55, %v1728_v62  ;;  %v1785_v59 = vmax.f32 %v1777_v13, 0.0  ;;  %v1780_v27 = vadd.f32 %v2558_v41, %v1765_v24 }
 0x20c   : > { %v1740_v22 = vpop.f32.mrf.mxu1  ;;  %v1749_v35 = vadd.f32 %v2841_v9, %v1684_v38 }
 0x20d   : > { %v1778_v25 = vadd.f32 %v2558_v41, %v1763_v14  ;;  %v1741_v11 = vadd.f32 %v1740_v22, %v1676_v52  ;;  %v1788_v39 = vmax.f32 %v1780_v27, 0.0 }
 0x20e   : > { %v2842_v5 = vpop.f32.mrf.mxu1  ;;  %v1768_v10 = vmul.f32 %v3880_v55, %v1749_v35 }
 0x20f   : > { %v1786_v60 = vmax.f32 %v1778_v25, 0.0  ;;  %v1766_v51 = vmul.f32 %v3880_v55, %v1741_v11  ;;  %v1752_v18 = vadd.f32 %v2842_v5, %v1687_v48  ;;  %v1794_v3 = vpack.c.bf16 %v1788_v39, %v1787_v44  ;;  %v4091_v25 = vld [vmem:[#allocation2_spill] sm:$0xff] }
 0x210   : > { %v1743_v31 = vpop.f32.mrf.mxu1  ;;  %v1783_v13 = vadd.f32 %v2558_v41, %v1768_v10  ;;  %v1970_v28 = vsub.s32 0, %v4091_v25  ;;  %v1974_v43 = vsub.s32 1, %v4091_v25 }
 0x211   : > { %v1793_v63 = vpack.c.bf16 %v1786_v60, %v1785_v59  ;;  %v1744_v29 = vadd.f32 %v1743_v31, %v1679_v21  ;;  %v1781_v2 = vadd.f32 %v2558_v41, %v1766_v51  ;;  %v1769_v62 = vmul.f32 %v3880_v55, %v1752_v18 }
 0x212   : > { %v1791_v15 = vmax.f32 %v1783_v13, 0.0  ;;  %v3925_v50 = vrot.slane %v2219_v33, %v1970_v28  ;;  %v3929_v34 = vrot.slane %v1966_v42, %v1970_v28  ;;  %v3931_v58 = vrot.slane %v1994_v45, %v1970_v28 }
 0x213   : > { %1926 = vmatmul.mubr.bf16.vlgmr.msra.gmra.mxu0 %v1793_v63  ;;  %v1767_v61 = vmul.f32 %v3880_v55, %v1744_v29  ;;  %v1789_v12 = vmax.f32 %v1781_v2, 0.0  ;;  %v1784_v20 = vadd.f32 %v2558_v41, %v1769_v62  ;;  %v3933_v49 = vrot.slane %v1966_v42, %v1974_v43 }
 0x214   : > { %1935 = vmatprep.mubr.bf16.mxu0 %v4090_v57  ;;  %v3935_v59 = vrot.slane %v2219_v33, %v1974_v43  ;;  %v3940_v56 = vrot.slane %v1994_v45, %v1974_v43 }
 0x215   : > { %v1782_v37 = vadd.f32 %v2558_v41, %v1767_v61  ;;  %v1792_v14 = vmax.f32 %v1784_v20, 0.0  ;;  %v2191_v41 = vld [vmem:[%s4030_s11] sm:$0x3] }
 0x216   : > { %v3912_v30 = vrot.slane %v2191_v41, %v1970_v28  ;;  %v3927_v53 = vrot.slane %v2191_v41, %v1974_v43 }
 0x217   : > { %v1790_v36 = vmax.f32 %v1782_v37, 0.0  ;;  %v1796_v1 = vpack.c.bf16 %v1792_v14, %v1791_v15 }
 0x219   : > { %v1795_v54 = vpack.c.bf16 %v1790_v36, %v1789_v12 }
 0x21b   : > { %1936 = vmatmul.mubr.bf16.gmra.mxu0 %v1794_v3 }
 0x21c   : > { %1945 = vmatprep.mubr.bf16.mxu0 %v4090_v57 }
 0x222   : > { %v2152_v9 = vpop.f32.mrf.mxu1 }
 0x223   : > { %1946 = vmatmul.mubr.bf16.gmra.mxu0 %v1795_v54  ;;  %v2203_v46 = vmul.f32 %v3912_v30, %v2152_v9 }
 0x224   : > { %1955 = vmatprep.mubr.bf16.mxu0 %v4090_v57  ;;  %v2154_v16 = vpop.f32.mrf.mxu1 }
 0x225   : > { %v2231_v6 = vadd.f32 %v3925_v50, %v2203_v46  ;;  %v2204_v21 = vmul.f32 %v3927_v53, %v2154_v16 }
 0x226   : > { %v2156_v17 = vpop.f32.mrf.mxu1 }
 0x227   : > { %v2205_v63 = vmul.f32 %v3912_v30, %v2156_v17  ;;  %v2232_v40 = vadd.f32 %v3935_v59, %v2204_v21 }
 0x228   : > { %v2158_v22 = vpop.f32.mrf.mxu1 }
 0x229   : > { %v2206_v29 = vmul.f32 %v3927_v53, %v2158_v22  ;;  %v2233_v61 = vadd.f32 %v3925_v50, %v2205_v63 }
 0x22a   : > { %v2162_v0 = vpop.f32.mrf.mxu1 }
 0x22b   : > { %1956 = vmatmul.mubr.bf16.gmra.mxu0 %v1796_v1  ;;  %v2207_v47 = vmul.f32 %v3912_v30, %v2162_v0  ;;  %v2234_v38 = vadd.f32 %v3935_v59, %v2206_v29 }
 0x22c   : > { %v2164_v24 = vpop.f32.mrf.mxu1 }
 0x22d   : > { %v2235_v36 = vadd.f32 %v3925_v50, %v2207_v47  ;;  %v2208_v10 = vmul.f32 %v3927_v53, %v2164_v24 }
 0x22e   : > { %v2166_v55 = vpop.f32.mrf.mxu1 }
 0x22f   : > { %v2209_v12 = vmul.f32 %v3912_v30, %v2166_v55  ;;  %v2236_v25 = vadd.f32 %v3935_v59, %v2208_v10 }
 0x230   : > { %v2168_v32 = vpop.f32.mrf.mxu1 }
 0x231   : > { %v2210_v15 = vmul.f32 %v3927_v53, %v2168_v32  ;;  %v2237_v28 = vadd.f32 %v3925_v50, %v2209_v12 }
 0x232   : > { %v2172_v5 = vpop.f32.mrf.mxu1 }
 0x233   : > { %v2211_v22 = vmul.f32 %v3912_v30, %v2172_v5  ;;  %v2238_v46 = vadd.f32 %v3935_v59, %v2210_v15 }
 0x234   : > { %v2174_v23 = vpop.f32.mrf.mxu1 }
 0x235   : > { %v2212_v42 = vmul.f32 %v3927_v53, %v2174_v23 }
 0x236   : > { %v2176_v26 = vpop.f32.mrf.mxu1 }
 0x237   : > { %v2240_v23 = vadd.f32 %v3935_v59, %v2212_v42  ;;  %v2213_v47 = vmul.f32 %v3912_v30, %v2176_v26 }
 0x238   : > { %v2178_v62 = vpop.f32.mrf.mxu1 }
 0x239   : > { %v2241_v26 = vadd.f32 %v3925_v50, %v2213_v47 }
 0x23a   : > { %v2182_v24 = vpop.f32.mrf.mxu1 }
 0x23c   : > { %v2184_v63 = vpop.f32.mrf.mxu1 }
 0x2d3   : > { %v1927_v60 = vpop.f32.mrf.mxu0 }
 0x2d4   : > { %v1978_v31 = vmul.f32 %v3929_v34, %v1927_v60 }
 0x2d5   : > { %v1929_v27 = vpop.f32.mrf.mxu0 }
 0x2d6   : > { %v2006_v52 = vadd.f32 %v3931_v58, %v1978_v31  ;;  %v1979_v8 = vmul.f32 %v3933_v49, %v1929_v27 }
 0x2d7   : > { %v1931_v7 = vpop.f32.mrf.mxu0 }
 0x2d8   : > { %v2247_v19 = vadd.f32 %v2231_v6, %v2006_v52  ;;  %v2007_v11 = vadd.f32 %v3940_v56, %v1979_v8  ;;  %v1980_v57 = vmul.f32 %v3929_v34, %v1931_v7  ;;  %v2239_v6 = vadd.f32 %v3925_v50, %v2211_v22 }
 0x2d9   : > { %v1933_v39 = vpop.f32.mrf.mxu0 }
 0x2da   : > { %v2248_v4 = vadd.f32 %v2232_v40, %v2007_v11  ;;  %v2008_v44 = vadd.f32 %v3931_v58, %v1980_v57  ;;  %v1981_v51 = vmul.f32 %v3933_v49, %v1933_v39  ;;  %v2263_v48 = vmax.f32 %v2247_v19, 0.0 }
 0x2db   : > { %v1937_v18 = vpop.f32.mrf.mxu0  ;;  %v2215_v39 = vmul.f32 %v3912_v30, %v2182_v24 }
 0x2dc   : > { %v2264_v37 = vmax.f32 %v2248_v4, 0.0  ;;  %v2249_v3 = vadd.f32 %v2233_v61, %v2008_v44  ;;  %v2009_v35 = vadd.f32 %v3940_v56, %v1981_v51  ;;  %v1982_v2 = vmul.f32 %v3929_v34, %v1937_v18 }
 0x2dd   : > { %v1939_v20 = vpop.f32.mrf.mxu0  ;;  %v2214_v18 = vmul.f32 %v3927_v53, %v2178_v62 }
 0x2de   : > { %v2603_v54 = vpack.c.bf16 %v2264_v37, %v2263_v48  ;;  %v2250_v13 = vadd.f32 %v2234_v38, %v2009_v35  ;;  %v2010_v14 = vadd.f32 %v3931_v58, %v1982_v2  ;;  %v1983_v1 = vmul.f32 %v3933_v49, %v1939_v20  ;;  %v2186_v38 = vpop.f32.mrf.mxu1 }
 0x2df   : > { %v1941_v9 = vpop.f32.mrf.mxu0  ;;  %v2265_v16 = vmax.f32 %v2249_v3, 0.0  ;;  %v2242_v15 = vadd.f32 %v3935_v59, %v2214_v18  ;;  %v2217_v22 = vmul.f32 %v3912_v30, %v2186_v38 }
 0x2e0   : > { %2327 = vst [vmem:[%s3960_s16] sm:$0xff] %v2603_v54  ;;  %v2266_v17 = vmax.f32 %v2250_v13, 0.0  ;;  %v1984_v0 = vmul.f32 %v3929_v34, %v1941_v9  ;;  %v2251_v55 = vadd.f32 %v2235_v36, %v2010_v14  ;;  %v2011_v41 = vadd.f32 %v3940_v56, %v1983_v1  ;;  %v2188_v14 = vpop.f32.mrf.mxu1 }
 0x2e1   : > { %v1943_v43 = vpop.f32.mrf.mxu0  ;;  %v2243_v36 = vadd.f32 %v3925_v50, %v2215_v39  ;;  %v2216_v13 = vmul.f32 %v3927_v53, %v2184_v63 }
 0x2e2   : > { %v2604_v32 = vpack.c.bf16 %v2266_v17, %v2265_v16  ;;  %v2012_v33 = vadd.f32 %v3931_v58, %v1984_v0  ;;  %v1985_v45 = vmul.f32 %v3933_v49, %v1943_v43  ;;  %v2252_v5 = vadd.f32 %v2236_v25, %v2011_v41 }
 0x2e3   : > { %v1947_v60 = vpop.f32.mrf.mxu0  ;;  %v2267_v52 = vmax.f32 %v2251_v55, 0.0  ;;  %v2244_v41 = vadd.f32 %v3935_v59, %v2216_v13 }
 0x2e4   : > { %2328 = vst [vmem:[%s3960_s16 + $0x8] sm:$0xff] %v2604_v32  ;;  %v2253_v21 = vadd.f32 %v2237_v28, %v2012_v33  ;;  %v2013_v31 = vadd.f32 %v3940_v56, %v1985_v45  ;;  %v1986_v27 = vmul.f32 %v3929_v34, %v1947_v60  ;;  %v2268_v8 = vmax.f32 %v2252_v5, 0.0 }
 0x2e5   : > { %v1949_v29 = vpop.f32.mrf.mxu0  ;;  %v2218_v28 = vmul.f32 %v3927_v53, %v2188_v14 }
 0x2e6   : > { %v2254_v7 = vadd.f32 %v2238_v46, %v2013_v31  ;;  %v2014_v40 = vadd.f32 %v3931_v58, %v1986_v27  ;;  %v1987_v19 = vmul.f32 %v3933_v49, %v1949_v29  ;;  %v2605_v11 = vpack.c.bf16 %v2268_v8, %v2267_v52 }
 0x2e7   : > { %v2269_v57 = vmax.f32 %v2253_v21, 0.0  ;;  %v1951_v61 = vpop.f32.mrf.mxu0  ;;  %v2245_v46 = vadd.f32 %v3925_v50, %v2217_v22  ;;  %v2246_v21 = vadd.f32 %v3935_v59, %v2218_v28 }
 0x2e8   : > { %v2270_v4 = vmax.f32 %v2254_v7, 0.0  ;;  %v2255_v44 = vadd.f32 %v2239_v6, %v2014_v40  ;;  %v2015_v51 = vadd.f32 %v3940_v56, %v1987_v19  ;;  %v1988_v48 = vmul.f32 %v3929_v34, %v1951_v61  ;;  %2329 = vst [vmem:[%s3960_s16 + $0x10] sm:$0xff] %v2605_v11 }
 0x2e9   : > { %v1953_v37 = vpop.f32.mrf.mxu0 }
 0x2ea   : > { %v2606_v3 = vpack.c.bf16 %v2270_v4, %v2269_v57  ;;  %v2256_v35 = vadd.f32 %v2240_v23, %v2015_v51  ;;  %v2016_v2 = vadd.f32 %v3931_v58, %v1988_v48  ;;  %v1989_v10 = vmul.f32 %v3933_v49, %v1953_v37 }
 0x2eb   : > { %v1957_v12 = vpop.f32.mrf.mxu0  ;;  %v2271_v20 = vmax.f32 %v2255_v44, 0.0 }
 0x2ec   : > { %2330 = vst [vmem:[%s3960_s16 + $0x18] sm:$0xff] %v2606_v3  ;;  %v2272_v54 = vmax.f32 %v2256_v35, 0.0  ;;  %v1990_v62 = vmul.f32 %v3929_v34, %v1957_v12  ;;  %v2257_v1 = vadd.f32 %v2241_v26, %v2016_v2  ;;  %v2017_v9 = vadd.f32 %v3940_v56, %v1989_v10 }
 0x2ed   : > { %v1959_v16 = vpop.f32.mrf.mxu0 }
 0x2ee   : > { %v2607_v17 = vpack.c.bf16 %v2272_v54, %v2271_v20  ;;  %v2018_v0 = vadd.f32 %v3931_v58, %v1990_v62  ;;  %v1991_v24 = vmul.f32 %v3933_v49, %v1959_v16  ;;  %v2258_v25 = vadd.f32 %v2242_v15, %v2017_v9 }
 0x2ef   : > { %v1961_v55 = vpop.f32.mrf.mxu0  ;;  %v2273_v42 = vmax.f32 %v2257_v1, 0.0 }
 0x2f0   : > { %2331 = vst [vmem:[%s3960_s16 + $0x20] sm:$0xff] %v2607_v17  ;;  %v2259_v43 = vadd.f32 %v2243_v36, %v2018_v0  ;;  %v2019_v32 = vadd.f32 %v3940_v56, %v1991_v24  ;;  %v1992_v33 = vmul.f32 %v3929_v34, %v1961_v55  ;;  %v2274_v30 = vmax.f32 %v2258_v25, 0.0 }
 0x2f1   : > { %v1963_v45 = vpop.f32.mrf.mxu0 }
 0x2f2   : > { %v2260_v5 = vadd.f32 %v2244_v41, %v2019_v32  ;;  %v2020_v53 = vadd.f32 %v3931_v58, %v1992_v33  ;;  %v1993_v60 = vmul.f32 %v3933_v49, %v1963_v45  ;;  %v2608_v6 = vpack.c.bf16 %v2274_v30, %v2273_v42 }
 0x2f3   : > { %v2275_v31 = vmax.f32 %v2259_v43, 0.0 }
 0x2f4   : > { %v2276_v27 = vmax.f32 %v2260_v5, 0.0  ;;  %v2261_v63 = vadd.f32 %v2245_v46, %v2020_v53  ;;  %v2021_v34 = vadd.f32 %v3940_v56, %v1993_v60  ;;  %2332 = vst [vmem:[%s3960_s16 + $0x28] sm:$0xff] %v2608_v6 }
 0x2f6   : > { %v2609_v52 = vpack.c.bf16 %v2276_v27, %v2275_v31  ;;  %v2262_v8 = vadd.f32 %v2246_v21, %v2021_v34  ;;  %v2277_v29 = vmax.f32 %v2261_v63, 0.0 }
 0x2f8   : > { %2333 = vst [vmem:[%s3960_s16 + $0x30] sm:$0xff] %v2609_v52  ;;  %v2278_v50 = vmax.f32 %v2262_v8, 0.0 }
 0x2fa   : > { %v2610_v23 = vpack.c.bf16 %v2278_v50, %v2277_v29 }
 0x2fc   : > { %2334 = vst [vmem:[%s3960_s16 + $0x38] sm:$0xff] %v2610_v23 }
 0x2fd PF: > { %s23_s25 = sadd.s32 1, %s2996_s25  }
 0x2fe   : > { %p20_p4 = scmp.ge.s32.totalorder %s23_s25, 4  }
 0x300   :  { %22 = sbr.rel (!%p20_p4) target bundleno = 1 (0x1), region = 102 }

// kernel: resnet50_base_forward.22
= control target key start
LH: loop header
LB: loop body
LE: loop exit
PB: predicated region body
PF: predicated region fallthrough
CT: control target
= control target key end

     0   :  { %s1194_s18 = smov 0   ;;  %s1196_s19 = smov 0   ;;  %s1336_s0 = inlined_call_operand.vmem [shape: bf16[32,128], index: 0, kind: input, shape index: {}]   ;;  %s1337_s1 = inlined_call_operand.vmem [shape: bf16[128,512], index: 1, kind: input, shape index: {}]   ;;  %s1338_s2 = inlined_call_operand.vmem [shape: f32[1,512], index: 2, kind: input, shape index: {}]   ;;  %s1339_s3 = inlined_call_operand.vmem [shape: f32[1,512], index: 3, kind: input, shape index: {}]   ;;  %s1340_s4 = inlined_call_operand.vmem [shape: bf16[32,512], index: 4, kind: input, shape index: {}]   ;;  %s1341_s5 = inlined_call_operand.vmem [shape: bf16[32,512], index: 5, kind: output, shape index: {}]  }
   0x1   :  { %s1198_s20 = smov 0   ;;  %s1200_s21 = smov 0  }
   0x2   :  { %s1202_s22 = smov 0  }
   0x3 LB: > { %s30_s23 = sadd.s32 1, %s1157_s21  ;;  %s989_s24 = sadd.s32 4294967295, %s1161_s22   ;;  %s1161_s22 = sphi %s1202_s22, %s15_s22   ;;  %s1157_s21 = sphi %s1200_s21, %s1347_s21   ;;  %s1153_s20 = sphi %s1198_s20, %s1346_s20   ;;  %s1149_s19 = sphi %s1196_s19, %s1345_s19   ;;  %s1145_s18 = sphi %s1194_s18, %s1344_s18  }
   0x4   : > { %p32_p0 = scmp.ge.s32.totalorder %s30_s23, 2  ;;  %p78_p1 = scmp.ne.s32.totalorder %s1149_s19, %s1145_s18 }
   0x5   : > { %p79_p2 = scmp.eq.s32.totalorder %s1161_s22, 0  ;;  %p190_p4 = scmp.eq.s32.totalorder %s989_s24, 1 }
   0x6   : > { %s1349_s23 = smov (%p32_p0, %s30_s23), 0  ;;  %s71_s27 = sadd.s32 1, %s1149_s19 }
   0x7   : > { %p1226_p3 = por %p79_p2, %p78_p1  ;;  %s67_s26 = ssub.s32 %s1157_s21, %s1349_s23 }
   0x8   : > { %p69_p5 = scmp.eq.s32.totalorder %s67_s26, 0  ;;  %p1233_p6 = por %p190_p4, %p78_p1 }
   0x9   : > { %p993_p7 = scmp.ge.s32.totalorder %s1161_s22, 2 }
   0xa   : > { %s1238_s29 = scalar_select %p69_p5, %s1149_s19, %s71_s27  }
   0xb   : > { %224 = sbr.rel (%p993_p7) target bundleno = 34 (0x22), region = 20 }
  0x10   : > { %227 = sbr.rel (!%p1226_p3) target bundleno = 28 (0x1c), region = 24  ;;  %s229_s30 = sand.u32 (%p1226_p3), 1, %s1149_s19  }
  0x11   : > { %s1033_s6 = sshll.u32 (%p1226_p3), %s1157_s21, 3  ;;  %s994_s7 = sshll.u32 (%p1226_p3), %s229_s30, 7 }
  0x12   : > { %s1248_s10 = scalar_lea.vmem (%p1226_p3), %s1337_s1, %s1033_s6  ;;  %s231_s11 = scalar_lea.vmem (%p1226_p3), [#allocation3], %s994_s7 }
  0x13   : > { %v296_v0 = vld [vmem:[%s1248_s10] sm:$0xff] (%p1226_p3)  ;;  %v298_v1 = vld [vmem:[%s1248_s10 + $0x10] sm:$0xff] (%p1226_p3) }
  0x14   : > { %v300_v2 = vld [vmem:[%s1248_s10 + $0x20] sm:$0xff] (%p1226_p3)  ;;  %297 = vst [vmem:[%s231_s11] sm:$0xff] (%p1226_p3), %v296_v0  ;;  %299 = vst [vmem:[%s231_s11 + $0x8] sm:$0xff] (%p1226_p3), %v298_v1  ;;  %v302_v3 = vld [vmem:[%s1248_s10 + $0x30] sm:$0xff] (%p1226_p3) }
  0x15   : > { %301 = vst [vmem:[%s231_s11 + $0x10] sm:$0xff] %v300_v2  ;;  %v304_v4 = vld [vmem:[%s1248_s10 + $0x40] sm:$0xff]  ;;  %v306_v5 = vld [vmem:[%s1248_s10 + $0x50] sm:$0xff]  ;;  %303 = vst [vmem:[%s231_s11 + $0x18] sm:$0xff] %v302_v3 }
  0x16   : > { %305 = vst [vmem:[%s231_s11 + $0x20] sm:$0xff] %v304_v4  ;;  %307 = vst [vmem:[%s231_s11 + $0x28] sm:$0xff] %v306_v5  ;;  %v308_v6 = vld [vmem:[%s1248_s10 + $0x60] sm:$0xff]  ;;  %v310_v7 = vld [vmem:[%s1248_s10 + $0x70] sm:$0xff] }
  0x17   : > { %v312_v8 = vld [vmem:[%s1248_s10 + $0x80] sm:$0xff]  ;;  %309 = vst [vmem:[%s231_s11 + $0x30] sm:$0xff] %v308_v6  ;;  %311 = vst [vmem:[%s231_s11 + $0x38] sm:$0xff] %v310_v7  ;;  %v314_v9 = vld [vmem:[%s1248_s10 + $0x90] sm:$0xff] }
  0x18   : > { %313 = vst [vmem:[%s231_s11 + $0x40] sm:$0xff] %v312_v8  ;;  %v316_v10 = vld [vmem:[%s1248_s10 + $0xa0] sm:$0xff]  ;;  %v318_v11 = vld [vmem:[%s1248_s10 + $0xb0] sm:$0xff]  ;;  %315 = vst [vmem:[%s231_s11 + $0x48] sm:$0xff] %v314_v9 }
  0x19   : > { %317 = vst [vmem:[%s231_s11 + $0x50] sm:$0xff] %v316_v10  ;;  %319 = vst [vmem:[%s231_s11 + $0x58] sm:$0xff] %v318_v11  ;;  %v320_v12 = vld [vmem:[%s1248_s10 + $0xc0] sm:$0xff]  ;;  %v322_v13 = vld [vmem:[%s1248_s10 + $0xd0] sm:$0xff] }
  0x1a   : > { %v324_v14 = vld [vmem:[%s1248_s10 + $0xe0] sm:$0xff]  ;;  %321 = vst [vmem:[%s231_s11 + $0x60] sm:$0xff] %v320_v12  ;;  %323 = vst [vmem:[%s231_s11 + $0x68] sm:$0xff] %v322_v13  ;;  %v326_v15 = vld [vmem:[%s1248_s10 + $0xf0] sm:$0xff] }
  0x1b   : > { %325 = vst [vmem:[%s231_s11 + $0x70] sm:$0xff] %v324_v14  ;;  %327 = vst [vmem:[%s231_s11 + $0x78] sm:$0xff] %v326_v15 }
  0x1c PF: > { %349 = sbr.rel (!%p1226_p3) target bundleno = 34 (0x22), region = 70  ;;  %s351_s12 = sand.u32 (%p1226_p3), 1, %s1149_s19  }
  0x1d   : > { %s1034_s13 = sshll.u32 (%p1226_p3), %s1157_s21, 3  ;;  %s997_s14 = sshll.u32 (%p1226_p3), %s351_s12, 5 }
  0x1e   : > { %s359_s17 = scalar_lea.vmem (%p1226_p3), %s1340_s4, %s1034_s13  ;;  %s353_s24 = scalar_lea.vmem (%p1226_p3), [#allocation4], %s997_s14 }
  0x1f   : > { %v394_v16 = vld [vmem:[%s359_s17] sm:$0xff] (%p1226_p3)  ;;  %v396_v17 = vld [vmem:[%s359_s17 + $0x10] sm:$0xff] (%p1226_p3) }
  0x20   : > { %v398_v18 = vld [vmem:[%s359_s17 + $0x20] sm:$0xff] (%p1226_p3)  ;;  %395 = vst [vmem:[%s353_s24] sm:$0xff] (%p1226_p3), %v394_v16  ;;  %397 = vst [vmem:[%s353_s24 + $0x8] sm:$0xff] (%p1226_p3), %v396_v17  ;;  %v400_v19 = vld [vmem:[%s359_s17 + $0x30] sm:$0xff] (%p1226_p3) }
  0x21   : > { %399 = vst [vmem:[%s353_s24 + $0x10] sm:$0xff] %v398_v18  ;;  %401 = vst [vmem:[%s353_s24 + $0x18] sm:$0xff] %v400_v19 }
  0x22 PF: > { %p1000_p8 = scmp.ge.s32.totalorder %s1161_s22, 1  ;;  %p406_p9 = scmp.lt.s32.totalorder %s1161_s22, 3 }
  0x24   : > { %p407_p10 = pnand %p1000_p8, %p406_p9 }
  0x25   : > { %s413_s25 = sand.u32 (!%p407_p10), 1, %s1145_s18   ;;  %s1004_s9 = sshll.u32 (!%p407_p10), %s1153_s20, 1 }
  0x26   : > { %410 = sbr.rel (%p407_p10) target bundleno = 295 (0x127), region = 108  ;;  %s1001_s26 = sshll.u32 (!%p407_p10), %s413_s25, 7 }
  0x27   : > { %s1278_s27 = scalar_lea.vmem (!%p407_p10), [#allocation3], %s1001_s26  ;;  %p478_p11 = scmp.lt.s32.totalorder (!%p407_p10), %s1004_s9, 3 }
  0x28   : > { %s1305_s10 = sshll.u32 (!%p407_p10), %s413_s25, 5 }
  0x29   : > { %s422_s17 = scalar_lea.vmem (!%p407_p10), [#allocation4], %s1305_s10  ;;  %s465_s18 = scalar_lea.vmem (!%p407_p10), [#allocation5], %s1305_s10 }
  0x2b   : > { %v1163_v20 = vmov 0   ;;  %v1097_v21 = vld [vmem:[%s1278_s27 + $0x74] ss:$8 sps:$4 sm:$0xff]   ;;  %v1099_v22 = vld [vmem:[%s1278_s27 + $0x70] ss:$8 sps:$4 sm:$0xff]   ;;  %v1121_v37 = vld [vmem:[%s1336_s0] sm:$0xff]   ;;  %v706_v39 = vlaneseq }
  0x2c   : > { %656 = vmatprep.mubr.bf16.mxu0 %v1163_v20  ;;  %666 = vmatprep.mubr.bf16.mxu1 %v1163_v20  ;;  %v1100_v23 = vld [vmem:[%s1278_s27 + $0x64] ss:$8 sps:$4 sm:$0xff]   ;;  %v1102_v24 = vld [vmem:[%s1278_s27 + $0x60] ss:$8 sps:$4 sm:$0xff]   ;;  %v1103_v25 = vld [vmem:[%s1278_s27 + $0x54] ss:$8 sps:$4 sm:$0xff]  }
  0x2d   : > { %624 = vmatprep.subr.bf16.mxu0 %v1097_v21  ;;  %1040 = vmatprep.subr.bf16.mxu1 %v1097_v21  ;;  %v1105_v26 = vld [vmem:[%s1278_s27 + $0x50] ss:$8 sps:$4 sm:$0xff]   ;;  %v1106_v27 = vld [vmem:[%s1278_s27 + $0x44] ss:$8 sps:$4 sm:$0xff]   ;;  %v1108_v28 = vld [vmem:[%s1278_s27 + $0x40] ss:$8 sps:$4 sm:$0xff]  }
  0x2e   : > { %625 = vmatpush1.bf16.msra.mxu0 %v1099_v22  ;;  %1048 = vmatpush1.bf16.msra.mxu1 %v1099_v22  ;;  %v1109_v29 = vld [vmem:[%s1278_s27 + $0x34] ss:$8 sps:$4 sm:$0xff]   ;;  %v1111_v30 = vld [vmem:[%s1278_s27 + $0x30] ss:$8 sps:$4 sm:$0xff]   ;;  %v1112_v31 = vld [vmem:[%s1278_s27 + $0x24] ss:$8 sps:$4 sm:$0xff]  }
  0x2f   : > { %626 = vmatprep.subr.bf16.mxu0 %v1100_v23  ;;  %1041 = vmatprep.subr.bf16.mxu1 %v1100_v23  ;;  %v1114_v32 = vld [vmem:[%s1278_s27 + $0x20] ss:$8 sps:$4 sm:$0xff]   ;;  %v1115_v33 = vld [vmem:[%s1278_s27 + $0x14] ss:$8 sps:$4 sm:$0xff]   ;;  %v1117_v34 = vld [vmem:[%s1278_s27 + $0x10] ss:$8 sps:$4 sm:$0xff]  }
  0x30   : > { %v1118_v35 = vld [vmem:[%s1278_s27 + $0x4] ss:$8 sps:$4 sm:$0xff]   ;;  %v1120_v36 = vld [vmem:[%s1278_s27] ss:$8 sps:$4 sm:$0xff]   ;;  %s1351_s9 = smov (!%p478_p11, %s1004_s9), 3  ;;  %v707_v40 = vshrl.u32 %v706_v39, 7 }
  0x31   : > { %v1122_v38 = vld [vmem:[%s1336_s0 + $0x8] sm:$0xff]   ;;  %s480_s13 = scalar_lea.vmem %s1338_s2, %s1351_s9  ;;  %s485_s16 = scalar_lea.vmem %s1339_s3, %s1351_s9  ;;  %v744_v46 = vld [vmem:[%s422_s17] sm:$0xff]  ;;  %v746_v47 = vld [vmem:[%s422_s17 + $0x10] sm:$0xff] }
  0x32   : > { %627 = vmatpush1.bf16.msra.mxu0 %v1102_v24  ;;  %1049 = vmatpush1.bf16.msra.mxu1 %v1102_v24  ;;  %v708_v41 = vsub.s32 0, %v707_v40  ;;  %v704_v42 = vld [vmem:[%s480_s13] sm:$0x3]  ;;  %v712_v43 = vsub.s32 1, %v707_v40  ;;  %v748_v51 = vunpack.c.l.bf16 %v744_v46  ;;  %v752_v55 = vunpack.c.l.bf16 %v746_v47  ;;  %v745_v1 = vld [vmem:[%s422_s17 + $0x8] sm:$0xff]  ;;  %v747_v2 = vld [vmem:[%s422_s17 + $0x18] sm:$0xff] }
  0x33   : > { %628 = vmatprep.subr.bf16.mxu0 %v1103_v25  ;;  %1042 = vmatprep.subr.bf16.mxu1 %v1103_v25  ;;  %v724_v44 = vld [vmem:[%s485_s16] sm:$0x3]  ;;  %v749_v58 = vunpack.c.h.bf16 %v744_v46  ;;  %v753_v60 = vunpack.c.h.bf16 %v746_v47  ;;  %v750_v10 = vunpack.c.l.bf16 %v745_v1  ;;  %v754_v12 = vunpack.c.l.bf16 %v747_v2  ;;  %s1039_s24 = sshll.u32 (%p1233_p6), %s1153_s20, 3 }
  0x34   : > { %v709_v45 = vrot.slane %v704_v42, %v708_v41  ;;  %v729_v48 = vrot.slane %v724_v44, %v708_v41  ;;  %v713_v49 = vrot.slane %v704_v42, %v712_v43  ;;  %v733_v56 = vrot.slane %v724_v44, %v712_v43  ;;  %s812_s27 = scalar_lea.vmem (%p1233_p6), %s1341_s5, %s1039_s24 }
  0x35   : > { %v751_v17 = vunpack.c.h.bf16 %v745_v1  ;;  %v755_v18 = vunpack.c.h.bf16 %v747_v2 }
  0x36   : > { %629 = vmatpush1.bf16.msra.mxu0 %v1105_v26  ;;  %1050 = vmatpush1.bf16.msra.mxu1 %v1105_v26 }
  0x37   : > { %630 = vmatprep.subr.bf16.mxu0 %v1106_v27  ;;  %1043 = vmatprep.subr.bf16.mxu1 %v1106_v27 }
  0x3a   : > { %631 = vmatpush1.bf16.msra.mxu0 %v1108_v28  ;;  %1051 = vmatpush1.bf16.msra.mxu1 %v1108_v28 }
  0x3b   : > { %632 = vmatprep.subr.bf16.mxu0 %v1109_v29  ;;  %1044 = vmatprep.subr.bf16.mxu1 %v1109_v29 }
  0x3e   : > { %633 = vmatpush1.bf16.msra.mxu0 %v1111_v30  ;;  %1052 = vmatpush1.bf16.msra.mxu1 %v1111_v30 }
  0x3f   : > { %634 = vmatprep.subr.bf16.mxu0 %v1112_v31  ;;  %1045 = vmatprep.subr.bf16.mxu1 %v1112_v31 }
  0x42   : > { %635 = vmatpush1.bf16.msra.mxu0 %v1114_v32  ;;  %1053 = vmatpush1.bf16.msra.mxu1 %v1114_v32 }
  0x43   : > { %636 = vmatprep.subr.bf16.mxu0 %v1115_v33  ;;  %1046 = vmatprep.subr.bf16.mxu1 %v1115_v33 }
  0x46   : > { %637 = vmatpush1.bf16.msra.mxu0 %v1117_v34  ;;  %1054 = vmatpush1.bf16.msra.mxu1 %v1117_v34 }
  0x47   : > { %638 = vmatprep.subr.bf16.mxu0 %v1118_v35  ;;  %1047 = vmatprep.subr.bf16.mxu1 %v1118_v35 }
  0x4a   : > { %639 = vmatpush1.bf16.msra.mxu0 %v1120_v36  ;;  %1055 = vmatpush1.bf16.msra.mxu1 %v1120_v36 }
  0x4d   : > { %657 = vmatmul.mubr.bf16.vlgmr.msra.gmra.mxu0 %v1121_v37  ;;  %667 = vmatmul.mubr.bf16.vlgmr.msra.gmra.mxu1 %v1122_v38 }
 0x10d   : > { %v658_v50 = vpop.f32.mrf.mxu0  ;;  %v668_v52 = vpop.f32.mrf.mxu1 }
 0x10e   : > { %v716_v53 = vmul.f32 %v709_v45, %v658_v50  ;;  %v720_v54 = vmul.f32 %v709_v45, %v668_v52 }
 0x10f   : > { %v660_v57 = vpop.f32.mrf.mxu0  ;;  %v670_v59 = vpop.f32.mrf.mxu1 }
 0x110   : > { %v736_v61 = vadd.f32 %v729_v48, %v716_v53  ;;  %v740_v62 = vadd.f32 %v729_v48, %v720_v54  ;;  %v717_v63 = vmul.f32 %v713_v49, %v660_v57  ;;  %v721_v0 = vmul.f32 %v713_v49, %v670_v59 }
 0x111   : > { %v662_v3 = vpop.f32.mrf.mxu0  ;;  %v672_v4 = vpop.f32.mrf.mxu1 }
 0x112   : > { %v756_v5 = vadd.f32 %v748_v51, %v736_v61  ;;  %v760_v6 = vadd.f32 %v752_v55, %v740_v62  ;;  %v737_v7 = vadd.f32 %v733_v56, %v717_v63  ;;  %v741_v8 = vadd.f32 %v733_v56, %v721_v0 }
 0x113   : > { %v718_v9 = vmul.f32 %v709_v45, %v662_v3  ;;  %v722_v11 = vmul.f32 %v709_v45, %v672_v4  ;;  %v664_v13 = vpop.f32.mrf.mxu0  ;;  %v674_v14 = vpop.f32.mrf.mxu1 }
 0x114   : > { %v757_v15 = vadd.f32 %v749_v58, %v737_v7  ;;  %v761_v16 = vadd.f32 %v753_v60, %v741_v8  ;;  %v719_v21 = vmul.f32 %v713_v49, %v664_v13  ;;  %v723_v22 = vmul.f32 %v713_v49, %v674_v14 }
 0x115   : > { %v738_v19 = vadd.f32 %v729_v48, %v718_v9  ;;  %v742_v20 = vadd.f32 %v729_v48, %v722_v11  ;;  %v764_v23 = vmax.f32 %v756_v5, 0.0  ;;  %v768_v24 = vmax.f32 %v760_v6, 0.0 }
 0x116   : > { %v765_v25 = vmax.f32 %v757_v15, 0.0  ;;  %v769_v26 = vmax.f32 %v761_v16, 0.0  ;;  %v739_v29 = vadd.f32 %v733_v56, %v719_v21  ;;  %v743_v30 = vadd.f32 %v733_v56, %v723_v22 }
 0x117   : > { %v758_v27 = vadd.f32 %v750_v10, %v738_v19  ;;  %v762_v28 = vadd.f32 %v754_v12, %v742_v20 }
 0x118   : > { %v1035_v31 = vpack.c.bf16 %v765_v25, %v764_v23  ;;  %v1037_v32 = vpack.c.bf16 %v769_v26, %v768_v24  ;;  %v759_v33 = vadd.f32 %v751_v17, %v739_v29  ;;  %v763_v34 = vadd.f32 %v755_v18, %v743_v30 }
 0x119   : > { %v766_v35 = vmax.f32 %v758_v27, 0.0  ;;  %v770_v36 = vmax.f32 %v762_v28, 0.0 }
 0x11a   : > { %796 = vst [vmem:[%s465_s18] sm:$0xff] %v1035_v31  ;;  %798 = vst [vmem:[%s465_s18 + $0x10] sm:$0xff] %v1037_v32  ;;  %v767_v37 = vmax.f32 %v759_v33, 0.0  ;;  %v771_v38 = vmax.f32 %v763_v34, 0.0  ;;  %806 = sbr.rel (!%p1233_p6) target bundleno = 295 (0x127), region = 128 }
 0x11c   : > { %v1036_v39 = vpack.c.bf16 %v767_v37, %v766_v35  ;;  %v1038_v40 = vpack.c.bf16 %v771_v38, %v770_v36 }
 0x11e   : > { %797 = vst [vmem:[%s465_s18 + $0x8] sm:$0xff] %v1036_v39  ;;  %799 = vst [vmem:[%s465_s18 + $0x18] sm:$0xff] %v1038_v40 }
 0x121   : > { %v847_v41 = vld [vmem:[%s465_s18] sm:$0xff]  ;;  %v851_v43 = vld [vmem:[%s465_s18 + $0x10] sm:$0xff] }
 0x122   : > { %848 = vst [vmem:[%s812_s27] sm:$0xff] %v847_v41  ;;  %852 = vst [vmem:[%s812_s27 + $0x20] sm:$0xff] %v851_v43 }
 0x125   : > { %v849_v42 = vld [vmem:[%s465_s18 + $0x8] sm:$0xff]  ;;  %v853_v44 = vld [vmem:[%s465_s18 + $0x18] sm:$0xff] }
 0x126   : > { %850 = vst [vmem:[%s812_s27 + $0x10] sm:$0xff] %v849_v42  ;;  %854 = vst [vmem:[%s812_s27 + $0x30] sm:$0xff] %v853_v44 }
 0x127 PF: > { %s15_s22 = sadd.s32 1, %s1161_s22   ;;  %s1344_s18 = smov %s1149_s19 }
 0x128   : > { %p12_p12 = scmp.ge.s32.totalorder %s15_s22, 4   ;;  %s1345_s19 = smov %s1238_s29 }
 0x129   : > { %s1346_s20 = smov %s1157_s21  ;;  %s1347_s21 = smov %s1349_s23 }
 0x12a   :  { %14 = sbr.rel (!%p12_p12) target bundleno = 3 (0x3), region = 214 }

// kernel: resnet50_base_forward.20
= control target key start
LH: loop header
LB: loop body
LE: loop exit
PB: predicated region body
PF: predicated region fallthrough
CT: control target
= control target key end

     0   :  { %s1143_s15 = smov 0   ;;  %s1145_s16 = smov 0   ;;  %s1256_s0 = inlined_call_operand.vmem [shape: bf16[32,1152], index: 0, kind: input, shape index: {}]   ;;  %s1257_s1 = inlined_call_operand.vmem [shape: bf16[1152,128], index: 1, kind: input, shape index: {}]   ;;  %s1258_s2 = inlined_call_operand.vmem [shape: f32[1,128], index: 2, kind: input, shape index: {}]   ;;  %s1259_s3 = inlined_call_operand.vmem [shape: f32[1,128], index: 3, kind: input, shape index: {}]   ;;  %s1260_s4 = inlined_call_operand.vmem [shape: bf16[32,128], index: 4, kind: output, shape index: {}]  }
   0x1   :  { %s1147_s17 = smov 0   ;;  %s1149_s18 = smov 0  }
   0x2   :  { %s1151_s19 = smov 0  }
   0x3 LB: > { %s26_s20 = sadd.s32 1, %s1111_s18  ;;  %p49_p1 = scmp.ne.s32.totalorder %s1103_s16, %s1099_s15  ;;  %s1115_s19 = sphi %s1151_s19, %s14_s19   ;;  %s1111_s18 = sphi %s1149_s18, %s1264_s18   ;;  %s1107_s17 = sphi %s1147_s17, %s1263_s17   ;;  %s1103_s16 = sphi %s1145_s16, %s1262_s16   ;;  %s1099_s15 = sphi %s1143_s15, %s1261_s15  }
   0x4   : > { %p27_p0 = scmp.ge.s32.totalorder %s26_s20, 3  ;;  %p50_p2 = scmp.eq.s32.totalorder %s1115_s19, 0 }
   0x5   : > { %s42_s22 = sadd.s32 1, %s1103_s16  ;;  %p874_p5 = scmp.ge.s32.totalorder %s1115_s19, 3 }
   0x6   : > { %s1266_s20 = smov (%p27_p0, %s26_s20), 0  ;;  %p51_p3 = por %p50_p2, %p49_p1 }
   0x7   : > { %s38_s21 = ssub.s32 %s1111_s18, %s1266_s20  ;;  %195 = sbr.rel (%p874_p5) target bundleno = 21 (0x15), region = 24 }
   0x8   : > { %p40_p4 = scmp.eq.s32.totalorder %s38_s21, 0 }
   0xa   : > { %s1178_s23 = scalar_select %p40_p4, %s1103_s16, %s42_s22  }
   0xc   : > { %198 = sbr.rel (!%p51_p3) target bundleno = 21 (0x15), region = 28  ;;  %s200_s24 = sand.u32 (%p51_p3), 1, %s1103_s16  }
   0xd   : > { %s928_s25 = smul.u32 (%p51_p3), 12, %s1111_s18 }
   0xe   : > { %s1002_s26 = smul.u32 (%p51_p3), 48, %s200_s24 }
   0xf   : > { %s208_s29 = scalar_lea.vmem (%p51_p3), %s1256_s0, %s928_s25 }
  0x10   : > { %v223_v0 = vld [vmem:[%s208_s29] sm:$0xff] (%p51_p3)  ;;  %v227_v2 = vld [vmem:[%s208_s29 + $0x48] sm:$0xff] (%p51_p3)  ;;  %s202_s30 = scalar_lea.vmem (%p51_p3), [#allocation3], %s1002_s26  ;;  %v880_v6 = vld [vmem:[%s208_s29 + $0x50] sm:$0xf] (%p51_p3) }
  0x11   : > { %v225_v1 = vld [vmem:[%s208_s29 + $0x24] sm:$0xff]  ;;  %224 = vst [vmem:[%s202_s30] sm:$0xff] %v223_v0  ;;  %228 = vst [vmem:[%s202_s30 + $0x18] sm:$0xff] %v227_v2  ;;  %v229_v3 = vld [vmem:[%s208_s29 + $0x6c] sm:$0xff] }
  0x12   : > { %226 = vst [vmem:[%s202_s30 + $0xc] sm:$0xff] %v225_v1  ;;  %v876_v4 = vld [vmem:[%s208_s29 + $0x8] sm:$0xf]  ;;  %v878_v5 = vld [vmem:[%s208_s29 + $0x2c] sm:$0xf]  ;;  %230 = vst [vmem:[%s202_s30 + $0x24] sm:$0xff] %v229_v3 }
  0x13   : > { %877 = vst [vmem:[%s202_s30 + $0x8] sm:$0xf] %v876_v4  ;;  %879 = vst [vmem:[%s202_s30 + $0x14] sm:$0xf] %v878_v5  ;;  %v882_v7 = vld [vmem:[%s208_s29 + $0x74] sm:$0xf] }
  0x14   : > { %881 = vst [vmem:[%s202_s30 + $0x20] sm:$0xf] %v880_v6  ;;  %883 = vst [vmem:[%s202_s30 + $0x2c] sm:$0xf] %v882_v7 }
  0x15 PF: > { %p884_p6 = scmp.ge.s32.totalorder %s1115_s19, 1  ;;  %p263_p7 = scmp.lt.s32.totalorder %s1115_s19, 4 }
  0x17   : > { %p264_p8 = pnand %p884_p6, %p263_p7 }
  0x18   : > { %s270_s5 = sand.u32 (!%p264_p8), 1, %s1099_s15   ;;  %s314_s6 = smul.u32 (!%p264_p8), 48, %s1107_s17 }
  0x19   : > { %267 = sbr.rel (%p264_p8) target bundleno = 301 (0x12d), region = 58  ;;  %p886_p10 = scmp.ne.s32.totalorder (!%p264_p8), %s1107_s17, 0 }
  0x1a   : > { %s1003_s7 = smul.u32 (!%p264_p8), 48, %s270_s5  ;;  %p315_p9 = scmp.lt.s32.totalorder (!%p264_p8), %s314_s6, 143 }
  0x1c   : > { %s1195_s12 = scalar_lea.vmem (!%p264_p8), [#allocation3], %s1003_s7 }
  0x1e   : > { %s1268_s6 = smov (!%p315_p9, %s314_s6), 143  ;;  %342 = sbr.rel (%p886_p10) target bundleno = 38 (0x26), region = 66 }
  0x1f   : > { %s885_s8 = sshll.u32 %s1268_s6, 2 }
  0x20   : > { %s1193_s11 = scalar_lea.vmem %s1257_s1, %s885_s8 }
  0x23   : > { %v1117_v8 = vmov 0.0  }
  0x24   : > { %343 = vst [vmem:[#allocation2 + $0x10] sm:$0xff] %v1117_v8  ;;  %344 = vst [vmem:[#allocation2] sm:$0xff] %v1117_v8 }
  0x25   : > { %345 = vst [vmem:[#allocation2 + $0x18] sm:$0xff] %v1117_v8  ;;  %346 = vst [vmem:[#allocation2 + $0x8] sm:$0xff] %v1117_v8 }
  0x26 PF: > { %v1045_v9 = vld [vmem:[%s1193_s11 + $0x78] sm:$0xff]   ;;  %v1048_v12 = vld [vmem:[%s1193_s11 + $0x70] sm:$0xff]   ;;  %v1051_v15 = vld [vmem:[%s1193_s11 + $0x68] sm:$0xff]   ;;  %p917_p11 = scmp.ne.s32.totalorder %s1107_s17, 2 }
  0x27   : > { %v1046_v10 = vld [vmem:[%s1193_s11 + $0x38] sm:$0xff]   ;;  %944 = vmatprep.subr.bf16.mxu0 %v1045_v9  ;;  %v1049_v13 = vld [vmem:[%s1193_s11 + $0x30] sm:$0xff]   ;;  %v1052_v16 = vld [vmem:[%s1193_s11 + $0x28] sm:$0xff]  }
  0x28   : > { %v1047_v11 = vld [vmem:[%s1193_s11 + $0xb8] sm:$0xff]   ;;  %945 = vmatpush3.bf16.msra.mxu0 %v1046_v10  ;;  %v1050_v14 = vld [vmem:[%s1193_s11 + $0xb0] sm:$0xff]   ;;  %v1053_v17 = vld [vmem:[%s1193_s11 + $0xa8] sm:$0xff]  }
  0x29   : > { %982 = vmatprep.subr.bf16.mxu1 %v1047_v11  ;;  %946 = vmatprep.subr.bf16.mxu0 %v1048_v12  ;;  %v1054_v18 = vld [vmem:[%s1193_s11 + $0x60] sm:$0xff]   ;;  %v1057_v21 = vld [vmem:[%s1193_s11 + $0x58] sm:$0xff]   ;;  %v1060_v24 = vld [vmem:[%s1193_s11 + $0x50] sm:$0xff]  }
  0x2a   : > { %983 = vmatpush3.bf16.msra.mxu1 %v1047_v11  ;;  %v1055_v19 = vld [vmem:[%s1193_s11 + $0x20] sm:$0xff]   ;;  %v1059_v22 = vld [vmem:[%s1193_s11 + $0x98] sm:$0xff]   ;;  %v1062_v25 = vld [vmem:[%s1193_s11 + $0x90] sm:$0xff]  }
  0x2b   : > { %984 = vmatprep.subr.bf16.mxu1 %v1050_v14  ;;  %v1056_v20 = vld [vmem:[%s1193_s11 + $0xa0] sm:$0xff]   ;;  %v1058_v23 = vld [vmem:[%s1193_s11 + $0x18] sm:$0xff]   ;;  %v1061_v26 = vld [vmem:[%s1193_s11 + $0x10] sm:$0xff]  }
  0x2c   : > { %947 = vmatpush3.bf16.msra.mxu0 %v1049_v13  ;;  %v1063_v27 = vld [vmem:[%s1193_s11 + $0x48] sm:$0xff]   ;;  %v1066_v30 = vld [vmem:[%s1193_s11 + $0x40] sm:$0xff]   ;;  %v347_v44 = vld [vmem:[#allocation2 + $0x10] sm:$0xff] }
  0x2d   : > { %948 = vmatprep.subr.bf16.mxu0 %v1051_v15  ;;  %v1064_v28 = vld [vmem:[%s1193_s11 + $0x8] sm:$0xff]   ;;  %v1068_v31 = vld [vmem:[%s1193_s11 + $0x80] sm:$0xff]   ;;  %v349_v58 = vld [vmem:[#allocation2 + $0x18] sm:$0xff] }
  0x2e   : > { %985 = vmatpush3.bf16.msra.mxu1 %v1050_v14  ;;  %v1065_v29 = vld [vmem:[%s1193_s11 + $0x88] sm:$0xff]   ;;  %v1071_v32 = vld [vmem:[%s1195_s12 + $0x4] ss:$12 sps:$4 sm:$0xff]  }
  0x2f   : > { %986 = vmatprep.subr.bf16.mxu1 %v1053_v17  ;;  %v1072_v33 = vld [vmem:[%s1195_s12 + $0x8] ss:$12 sps:$4 sm:$0xff]   ;;  %615 = vmatprep.mubr.bf16.mxu0 %v1071_v32  ;;  %v1069_v35 = vld [vmem:[%s1195_s12] ss:$12 sps:$4 sm:$0xff]   ;;  %v1076_v38 = vld [vmem:[%s1195_s12 + $0x18] ss:$12 sps:$4 sm:$0xff]  }
  0x30   : > { %949 = vmatpush3.bf16.msra.mxu0 %v1052_v16  ;;  %v1067_v34 = vld [vmem:[%s1193_s11] sm:$0xff]   ;;  %998 = vmatprep.mubr.bf16.mxu1 %v1072_v33  ;;  %v1074_v36 = vld [vmem:[%s1195_s12 + $0x1c] ss:$12 sps:$4 sm:$0xff]  }
  0x31   : > { %950 = vmatprep.subr.bf16.mxu0 %v1054_v18  ;;  %v1073_v37 = vld [vmem:[%s1195_s12 + $0x20] ss:$12 sps:$4 sm:$0xff]  }
  0x32   : > { %987 = vmatpush3.bf16.msra.mxu1 %v1053_v17  ;;  %v348_v52 = vld [vmem:[#allocation2] sm:$0xff]  ;;  %v350_v0 = vld [vmem:[#allocation2 + $0x8] sm:$0xff] }
  0x33   : > { %988 = vmatprep.subr.bf16.mxu1 %v1056_v20 }
  0x34   : > { %951 = vmatpush3.bf16.msra.mxu0 %v1055_v19 }
  0x35   : > { %952 = vmatprep.subr.bf16.mxu0 %v1057_v21 }
  0x36   : > { %989 = vmatpush3.bf16.msra.mxu1 %v1056_v20 }
  0x37   : > { %990 = vmatprep.subr.bf16.mxu1 %v1059_v22 }
  0x38   : > { %953 = vmatpush3.bf16.msra.mxu0 %v1058_v23 }
  0x39   : > { %954 = vmatprep.subr.bf16.mxu0 %v1060_v24 }
  0x3a   : > { %991 = vmatpush3.bf16.msra.mxu1 %v1059_v22 }
  0x3b   : > { %992 = vmatprep.subr.bf16.mxu1 %v1062_v25 }
  0x3c   : > { %955 = vmatpush3.bf16.msra.mxu0 %v1061_v26 }
  0x3d   : > { %956 = vmatprep.subr.bf16.mxu0 %v1063_v27 }
  0x3e   : > { %993 = vmatpush3.bf16.msra.mxu1 %v1062_v25 }
  0x3f   : > { %994 = vmatprep.subr.bf16.mxu1 %v1065_v29 }
  0x40   : > { %957 = vmatpush3.bf16.msra.mxu0 %v1064_v28 }
  0x41   : > { %958 = vmatprep.subr.bf16.mxu0 %v1066_v30 }
  0x42   : > { %995 = vmatpush3.bf16.msra.mxu1 %v1065_v29 }
  0x43   : > { %996 = vmatprep.subr.bf16.mxu1 %v1068_v31 }
  0x44   : > { %959 = vmatpush3.bf16.msra.mxu0 %v1067_v34 }
  0x46   : > { %997 = vmatpush3.bf16.msra.mxu1 %v1068_v31 }
  0x47   : > { %616 = vmatmul.mubr.bf16.vlgmr.msra.gmra.mxu0 %v1069_v35 }
  0x48   : > { %623 = vmatprep.mubr.bf16.mxu0 %v1074_v36 }
  0x49   : > { %999 = vmatmul.mubr.bf16.vlgmr.msra.gmra.mxu1 %v1073_v37 }
  0x4f   : > { %624 = vmatmul.mubr.bf16.gmra.mxu0 %v1076_v38 }
 0x107   : > { %v960_v39 = vpop.f32.mrf.mxu0 }
 0x109   : > { %v961_v40 = vpop.f32.mrf.mxu0  ;;  %v1000_v41 = vpop.f32.mrf.mxu1 }
 0x10a   : > { %v962_v42 = vadd.f32 %v961_v40, %v960_v39 }
 0x10b   : > { %v963_v43 = vpop.f32.mrf.mxu0  ;;  %v666_v45 = vpop.f32.mrf.mxu1 }
 0x10c   : > { %v667_v46 = vadd.f32 %v962_v42, %v666_v45 }
 0x10d   : > { %v964_v47 = vpop.f32.mrf.mxu0  ;;  %v1001_v48 = vpop.f32.mrf.mxu1 }
 0x10e   : > { %v681_v49 = vadd.f32 %v667_v46, %v347_v44  ;;  %v965_v50 = vadd.f32 %v964_v47, %v963_v43 }
 0x10f   : > { %v966_v51 = vpop.f32.mrf.mxu0  ;;  %v669_v53 = vpop.f32.mrf.mxu1 }
 0x110   : > { %685 = vst [vmem:[#allocation2 + $0x10] sm:$0xff] %v681_v49  ;;  %v670_v54 = vadd.f32 %v965_v50, %v669_v53 }
 0x111   : > { %v967_v55 = vpop.f32.mrf.mxu0 }
 0x112   : > { %v682_v56 = vadd.f32 %v670_v54, %v348_v52  ;;  %v968_v57 = vadd.f32 %v967_v55, %v966_v51 }
 0x113   : > { %v969_v59 = vpop.f32.mrf.mxu0 }
 0x114   : > { %686 = vst [vmem:[#allocation2] sm:$0xff] %v682_v56  ;;  %v675_v60 = vadd.f32 %v1000_v41, %v968_v57 }
 0x115   : > { %v970_v61 = vpop.f32.mrf.mxu0 }
 0x116   : > { %v683_v62 = vadd.f32 %v675_v60, %v349_v58  ;;  %v971_v63 = vadd.f32 %v970_v61, %v969_v59 }
 0x118   : > { %687 = vst [vmem:[#allocation2 + $0x18] sm:$0xff] %v683_v62  ;;  %v678_v1 = vadd.f32 %v1001_v48, %v971_v63  ;;  %692 = sbr.rel (%p917_p11) target bundleno = 301 (0x12d), region = 70 }
 0x11a   : > { %v684_v2 = vadd.f32 %v678_v1, %v350_v0 }
 0x11c   : > { %688 = vst [vmem:[#allocation2 + $0x8] sm:$0xff] %v684_v2 }
 0x11d   : > { %v693_v3 = vld [vmem:[#allocation2 + $0x10] sm:$0xff]  ;;  %v694_v4 = vld [vmem:[#allocation2] sm:$0xff] }
 0x11e   : > { %v918_v5 = vld [vmem:[%s1258_s2] ss:$0 sm:$0xff] }
 0x11f   : > { %v704_v6 = vmul.f32 %v918_v5, %v693_v3  ;;  %v705_v7 = vmul.f32 %v918_v5, %v694_v4  ;;  %v919_v8 = vld [vmem:[%s1259_s3] ss:$0 sm:$0xff]  ;;  %v695_v9 = vld [vmem:[#allocation2 + $0x18] sm:$0xff] }
 0x120   : > { %v706_v11 = vmul.f32 %v918_v5, %v695_v9 }
 0x121   : > { %v715_v13 = vadd.f32 %v919_v8, %v704_v6  ;;  %v716_v14 = vadd.f32 %v919_v8, %v705_v7 }
 0x122   : > { %v717_v15 = vadd.f32 %v919_v8, %v706_v11 }
 0x123   : > { %v696_v10 = vld [vmem:[#allocation2 + $0x8] sm:$0xff]  ;;  %v719_v17 = vmax.f32 %v715_v13, 0.0  ;;  %v720_v18 = vmax.f32 %v716_v14, 0.0 }
 0x124   : > { %v707_v12 = vmul.f32 %v918_v5, %v696_v10  ;;  %v721_v19 = vmax.f32 %v717_v15, 0.0 }
 0x125   : > { %v936_v21 = vpack.c.bf16 %v720_v18, %v719_v17 }
 0x126   : > { %v718_v16 = vadd.f32 %v919_v8, %v707_v12 }
 0x127   : > { %937 = vst [vmem:[%s1260_s4] sm:$0xff] %v936_v21  }
 0x128   : > { %v722_v20 = vmax.f32 %v718_v16, 0.0 }
 0x12a   : > { %v941_v22 = vpack.c.bf16 %v722_v20, %v721_v19 }
 0x12c   : > { %943 = vst [vmem:[%s1260_s4 + $0x8] sm:$0xff] %v941_v22  }
 0x12d PF: > { %s14_s19 = sadd.s32 1, %s1115_s19   ;;  %s1261_s15 = smov %s1103_s16 }
 0x12e   : > { %p11_p12 = scmp.ge.s32.totalorder %s14_s19, 5   ;;  %s1262_s16 = smov %s1178_s23 }
 0x12f   : > { %s1263_s17 = smov %s1111_s18  ;;  %s1264_s18 = smov %s1266_s20 }
 0x130   :  { %13 = sbr.rel (!%p11_p12) target bundleno = 3 (0x3), region = 120 }

// kernel: resnet50_base_forward.21
= control target key start
LH: loop header
LB: loop body
LE: loop exit
PB: predicated region body
PF: predicated region fallthrough
CT: control target
= control target key end

     0   :  { %s1271_s15 = smov 0   ;;  %s1273_s16 = smov 0   ;;  %s1468_s0 = inlined_call_operand.vmem [shape: bf16[32,256], index: 0, kind: input, shape index: {}]   ;;  %s1469_s1 = inlined_call_operand.vmem [shape: bf16[256,512], index: 1, kind: input, shape index: {}]   ;;  %s1470_s2 = inlined_call_operand.vmem [shape: f32[1,512], index: 2, kind: input, shape index: {}]   ;;  %s1471_s3 = inlined_call_operand.vmem [shape: f32[1,512], index: 3, kind: input, shape index: {}]   ;;  %s1472_s4 = inlined_call_operand.vmem [shape: bf16[32,512], index: 4, kind: output, shape index: {}]  }
   0x1   :  { %s1275_s17 = smov 0   ;;  %s1277_s18 = smov 0  }
   0x2   :  { %s1279_s19 = smov 0  }
   0x3 LB: > { %s29_s20 = sadd.s32 1, %s1240_s18  ;;  %s1016_s21 = sadd.s32 4294967295, %s1244_s19   ;;  %s1244_s19 = sphi %s1279_s19, %s14_s19   ;;  %s1240_s18 = sphi %s1277_s18, %s1477_s18   ;;  %s1236_s17 = sphi %s1275_s17, %s1476_s17   ;;  %s1232_s16 = sphi %s1273_s16, %s1475_s16   ;;  %s1228_s15 = sphi %s1271_s15, %s1474_s15  }
   0x4   : > { %p31_p0 = scmp.ge.s32.totalorder %s29_s20, 2  ;;  %p77_p1 = scmp.ne.s32.totalorder %s1232_s16, %s1228_s15 }
   0x5   : > { %p78_p2 = scmp.eq.s32.totalorder %s1244_s19, 0  ;;  %p161_p4 = scmp.eq.s32.totalorder %s1016_s21, 1 }
   0x6   : > { %s1479_s20 = smov (%p31_p0, %s29_s20), 0  ;;  %s70_s23 = sadd.s32 1, %s1232_s16 }
   0x7   : > { %p79_p3 = por %p78_p2, %p77_p1  ;;  %s66_s22 = ssub.s32 %s1240_s18, %s1479_s20 }
   0x8   : > { %p68_p5 = scmp.eq.s32.totalorder %s66_s22, 0  ;;  %p1306_p6 = por %p161_p4, %p77_p1 }
   0x9   : > { %p1020_p7 = scmp.ge.s32.totalorder %s1244_s19, 2 }
   0xa   : > { %s1311_s25 = scalar_select %p68_p5, %s1232_s16, %s70_s23  }
   0xb   : > { %198 = sbr.rel (%p1020_p7) target bundleno = 36 (0x24), region = 20 }
  0x10   : > { %201 = sbr.rel (!%p79_p3) target bundleno = 36 (0x24), region = 24  ;;  %s203_s26 = sand.u32 (%p79_p3), 1, %s1232_s16  }
  0x11   : > { %s1074_s27 = sshll.u32 (%p79_p3), %s1240_s18, 3  ;;  %s1021_s28 = sshll.u32 (%p79_p3), %s203_s26, 8 }
  0x12   : > { %s1319_s5 = scalar_lea.vmem (%p79_p3), %s1469_s1, %s1074_s27  ;;  %s1324_s6 = scalar_lea.vmem (%p79_p3), [#allocation3], %s1021_s28 }
  0x13   : > { %v302_v0 = vld [vmem:[%s1319_s5] sm:$0xff] (%p79_p3)  ;;  %v304_v1 = vld [vmem:[%s1319_s5 + $0x10] sm:$0xff] (%p79_p3) }
  0x14   : > { %v306_v2 = vld [vmem:[%s1319_s5 + $0x20] sm:$0xff] (%p79_p3)  ;;  %303 = vst [vmem:[%s1324_s6] sm:$0xff] (%p79_p3), %v302_v0  ;;  %305 = vst [vmem:[%s1324_s6 + $0x8] sm:$0xff] (%p79_p3), %v304_v1  ;;  %v308_v3 = vld [vmem:[%s1319_s5 + $0x30] sm:$0xff] (%p79_p3) }
  0x15   : > { %307 = vst [vmem:[%s1324_s6 + $0x10] sm:$0xff] %v306_v2  ;;  %v310_v4 = vld [vmem:[%s1319_s5 + $0x40] sm:$0xff]  ;;  %v312_v5 = vld [vmem:[%s1319_s5 + $0x50] sm:$0xff]  ;;  %309 = vst [vmem:[%s1324_s6 + $0x18] sm:$0xff] %v308_v3 }
  0x16   : > { %311 = vst [vmem:[%s1324_s6 + $0x20] sm:$0xff] %v310_v4  ;;  %313 = vst [vmem:[%s1324_s6 + $0x28] sm:$0xff] %v312_v5  ;;  %v314_v6 = vld [vmem:[%s1319_s5 + $0x60] sm:$0xff]  ;;  %v316_v7 = vld [vmem:[%s1319_s5 + $0x70] sm:$0xff] }
  0x17   : > { %v318_v8 = vld [vmem:[%s1319_s5 + $0x80] sm:$0xff]  ;;  %315 = vst [vmem:[%s1324_s6 + $0x30] sm:$0xff] %v314_v6  ;;  %317 = vst [vmem:[%s1324_s6 + $0x38] sm:$0xff] %v316_v7  ;;  %v320_v9 = vld [vmem:[%s1319_s5 + $0x90] sm:$0xff] }
  0x18   : > { %319 = vst [vmem:[%s1324_s6 + $0x40] sm:$0xff] %v318_v8  ;;  %v322_v10 = vld [vmem:[%s1319_s5 + $0xa0] sm:$0xff]  ;;  %v324_v11 = vld [vmem:[%s1319_s5 + $0xb0] sm:$0xff]  ;;  %321 = vst [vmem:[%s1324_s6 + $0x48] sm:$0xff] %v320_v9 }
  0x19   : > { %323 = vst [vmem:[%s1324_s6 + $0x50] sm:$0xff] %v322_v10  ;;  %325 = vst [vmem:[%s1324_s6 + $0x58] sm:$0xff] %v324_v11  ;;  %v326_v12 = vld [vmem:[%s1319_s5 + $0xc0] sm:$0xff]  ;;  %v328_v13 = vld [vmem:[%s1319_s5 + $0xd0] sm:$0xff] }
  0x1a   : > { %v330_v14 = vld [vmem:[%s1319_s5 + $0xe0] sm:$0xff]  ;;  %327 = vst [vmem:[%s1324_s6 + $0x60] sm:$0xff] %v326_v12  ;;  %329 = vst [vmem:[%s1324_s6 + $0x68] sm:$0xff] %v328_v13  ;;  %v332_v15 = vld [vmem:[%s1319_s5 + $0xf0] sm:$0xff] }
  0x1b   : > { %331 = vst [vmem:[%s1324_s6 + $0x70] sm:$0xff] %v330_v14  ;;  %v334_v16 = vld [vmem:[%s1319_s5 + $0x100] sm:$0xff]  ;;  %v336_v17 = vld [vmem:[%s1319_s5 + $0x110] sm:$0xff]  ;;  %333 = vst [vmem:[%s1324_s6 + $0x78] sm:$0xff] %v332_v15 }
  0x1c   : > { %335 = vst [vmem:[%s1324_s6 + $0x80] sm:$0xff] %v334_v16  ;;  %337 = vst [vmem:[%s1324_s6 + $0x88] sm:$0xff] %v336_v17  ;;  %v338_v18 = vld [vmem:[%s1319_s5 + $0x120] sm:$0xff]  ;;  %v340_v19 = vld [vmem:[%s1319_s5 + $0x130] sm:$0xff] }
  0x1d   : > { %v342_v20 = vld [vmem:[%s1319_s5 + $0x140] sm:$0xff]  ;;  %339 = vst [vmem:[%s1324_s6 + $0x90] sm:$0xff] %v338_v18  ;;  %341 = vst [vmem:[%s1324_s6 + $0x98] sm:$0xff] %v340_v19  ;;  %v344_v21 = vld [vmem:[%s1319_s5 + $0x150] sm:$0xff] }
  0x1e   : > { %343 = vst [vmem:[%s1324_s6 + $0xa0] sm:$0xff] %v342_v20  ;;  %v346_v22 = vld [vmem:[%s1319_s5 + $0x160] sm:$0xff]  ;;  %v348_v23 = vld [vmem:[%s1319_s5 + $0x170] sm:$0xff]  ;;  %345 = vst [vmem:[%s1324_s6 + $0xa8] sm:$0xff] %v344_v21 }
  0x1f   : > { %347 = vst [vmem:[%s1324_s6 + $0xb0] sm:$0xff] %v346_v22  ;;  %349 = vst [vmem:[%s1324_s6 + $0xb8] sm:$0xff] %v348_v23  ;;  %v350_v24 = vld [vmem:[%s1319_s5 + $0x180] sm:$0xff]  ;;  %v352_v25 = vld [vmem:[%s1319_s5 + $0x190] sm:$0xff] }
  0x20   : > { %v354_v26 = vld [vmem:[%s1319_s5 + $0x1a0] sm:$0xff]  ;;  %351 = vst [vmem:[%s1324_s6 + $0xc0] sm:$0xff] %v350_v24  ;;  %353 = vst [vmem:[%s1324_s6 + $0xc8] sm:$0xff] %v352_v25  ;;  %v356_v27 = vld [vmem:[%s1319_s5 + $0x1b0] sm:$0xff] }
  0x21   : > { %355 = vst [vmem:[%s1324_s6 + $0xd0] sm:$0xff] %v354_v26  ;;  %v358_v28 = vld [vmem:[%s1319_s5 + $0x1c0] sm:$0xff]  ;;  %v360_v29 = vld [vmem:[%s1319_s5 + $0x1d0] sm:$0xff]  ;;  %357 = vst [vmem:[%s1324_s6 + $0xd8] sm:$0xff] %v356_v27 }
  0x22   : > { %359 = vst [vmem:[%s1324_s6 + $0xe0] sm:$0xff] %v358_v28  ;;  %361 = vst [vmem:[%s1324_s6 + $0xe8] sm:$0xff] %v360_v29  ;;  %v362_v30 = vld [vmem:[%s1319_s5 + $0x1e0] sm:$0xff]  ;;  %v364_v31 = vld [vmem:[%s1319_s5 + $0x1f0] sm:$0xff] }
  0x23   : > { %363 = vst [vmem:[%s1324_s6 + $0xf0] sm:$0xff] %v362_v30  ;;  %365 = vst [vmem:[%s1324_s6 + $0xf8] sm:$0xff] %v364_v31 }
  0x24 PF: > { %p1024_p8 = scmp.ge.s32.totalorder %s1244_s19, 1  ;;  %p386_p9 = scmp.lt.s32.totalorder %s1244_s19, 3 }
  0x26   : > { %p387_p10 = pnand %p1024_p8, %p386_p9 }
  0x27   : > { %s393_s7 = sand.u32 (!%p387_p10), 1, %s1228_s15   ;;  %s1027_s26 = sshll.u32 (!%p387_p10), %s1236_s17, 1 }
  0x28   : > { %390 = sbr.rel (%p387_p10) target bundleno = 325 (0x145), region = 70  ;;  %s1025_s8 = sshll.u32 (!%p387_p10), %s393_s7, 8 }
  0x29   : > { %s1398_s13 = scalar_lea.vmem (!%p387_p10), [#allocation3], %s1025_s8  ;;  %p450_p11 = scmp.lt.s32.totalorder (!%p387_p10), %s1027_s26, 3 }
  0x2a   : > { %s1026_s8 = sshll.u32 (!%p387_p10), %s393_s7, 5 }
  0x2b   : > { %s434_s9 = scalar_lea.vmem (!%p387_p10), [#allocation4], %s1026_s8 }
  0x2d   : > { %v1202_v32 = vld [vmem:[%s1468_s0 + $0x4] ss:$8 sps:$4 sm:$0xff]   ;;  %v1205_v33 = vld [vmem:[%s1468_s0 + $0x14] ss:$8 sps:$4 sm:$0xff]   ;;  %v1154_v35 = vld [vmem:[%s1398_s13 + $0x70] ss:$8 sps:$4 sm:$0xff]   ;;  %v779_v4 = vlaneseq }
  0x2e   : > { %v1152_v34 = vld [vmem:[%s1398_s13 + $0x74] ss:$8 sps:$4 sm:$0xff]   ;;  %729 = vmatprep.mubr.bf16.mxu0 %v1202_v32  ;;  %739 = vmatprep.mubr.bf16.mxu1 %v1205_v33  ;;  %v1155_v36 = vld [vmem:[%s1398_s13 + $0x64] ss:$8 sps:$4 sm:$0xff]   ;;  %v1157_v37 = vld [vmem:[%s1398_s13 + $0x60] ss:$8 sps:$4 sm:$0xff]  }
  0x2f   : > { %697 = vmatprep.subr.bf16.mxu0 %v1152_v34  ;;  %1080 = vmatprep.subr.bf16.mxu1 %v1152_v34  ;;  %v1158_v38 = vld [vmem:[%s1398_s13 + $0x54] ss:$8 sps:$4 sm:$0xff]   ;;  %v1160_v39 = vld [vmem:[%s1398_s13 + $0x50] ss:$8 sps:$4 sm:$0xff]   ;;  %v1161_v40 = vld [vmem:[%s1398_s13 + $0x44] ss:$8 sps:$4 sm:$0xff]  }
  0x30   : > { %698 = vmatpush1.bf16.msra.mxu0 %v1154_v35  ;;  %1096 = vmatpush1.bf16.msra.mxu1 %v1154_v35  ;;  %v1163_v41 = vld [vmem:[%s1398_s13 + $0x40] ss:$8 sps:$4 sm:$0xff]   ;;  %v1164_v42 = vld [vmem:[%s1398_s13 + $0x34] ss:$8 sps:$4 sm:$0xff]   ;;  %v1166_v43 = vld [vmem:[%s1398_s13 + $0x30] ss:$8 sps:$4 sm:$0xff]  }
  0x31   : > { %699 = vmatprep.subr.bf16.mxu0 %v1155_v36  ;;  %1081 = vmatprep.subr.bf16.mxu1 %v1155_v36  ;;  %v1167_v44 = vld [vmem:[%s1398_s13 + $0x24] ss:$8 sps:$4 sm:$0xff]   ;;  %v1169_v45 = vld [vmem:[%s1398_s13 + $0x20] ss:$8 sps:$4 sm:$0xff]   ;;  %v1170_v46 = vld [vmem:[%s1398_s13 + $0x14] ss:$8 sps:$4 sm:$0xff]  }
  0x32   : > { %v1172_v47 = vld [vmem:[%s1398_s13 + $0x10] ss:$8 sps:$4 sm:$0xff]   ;;  %v1173_v48 = vld [vmem:[%s1398_s13 + $0x4] ss:$8 sps:$4 sm:$0xff]   ;;  %v1175_v49 = vld [vmem:[%s1398_s13] ss:$8 sps:$4 sm:$0xff]  }
  0x33   : > { %v1176_v50 = vld [vmem:[%s1398_s13 + $0xf4] ss:$8 sps:$4 sm:$0xff]   ;;  %v1178_v51 = vld [vmem:[%s1398_s13 + $0xf0] ss:$8 sps:$4 sm:$0xff]   ;;  %v1179_v52 = vld [vmem:[%s1398_s13 + $0xe4] ss:$8 sps:$4 sm:$0xff]  }
  0x34   : > { %700 = vmatpush1.bf16.msra.mxu0 %v1157_v37  ;;  %1097 = vmatpush1.bf16.msra.mxu1 %v1157_v37  ;;  %v1181_v53 = vld [vmem:[%s1398_s13 + $0xe0] ss:$8 sps:$4 sm:$0xff]   ;;  %v1182_v54 = vld [vmem:[%s1398_s13 + $0xd4] ss:$8 sps:$4 sm:$0xff]   ;;  %v1184_v55 = vld [vmem:[%s1398_s13 + $0xd0] ss:$8 sps:$4 sm:$0xff]  }
  0x35   : > { %701 = vmatprep.subr.bf16.mxu0 %v1158_v38  ;;  %1082 = vmatprep.subr.bf16.mxu1 %v1158_v38  ;;  %v1185_v56 = vld [vmem:[%s1398_s13 + $0xc4] ss:$8 sps:$4 sm:$0xff]   ;;  %v1187_v57 = vld [vmem:[%s1398_s13 + $0xc0] ss:$8 sps:$4 sm:$0xff]   ;;  %v1188_v58 = vld [vmem:[%s1398_s13 + $0xb4] ss:$8 sps:$4 sm:$0xff]  }
  0x36   : > { %v1190_v59 = vld [vmem:[%s1398_s13 + $0xb0] ss:$8 sps:$4 sm:$0xff]   ;;  %v1191_v60 = vld [vmem:[%s1398_s13 + $0xa4] ss:$8 sps:$4 sm:$0xff]   ;;  %v1193_v61 = vld [vmem:[%s1398_s13 + $0xa0] ss:$8 sps:$4 sm:$0xff]  }
  0x37   : > { %v1194_v62 = vld [vmem:[%s1398_s13 + $0x94] ss:$8 sps:$4 sm:$0xff]   ;;  %v1196_v63 = vld [vmem:[%s1398_s13 + $0x90] ss:$8 sps:$4 sm:$0xff]   ;;  %v1197_v0 = vld [vmem:[%s1398_s13 + $0x84] ss:$8 sps:$4 sm:$0xff]  }
  0x38   : > { %702 = vmatpush1.bf16.msra.mxu0 %v1160_v39  ;;  %1098 = vmatpush1.bf16.msra.mxu1 %v1160_v39  ;;  %v1199_v1 = vld [vmem:[%s1398_s13 + $0x80] ss:$8 sps:$4 sm:$0xff]   ;;  %v1203_v3 = vld [vmem:[%s1468_s0 + $0x10] ss:$8 sps:$4 sm:$0xff]   ;;  %s1481_s26 = smov (!%p450_p11, %s1027_s26), 3  ;;  %v780_v5 = vshrl.u32 %v779_v4, 7 }
  0x39   : > { %703 = vmatprep.subr.bf16.mxu0 %v1161_v40  ;;  %1083 = vmatprep.subr.bf16.mxu1 %v1161_v40  ;;  %v1200_v2 = vld [vmem:[%s1468_s0] ss:$8 sps:$4 sm:$0xff]   ;;  %s452_s29 = scalar_lea.vmem %s1470_s2, %s1481_s26  ;;  %s457_s6 = scalar_lea.vmem %s1471_s3, %s1481_s26 }
  0x3a   : > { %v781_v6 = vsub.s32 0, %v780_v5  ;;  %v777_v7 = vld [vmem:[%s452_s29] sm:$0x3]  ;;  %v785_v8 = vsub.s32 1, %v780_v5  ;;  %s1079_s15 = sshll.u32 (%p1306_p6), %s1236_s17, 3 }
  0x3b   : > { %v797_v10 = vld [vmem:[%s457_s6] sm:$0x3]  ;;  %s857_s11 = scalar_lea.vmem (%p1306_p6), %s1472_s4, %s1079_s15 }
  0x3c   : > { %704 = vmatpush1.bf16.msra.mxu0 %v1163_v41  ;;  %1099 = vmatpush1.bf16.msra.mxu1 %v1163_v41  ;;  %v782_v9 = vrot.slane %v777_v7, %v781_v6  ;;  %v786_v11 = vrot.slane %v777_v7, %v785_v8  ;;  %v802_v15 = vrot.slane %v797_v10, %v781_v6 }
  0x3d   : > { %705 = vmatprep.subr.bf16.mxu0 %v1164_v42  ;;  %1084 = vmatprep.subr.bf16.mxu1 %v1164_v42  ;;  %v806_v17 = vrot.slane %v797_v10, %v785_v8 }
  0x40   : > { %706 = vmatpush1.bf16.msra.mxu0 %v1166_v43  ;;  %1100 = vmatpush1.bf16.msra.mxu1 %v1166_v43 }
  0x41   : > { %707 = vmatprep.subr.bf16.mxu0 %v1167_v44  ;;  %1085 = vmatprep.subr.bf16.mxu1 %v1167_v44 }
  0x44   : > { %708 = vmatpush1.bf16.msra.mxu0 %v1169_v45  ;;  %1101 = vmatpush1.bf16.msra.mxu1 %v1169_v45 }
  0x45   : > { %709 = vmatprep.subr.bf16.mxu0 %v1170_v46  ;;  %1086 = vmatprep.subr.bf16.mxu1 %v1170_v46 }
  0x48   : > { %710 = vmatpush1.bf16.msra.mxu0 %v1172_v47  ;;  %1102 = vmatpush1.bf16.msra.mxu1 %v1172_v47 }
  0x49   : > { %711 = vmatprep.subr.bf16.mxu0 %v1173_v48  ;;  %1087 = vmatprep.subr.bf16.mxu1 %v1173_v48 }
  0x4c   : > { %712 = vmatpush1.bf16.msra.mxu0 %v1175_v49  ;;  %1103 = vmatpush1.bf16.msra.mxu1 %v1175_v49 }
  0x4d   : > { %713 = vmatprep.subr.bf16.mxu0 %v1176_v50  ;;  %1088 = vmatprep.subr.bf16.mxu1 %v1176_v50 }
  0x50   : > { %714 = vmatpush2.bf16.msra.mxu0 %v1178_v51  ;;  %1104 = vmatpush2.bf16.msra.mxu1 %v1178_v51 }
  0x51   : > { %715 = vmatprep.subr.bf16.mxu0 %v1179_v52  ;;  %1089 = vmatprep.subr.bf16.mxu1 %v1179_v52 }
  0x54   : > { %716 = vmatpush2.bf16.msra.mxu0 %v1181_v53  ;;  %1105 = vmatpush2.bf16.msra.mxu1 %v1181_v53 }
  0x55   : > { %717 = vmatprep.subr.bf16.mxu0 %v1182_v54  ;;  %1090 = vmatprep.subr.bf16.mxu1 %v1182_v54 }
  0x58   : > { %718 = vmatpush2.bf16.msra.mxu0 %v1184_v55  ;;  %1106 = vmatpush2.bf16.msra.mxu1 %v1184_v55 }
  0x59   : > { %719 = vmatprep.subr.bf16.mxu0 %v1185_v56  ;;  %1091 = vmatprep.subr.bf16.mxu1 %v1185_v56 }
  0x5c   : > { %720 = vmatpush2.bf16.msra.mxu0 %v1187_v57  ;;  %1107 = vmatpush2.bf16.msra.mxu1 %v1187_v57 }
  0x5d   : > { %721 = vmatprep.subr.bf16.mxu0 %v1188_v58  ;;  %1092 = vmatprep.subr.bf16.mxu1 %v1188_v58 }
  0x60   : > { %722 = vmatpush2.bf16.msra.mxu0 %v1190_v59  ;;  %1108 = vmatpush2.bf16.msra.mxu1 %v1190_v59 }
  0x61   : > { %723 = vmatprep.subr.bf16.mxu0 %v1191_v60  ;;  %1093 = vmatprep.subr.bf16.mxu1 %v1191_v60 }
  0x64   : > { %724 = vmatpush2.bf16.msra.mxu0 %v1193_v61  ;;  %1109 = vmatpush2.bf16.msra.mxu1 %v1193_v61 }
  0x65   : > { %725 = vmatprep.subr.bf16.mxu0 %v1194_v62  ;;  %1094 = vmatprep.subr.bf16.mxu1 %v1194_v62 }
  0x68   : > { %726 = vmatpush2.bf16.msra.mxu0 %v1196_v63  ;;  %1110 = vmatpush2.bf16.msra.mxu1 %v1196_v63 }
  0x69   : > { %727 = vmatprep.subr.bf16.mxu0 %v1197_v0  ;;  %1095 = vmatprep.subr.bf16.mxu1 %v1197_v0 }
  0x6c   : > { %728 = vmatpush2.bf16.msra.mxu0 %v1199_v1  ;;  %1111 = vmatpush2.bf16.msra.mxu1 %v1199_v1 }
  0x6f   : > { %730 = vmatmul.mubr.bf16.vlgmr.msra.gmra.mxu0 %v1200_v2  ;;  %740 = vmatmul.mubr.bf16.vlgmr.msra.gmra.mxu1 %v1203_v3 }
 0x12f   : > { %v731_v12 = vpop.f32.mrf.mxu0  ;;  %v741_v13 = vpop.f32.mrf.mxu1 }
 0x130   : > { %v789_v14 = vmul.f32 %v782_v9, %v731_v12  ;;  %v793_v16 = vmul.f32 %v782_v9, %v741_v13 }
 0x131   : > { %v733_v18 = vpop.f32.mrf.mxu0  ;;  %v743_v19 = vpop.f32.mrf.mxu1 }
 0x132   : > { %v790_v20 = vmul.f32 %v786_v11, %v733_v18  ;;  %v794_v21 = vmul.f32 %v786_v11, %v743_v19  ;;  %v809_v24 = vadd.f32 %v802_v15, %v789_v14  ;;  %v813_v25 = vadd.f32 %v802_v15, %v793_v16 }
 0x133   : > { %v735_v22 = vpop.f32.mrf.mxu0  ;;  %v745_v23 = vpop.f32.mrf.mxu1 }
 0x134   : > { %v810_v26 = vadd.f32 %v806_v17, %v790_v20  ;;  %v814_v27 = vadd.f32 %v806_v17, %v794_v21  ;;  %v791_v28 = vmul.f32 %v782_v9, %v735_v22  ;;  %v795_v29 = vmul.f32 %v782_v9, %v745_v23 }
 0x135   : > { %v737_v30 = vpop.f32.mrf.mxu0  ;;  %v747_v31 = vpop.f32.mrf.mxu1 }
 0x136   : > { %v1075_v32 = vpack.c.bf16 %v810_v26, %v809_v24  ;;  %v1077_v33 = vpack.c.bf16 %v814_v27, %v813_v25  ;;  %v792_v34 = vmul.f32 %v786_v11, %v737_v30  ;;  %v796_v35 = vmul.f32 %v786_v11, %v747_v31 }
 0x137   : > { %v811_v36 = vadd.f32 %v802_v15, %v791_v28  ;;  %v815_v37 = vadd.f32 %v802_v15, %v795_v29 }
 0x138   : > { %841 = vst [vmem:[%s434_s9] sm:$0xff] %v1075_v32  ;;  %843 = vst [vmem:[%s434_s9 + $0x10] sm:$0xff] %v1077_v33  ;;  %v812_v38 = vadd.f32 %v806_v17, %v792_v34  ;;  %v816_v39 = vadd.f32 %v806_v17, %v796_v35  ;;  %851 = sbr.rel (!%p1306_p6) target bundleno = 325 (0x145), region = 86 }
 0x13a   : > { %v1076_v40 = vpack.c.bf16 %v812_v38, %v811_v36  ;;  %v1078_v41 = vpack.c.bf16 %v816_v39, %v815_v37 }
 0x13c   : > { %842 = vst [vmem:[%s434_s9 + $0x8] sm:$0xff] %v1076_v40  ;;  %844 = vst [vmem:[%s434_s9 + $0x18] sm:$0xff] %v1078_v41 }
 0x13f   : > { %v892_v42 = vld [vmem:[%s434_s9] sm:$0xff]  ;;  %v896_v44 = vld [vmem:[%s434_s9 + $0x10] sm:$0xff] }
 0x140   : > { %893 = vst [vmem:[%s857_s11] sm:$0xff] %v892_v42  ;;  %897 = vst [vmem:[%s857_s11 + $0x20] sm:$0xff] %v896_v44 }
 0x143   : > { %v894_v43 = vld [vmem:[%s434_s9 + $0x8] sm:$0xff]  ;;  %v898_v45 = vld [vmem:[%s434_s9 + $0x18] sm:$0xff] }
 0x144   : > { %895 = vst [vmem:[%s857_s11 + $0x10] sm:$0xff] %v894_v43  ;;  %899 = vst [vmem:[%s857_s11 + $0x30] sm:$0xff] %v898_v45 }
 0x145 PF: > { %s14_s19 = sadd.s32 1, %s1244_s19   ;;  %s1474_s15 = smov %s1232_s16 }
 0x146   : > { %p11_p12 = scmp.ge.s32.totalorder %s14_s19, 4   ;;  %s1475_s16 = smov %s1311_s25 }
 0x147   : > { %s1476_s17 = smov %s1240_s18  ;;  %s1477_s18 = smov %s1479_s20 }
 0x148   :  { %13 = sbr.rel (!%p11_p12) target bundleno = 3 (0x3), region = 164 }

// kernel: resnet50_base_forward.26
= control target key start
LH: loop header
LB: loop body
LE: loop exit
PB: predicated region body
PF: predicated region fallthrough
CT: control target
= control target key end

     0   :  { %v159_v3 = vmov 1983009808   ;;  %v110_v5 = vlaneseq  ;;  %vm144_vm0 = vcmask 1041409   ;;  %vm146_vm1 = vcmask 1043459   ;;  %s201_s0 = inlined_call_operand.vmem [shape: bf16[2,16,512], index: 0, kind: input, shape index: {}]   ;;  %s202_s1 = inlined_call_operand.vmem [shape: f32[2,512], index: 1, kind: output, shape index: {}]  }
   0x1   :  { %v8_v0 = vld [vmem:[%s201_s0] sm:$0xff]  ;;  %v9_v1 = vld [vmem:[%s201_s0 + $0x8] sm:$0xff]  ;;  %v10_v2 = vld [vmem:[%s201_s0 + $0x10] sm:$0xff]  ;;  %v179_v4 = vunpack.c.l.s4 %v159_v3  ;;  %vm148_vm2 = vcmask 1045509   ;;  %vm150_vm3 = vcmask 1047559  }
   0x2   :  { %v11_v6 = vld [vmem:[%s201_s0 + $0x18] sm:$0xff]  ;;  %v12_v7 = vld [vmem:[%s201_s0 + $0x20] sm:$0xff]  ;;  %v13_v8 = vld [vmem:[%s201_s0 + $0x28] sm:$0xff]  ;;  %v16_v9 = vunpack.c.l.bf16 %v8_v0  ;;  %v17_v10 = vunpack.c.h.bf16 %v8_v0  ;;  %v18_v11 = vunpack.c.l.bf16 %v9_v1  ;;  %v19_v12 = vunpack.c.h.bf16 %v9_v1 }
   0x3   :  { %v14_v13 = vld [vmem:[%s201_s0 + $0x30] sm:$0xff]  ;;  %v15_v14 = vld [vmem:[%s201_s0 + $0x38] sm:$0xff]  ;;  %v20_v15 = vunpack.c.l.bf16 %v10_v2  ;;  %v21_v16 = vunpack.c.h.bf16 %v10_v2  ;;  %v22_v17 = vunpack.c.l.bf16 %v11_v6  ;;  %v23_v18 = vunpack.c.h.bf16 %v11_v6 }
   0x4   :  { %v24_v19 = vunpack.c.l.bf16 %v12_v7  ;;  %v25_v20 = vunpack.c.h.bf16 %v12_v7  ;;  %v26_v21 = vunpack.c.l.bf16 %v13_v8  ;;  %v27_v22 = vunpack.c.h.bf16 %v13_v8 }
   0x5   :  { %v28_v23 = vunpack.c.l.bf16 %v14_v13  ;;  %v29_v24 = vunpack.c.h.bf16 %v14_v13  ;;  %v30_v25 = vunpack.c.l.bf16 %v15_v14  ;;  %v31_v26 = vunpack.c.h.bf16 %v15_v14 }
   0x6   :  { %v32_v27 = vadd.f32 %v20_v15, %v16_v9  ;;  %v39_v28 = vadd.f32 %v21_v16, %v17_v10  ;;  %v46_v29 = vadd.f32 %v22_v17, %v18_v11  ;;  %v53_v30 = vadd.f32 %v23_v18, %v19_v12 }
   0x7   :  { %v60_v31 = vadd.f32 %v28_v23, %v24_v19  ;;  %v67_v32 = vadd.f32 %v29_v24, %v25_v20  ;;  %v74_v33 = vadd.f32 %v30_v25, %v26_v21  ;;  %v81_v34 = vadd.f32 %v31_v26, %v27_v22 }
   0x8   :  { %v33_v35 = vrot.slane %v32_v27, 4  ;;  %v40_v36 = vrot.slane %v39_v28, 4  ;;  %v47_v37 = vrot.slane %v46_v29, 4  ;;  %v54_v38 = vrot.slane %v53_v30, 4 }
   0x9   :  { %v61_v39 = vrot.slane %v60_v31, 4  ;;  %v68_v40 = vrot.slane %v67_v32, 4  ;;  %v75_v41 = vrot.slane %v74_v33, 4  ;;  %v82_v42 = vrot.slane %v81_v34, 4 }
   0xa   :  { %v34_v43 = vadd.f32 %v33_v35, %v32_v27  ;;  %v41_v44 = vadd.f32 %v40_v36, %v39_v28  ;;  %v48_v45 = vadd.f32 %v47_v37, %v46_v29  ;;  %v55_v46 = vadd.f32 %v54_v38, %v53_v30 }
   0xb   :  { %v62_v47 = vadd.f32 %v61_v39, %v60_v31  ;;  %v69_v48 = vadd.f32 %v68_v40, %v67_v32  ;;  %v76_v49 = vadd.f32 %v75_v41, %v74_v33  ;;  %v83_v50 = vadd.f32 %v82_v42, %v81_v34 }
   0xc   :  { %v35_v51 = vrot.slane %v34_v43, 2  ;;  %v42_v52 = vrot.slane %v41_v44, 2  ;;  %v49_v53 = vrot.slane %v48_v45, 2  ;;  %v56_v54 = vrot.slane %v55_v46, 2 }
   0xd   :  { %v63_v55 = vrot.slane %v62_v47, 2  ;;  %v70_v56 = vrot.slane %v69_v48, 2  ;;  %v77_v57 = vrot.slane %v76_v49, 2  ;;  %v84_v58 = vrot.slane %v83_v50, 2 }
   0xe   :  { %v36_v59 = vadd.f32 %v35_v51, %v34_v43  ;;  %v43_v60 = vadd.f32 %v42_v52, %v41_v44  ;;  %v50_v61 = vadd.f32 %v49_v53, %v48_v45  ;;  %v57_v62 = vadd.f32 %v56_v54, %v55_v46 }
   0xf   :  { %v64_v63 = vadd.f32 %v63_v55, %v62_v47  ;;  %v71_v0 = vadd.f32 %v70_v56, %v69_v48  ;;  %v78_v1 = vadd.f32 %v77_v57, %v76_v49  ;;  %v85_v2 = vadd.f32 %v84_v58, %v83_v50 }
  0x10   :  { %v37_v3 = vrot.slane %v36_v59, 1  ;;  %v44_v6 = vrot.slane %v43_v60, 1  ;;  %v51_v7 = vrot.slane %v50_v61, 1  ;;  %v58_v8 = vrot.slane %v57_v62, 1 }
  0x11   :  { %v65_v9 = vrot.slane %v64_v63, 1  ;;  %v72_v10 = vrot.slane %v71_v0, 1  ;;  %v79_v11 = vrot.slane %v78_v1, 1  ;;  %v86_v12 = vrot.slane %v85_v2, 1 }
  0x12   :  { %v38_v13 = vadd.f32 %v37_v3, %v36_v59  ;;  %v45_v14 = vadd.f32 %v44_v6, %v43_v60  ;;  %v52_v15 = vadd.f32 %v51_v7, %v50_v61  ;;  %v59_v16 = vadd.f32 %v58_v8, %v57_v62 }
  0x13   :  { %v66_v17 = vadd.f32 %v65_v9, %v64_v63  ;;  %v73_v18 = vadd.f32 %v72_v10, %v71_v0  ;;  %v80_v19 = vadd.f32 %v79_v11, %v78_v1  ;;  %v87_v20 = vadd.f32 %v86_v12, %v85_v2 }
  0x14   :  { %v89_v21 = vmul.f32 0.0625, %v38_v13  ;;  %v90_v22 = vmul.f32 0.0625, %v45_v14  ;;  %v91_v23 = vmul.f32 0.0625, %v52_v15  ;;  %v92_v24 = vmul.f32 0.0625, %v59_v16 }
  0x15   :  { %v93_v25 = vmul.f32 0.0625, %v66_v17  ;;  %v94_v26 = vmul.f32 0.0625, %v73_v18  ;;  %v95_v27 = vmul.f32 0.0625, %v80_v19  ;;  %v96_v28 = vmul.f32 0.0625, %v87_v20 }
  0x16   :  { %v105_v29 = vcombine.low %v89_v21, %v90_v22  ;;  %v106_v30 = vcombine.low %v91_v23, %v92_v24  ;;  %v109_v31 = vunpack.c.0.s8 %v179_v4  ;;  %v111_v32 = vshrl.u32 %v110_v5, 7 }
  0x17   :  { %v122_v33 = vcombine.low %v93_v25, %v94_v26  ;;  %v123_v34 = vcombine.low %v95_v27, %v96_v28 }
  0x18   :  { %v112_v35 = vsub.s32 %v109_v31, %v111_v32 }
  0x1a   :  { %v113_v36 = vrot.slane %v105_v29, %v112_v35  ;;  %v120_v37 = vrot.slane %v106_v30, %v112_v35  ;;  %v130_v38 = vrot.slane %v122_v33, %v112_v35  ;;  %v137_v39 = vrot.slane %v123_v34, %v112_v35 }
  0x1c   :  { %v121_v40 = vcombine.low %v113_v36, %v120_v37  ;;  %v138_v41 = vcombine.low %v130_v38, %v137_v39 }
  0x1e   :  { %v143_v42 = vrot.slane %v138_v41, 7 }
  0x20   :  { %v145_v43 = vsel %vm144_vm0, %v143_v42, %v121_v40 }
  0x21   :  { %v147_v44 = vsel %vm146_vm1, %v143_v42, %v145_v43 }
  0x22   :  { %v149_v45 = vsel %vm148_vm2, %v143_v42, %v147_v44 }
  0x23   :  { %v151_v4 = vsel %vm150_vm3, %v143_v42, %v149_v45 }
  0x24   :  { %153 = vst [vmem:[%s202_s1] sm:$0xff] %v151_v4 }

// kernel: resnet50_base_forward.23
= control target key start
LH: loop header
LB: loop body
LE: loop exit
PB: predicated region body
PF: predicated region fallthrough
CT: control target
= control target key end

     0   :  { %s2661_s13 = smov 0   ;;  %s3236_s0 = inlined_call_operand.vmem [shape: bf16[2,16,512], index: 0, kind: input, shape index: {}]   ;;  %s3237_s1 = inlined_call_operand.vmem [shape: bf16[512,128], index: 1, kind: input, shape index: {}]   ;;  %s3238_s2 = inlined_call_operand.vmem [shape: f32[1,128], index: 2, kind: input, shape index: {}]   ;;  %s3239_s3 = inlined_call_operand.vmem [shape: f32[1,128], index: 3, kind: input, shape index: {}]   ;;  %s3240_s4 = inlined_call_operand.vmem [shape: bf16[1152,128], index: 4, kind: input, shape index: {}]   ;;  %s3241_s5 = inlined_call_operand.vmem [shape: f32[1,128], index: 5, kind: input, shape index: {}]   ;;  %s3242_s6 = inlined_call_operand.vmem [shape: f32[1,128], index: 6, kind: input, shape index: {}]   ;;  %s3243_s7 = inlined_call_operand.vmem [shape: bf16[128,512], index: 7, kind: input, shape index: {}]   ;;  %s3244_s8 = inlined_call_operand.vmem [shape: f32[1,512], index: 8, kind: input, shape index: {}]   ;;  %s3245_s9 = inlined_call_operand.vmem [shape: f32[1,512], index: 9, kind: input, shape index: {}]   ;;  %s3246_s10 = inlined_call_operand.vmem [shape: bf16[2,16,512], index: 10, kind: output, shape index: {}]  }
   0x1 LB: > { %s2080_s14 = sadd.s32 4294967295, %s2601_s13   ;;  %p2084_p0 = scmp.ge.s32.totalorder %s2601_s13, 1  ;;  %s2601_s13 = sphi %s2661_s13, %s20_s13  }
   0x2   : > { %p312_p1 = scmp.lt.s32.totalorder %s2601_s13, 3 }
   0x4   : > { %p313_p2 = pnand %p2084_p0, %p312_p1 }
   0x5   : > { %p350_p3 = scmp.lt.s32.totalorder (!%p313_p2), %s2080_s14, 1 }
   0x6   : > { %316 = sbr.rel (%p313_p2) target bundleno = 745 (0x2e9), region = 60 }
   0xb   : > { %v2435_v0 = vld [vmem:[%s3237_s1 + $0x78] sm:$0xff]   ;;  %v2439_v4 = vld [vmem:[%s3237_s1 + $0x70] sm:$0xff]   ;;  %v2443_v8 = vld [vmem:[%s3237_s1 + $0x68] sm:$0xff]   ;;  %s3260_s14 = smov (!%p350_p3, %s2080_s14), 1  ;;  %vm745_vm0 = vcmask 1044480   ;;  %vm805_vm1 = vcmask 1046528  }
   0xc   : > { %v2436_v1 = vld [vmem:[%s3237_s1 + $0xf8] sm:$0xff]   ;;  %2263 = vmatprep.subr.bf16.mxu0 %v2435_v0  ;;  %v2440_v5 = vld [vmem:[%s3237_s1 + $0xf0] sm:$0xff]   ;;  %v2444_v9 = vld [vmem:[%s3237_s1 + $0xe8] sm:$0xff]   ;;  %s2257_s15 = sshll.u32 %s3260_s14, 5  ;;  %vm777_vm3 = vcmask 1043456   ;;  %vm767_vm4 = vcmask 1045504  }
   0xd   : > { %v2437_v2 = vld [vmem:[%s3237_s1 + $0x38] sm:$0xff]   ;;  %2285 = vmatprep.subr.bf16.mxu1 %v2436_v1  ;;  %v2441_v6 = vld [vmem:[%s3237_s1 + $0x30] sm:$0xff]   ;;  %v2445_v10 = vld [vmem:[%s3237_s1 + $0x28] sm:$0xff]   ;;  %s2771_s24 = scalar_lea.vmem %s3236_s0, %s2257_s15  ;;  %vm787_vm5 = vcmask 1041408   ;;  %vm813_vm11 = vcmask 1042432   ;;  %vm2604_vm12 = vmmov 0  }
   0xe   : > { %v2438_v3 = vld [vmem:[%s3237_s1 + $0xb8] sm:$0xff]   ;;  %2264 = vmatpush3.bf16.msra.mxu0 %v2437_v2  ;;  %v2442_v7 = vld [vmem:[%s3237_s1 + $0xb0] sm:$0xff]   ;;  %v2446_v11 = vld [vmem:[%s3237_s1 + $0xa8] sm:$0xff]  }
   0xf   : > { %2286 = vmatpush3.bf16.msra.mxu1 %v2438_v3  ;;  %2265 = vmatprep.subr.bf16.mxu0 %v2439_v4  ;;  %v2447_v12 = vld [vmem:[%s3237_s1 + $0x60] sm:$0xff]   ;;  %v2451_v16 = vld [vmem:[%s3237_s1 + $0x58] sm:$0xff]   ;;  %v2455_v20 = vld [vmem:[%s3237_s1 + $0x50] sm:$0xff]  }
  0x10   : > { %2287 = vmatprep.subr.bf16.mxu1 %v2440_v5  ;;  %v2448_v13 = vld [vmem:[%s3237_s1 + $0xe0] sm:$0xff]   ;;  %v2452_v17 = vld [vmem:[%s3237_s1 + $0xd8] sm:$0xff]   ;;  %v2456_v21 = vld [vmem:[%s3237_s1 + $0xd0] sm:$0xff]  }
  0x11   : > { %v2449_v14 = vld [vmem:[%s3237_s1 + $0x20] sm:$0xff]   ;;  %v2453_v18 = vld [vmem:[%s3237_s1 + $0x18] sm:$0xff]   ;;  %v2457_v22 = vld [vmem:[%s3237_s1 + $0x10] sm:$0xff]  }
  0x12   : > { %2266 = vmatpush3.bf16.msra.mxu0 %v2441_v6  ;;  %v2450_v15 = vld [vmem:[%s3237_s1 + $0xa0] sm:$0xff]   ;;  %v2454_v19 = vld [vmem:[%s3237_s1 + $0x98] sm:$0xff]   ;;  %v2458_v23 = vld [vmem:[%s3237_s1 + $0x90] sm:$0xff]  }
  0x13   : > { %2288 = vmatpush3.bf16.msra.mxu1 %v2442_v7  ;;  %2267 = vmatprep.subr.bf16.mxu0 %v2443_v8  ;;  %v2459_v24 = vld [vmem:[%s3237_s1 + $0x48] sm:$0xff]   ;;  %v2463_v28 = vld [vmem:[%s3237_s1 + $0x40] sm:$0xff]   ;;  %v363_v33 = vld [vmem:[%s2771_s24 + $0x10] sm:$0xff] }
  0x14   : > { %2289 = vmatprep.subr.bf16.mxu1 %v2444_v9  ;;  %v2460_v25 = vld [vmem:[%s3237_s1 + $0xc8] sm:$0xff]   ;;  %v2464_v29 = vld [vmem:[%s3237_s1 + $0xc0] sm:$0xff]   ;;  %v364_v36 = vld [vmem:[%s2771_s24 + $0x18] sm:$0xff] }
  0x15   : > { %v2461_v26 = vld [vmem:[%s3237_s1 + $0x8] sm:$0xff]   ;;  %v2465_v30 = vld [vmem:[%s3237_s1] sm:$0xff]   ;;  %v2471_v40 = vld [vmem:[%s3240_s4 + $0x78] sm:$0xff]  }
  0x16   : > { %2268 = vmatpush3.bf16.msra.mxu0 %v2445_v10  ;;  %v2462_v27 = vld [vmem:[%s3237_s1 + $0x88] sm:$0xff]   ;;  %v2466_v31 = vld [vmem:[%s3237_s1 + $0x80] sm:$0xff]   ;;  %v2472_v41 = vld [vmem:[%s3240_s4 + $0xf8] sm:$0xff]  }
  0x17   : > { %2290 = vmatpush3.bf16.msra.mxu1 %v2446_v11  ;;  %2269 = vmatprep.subr.bf16.mxu0 %v2447_v12  ;;  %v361_v32 = vld [vmem:[%s2771_s24] sm:$0xff]  ;;  %v362_v34 = vld [vmem:[%s2771_s24 + $0x8] sm:$0xff]  ;;  %v2473_v42 = vld [vmem:[%s3240_s4 + $0x38] sm:$0xff]  }
  0x18   : > { %2291 = vmatprep.subr.bf16.mxu1 %v2448_v13  ;;  %v2090_v35 = vcombine.high %v361_v32, %v363_v33  ;;  %v2089_v37 = vcombine.low %v361_v32, %v363_v33  ;;  %v2092_v38 = vcombine.high %v362_v34, %v364_v36  ;;  %v2091_v39 = vcombine.low %v362_v34, %v364_v36  ;;  %v2474_v43 = vld [vmem:[%s3240_s4 + $0xb8] sm:$0xff]   ;;  %v2475_v44 = vld [vmem:[%s3240_s4 + $0x70] sm:$0xff]   ;;  %v2479_v48 = vld [vmem:[%s3240_s4 + $0x68] sm:$0xff]  }
  0x19   : > { %v2476_v45 = vld [vmem:[%s3240_s4 + $0xf0] sm:$0xff]   ;;  %v2480_v49 = vld [vmem:[%s3240_s4 + $0xe8] sm:$0xff]   ;;  %v2483_v52 = vld [vmem:[%s3240_s4 + $0x60] sm:$0xff]   ;;  %v754_v13 = vlaneseq }
  0x1a   : > { %2270 = vmatpush3.bf16.msra.mxu0 %v2449_v14  ;;  %673 = vmatprep.mubr.bf16.mxu0 %v2090_v35  ;;  %v2477_v46 = vld [vmem:[%s3240_s4 + $0x30] sm:$0xff]   ;;  %v2481_v50 = vld [vmem:[%s3240_s4 + $0x28] sm:$0xff]   ;;  %v2484_v53 = vld [vmem:[%s3240_s4 + $0xe0] sm:$0xff]  }
  0x1b   : > { %2292 = vmatpush3.bf16.msra.mxu1 %v2450_v15  ;;  %2271 = vmatprep.subr.bf16.mxu0 %v2451_v16  ;;  %v2478_v47 = vld [vmem:[%s3240_s4 + $0xb0] sm:$0xff]   ;;  %v2482_v51 = vld [vmem:[%s3240_s4 + $0xa8] sm:$0xff]   ;;  %v2485_v54 = vld [vmem:[%s3240_s4 + $0x20] sm:$0xff]  }
  0x1c   : > { %2293 = vmatprep.subr.bf16.mxu1 %v2452_v17  ;;  %714 = vmatprep.mubr.bf16.mxu1 %v2092_v38  ;;  %v2486_v55 = vld [vmem:[%s3240_s4 + $0xa0] sm:$0xff]   ;;  %v2487_v56 = vld [vmem:[%s3240_s4 + $0x58] sm:$0xff]   ;;  %v2491_v60 = vld [vmem:[%s3240_s4 + $0x50] sm:$0xff]  }
  0x1d   : > { %v2488_v57 = vld [vmem:[%s3240_s4 + $0xd8] sm:$0xff]   ;;  %v2492_v61 = vld [vmem:[%s3240_s4 + $0xd0] sm:$0xff]   ;;  %v2495_v0 = vld [vmem:[%s3240_s4 + $0x48] sm:$0xff]  }
  0x1e   : > { %2272 = vmatpush3.bf16.msra.mxu0 %v2453_v18  ;;  %v2489_v58 = vld [vmem:[%s3240_s4 + $0x18] sm:$0xff]   ;;  %v2493_v62 = vld [vmem:[%s3240_s4 + $0x10] sm:$0xff]   ;;  %v2496_v1 = vld [vmem:[%s3240_s4 + $0xc8] sm:$0xff]  }
  0x1f   : > { %2294 = vmatpush3.bf16.msra.mxu1 %v2454_v19  ;;  %2273 = vmatprep.subr.bf16.mxu0 %v2455_v20  ;;  %v2490_v59 = vld [vmem:[%s3240_s4 + $0x98] sm:$0xff]   ;;  %v2494_v63 = vld [vmem:[%s3240_s4 + $0x90] sm:$0xff]   ;;  %v2497_v2 = vld [vmem:[%s3240_s4 + $0x8] sm:$0xff]  }
  0x20   : > { %2295 = vmatprep.subr.bf16.mxu1 %v2456_v21  ;;  %v2498_v3 = vld [vmem:[%s3240_s4 + $0x88] sm:$0xff]   ;;  %v2499_v4 = vld [vmem:[%s3240_s4 + $0x40] sm:$0xff]   ;;  %v2503_v8 = vld [vmem:[%s3240_s4 + $0x178] sm:$0xff]  }
  0x21   : > { %v2500_v5 = vld [vmem:[%s3240_s4 + $0xc0] sm:$0xff]   ;;  %v2504_v9 = vld [vmem:[%s3240_s4 + $0x1f8] sm:$0xff]  }
  0x22   : > { %2274 = vmatpush3.bf16.msra.mxu0 %v2457_v22  ;;  %v2501_v6 = vld [vmem:[%s3240_s4] sm:$0xff]   ;;  %v2888_v22 = vshrl.u32 %v754_v13, 7  ;;  %v2507_v13 = vld [vmem:[%s3240_s4 + $0x170] sm:$0xff]  }
  0x23   : > { %2296 = vmatpush3.bf16.msra.mxu1 %v2458_v23  ;;  %2275 = vmatprep.subr.bf16.mxu0 %v2459_v24  ;;  %v2502_v7 = vld [vmem:[%s3240_s4 + $0x80] sm:$0xff]  }
  0x24   : > { %2297 = vmatprep.subr.bf16.mxu1 %v2460_v25  ;;  %v2125_v18 = vld [vmem:[%s3238_s2] ss:$0 sm:$0xff]  ;;  %v757_v33 = vand.u32 3, %v2888_v22 }
  0x25   : > { %v2126_v23 = vld [vmem:[%s3239_s3] ss:$0 sm:$0xff] }
  0x26   : > { %2276 = vmatpush3.bf16.msra.mxu0 %v2461_v26  ;;  %vm2898_vm2 = vcmp.ge.s32.totalorder %v757_v33, 1  ;;  %vm2906_vm7 = vcmp.lt.s32.totalorder %v757_v33, 3  ;;  %v2521_v33 = vld [vmem:[%s3240_s4 + $0x118] sm:$0xff]  }
  0x27   : > { %2298 = vmatpush3.bf16.msra.mxu1 %v2462_v27  ;;  %2277 = vmatprep.subr.bf16.mxu0 %v2463_v28 }
  0x28   : > { %2299 = vmatprep.subr.bf16.mxu1 %v2464_v29 }
  0x2a   : > { %2278 = vmatpush3.bf16.msra.mxu0 %v2465_v30  ;;  %v756_v30 = vadd.s32 8, %v2888_v22 }
  0x2b   : > { %2300 = vmatpush3.bf16.msra.mxu1 %v2466_v31  ;;  %2307 = vmatprep.subr.bf16.mxu0 %v2471_v40 }
  0x2c   : > { %2329 = vmatprep.subr.bf16.mxu1 %v2472_v41  ;;  %v758_v36 = vand.u32 3, %v756_v30  ;;  %v2518_v30 = vld [vmem:[%s3240_s4 + $0x1a0] sm:$0xff]   ;;  %v2528_v41 = vld [vmem:[%s3240_s4 + $0x1c8] sm:$0xff]  }
  0x2d   : > { %674 = vmatmul.mubr.bf16.vlgmr.msra.gmra.mxu0 %v2089_v37 }
  0x2e   : > { %715 = vmatmul.mubr.bf16.vlgmr.msra.gmra.mxu1 %v2091_v39  ;;  %2308 = vmatpush3.bf16.msra.mxu0 %v2473_v42  ;;  %vm2902_vm6 = vcmp.ge.s32.totalorder %v758_v36, 1  ;;  %vm2913_vm8 = vcmp.lt.s32.totalorder %v758_v36, 3  ;;  %v2524_v36 = vld [vmem:[%s3240_s4 + $0x1d0] sm:$0xff]   ;;  %v2529_v42 = vld [vmem:[%s3240_s4 + $0x108] sm:$0xff]  }
  0x2f   : > { %2330 = vmatpush3.bf16.msra.mxu1 %v2474_v43  ;;  %2309 = vmatprep.subr.bf16.mxu0 %v2475_v44  ;;  %v2603_v43 = vmov 0.0   ;;  %vm2943_vm9 = vmpackc.low %vm2902_vm6, %vm2898_vm2  ;;  %v2526_v39 = vld [vmem:[%s3240_s4 + $0x190] sm:$0xff]  }
  0x30   : > { %2331 = vmatprep.subr.bf16.mxu1 %v2476_v45  ;;  %v821_v44 = vrot.slane %v2603_v43, 1  ;;  %vm2955_vm10 = vmpackc.low %vm2913_vm8, %vm2906_vm7 }
  0x32   : > { %2310 = vmatpush3.bf16.msra.mxu0 %v2477_v46 }
  0x33   : > { %2332 = vmatpush3.bf16.msra.mxu1 %v2478_v47  ;;  %2311 = vmatprep.subr.bf16.mxu0 %v2479_v48  ;;  %v800_v48 = vrot.slane %v2603_v43, 2 }
  0x34   : > { %2333 = vmatprep.subr.bf16.mxu1 %v2480_v49 }
  0x36   : > { %2312 = vmatpush3.bf16.msra.mxu0 %v2481_v50 }
  0x37   : > { %2334 = vmatpush3.bf16.msra.mxu1 %v2482_v51  ;;  %2313 = vmatprep.subr.bf16.mxu0 %v2483_v52 }
  0x38   : > { %2335 = vmatprep.subr.bf16.mxu1 %v2484_v53 }
  0x3a   : > { %2314 = vmatpush3.bf16.msra.mxu0 %v2485_v54 }
  0x3b   : > { %2336 = vmatpush3.bf16.msra.mxu1 %v2486_v55  ;;  %2315 = vmatprep.subr.bf16.mxu0 %v2487_v56 }
  0x3c   : > { %2337 = vmatprep.subr.bf16.mxu1 %v2488_v57 }
  0x3e   : > { %2316 = vmatpush3.bf16.msra.mxu0 %v2489_v58 }
  0x3f   : > { %2338 = vmatpush3.bf16.msra.mxu1 %v2490_v59  ;;  %2317 = vmatprep.subr.bf16.mxu0 %v2491_v60 }
  0x40   : > { %2339 = vmatprep.subr.bf16.mxu1 %v2492_v61 }
  0x42   : > { %2318 = vmatpush3.bf16.msra.mxu0 %v2493_v62 }
  0x43   : > { %2340 = vmatpush3.bf16.msra.mxu1 %v2494_v63  ;;  %2319 = vmatprep.subr.bf16.mxu0 %v2495_v0 }
  0x44   : > { %2341 = vmatprep.subr.bf16.mxu1 %v2496_v1  ;;  %v2546_v1 = vld [vmem:[%s3243_s7 + $0xe8] ss:$16 sps:$4 sm:$0xff]  }
  0x46   : > { %2320 = vmatpush3.bf16.msra.mxu0 %v2497_v2 }
  0x47   : > { %2342 = vmatpush3.bf16.msra.mxu1 %v2498_v3  ;;  %2321 = vmatprep.subr.bf16.mxu0 %v2499_v4 }
  0x48   : > { %2343 = vmatprep.subr.bf16.mxu1 %v2500_v5 }
  0x4a   : > { %2322 = vmatpush3.bf16.msra.mxu0 %v2501_v6  ;;  %v2557_v6 = vld [vmem:[%s3243_s7 + $0xa4] ss:$16 sps:$4 sm:$0xff]  }
  0x4b   : > { %2344 = vmatpush3.bf16.msra.mxu1 %v2502_v7  ;;  %2351 = vmatprep.subr.bf16.mxu0 %v2503_v8  ;;  %v2505_v7 = vld [vmem:[%s3240_s4 + $0x138] sm:$0xff]  }
  0x4c   : > { %2373 = vmatprep.subr.bf16.mxu1 %v2504_v9  ;;  %v2506_v8 = vld [vmem:[%s3240_s4 + $0x1b8] sm:$0xff]  }
  0xed   : > { %v2279_v10 = vpop.f32.mrf.mxu0 }
  0xee   : > { %v2301_v11 = vpop.f32.mrf.mxu1 }
  0xef   : > { %v2280_v12 = vpop.f32.mrf.mxu0 }
  0xf0   : > { %v2281_v14 = vadd.f32 %v2280_v12, %v2279_v10  ;;  %v2302_v15 = vpop.f32.mrf.mxu1 }
  0xf1   : > { %v2303_v16 = vadd.f32 %v2302_v15, %v2301_v11  ;;  %v2282_v17 = vpop.f32.mrf.mxu0 }
  0xf2   : > { %v2304_v19 = vpop.f32.mrf.mxu1 }
  0xf3   : > { %v717_v20 = vadd.f32 %v2303_v16, %v2281_v14  ;;  %v2283_v21 = vpop.f32.mrf.mxu0  ;;  %v2508_v14 = vld [vmem:[%s3240_s4 + $0x1f0] sm:$0xff]  }
  0xf4   : > { %v2284_v24 = vadd.f32 %v2283_v21, %v2282_v17  ;;  %v2305_v25 = vpop.f32.mrf.mxu1  ;;  %v2511_v21 = vld [vmem:[%s3240_s4 + $0x168] sm:$0xff]  }
  0xf5   : > { %v730_v26 = vmul.f32 %v2125_v18, %v717_v20  ;;  %v2306_v27 = vadd.f32 %v2305_v25, %v2304_v19  ;;  %v2509_v19 = vld [vmem:[%s3240_s4 + $0x130] sm:$0xff]   ;;  %v2513_v25 = vld [vmem:[%s3240_s4 + $0x128] sm:$0xff]  }
  0xf6   : > { %v2510_v20 = vld [vmem:[%s3240_s4 + $0x1b0] sm:$0xff]  }
  0xf7   : > { %v739_v28 = vadd.f32 %v2126_v23, %v730_v26  ;;  %v720_v29 = vadd.f32 %v2306_v27, %v2284_v24  ;;  %v2514_v26 = vld [vmem:[%s3240_s4 + $0x1a8] sm:$0xff]   ;;  %v2515_v27 = vld [vmem:[%s3240_s4 + $0x160] sm:$0xff]  }
  0xf9   : > { %v741_v31 = vmax.f32 %v739_v28, 0.0  ;;  %v731_v32 = vmul.f32 %v2125_v18, %v720_v29  ;;  %v2516_v28 = vld [vmem:[%s3240_s4 + $0x1e0] sm:$0xff]  }
  0xfa   : > { %v2517_v29 = vld [vmem:[%s3240_s4 + $0x120] sm:$0xff]  }
  0xfb   : > { %v746_v34 = vrot.slane %v741_v31, 3  ;;  %v740_v35 = vadd.f32 %v2126_v23, %v731_v32  ;;  %v2512_v23 = vld [vmem:[%s3240_s4 + $0x1e8] sm:$0xff]   ;;  %v2519_v31 = vld [vmem:[%s3240_s4 + $0x158] sm:$0xff]  }
  0xfc   : > { %v2520_v32 = vld [vmem:[%s3240_s4 + $0x1d8] sm:$0xff]  }
  0xfd   : > { %v2896_v37 = vsel %vm745_vm0, 0.0, %v746_v34  ;;  %v742_v38 = vmax.f32 %v740_v35, 0.0  ;;  %v2523_v35 = vld [vmem:[%s3240_s4 + $0x150] sm:$0xff]  }
  0xfe   : > { %v806_v45 = vrot.slane %v2896_v37, 1  ;;  %v778_v46 = vrot.slane %v2896_v37, 4  ;;  %v768_v51 = vrot.slane %v2896_v37, 2  ;;  %v788_v52 = vrot.slane %v2896_v37, 6 }
  0xff   : > { %v747_v40 = vrot.slane %v742_v38, 3  ;;  %v2525_v38 = vld [vmem:[%s3240_s4 + $0x110] sm:$0xff]  }
 0x101   : > { %v2919_v49 = vsel %vm745_vm0, %v746_v34, %v747_v40  ;;  %v2922_v50 = vsel %vm745_vm0, %v747_v40, 0.0  ;;  %v2522_v34 = vld [vmem:[%s3240_s4 + $0x198] sm:$0xff]   ;;  %v2527_v40 = vld [vmem:[%s3240_s4 + $0x148] sm:$0xff]  }
 0x102   : > { %v807_v53 = vrot.slane %v2919_v49, 1  ;;  %v809_v54 = vrot.slane %v2922_v50, 1  ;;  %v779_v55 = vrot.slane %v2919_v49, 4  ;;  %v781_v56 = vrot.slane %v2922_v50, 4 }
 0x103   : > { %v2200_v57 = vpack.c.bf16 %v2919_v49, %v2896_v37  ;;  %v769_v58 = vrot.slane %v2919_v49, 2  ;;  %v771_v59 = vrot.slane %v2922_v50, 2  ;;  %v789_v60 = vrot.slane %v2919_v49, 6 }
 0x104   : > { %v808_v61 = vsel %vm805_vm1, %v806_v45, %v807_v53  ;;  %v810_v62 = vsel %vm805_vm1, %v807_v53, %v809_v54  ;;  %v780_v63 = vsel %vm777_vm3, %v778_v46, %v779_v55  ;;  %v782_v0 = vsel %vm777_vm3, %v779_v55, %v781_v56  ;;  %v2531_v45 = vld [vmem:[%s3240_s4 + $0x140] sm:$0xff]   ;;  %v2535_v56 = vld [vmem:[%s3240_s4 + $0x238] sm:$0xff]  }
 0x105   : > { %v825_v2 = vpack.c.bf16 %v810_v62, %v808_v61  ;;  %v2203_v3 = vpack.c.bf16 %v782_v0, %v780_v63  ;;  %v770_v4 = vsel %vm767_vm4, %v768_v51, %v769_v58  ;;  %v2949_v5 = vsel %vm767_vm4, %v769_v58, %v771_v59  ;;  %v2532_v46 = vld [vmem:[%s3240_s4 + $0x1c0] sm:$0xff]   ;;  %v2541_v61 = vld [vmem:[%s3240_s4 + $0x208] sm:$0xff]  }
 0x106   : > { %v2206_v9 = vpack.c.bf16 %v2949_v5, %v770_v4  ;;  %v790_v10 = vsel %vm787_vm5, %v788_v52, %v789_v60  ;;  %v791_v11 = vrot.slane %v2922_v50, 6  ;;  %v822_v12 = vsel %vm805_vm1, %v809_v54, %v821_v44  ;;  %v2530_v44 = vld [vmem:[%s3240_s4 + $0x188] sm:$0xff]   ;;  %v2533_v51 = vld [vmem:[%s3240_s4 + $0x100] sm:$0xff]  }
 0x107   : > { %1441 = vmatprep.mubr.bf16.mxu0 %v825_v2  ;;  %2204 = vmatprep.mubr.msk.bf16.mxu1 %vm2943_vm9, %v2203_v3  ;;  %v831_v16 = vpack.c.bf16 %v822_v12, %v810_v62  ;;  %v2983_v17 = vsel %vm767_vm4, %v771_v59, %v800_v48  ;;  %v815_v47 = vrot.slane %v2919_v49, 5  ;;  %v817_v48 = vrot.slane %v2922_v50, 5  ;;  %v2534_v52 = vld [vmem:[%s3240_s4 + $0x180] sm:$0xff]   ;;  %v2539_v59 = vld [vmem:[%s3240_s4 + $0x218] sm:$0xff]  }
 0x108   : > { %2201 = vmatmul.mubr.msk.bf16.vlgmr.msra.gmra.mxu0 %vm2943_vm9, %v2200_v57  ;;  %2207 = vmatmul.mubr.msk.bf16.vlgmr.msra.gmra.mxu1 %vm2955_vm10, %v2206_v9  ;;  %v792_v15 = vsel %vm787_vm5, %v789_v60, %v791_v11  ;;  %v2215_v24 = vpack.c.bf16 %v2983_v17, %v2949_v5  ;;  %v814_v53 = vrot.slane %v2896_v37, 5  ;;  %v2212_v58 = vpack.c.bf16 %v2922_v50, %v2919_v49  ;;  %v2536_v37 = vld [vmem:[%s3240_s4 + $0x230] sm:$0xff]   ;;  %v2537_v49 = vld [vmem:[%s3240_s4 + $0x228] sm:$0xff]   ;;  %v2538_v50 = vld [vmem:[%s3240_s4 + $0x220] sm:$0xff]  }
 0x109   : > { %2352 = vmatpush3.bf16.msra.mxu0 %v2505_v7  ;;  %2374 = vmatpush3.bf16.msra.mxu1 %v2506_v8  ;;  %v2209_v18 = vpack.c.bf16 %v792_v15, %v790_v10  ;;  %v818_v55 = vsel %vm813_vm11, %v815_v47, %v817_v48  ;;  %v2540_v60 = vld [vmem:[%s3240_s4 + $0x210] sm:$0xff]   ;;  %v2542_v62 = vld [vmem:[%s3240_s4 + $0x200] sm:$0xff]   ;;  %v2554_v3 = vld [vmem:[%s3243_s7 + $0xcc] ss:$16 sps:$4 sm:$0xff]  }
 0x10a   : > { %1564 = vmatprep.mubr.bf16.mxu1 %v831_v16  ;;  %2353 = vmatprep.subr.bf16.mxu0 %v2507_v13  ;;  %v816_v54 = vsel %vm813_vm11, %v814_v53, %v815_v47  ;;  %v2543_v63 = vld [vmem:[%s3243_s7 + $0xe0] ss:$16 sps:$4 sm:$0xff]   ;;  %v2545_v0 = vld [vmem:[%s3243_s7 + $0xe4] ss:$16 sps:$4 sm:$0xff]   ;;  %v2552_v5 = vld [vmem:[%s3243_s7 + $0xc8] ss:$16 sps:$4 sm:$0xff]  }
 0x10b   : > { %2210 = vmatprep.mubr.msk.bf16.mxu0 %vm2955_vm10, %v2209_v18  ;;  %2375 = vmatprep.subr.bf16.mxu1 %v2508_v14  ;;  %v828_v57 = vpack.c.bf16 %v818_v55, %v816_v54  ;;  %v2551_v2 = vld [vmem:[%s3243_s7 + $0xc4] ss:$16 sps:$4 sm:$0xff]   ;;  %v2549_v4 = vld [vmem:[%s3243_s7 + $0xc0] ss:$16 sps:$4 sm:$0xff]   ;;  %v2560_v7 = vld [vmem:[%s3243_s7 + $0xac] ss:$16 sps:$4 sm:$0xff]  }
 0x10c   : > { %v2555_v8 = vld [vmem:[%s3243_s7 + $0xa0] ss:$16 sps:$4 sm:$0xff]   ;;  %v2558_v9 = vld [vmem:[%s3243_s7 + $0xa8] ss:$16 sps:$4 sm:$0xff]   ;;  %v2563_v10 = vld [vmem:[%s3243_s7 + $0x84] ss:$16 sps:$4 sm:$0xff]  }
 0x10d   : > { %2354 = vmatpush3.bf16.msra.mxu0 %v2509_v19  ;;  %2376 = vmatpush3.bf16.msra.mxu1 %v2510_v20  ;;  %v2566_v11 = vld [vmem:[%s3243_s7 + $0x8c] ss:$16 sps:$4 sm:$0xff]   ;;  %v2561_v12 = vld [vmem:[%s3243_s7 + $0x80] ss:$16 sps:$4 sm:$0xff]   ;;  %v2564_v13 = vld [vmem:[%s3243_s7 + $0x88] ss:$16 sps:$4 sm:$0xff]  }
 0x10e   : > { %2355 = vmatprep.subr.bf16.mxu0 %v2511_v21  ;;  %2377 = vmatprep.subr.bf16.mxu1 %v2512_v23  ;;  %v2569_v14 = vld [vmem:[%s3243_s7 + $0x64] ss:$16 sps:$4 sm:$0xff]   ;;  %v2572_v15 = vld [vmem:[%s3243_s7 + $0x6c] ss:$16 sps:$4 sm:$0xff]   ;;  %v2567_v16 = vld [vmem:[%s3243_s7 + $0x60] ss:$16 sps:$4 sm:$0xff]  }
 0x10f   : > { %v2570_v17 = vld [vmem:[%s3243_s7 + $0x68] ss:$16 sps:$4 sm:$0xff]   ;;  %v2575_v18 = vld [vmem:[%s3243_s7 + $0x44] ss:$16 sps:$4 sm:$0xff]   ;;  %v2578_v19 = vld [vmem:[%s3243_s7 + $0x4c] ss:$16 sps:$4 sm:$0xff]  }
 0x110   : > { %v2573_v20 = vld [vmem:[%s3243_s7 + $0x40] ss:$16 sps:$4 sm:$0xff]   ;;  %v2576_v21 = vld [vmem:[%s3243_s7 + $0x48] ss:$16 sps:$4 sm:$0xff]   ;;  %v2581_v23 = vld [vmem:[%s3243_s7 + $0x24] ss:$16 sps:$4 sm:$0xff]  }
 0x111   : > { %2356 = vmatpush3.bf16.msra.mxu0 %v2513_v25  ;;  %2378 = vmatpush3.bf16.msra.mxu1 %v2514_v26  ;;  %v2579_v25 = vld [vmem:[%s3243_s7 + $0x20] ss:$16 sps:$4 sm:$0xff]   ;;  %v2582_v26 = vld [vmem:[%s3243_s7 + $0x28] ss:$16 sps:$4 sm:$0xff]  }
 0x112   : > { %2357 = vmatprep.subr.bf16.mxu0 %v2515_v27  ;;  %2379 = vmatprep.subr.bf16.mxu1 %v2516_v28  ;;  %v2585_v27 = vld [vmem:[%s3243_s7] ss:$16 sps:$4 sm:$0xff]   ;;  %v2587_v28 = vld [vmem:[%s3243_s7 + $0x4] ss:$16 sps:$4 sm:$0xff]  }
 0x115   : > { %2358 = vmatpush3.bf16.msra.mxu0 %v2517_v29  ;;  %2380 = vmatpush3.bf16.msra.mxu1 %v2518_v30  ;;  %v2588_v29 = vld [vmem:[%s3243_s7 + $0x8] ss:$16 sps:$4 sm:$0xff]   ;;  %v2590_v30 = vld [vmem:[%s3243_s7 + $0xc] ss:$16 sps:$4 sm:$0xff]  }
 0x116   : > { %2359 = vmatprep.subr.bf16.mxu0 %v2519_v31  ;;  %2381 = vmatprep.subr.bf16.mxu1 %v2520_v32  ;;  %v2605_v31 = vmov 0  }
 0x119   : > { %2360 = vmatpush3.bf16.msra.mxu0 %v2521_v33  ;;  %2382 = vmatpush3.bf16.msra.mxu1 %v2522_v34 }
 0x11a   : > { %2361 = vmatprep.subr.bf16.mxu0 %v2523_v35  ;;  %2383 = vmatprep.subr.bf16.mxu1 %v2524_v36 }
 0x11d   : > { %2362 = vmatpush3.bf16.msra.mxu0 %v2525_v38  ;;  %2384 = vmatpush3.bf16.msra.mxu1 %v2526_v39 }
 0x11e   : > { %2363 = vmatprep.subr.bf16.mxu0 %v2527_v40  ;;  %2385 = vmatprep.subr.bf16.mxu1 %v2528_v41 }
 0x121   : > { %2364 = vmatpush3.bf16.msra.mxu0 %v2529_v42  ;;  %2386 = vmatpush3.bf16.msra.mxu1 %v2530_v44 }
 0x122   : > { %2365 = vmatprep.subr.bf16.mxu0 %v2531_v45  ;;  %2387 = vmatprep.subr.bf16.mxu1 %v2532_v46 }
 0x125   : > { %2366 = vmatpush3.bf16.msra.mxu0 %v2533_v51  ;;  %2388 = vmatpush3.bf16.msra.mxu1 %v2534_v52 }
 0x126   : > { %2404 = vmatprep.subr.bf16.mxu0 %v2603_v43  ;;  %1827 = vmatprep.subr.bf16.mxu1 %v2545_v0 }
 0x128   : > { %1524 = vmatmul.mubr.bf16.vlgmr.msra.gmra.mxu0 %v828_v57  ;;  %2213 = vmatmul.mubr.msk.bf16.vlgmr.msra.gmra.mxu1 %vm2943_vm9, %v2212_v58 }
 0x129   : > { %2405 = vmatpush3.bf16.msra.mxu0 %v2535_v56  ;;  %2420 = vmatprep.mubr.msk.bf16.mxu0 %vm2604_vm12, %v2603_v43 }
 0x12a   : > { %2406 = vmatprep.subr.bf16.mxu0 %v2603_v43  ;;  %1828 = vmatpush1.bf16.msra.mxu1 %v2543_v63 }
 0x12b   : > { %1829 = vmatprep.subr.bf16.mxu1 %v2551_v2  ;;  %1859 = vmatprep.mubr.bf16.mxu1 %v2605_v31 }
 0x12d   : > { %2407 = vmatpush3.bf16.msra.mxu0 %v2536_v37 }
 0x12e   : > { %2408 = vmatprep.subr.bf16.mxu0 %v2603_v43  ;;  %1830 = vmatpush1.bf16.msra.mxu1 %v2549_v4 }
 0x12f   : > { %1831 = vmatprep.subr.bf16.mxu1 %v2557_v6 }
 0x131   : > { %2409 = vmatpush3.bf16.msra.mxu0 %v2537_v49 }
 0x132   : > { %2410 = vmatprep.subr.bf16.mxu0 %v2603_v43  ;;  %1832 = vmatpush1.bf16.msra.mxu1 %v2555_v8 }
 0x133   : > { %1833 = vmatprep.subr.bf16.mxu1 %v2563_v10 }
 0x135   : > { %2411 = vmatpush3.bf16.msra.mxu0 %v2538_v50 }
 0x136   : > { %2412 = vmatprep.subr.bf16.mxu0 %v2603_v43  ;;  %1834 = vmatpush1.bf16.msra.mxu1 %v2561_v12 }
 0x137   : > { %1835 = vmatprep.subr.bf16.mxu1 %v2569_v14  ;;  %v1925_v14 = vsub.s32 2, %v2888_v22 }
 0x139   : > { %2413 = vmatpush3.bf16.msra.mxu0 %v2539_v59 }
 0x13a   : > { %2414 = vmatprep.subr.bf16.mxu0 %v2603_v43  ;;  %1836 = vmatpush1.bf16.msra.mxu1 %v2567_v16  ;;  %v1921_v16 = vsub.s32 1, %v2888_v22 }
 0x13b   : > { %1837 = vmatprep.subr.bf16.mxu1 %v2575_v18  ;;  %v1943_v18 = vld [vmem:[%s3245_s9] sm:$0xf] }
 0x13d   : > { %2415 = vmatpush3.bf16.msra.mxu0 %v2540_v60 }
 0x13e   : > { %2416 = vmatprep.subr.bf16.mxu0 %v2603_v43  ;;  %1838 = vmatpush1.bf16.msra.mxu1 %v2573_v20 }
 0x13f   : > { %1839 = vmatprep.subr.bf16.mxu1 %v2581_v23  ;;  %v1956_v23 = vrot.slane %v1943_v18, %v1925_v14 }
 0x141   : > { %2417 = vmatpush3.bf16.msra.mxu0 %v2541_v61 }
 0x142   : > { %2418 = vmatprep.subr.bf16.mxu0 %v2603_v43  ;;  %v2548_v43 = vld [vmem:[%s3243_s7 + $0xec] ss:$16 sps:$4 sm:$0xff]   ;;  %1840 = vmatpush1.bf16.msra.mxu1 %v2579_v25 }
 0x143   : > { %1841 = vmatprep.subr.bf16.mxu1 %v2587_v28 }
 0x145   : > { %2419 = vmatpush3.bf16.msra.mxu0 %v2542_v62  ;;  %v2217_v62 = vld [vmem:[%s3241_s5] ss:$0 sm:$0xff] }
 0x146   : > { %1870 = vmatprep.subr.bf16.mxu0 %v2548_v43  ;;  %1842 = vmatpush1.bf16.msra.mxu1 %v2585_v27  ;;  %v2591_v27 = vld [vmem:[%s2771_s24] sm:$0xff] }
 0x147   : > { %v1973_v28 = vunpack.c.l.bf16 %v2591_v27 }
 0x148   : > { %2421 = vmatmul.mubr.msk.bf16.vlgmr.msra.gmra.mxu0 %vm2955_vm10, %v2215_v24  ;;  %v2584_v24 = vld [vmem:[%s3243_s7 + $0x2c] ss:$16 sps:$4 sm:$0xff]  }
 0x149   : > { %1871 = vmatpush1.bf16.msra.mxu0 %v2546_v1  ;;  %1902 = vmatprep.mubr.bf16.mxu0 %v2605_v31 }
 0x14a   : > { %1872 = vmatprep.subr.bf16.mxu0 %v2554_v3  ;;  %v2218_v3 = vld [vmem:[%s3242_s6] ss:$0 sm:$0xff] }
 0x14d   : > { %1873 = vmatpush1.bf16.msra.mxu0 %v2552_v5 }
 0x14e   : > { %1874 = vmatprep.subr.bf16.mxu0 %v2560_v7 }
 0x151   : > { %1875 = vmatpush1.bf16.msra.mxu0 %v2558_v9 }
 0x152   : > { %1876 = vmatprep.subr.bf16.mxu0 %v2566_v11 }
 0x155   : > { %1877 = vmatpush1.bf16.msra.mxu0 %v2564_v13  ;;  %v1917_v13 = vsub.s32 0, %v2888_v22 }
 0x156   : > { %1878 = vmatprep.subr.bf16.mxu0 %v2572_v15  ;;  %v1913_v15 = vld [vmem:[%s3244_s8] sm:$0xf] }
 0x157   : > { %v1926_v20 = vrot.slane %v1913_v15, %v1925_v14 }
 0x159   : > { %1879 = vmatpush1.bf16.msra.mxu0 %v2570_v17  ;;  %v1929_v17 = vsub.s32 3, %v2888_v22 }
 0x15a   : > { %1880 = vmatprep.subr.bf16.mxu0 %v2578_v19  ;;  %v1918_v19 = vrot.slane %v1913_v15, %v1917_v13 }
 0x15b   : > { %v1930_v25 = vrot.slane %v1913_v15, %v1929_v17  ;;  %v1960_v22 = vrot.slane %v1943_v18, %v1929_v17 }
 0x15d   : > { %1881 = vmatpush1.bf16.msra.mxu0 %v2576_v21  ;;  %v1948_v21 = vrot.slane %v1943_v18, %v1917_v13 }
 0x15e   : > { %1882 = vmatprep.subr.bf16.mxu0 %v2584_v24  ;;  %v1922_v24 = vrot.slane %v1913_v15, %v1921_v16 }
 0x161   : > { %1883 = vmatpush1.bf16.msra.mxu0 %v2582_v26 }
 0x162   : > { %1884 = vmatprep.subr.bf16.mxu0 %v2590_v30  ;;  %v2592_v30 = vld [vmem:[%s2771_s24 + $0x8] sm:$0xff] }
 0x163   : > { %v1975_v31 = vunpack.c.l.bf16 %v2592_v30 }
 0x165   : > { %1885 = vmatpush1.bf16.msra.mxu0 %v2588_v29 }
 0x1c8   : > { %v2323_v32 = vpop.f32.mrf.mxu0  ;;  %v2345_v34 = vpop.f32.mrf.mxu1 }
 0x1ca   : > { %v2324_v33 = vpop.f32.mrf.mxu0  ;;  %v2346_v36 = vpop.f32.mrf.mxu1 }
 0x1cb   : > { %v2325_v46 = vadd.f32 %v2324_v33, %v2323_v32  ;;  %v2347_v47 = vadd.f32 %v2346_v36, %v2345_v34  ;;  %v1952_v34 = vrot.slane %v1943_v18, %v1921_v16  ;;  %v1974_v36 = vunpack.c.h.bf16 %v2591_v27 }
 0x1cc   : > { %v2326_v35 = vpop.f32.mrf.mxu0  ;;  %v2348_v39 = vpop.f32.mrf.mxu1 }
 0x1cd   : > { %v1485_v53 = vadd.f32 %v2347_v47, %v2325_v46 }
 0x1ce   : > { %v2327_v38 = vpop.f32.mrf.mxu0  ;;  %v2349_v41 = vpop.f32.mrf.mxu1 }
 0x1cf   : > { %v2328_v54 = vadd.f32 %v2327_v38, %v2326_v35  ;;  %v2350_v55 = vadd.f32 %v2349_v41, %v2348_v39  ;;  %v1976_v39 = vunpack.c.h.bf16 %v2592_v30 }
 0x1d1   : > { %v1488_v37 = vadd.f32 %v2350_v55, %v2328_v54  ;;  %v2593_v54 = vld [vmem:[%s2771_s24 + $0x10] sm:$0xff] }
 0x1d2   : > { %v1977_v55 = vunpack.c.l.bf16 %v2593_v54 }
 0x1e8   : > { %v2367_v40 = vpop.f32.mrf.mxu0  ;;  %v2389_v44 = vpop.f32.mrf.mxu1 }
 0x1ea   : > { %v2368_v42 = vpop.f32.mrf.mxu0  ;;  %v2390_v48 = vpop.f32.mrf.mxu1 }
 0x1eb   : > { %v2369_v51 = vadd.f32 %v2368_v42, %v2367_v40  ;;  %v2391_v49 = vadd.f32 %v2390_v48, %v2389_v44 }
 0x1ec   : > { %v2370_v45 = vpop.f32.mrf.mxu0  ;;  %v2392_v56 = vpop.f32.mrf.mxu1 }
 0x1ed   : > { %v1526_v57 = vadd.f32 %v2369_v51, %v1485_v53 }
 0x1ee   : > { %v2371_v52 = vpop.f32.mrf.mxu0  ;;  %v2393_v50 = vpop.f32.mrf.mxu1 }
 0x1ef   : > { %v2372_v58 = vadd.f32 %v2371_v52, %v2370_v45  ;;  %v1567_v60 = vadd.f32 %v2391_v49, %v1526_v57  ;;  %v2394_v63 = vadd.f32 %v2393_v50, %v2392_v56  ;;  %v2594_v57 = vld [vmem:[%s2771_s24 + $0x18] sm:$0xff]  ;;  %s359_s24 = scalar_lea.vmem %s3246_s10, %s2257_s15 }
 0x1f1   : > { %v1529_v59 = vadd.f32 %v2372_v58, %v1488_v37  ;;  %v1979_v58 = vunpack.c.l.bf16 %v2594_v57 }
 0x1f3   : > { %v1570_v2 = vadd.f32 %v2394_v63, %v1529_v59 }
 0x208   : > { %v1607_v61 = vpop.f32.mrf.mxu0 }
 0x209   : > { %v1608_v0 = vadd.f32 %v1607_v61, %v1567_v60  ;;  %v1978_v60 = vunpack.c.h.bf16 %v2593_v54  ;;  %v1980_v61 = vunpack.c.h.bf16 %v2594_v57 }
 0x20a   : > { %v2422_v1 = vpop.f32.mrf.mxu0 }
 0x20b   : > { %v1621_v43 = vmul.f32 %v2217_v62, %v1608_v0 }
 0x20c   : > { %v1610_v4 = vpop.f32.mrf.mxu0 }
 0x20d   : > { %v1611_v5 = vadd.f32 %v1610_v4, %v1570_v2  ;;  %v1630_v7 = vadd.f32 %v2218_v3, %v1621_v43 }
 0x20e   : > { %v2423_v6 = vpop.f32.mrf.mxu0 }
 0x20f   : > { %v1622_v8 = vmul.f32 %v2217_v62, %v1611_v5  ;;  %v1632_v10 = vmax.f32 %v1630_v7, 0.0 }
 0x211   : > { %v1631_v9 = vadd.f32 %v2218_v3, %v1622_v8 }
 0x213   : > { %v1633_v11 = vmax.f32 %v1631_v9, 0.0 }
 0x215   : > { %v1634_v12 = vpack.c.bf16 %v1633_v11, %v1632_v10 }
 0x217   : > { %1860 = vmatmul.mubr.bf16.vlgmr.msra.gmra.mxu1 %v1634_v12  ;;  %1903 = vmatmul.mubr.bf16.vlgmr.msra.gmra.mxu0 %v1634_v12 }
 0x2d7   : > { %v1861_v26 = vpop.f32.mrf.mxu1  ;;  %v1904_v29 = vpop.f32.mrf.mxu0 }
 0x2d8   : > { %v1935_v32 = vmul.f32 %v1918_v19, %v1861_v26  ;;  %v1937_v33 = vmul.f32 %v1926_v20, %v1904_v29 }
 0x2d9   : > { %v1863_v35 = vpop.f32.mrf.mxu1  ;;  %v1906_v38 = vpop.f32.mrf.mxu0 }
 0x2da   : > { %v1965_v40 = vadd.f32 %v1948_v21, %v1935_v32  ;;  %v1967_v41 = vadd.f32 %v1956_v23, %v1937_v33  ;;  %v1936_v42 = vmul.f32 %v1922_v24, %v1863_v35  ;;  %v1938_v44 = vmul.f32 %v1930_v25, %v1906_v38 }
 0x2db   : > { %v1865_v45 = vpop.f32.mrf.mxu1  ;;  %v1908_v46 = vpop.f32.mrf.mxu0 }
 0x2dc   : > { %v1981_v47 = vadd.f32 %v1973_v28, %v1965_v40  ;;  %v1983_v48 = vadd.f32 %v1975_v31, %v1967_v41  ;;  %v1966_v51 = vadd.f32 %v1952_v34, %v1936_v42  ;;  %v1968_v52 = vadd.f32 %v1960_v22, %v1938_v44 }
 0x2dd   : > { %v1939_v53 = vmul.f32 %v1918_v19, %v1865_v45  ;;  %v1941_v56 = vmul.f32 %v1926_v20, %v1908_v46  ;;  %v1867_v37 = vpop.f32.mrf.mxu1  ;;  %v1910_v49 = vpop.f32.mrf.mxu0 }
 0x2de   : > { %v1982_v50 = vadd.f32 %v1974_v36, %v1966_v51  ;;  %v1984_v59 = vadd.f32 %v1976_v39, %v1968_v52  ;;  %v1940_v0 = vmul.f32 %v1922_v24, %v1867_v37  ;;  %v1942_v1 = vmul.f32 %v1930_v25, %v1910_v49 }
 0x2df   : > { %v1969_v62 = vadd.f32 %v1948_v21, %v1939_v53  ;;  %v1971_v63 = vadd.f32 %v1956_v23, %v1941_v56  ;;  %v1989_v43 = vmax.f32 %v1981_v47, 0.0  ;;  %v1991_v2 = vmax.f32 %v1983_v48, 0.0 }
 0x2e0   : > { %v1990_v3 = vmax.f32 %v1982_v50, 0.0  ;;  %v1992_v4 = vmax.f32 %v1984_v59, 0.0  ;;  %v1970_v7 = vadd.f32 %v1952_v34, %v1940_v0  ;;  %v1972_v8 = vadd.f32 %v1960_v22, %v1942_v1 }
 0x2e1   : > { %v1985_v5 = vadd.f32 %v1977_v55, %v1969_v62  ;;  %v1987_v6 = vadd.f32 %v1979_v58, %v1971_v63 }
 0x2e2   : > { %v2259_v9 = vpack.c.bf16 %v1990_v3, %v1989_v43  ;;  %v2260_v10 = vpack.c.bf16 %v1992_v4, %v1991_v2  ;;  %v1986_v11 = vadd.f32 %v1978_v60, %v1970_v7  ;;  %v1988_v12 = vadd.f32 %v1980_v61, %v1972_v8 }
 0x2e3   : > { %v1993_v13 = vmax.f32 %v1985_v5, 0.0  ;;  %v1995_v14 = vmax.f32 %v1987_v6, 0.0 }
 0x2e4   : > { %2021 = vst [vmem:[%s359_s24] sm:$0xff] %v2259_v9  ;;  %2022 = vst [vmem:[%s359_s24 + $0x8] sm:$0xff] %v2260_v10  ;;  %v1994_v15 = vmax.f32 %v1986_v11, 0.0  ;;  %v1996_v16 = vmax.f32 %v1988_v12, 0.0 }
 0x2e6   : > { %v2261_v17 = vpack.c.bf16 %v1994_v15, %v1993_v13  ;;  %v2262_v18 = vpack.c.bf16 %v1996_v16, %v1995_v14 }
 0x2e8   : > { %2023 = vst [vmem:[%s359_s24 + $0x10] sm:$0xff] %v2261_v17  ;;  %2024 = vst [vmem:[%s359_s24 + $0x18] sm:$0xff] %v2262_v18 }
 0x2e9 PF: > { %s20_s13 = sadd.s32 1, %s2601_s13  }
 0x2ea   : > { %p17_p4 = scmp.ge.s32.totalorder %s20_s13, 4  }
 0x2ec   :  { %19 = sbr.rel (!%p17_p4) target bundleno = 1 (0x1), region = 90 }

// kernel: resnet50_base_forward.27
= control target key start
LH: loop header
LB: loop body
LE: loop exit
PB: predicated region body
PF: predicated region fallthrough
CT: control target
= control target key end

     0   :  { %s665_s1 = inlined_call_operand.vmem [shape: bf16[512,128], index: 1, kind: input, shape index: {}]   ;;  %s666_s0 = inlined_call_operand.vmem [shape: bf16[16,512], index: 0, kind: input, shape index: {}]   ;;  %s667_s2 = inlined_call_operand.vmem [shape: f32[1,128], index: 2, kind: input, shape index: {}]   ;;  %s668_s3 = inlined_call_operand.vmem [shape: f32[16,128], index: 3, kind: output, shape index: {}]  }
   0x1   :  { %v490_v0 = vld [vmem:[%s665_s1 + $0x78] sm:$0xff]   ;;  %v494_v4 = vld [vmem:[%s665_s1 + $0x70] sm:$0xff]   ;;  %v498_v8 = vld [vmem:[%s665_s1 + $0x68] sm:$0xff]  }
   0x2   :  { %v491_v1 = vld [vmem:[%s665_s1 + $0xf8] sm:$0xff]   ;;  %446 = vmatprep.subr.bf16.mxu0 %v490_v0  ;;  %v495_v5 = vld [vmem:[%s665_s1 + $0xf0] sm:$0xff]   ;;  %v499_v9 = vld [vmem:[%s665_s1 + $0xe8] sm:$0xff]  }
   0x3   :  { %v492_v2 = vld [vmem:[%s665_s1 + $0x38] sm:$0xff]   ;;  %468 = vmatprep.subr.bf16.mxu1 %v491_v1  ;;  %v496_v6 = vld [vmem:[%s665_s1 + $0x30] sm:$0xff]   ;;  %v500_v10 = vld [vmem:[%s665_s1 + $0x28] sm:$0xff]  }
   0x4   :  { %v493_v3 = vld [vmem:[%s665_s1 + $0xb8] sm:$0xff]   ;;  %447 = vmatpush3.bf16.msra.mxu0 %v492_v2  ;;  %v497_v7 = vld [vmem:[%s665_s1 + $0xb0] sm:$0xff]   ;;  %v501_v11 = vld [vmem:[%s665_s1 + $0xa8] sm:$0xff]  }
   0x5   :  { %469 = vmatpush3.bf16.msra.mxu1 %v493_v3  ;;  %448 = vmatprep.subr.bf16.mxu0 %v494_v4  ;;  %v502_v12 = vld [vmem:[%s665_s1 + $0x60] sm:$0xff]   ;;  %v506_v16 = vld [vmem:[%s665_s1 + $0x58] sm:$0xff]   ;;  %v510_v20 = vld [vmem:[%s665_s1 + $0x50] sm:$0xff]  }
   0x6   :  { %470 = vmatprep.subr.bf16.mxu1 %v495_v5  ;;  %v503_v13 = vld [vmem:[%s665_s1 + $0xe0] sm:$0xff]   ;;  %v507_v17 = vld [vmem:[%s665_s1 + $0xd8] sm:$0xff]   ;;  %v511_v21 = vld [vmem:[%s665_s1 + $0xd0] sm:$0xff]  }
   0x7   :  { %v504_v14 = vld [vmem:[%s665_s1 + $0x20] sm:$0xff]   ;;  %v508_v18 = vld [vmem:[%s665_s1 + $0x18] sm:$0xff]   ;;  %v512_v22 = vld [vmem:[%s665_s1 + $0x10] sm:$0xff]  }
   0x8   :  { %449 = vmatpush3.bf16.msra.mxu0 %v496_v6  ;;  %v505_v15 = vld [vmem:[%s665_s1 + $0xa0] sm:$0xff]   ;;  %v509_v19 = vld [vmem:[%s665_s1 + $0x98] sm:$0xff]   ;;  %v513_v23 = vld [vmem:[%s665_s1 + $0x90] sm:$0xff]  }
   0x9   :  { %471 = vmatpush3.bf16.msra.mxu1 %v497_v7  ;;  %450 = vmatprep.subr.bf16.mxu0 %v498_v8  ;;  %v514_v24 = vld [vmem:[%s665_s1 + $0x48] sm:$0xff]   ;;  %v518_v28 = vld [vmem:[%s665_s1 + $0x40] sm:$0xff]  }
   0xa   :  { %472 = vmatprep.subr.bf16.mxu1 %v499_v9  ;;  %v515_v25 = vld [vmem:[%s665_s1 + $0xc8] sm:$0xff]   ;;  %v519_v29 = vld [vmem:[%s665_s1 + $0xc0] sm:$0xff]  }
   0xb   :  { %v516_v26 = vld [vmem:[%s665_s1 + $0x8] sm:$0xff]   ;;  %v520_v30 = vld [vmem:[%s665_s1] sm:$0xff]  }
   0xc   :  { %451 = vmatpush3.bf16.msra.mxu0 %v500_v10  ;;  %v517_v27 = vld [vmem:[%s665_s1 + $0x88] sm:$0xff]   ;;  %v521_v31 = vld [vmem:[%s665_s1 + $0x80] sm:$0xff]  }
   0xd   :  { %473 = vmatpush3.bf16.msra.mxu1 %v501_v11  ;;  %452 = vmatprep.subr.bf16.mxu0 %v502_v12  ;;  %v522_v32 = vld [vmem:[%s666_s0] ss:$16 sps:$4 sm:$0xff]   ;;  %v524_v33 = vld [vmem:[%s666_s0 + $0x4] ss:$16 sps:$4 sm:$0xff]   ;;  %v525_v34 = vld [vmem:[%s666_s0 + $0x8] ss:$16 sps:$4 sm:$0xff]  }
   0xe   :  { %474 = vmatprep.subr.bf16.mxu1 %v503_v13  ;;  %v527_v35 = vld [vmem:[%s666_s0 + $0xc] ss:$16 sps:$4 sm:$0xff]   ;;  %335 = vmatprep.mubr.bf16.mxu0 %v524_v33  ;;  %v445_v43 = vld [vmem:[%s667_s2] ss:$0 sm:$0xff] }
   0xf   :  { %376 = vmatprep.mubr.bf16.mxu1 %v527_v35 }
  0x10   :  { %453 = vmatpush3.bf16.msra.mxu0 %v504_v14 }
  0x11   :  { %475 = vmatpush3.bf16.msra.mxu1 %v505_v15  ;;  %454 = vmatprep.subr.bf16.mxu0 %v506_v16 }
  0x12   :  { %476 = vmatprep.subr.bf16.mxu1 %v507_v17 }
  0x14   :  { %455 = vmatpush3.bf16.msra.mxu0 %v508_v18 }
  0x15   :  { %477 = vmatpush3.bf16.msra.mxu1 %v509_v19  ;;  %456 = vmatprep.subr.bf16.mxu0 %v510_v20 }
  0x16   :  { %478 = vmatprep.subr.bf16.mxu1 %v511_v21 }
  0x18   :  { %457 = vmatpush3.bf16.msra.mxu0 %v512_v22 }
  0x19   :  { %479 = vmatpush3.bf16.msra.mxu1 %v513_v23  ;;  %458 = vmatprep.subr.bf16.mxu0 %v514_v24 }
  0x1a   :  { %480 = vmatprep.subr.bf16.mxu1 %v515_v25 }
  0x1c   :  { %459 = vmatpush3.bf16.msra.mxu0 %v516_v26 }
  0x1d   :  { %481 = vmatpush3.bf16.msra.mxu1 %v517_v27  ;;  %460 = vmatprep.subr.bf16.mxu0 %v518_v28 }
  0x1e   :  { %482 = vmatprep.subr.bf16.mxu1 %v519_v29 }
  0x20   :  { %461 = vmatpush3.bf16.msra.mxu0 %v520_v30 }
  0x21   :  { %483 = vmatpush3.bf16.msra.mxu1 %v521_v31 }
  0x23   :  { %336 = vmatmul.mubr.bf16.vlgmr.msra.gmra.mxu0 %v522_v32 }
  0x24   :  { %377 = vmatmul.mubr.bf16.vlgmr.msra.gmra.mxu1 %v525_v34 }
  0xe3   :  { %v462_v36 = vpop.f32.mrf.mxu0 }
  0xe4   :  { %v484_v37 = vpop.f32.mrf.mxu1 }
  0xe5   :  { %v463_v38 = vpop.f32.mrf.mxu0 }
  0xe6   :  { %v464_v39 = vadd.f32 %v463_v38, %v462_v36  ;;  %v485_v40 = vpop.f32.mrf.mxu1 }
  0xe7   :  { %v486_v41 = vadd.f32 %v485_v40, %v484_v37  ;;  %v465_v42 = vpop.f32.mrf.mxu0 }
  0xe8   :  { %v487_v44 = vpop.f32.mrf.mxu1 }
  0xe9   :  { %v379_v45 = vadd.f32 %v486_v41, %v464_v39  ;;  %v466_v46 = vpop.f32.mrf.mxu0 }
  0xea   :  { %v467_v47 = vadd.f32 %v466_v46, %v465_v42  ;;  %v488_v48 = vpop.f32.mrf.mxu1 }
  0xeb   :  { %v401_v49 = vadd.f32 %v445_v43, %v379_v45  ;;  %v489_v50 = vadd.f32 %v488_v48, %v487_v44 }
  0xed   :  { %403 = vst [vmem:[%s668_s3] sm:$0xff] %v401_v49  ;;  %v382_v51 = vadd.f32 %v489_v50, %v467_v47 }
  0xef   :  { %v402_v52 = vadd.f32 %v445_v43, %v382_v51 }
  0xf1   :  { %404 = vst [vmem:[%s668_s3 + $0x8] sm:$0xff] %v402_v52 }

</bundles_post_ra>
